<compile_context>
chip_gen: v7x
topology: tpu7x:2x2x1
jax: 0.10.0
libtpu: 0.0.40
codegen_flags: <defaults>
</compile_context>

<pallas_src>
import functools
import math

import jax
import jax.numpy as jnp
from jax.experimental import pallas as pl
from jax.experimental.pallas import tpu as pltpu


# Fixed ordering of per-encoder parameters passed to the fused kernel.
_ENC_PARAM_ORDER = ("in_w", "in_b", "out_w", "out_b", "wqkv", "bqkv", "wo", "bo",
                    "ln1_g", "ln1_b", "w1", "b1", "w2", "b2", "ln2_g", "ln2_b")
_P = len(_ENC_PARAM_ORDER)  # 16 params per encoder


# ------------------------- fused WatchPoser Pallas kernel --------------------

def _watch_poser_kernel(*refs, n_head, B, S, n_imu, eps):
    """refs = [imu, pos, 3*16 encoder params..., 3 outputs..., attn scratch]."""
    f32 = jnp.float32
    imu = refs[0][...].astype(f32)                       # (M, n_imu)
    pos = refs[1][...].astype(f32)                       # (M, D)
    enc = [refs[2 + i * _P: 2 + (i + 1) * _P] for i in range(3)]
    fj_ref, fp_ref, vel_ref = refs[2 + 3 * _P: 5 + 3 * _P]
    attn = refs[5 + 3 * _P]                              # VMEM scratch (M, D)

    def layer_norm(x, g, b):
        mean = jnp.mean(x, axis=-1, keepdims=True)
        var = jnp.mean(jnp.square(x - mean), axis=-1, keepdims=True)
        return (x - mean) * jax.lax.rsqrt(var + eps) * g + b

    def encoder(h, p):
        """h: (M, D) activation after in_proj + positional enc.; returns (M, Dout)."""
        (_, _, out_w, out_b, wqkv, bqkv, wo, bo,
         ln1g, ln1b, w1, b1, w2, b2, ln2g, ln2b) = p
        n_layers, D = wqkv.shape[0], wqkv.shape[1]
        Dh = D // n_head
        scale = 1.0 / math.sqrt(Dh)

        for l in range(n_layers):
            # ---- multi-head self-attention, fused QKV projection ----
            qkv = jnp.dot(h, wqkv[l], preferred_element_type=f32) + bqkv[l]
            for b in range(B):
                r0 = b * S
                for hd in range(n_head):
                    c0 = hd * Dh
                    q = qkv[r0:r0 + S, c0:c0 + Dh]
                    k = qkv[r0:r0 + S, D + c0:D + c0 + Dh]
                    v = qkv[r0:r0 + S, 2 * D + c0:2 * D + c0 + Dh]
                    s = jnp.dot(q, k.T, preferred_element_type=f32) * scale
                    m = jnp.max(s, axis=-1, keepdims=True)
                    pexp = jnp.exp(s - m)
                    pexp = pexp * pl.reciprocal(
                        jnp.sum(pexp, axis=-1, keepdims=True), approx=True)
                    attn[r0:r0 + S, c0:c0 + Dh] = jnp.dot(
                        pexp, v, preferred_element_type=f32)
            a = jnp.dot(attn[...], wo[l], preferred_element_type=f32) + bo[l]
            h = layer_norm(h + a, ln1g[l], ln1b[l])

            # ---- position-wise feed-forward (ReLU) ----
            f = jnp.dot(h, w1[l], preferred_element_type=f32) + b1[l]
            f = jnp.maximum(f, 0.0)
            f = jnp.dot(f, w2[l], preferred_element_type=f32) + b2[l]
            h = layer_norm(h + f, ln2g[l], ln2b[l])

        return jnp.dot(h, out_w[...], preferred_element_type=f32) + out_b[...]

    # ---- joint_s1 encoder ----
    p0 = enc[0]
    h0 = jnp.dot(imu, p0[0][...], preferred_element_type=f32) + p0[1][...] + pos
    fj = encoder(h0, p0)
    fj_ref[...] = fj.astype(fj_ref.dtype)

    # ---- pose_s1 / vel encoders: x_cat = concat(imu, full_joint) folded into
    #      split input-projection matmuls (no concat / relayout in-kernel) ----
    for p, out_ref in ((enc[1], fp_ref), (enc[2], vel_ref)):
        w_in = p[0][...]                                  # (n_imu + Dj, D)
        h0 = (jnp.dot(imu, w_in[:n_imu, :], preferred_element_type=f32)
              + jnp.dot(fj, w_in[n_imu:, :], preferred_element_type=f32)
              + p[1][...] + pos)
        out = encoder(h0, p)
        out_ref[...] = out.astype(out_ref.dtype)


def _full_spec(shape):
    n = len(shape)
    return pl.BlockSpec(shape, lambda i: (0,) * n)


def watch_poser_forward(params, imu, *, n_head):
    """Single fused pallas_call for the whole WatchPoser forward.  imu: (B,S,n_imu)."""
    B, S, n_imu = imu.shape
    M = B * S
    enc_names = ("joint_s1", "pose_s1", "vel")
    d_model = params["joint_s1"]["in_w"].shape[1]

    # Rows of imu.reshape(M, n_imu) are [b0s0..b0s(S-1), b1s0..]: tile PE per batch.
    # The sinusoidal table is identical for all three encoders -> pass once.
    pos = jnp.tile(params["joint_s1"]["pos"][:S], (B, 1))            # (M, D)

    enc_args = []
    for name in enc_names:
        enc_args += [params[name][k] for k in _ENC_PARAM_ORDER]
    args = (imu.reshape(M, n_imu), pos, *enc_args)

    out_dims = tuple(params[n]["out_w"].shape[1] for n in enc_names)
    out_shapes = tuple(jax.ShapeDtypeStruct((M, d), imu.dtype) for d in out_dims)

    kernel = functools.partial(_watch_poser_kernel, n_head=n_head,
                               B=B, S=S, n_imu=n_imu, eps=1e-5)
    fj, fp, vel = pl.pallas_call(
        kernel,
        out_shape=out_shapes,
        grid=(1,),
        in_specs=[_full_spec(a.shape) for a in args],
        out_specs=tuple(_full_spec((M, d)) for d in out_dims),
        scratch_shapes=[pltpu.VMEM((M, d_model), jnp.float32)],
        compiler_params=pltpu.CompilerParams(
            dimension_semantics=("arbitrary",)),
    )(*args)

    return (fj.reshape(B, S, -1), fp.reshape(B, S, -1), vel.reshape(B, S, -1))


# ------------------------------ parameter init --------------------------------

def sinusoidal_pos_encoding(n_position, d_model):
    pos = jnp.arange(n_position, dtype=jnp.float32)[:, None]
    i = jnp.arange(d_model)[None, :]
    angle = pos / jnp.power(10000.0, (2.0 * (i // 2)) / d_model)
    return jnp.where(i % 2 == 0, jnp.sin(angle), jnp.cos(angle)).astype(jnp.float32)


def init_transformer_encoder(key, *, input_dim, output_dim, d_model, d_embedding,
                             n_layers, n_position):
    ks = jax.random.split(key, 6)

    def w(k, shape):
        return jax.random.normal(k, shape, jnp.float32) * 0.02

    return {
        "in_w": w(ks[0], (input_dim, d_model)),
        "in_b": jnp.zeros((1, d_model), jnp.float32),
        "out_w": w(ks[1], (d_model, output_dim)),
        "out_b": jnp.zeros((1, output_dim), jnp.float32),
        "pos": sinusoidal_pos_encoding(n_position, d_model),
        # Per-layer weights stacked along a leading layer axis; Q/K/V fused.
        "wqkv": w(ks[2], (n_layers, d_model, 3 * d_model)),
        "bqkv": jnp.zeros((n_layers, 1, 3 * d_model), jnp.float32),
        "wo": w(ks[3], (n_layers, d_model, d_model)),
        "bo": jnp.zeros((n_layers, 1, d_model), jnp.float32),
        "w1": w(ks[4], (n_layers, d_model, d_embedding)),
        "b1": jnp.zeros((n_layers, 1, d_embedding), jnp.float32),
        "w2": w(ks[5], (n_layers, d_embedding, d_model)),
        "b2": jnp.zeros((n_layers, 1, d_model), jnp.float32),
        "ln1_g": jnp.ones((n_layers, 1, d_model), jnp.float32),
        "ln1_b": jnp.zeros((n_layers, 1, d_model), jnp.float32),
        "ln2_g": jnp.ones((n_layers, 1, d_model), jnp.float32),
        "ln2_b": jnp.zeros((n_layers, 1, d_model), jnp.float32),
    }


# ------------------------- pure-JAX reference (for check) ----------------------

def _layer_norm_ref(x, g, b, eps=1e-5):
    mean = jnp.mean(x, axis=-1, keepdims=True)
    var = jnp.mean(jnp.square(x - mean), axis=-1, keepdims=True)
    return (x - mean) * jax.lax.rsqrt(var + eps) * g + b


def transformer_encoder_ref(params, x, *, n_head):
    B, S, Din = x.shape
    D = params["in_w"].shape[1]
    L = params["wqkv"].shape[0]
    Dh = D // n_head
    h = x.reshape(B * S, Din) @ params["in_w"] + params["in_b"]
    h = h + jnp.tile(params["pos"][:S], (B, 1))
    for l in range(L):
        qkv = h @ params["wqkv"][l] + params["bqkv"][l]
        q, k, v = qkv[:, :D], qkv[:, D:2 * D], qkv[:, 2 * D:]

        def heads(t):
            return t.reshape(B, S, n_head, Dh).transpose(0, 2, 1, 3)

        qh, kh, vh = heads(q), heads(k), heads(v)
        s = jnp.einsum("bhqd,bhkd->bhqk", qh, kh) / math.sqrt(Dh)
        p = jax.nn.softmax(s, axis=-1)
        o = jnp.einsum("bhqk,bhkd->bhqd", p, vh).transpose(0, 2, 1, 3)
        a = o.reshape(B * S, D) @ params["wo"][l] + params["bo"][l]
        h = _layer_norm_ref(h + a, params["ln1_g"][l], params["ln1_b"][l])
        f = jnp.maximum(h @ params["w1"][l] + params["b1"][l], 0.0)
        f = f @ params["w2"][l] + params["b2"][l]
        h = _layer_norm_ref(h + f, params["ln2_g"][l], params["ln2_b"][l])
    out = h @ params["out_w"] + params["out_b"]
    return out.reshape(B, S, -1)


def watch_poser_ref(params, imu, *, n_head):
    fj = transformer_encoder_ref(params["joint_s1"], imu, n_head=n_head)
    x_cat = jnp.concatenate([imu, fj], axis=-1)
    fp = transformer_encoder_ref(params["pose_s1"], x_cat, n_head=n_head)
    vel = transformer_encoder_ref(params["vel"], x_cat, n_head=n_head)
    return fj, fp, vel


# --------------------------------- main ----------------------------------------

if __name__ == "__main__":
    cfg = dict(
        n_imu=12,
        joint_output_dim=15,
        pose_output_dim=24,
        vel_output_dim=3,
        d_model=32,
        d_embedding=64,
        n_layers=2,
        n_head=4,
        dropout=0.0,        # eval mode -> dropout is a no-op
        n_position=64,
    )
    B, S = 2, 8

    root = jax.random.PRNGKey(0)
    k_joint, k_pose, k_vel, k_data = jax.random.split(root, 4)

    params = {
        "joint_s1": init_transformer_encoder(
            k_joint, input_dim=cfg["n_imu"], output_dim=cfg["joint_output_dim"],
            d_model=cfg["d_model"], d_embedding=cfg["d_embedding"],
            n_layers=cfg["n_layers"], n_position=cfg["n_position"]),
        "pose_s1": init_transformer_encoder(
            k_pose, input_dim=cfg["n_imu"] + cfg["joint_output_dim"],
            output_dim=cfg["pose_output_dim"], d_model=cfg["d_model"],
            d_embedding=cfg["d_embedding"], n_layers=cfg["n_layers"],
            n_position=cfg["n_position"]),
        "vel": init_transformer_encoder(
            k_vel, input_dim=cfg["n_imu"] + cfg["joint_output_dim"],
            output_dim=cfg["vel_output_dim"], d_model=cfg["d_model"],
            d_embedding=cfg["d_embedding"] + 1,   # matches reference spec
            n_layers=cfg["n_layers"], n_position=cfg["n_position"]),
    }

    imu = jax.random.normal(k_data, (B, S, cfg["n_imu"]), jnp.float32)

    fwd = jax.jit(functools.partial(watch_poser_forward, n_head=cfg["n_head"]))
    full_joint, full_pose, velocity = fwd(params, imu)
    jax.block_until_ready((full_joint, full_pose, velocity))

    assert full_joint.shape == (B, S, cfg["joint_output_dim"])
    assert full_pose.shape == (B, S, cfg["pose_output_dim"])
    assert velocity.shape == (B, S, cfg["vel_output_dim"])

    # Numerical sanity check against a pure-JAX reference (same weights).
    ref_j, ref_p, ref_v = watch_poser_ref(params, imu, n_head=cfg["n_head"])
    err = max(float(jnp.max(jnp.abs(a - b)))
              for a, b in ((full_joint, ref_j), (full_pose, ref_p), (velocity, ref_v)))
    assert err < 2e-2, f"mismatch vs reference: max abs err = {err}"

    print("KERNEL_OK")
</pallas_src>

<mosaic_0001>
module attributes {stable_mosaic.version = 11 : i64} {
  func.func @_watch_poser_kernel(%arg0: i32, %arg1: memref<16x12xf32, #tpu.memory_space<vmem>>, %arg2: memref<16x32xf32, #tpu.memory_space<vmem>>, %arg3: memref<12x32xf32, #tpu.memory_space<vmem>>, %arg4: memref<1x32xf32, #tpu.memory_space<vmem>>, %arg5: memref<32x15xf32, #tpu.memory_space<vmem>>, %arg6: memref<1x15xf32, #tpu.memory_space<vmem>>, %arg7: memref<2x32x96xf32, #tpu.memory_space<vmem>>, %arg8: memref<2x1x96xf32, #tpu.memory_space<vmem>>, %arg9: memref<2x32x32xf32, #tpu.memory_space<vmem>>, %arg10: memref<2x1x32xf32, #tpu.memory_space<vmem>>, %arg11: memref<2x1x32xf32, #tpu.memory_space<vmem>>, %arg12: memref<2x1x32xf32, #tpu.memory_space<vmem>>, %arg13: memref<2x32x64xf32, #tpu.memory_space<vmem>>, %arg14: memref<2x1x64xf32, #tpu.memory_space<vmem>>, %arg15: memref<2x64x32xf32, #tpu.memory_space<vmem>>, %arg16: memref<2x1x32xf32, #tpu.memory_space<vmem>>, %arg17: memref<2x1x32xf32, #tpu.memory_space<vmem>>, %arg18: memref<2x1x32xf32, #tpu.memory_space<vmem>>, %arg19: memref<27x32xf32, #tpu.memory_space<vmem>>, %arg20: memref<1x32xf32, #tpu.memory_space<vmem>>, %arg21: memref<32x24xf32, #tpu.memory_space<vmem>>, %arg22: memref<1x24xf32, #tpu.memory_space<vmem>>, %arg23: memref<2x32x96xf32, #tpu.memory_space<vmem>>, %arg24: memref<2x1x96xf32, #tpu.memory_space<vmem>>, %arg25: memref<2x32x32xf32, #tpu.memory_space<vmem>>, %arg26: memref<2x1x32xf32, #tpu.memory_space<vmem>>, %arg27: memref<2x1x32xf32, #tpu.memory_space<vmem>>, %arg28: memref<2x1x32xf32, #tpu.memory_space<vmem>>, %arg29: memref<2x32x64xf32, #tpu.memory_space<vmem>>, %arg30: memref<2x1x64xf32, #tpu.memory_space<vmem>>, %arg31: memref<2x64x32xf32, #tpu.memory_space<vmem>>, %arg32: memref<2x1x32xf32, #tpu.memory_space<vmem>>, %arg33: memref<2x1x32xf32, #tpu.memory_space<vmem>>, %arg34: memref<2x1x32xf32, #tpu.memory_space<vmem>>, %arg35: memref<27x32xf32, #tpu.memory_space<vmem>>, %arg36: memref<1x32xf32, #tpu.memory_space<vmem>>, %arg37: memref<32x3xf32, #tpu.memory_space<vmem>>, %arg38: memref<1x3xf32, #tpu.memory_space<vmem>>, %arg39: memref<2x32x96xf32, #tpu.memory_space<vmem>>, %arg40: memref<2x1x96xf32, #tpu.memory_space<vmem>>, %arg41: memref<2x32x32xf32, #tpu.memory_space<vmem>>, %arg42: memref<2x1x32xf32, #tpu.memory_space<vmem>>, %arg43: memref<2x1x32xf32, #tpu.memory_space<vmem>>, %arg44: memref<2x1x32xf32, #tpu.memory_space<vmem>>, %arg45: memref<2x32x65xf32, #tpu.memory_space<vmem>>, %arg46: memref<2x1x65xf32, #tpu.memory_space<vmem>>, %arg47: memref<2x65x32xf32, #tpu.memory_space<vmem>>, %arg48: memref<2x1x32xf32, #tpu.memory_space<vmem>>, %arg49: memref<2x1x32xf32, #tpu.memory_space<vmem>>, %arg50: memref<2x1x32xf32, #tpu.memory_space<vmem>>, %arg51: memref<16x15xf32, #tpu.memory_space<vmem>>, %arg52: memref<16x24xf32, #tpu.memory_space<vmem>>, %arg53: memref<16x3xf32, #tpu.memory_space<vmem>>, %arg54: memref<16x32xf32, #tpu.memory_space<vmem>>) attributes {dimension_semantics = [#tpu.dimension_semantics<arbitrary>], iteration_bounds = array<i64: 1>, scalar_prefetch = 0 : i64, scratch_operands = 1 : i64, tpu.core_type = #tpu.core_type<tc>, window_params = [{pipeline_mode = #tpu.pipeline_mode<synchronous>, transform_indices = @transform_0, window_bounds = array<i64: 16, 12>}, {pipeline_mode = #tpu.pipeline_mode<synchronous>, transform_indices = @transform_1, window_bounds = array<i64: 16, 32>}, {pipeline_mode = #tpu.pipeline_mode<synchronous>, transform_indices = @transform_2, window_bounds = array<i64: 12, 32>}, {pipeline_mode = #tpu.pipeline_mode<synchronous>, transform_indices = @transform_3, window_bounds = array<i64: 1, 32>}, {pipeline_mode = #tpu.pipeline_mode<synchronous>, transform_indices = @transform_4, window_bounds = array<i64: 32, 15>}, {pipeline_mode = #tpu.pipeline_mode<synchronous>, transform_indices = @transform_5, window_bounds = array<i64: 1, 15>}, {pipeline_mode = #tpu.pipeline_mode<synchronous>, transform_indices = @transform_6, window_bounds = array<i64: 2, 32, 96>}, {pipeline_mode = #tpu.pipeline_mode<synchronous>, transform_indices = @transform_7, window_bounds = array<i64: 2, 1, 96>}, {pipeline_mode = #tpu.pipeline_mode<synchronous>, transform_indices = @transform_8, window_bounds = array<i64: 2, 32, 32>}, {pipeline_mode = #tpu.pipeline_mode<synchronous>, transform_indices = @transform_9, window_bounds = array<i64: 2, 1, 32>}, {pipeline_mode = #tpu.pipeline_mode<synchronous>, transform_indices = @transform_10, window_bounds = array<i64: 2, 1, 32>}, {pipeline_mode = #tpu.pipeline_mode<synchronous>, transform_indices = @transform_11, window_bounds = array<i64: 2, 1, 32>}, {pipeline_mode = #tpu.pipeline_mode<synchronous>, transform_indices = @transform_12, window_bounds = array<i64: 2, 32, 64>}, {pipeline_mode = #tpu.pipeline_mode<synchronous>, transform_indices = @transform_13, window_bounds = array<i64: 2, 1, 64>}, {pipeline_mode = #tpu.pipeline_mode<synchronous>, transform_indices = @transform_14, window_bounds = array<i64: 2, 64, 32>}, {pipeline_mode = #tpu.pipeline_mode<synchronous>, transform_indices = @transform_15, window_bounds = array<i64: 2, 1, 32>}, {pipeline_mode = #tpu.pipeline_mode<synchronous>, transform_indices = @transform_16, window_bounds = array<i64: 2, 1, 32>}, {pipeline_mode = #tpu.pipeline_mode<synchronous>, transform_indices = @transform_17, window_bounds = array<i64: 2, 1, 32>}, {pipeline_mode = #tpu.pipeline_mode<synchronous>, transform_indices = @transform_18, window_bounds = array<i64: 27, 32>}, {pipeline_mode = #tpu.pipeline_mode<synchronous>, transform_indices = @transform_19, window_bounds = array<i64: 1, 32>}, {pipeline_mode = #tpu.pipeline_mode<synchronous>, transform_indices = @transform_20, window_bounds = array<i64: 32, 24>}, {pipeline_mode = #tpu.pipeline_mode<synchronous>, transform_indices = @transform_21, window_bounds = array<i64: 1, 24>}, {pipeline_mode = #tpu.pipeline_mode<synchronous>, transform_indices = @transform_22, window_bounds = array<i64: 2, 32, 96>}, {pipeline_mode = #tpu.pipeline_mode<synchronous>, transform_indices = @transform_23, window_bounds = array<i64: 2, 1, 96>}, {pipeline_mode = #tpu.pipeline_mode<synchronous>, transform_indices = @transform_24, window_bounds = array<i64: 2, 32, 32>}, {pipeline_mode = #tpu.pipeline_mode<synchronous>, transform_indices = @transform_25, window_bounds = array<i64: 2, 1, 32>}, {pipeline_mode = #tpu.pipeline_mode<synchronous>, transform_indices = @transform_26, window_bounds = array<i64: 2, 1, 32>}, {pipeline_mode = #tpu.pipeline_mode<synchronous>, transform_indices = @transform_27, window_bounds = array<i64: 2, 1, 32>}, {pipeline_mode = #tpu.pipeline_mode<synchronous>, transform_indices = @transform_28, window_bounds = array<i64: 2, 32, 64>}, {pipeline_mode = #tpu.pipeline_mode<synchronous>, transform_indices = @transform_29, window_bounds = array<i64: 2, 1, 64>}, {pipeline_mode = #tpu.pipeline_mode<synchronous>, transform_indices = @transform_30, window_bounds = array<i64: 2, 64, 32>}, {pipeline_mode = #tpu.pipeline_mode<synchronous>, transform_indices = @transform_31, window_bounds = array<i64: 2, 1, 32>}, {pipeline_mode = #tpu.pipeline_mode<synchronous>, transform_indices = @transform_32, window_bounds = array<i64: 2, 1, 32>}, {pipeline_mode = #tpu.pipeline_mode<synchronous>, transform_indices = @transform_33, window_bounds = array<i64: 2, 1, 32>}, {pipeline_mode = #tpu.pipeline_mode<synchronous>, transform_indices = @transform_34, window_bounds = array<i64: 27, 32>}, {pipeline_mode = #tpu.pipeline_mode<synchronous>, transform_indices = @transform_35, window_bounds = array<i64: 1, 32>}, {pipeline_mode = #tpu.pipeline_mode<synchronous>, transform_indices = @transform_36, window_bounds = array<i64: 32, 3>}, {pipeline_mode = #tpu.pipeline_mode<synchronous>, transform_indices = @transform_37, window_bounds = array<i64: 1, 3>}, {pipeline_mode = #tpu.pipeline_mode<synchronous>, transform_indices = @transform_38, window_bounds = array<i64: 2, 32, 96>}, {pipeline_mode = #tpu.pipeline_mode<synchronous>, transform_indices = @transform_39, window_bounds = array<i64: 2, 1, 96>}, {pipeline_mode = #tpu.pipeline_mode<synchronous>, transform_indices = @transform_40, window_bounds = array<i64: 2, 32, 32>}, {pipeline_mode = #tpu.pipeline_mode<synchronous>, transform_indices = @transform_41, window_bounds = array<i64: 2, 1, 32>}, {pipeline_mode = #tpu.pipeline_mode<synchronous>, transform_indices = @transform_42, window_bounds = array<i64: 2, 1, 32>}, {pipeline_mode = #tpu.pipeline_mode<synchronous>, transform_indices = @transform_43, window_bounds = array<i64: 2, 1, 32>}, {pipeline_mode = #tpu.pipeline_mode<synchronous>, transform_indices = @transform_44, window_bounds = array<i64: 2, 32, 65>}, {pipeline_mode = #tpu.pipeline_mode<synchronous>, transform_indices = @transform_45, window_bounds = array<i64: 2, 1, 65>}, {pipeline_mode = #tpu.pipeline_mode<synchronous>, transform_indices = @transform_46, window_bounds = array<i64: 2, 65, 32>}, {pipeline_mode = #tpu.pipeline_mode<synchronous>, transform_indices = @transform_47, window_bounds = array<i64: 2, 1, 32>}, {pipeline_mode = #tpu.pipeline_mode<synchronous>, transform_indices = @transform_48, window_bounds = array<i64: 2, 1, 32>}, {pipeline_mode = #tpu.pipeline_mode<synchronous>, transform_indices = @transform_49, window_bounds = array<i64: 2, 1, 32>}, {pipeline_mode = #tpu.pipeline_mode<synchronous>, transform_indices = @transform_50, window_bounds = array<i64: 16, 15>}, {pipeline_mode = #tpu.pipeline_mode<synchronous>, transform_indices = @transform_51, window_bounds = array<i64: 16, 24>}, {pipeline_mode = #tpu.pipeline_mode<synchronous>, transform_indices = @transform_52, window_bounds = array<i64: 16, 3>}]} {
    %c0 = arith.constant 0 : index
    %c0_0 = arith.constant 0 : index
    %0 = vector.load %arg1[%c0, %c0_0] : memref<16x12xf32, #tpu.memory_space<vmem>>, vector<16x12xf32>
    %c0_1 = arith.constant 0 : index
    %c0_2 = arith.constant 0 : index
    %1 = vector.load %arg2[%c0_1, %c0_2] : memref<16x32xf32, #tpu.memory_space<vmem>>, vector<16x32xf32>
    %c0_3 = arith.constant 0 : index
    %c0_4 = arith.constant 0 : index
    %2 = vector.load %arg3[%c0_3, %c0_4] : memref<12x32xf32, #tpu.memory_space<vmem>>, vector<12x32xf32>
    %cst = arith.constant dense<0.000000e+00> : vector<16x32xf32>
    %3 = tpu.matmul %0, %2, %cst {dimension_numbers = #tpu.dot_dimension_numbers<[1], [0], [0], [1], [0, 0, 1, 1], [], []>} : vector<16x12xf32>, vector<12x32xf32>, vector<16x32xf32> -> vector<16x32xf32>
    %c0_5 = arith.constant 0 : index
    %c0_6 = arith.constant 0 : index
    %4 = vector.load %arg4[%c0_5, %c0_6] : memref<1x32xf32, #tpu.memory_space<vmem>>, vector<1x32xf32>
    %5 = vector.broadcast %4 : vector<1x32xf32> to vector<16x32xf32>
    %6 = arith.addf %3, %5 : vector<16x32xf32>
    %7 = arith.addf %6, %1 : vector<16x32xf32>
    %c0_7 = arith.constant 0 : index
    %c0_8 = arith.constant 0 : index
    %c0_9 = arith.constant 0 : index
    %8 = vector.load %arg7[%c0_7, %c0_8, %c0_9] : memref<2x32x96xf32, #tpu.memory_space<vmem>>, vector<1x32x96xf32>
    %9 = vector.shape_cast %8 : vector<1x32x96xf32> to vector<32x96xf32>
    %cst_10 = arith.constant dense<0.000000e+00> : vector<16x96xf32>
    %10 = tpu.matmul %7, %9, %cst_10 {dimension_numbers = #tpu.dot_dimension_numbers<[1], [0], [0], [1], [0, 0, 1, 1], [], []>} : vector<16x32xf32>, vector<32x96xf32>, vector<16x96xf32> -> vector<16x96xf32>
    %c0_11 = arith.constant 0 : index
    %c0_12 = arith.constant 0 : index
    %c0_13 = arith.constant 0 : index
    %11 = vector.load %arg8[%c0_11, %c0_12, %c0_13] : memref<2x1x96xf32, #tpu.memory_space<vmem>>, vector<1x1x96xf32>
    %12 = vector.shape_cast %11 : vector<1x1x96xf32> to vector<1x96xf32>
    %13 = vector.broadcast %12 : vector<1x96xf32> to vector<16x96xf32>
    %14 = arith.addf %10, %13 : vector<16x96xf32>
    %15 = vector.extract_strided_slice %14 {offsets = [0, 0], sizes = [8, 8], strides = [1, 1]} : vector<16x96xf32> to vector<8x8xf32>
    %16 = vector.extract_strided_slice %14 {offsets = [0, 32], sizes = [8, 8], strides = [1, 1]} : vector<16x96xf32> to vector<8x8xf32>
    %17 = vector.extract_strided_slice %14 {offsets = [0, 64], sizes = [8, 8], strides = [1, 1]} : vector<16x96xf32> to vector<8x8xf32>
    %18 = tpu.transpose %16, [1, 0] : vector<8x8xf32> -> vector<8x8xf32>
    %cst_14 = arith.constant dense<0.000000e+00> : vector<8x8xf32>
    %19 = tpu.matmul %15, %18, %cst_14 {dimension_numbers = #tpu.dot_dimension_numbers<[1], [0], [0], [1], [0, 0, 1, 1], [], []>} : vector<8x8xf32>, vector<8x8xf32>, vector<8x8xf32> -> vector<8x8xf32>
    %cst_15 = arith.constant 0.353553385 : f32
    %20 = vector.broadcast %cst_15 : f32 to vector<8x8xf32>
    %21 = arith.mulf %19, %20 : vector<8x8xf32>
    %cst_16 = arith.constant dense<0xFF800000> : vector<8xf32>
    %22 = vector.multi_reduction <maximumf>, %21, %cst_16 [1] : vector<8x8xf32> to vector<8xf32>
    %23 = vector.shape_cast %22 : vector<8xf32> to vector<8x1xf32>
    %24 = vector.broadcast %23 : vector<8x1xf32> to vector<8x8xf32>
    %25 = arith.subf %21, %24 : vector<8x8xf32>
    %26 = math.exp %25 : vector<8x8xf32>
    %cst_17 = arith.constant dense<0.000000e+00> : vector<8xf32>
    %27 = vector.multi_reduction <add>, %26, %cst_17 [1] : vector<8x8xf32> to vector<8xf32>
    %28 = vector.shape_cast %27 : vector<8xf32> to vector<8x1xf32>
    %29 = tpu.reciprocal %28 {approx = true} : vector<8x1xf32> -> vector<8x1xf32>
    %30 = vector.broadcast %29 : vector<8x1xf32> to vector<8x8xf32>
    %31 = arith.mulf %26, %30 : vector<8x8xf32>
    %cst_18 = arith.constant dense<0.000000e+00> : vector<8x8xf32>
    %32 = tpu.matmul %31, %17, %cst_18 {dimension_numbers = #tpu.dot_dimension_numbers<[1], [0], [0], [1], [0, 0, 1, 1], [], []>} : vector<8x8xf32>, vector<8x8xf32>, vector<8x8xf32> -> vector<8x8xf32>
    %c0_19 = arith.constant 0 : index
    %c0_20 = arith.constant 0 : index
    %33 = vector.load %arg54[%c0_19, %c0_20] : memref<16x32xf32, #tpu.memory_space<vmem>>, vector<8x8xf32>
    tpu.vector_store %arg54[%c0_19, %c0_20], %32 {strides = array<i32>} : memref<16x32xf32, #tpu.memory_space<vmem>>, vector<8x8xf32>,
    %34 = vector.extract_strided_slice %14 {offsets = [0, 8], sizes = [8, 8], strides = [1, 1]} : vector<16x96xf32> to vector<8x8xf32>
    %35 = vector.extract_strided_slice %14 {offsets = [0, 40], sizes = [8, 8], strides = [1, 1]} : vector<16x96xf32> to vector<8x8xf32>
    %36 = vector.extract_strided_slice %14 {offsets = [0, 72], sizes = [8, 8], strides = [1, 1]} : vector<16x96xf32> to vector<8x8xf32>
    %37 = tpu.transpose %35, [1, 0] : vector<8x8xf32> -> vector<8x8xf32>
    %cst_21 = arith.constant dense<0.000000e+00> : vector<8x8xf32>
    %38 = tpu.matmul %34, %37, %cst_21 {dimension_numbers = #tpu.dot_dimension_numbers<[1], [0], [0], [1], [0, 0, 1, 1], [], []>} : vector<8x8xf32>, vector<8x8xf32>, vector<8x8xf32> -> vector<8x8xf32>
    %cst_22 = arith.constant 0.353553385 : f32
    %39 = vector.broadcast %cst_22 : f32 to vector<8x8xf32>
    %40 = arith.mulf %38, %39 : vector<8x8xf32>
    %cst_23 = arith.constant dense<0xFF800000> : vector<8xf32>
    %41 = vector.multi_reduction <maximumf>, %40, %cst_23 [1] : vector<8x8xf32> to vector<8xf32>
    %42 = vector.shape_cast %41 : vector<8xf32> to vector<8x1xf32>
    %43 = vector.broadcast %42 : vector<8x1xf32> to vector<8x8xf32>
    %44 = arith.subf %40, %43 : vector<8x8xf32>
    %45 = math.exp %44 : vector<8x8xf32>
    %cst_24 = arith.constant dense<0.000000e+00> : vector<8xf32>
    %46 = vector.multi_reduction <add>, %45, %cst_24 [1] : vector<8x8xf32> to vector<8xf32>
    %47 = vector.shape_cast %46 : vector<8xf32> to vector<8x1xf32>
    %48 = tpu.reciprocal %47 {approx = true} : vector<8x1xf32> -> vector<8x1xf32>
    %49 = vector.broadcast %48 : vector<8x1xf32> to vector<8x8xf32>
    %50 = arith.mulf %45, %49 : vector<8x8xf32>
    %cst_25 = arith.constant dense<0.000000e+00> : vector<8x8xf32>
    %51 = tpu.matmul %50, %36, %cst_25 {dimension_numbers = #tpu.dot_dimension_numbers<[1], [0], [0], [1], [0, 0, 1, 1], [], []>} : vector<8x8xf32>, vector<8x8xf32>, vector<8x8xf32> -> vector<8x8xf32>
    %c0_26 = arith.constant 0 : index
    %c8 = arith.constant 8 : index
    %52 = vector.load %arg54[%c0_26, %c8] : memref<16x32xf32, #tpu.memory_space<vmem>>, vector<8x8xf32>
    tpu.vector_store %arg54[%c0_26, %c8], %51 {strides = array<i32>} : memref<16x32xf32, #tpu.memory_space<vmem>>, vector<8x8xf32>,
    %53 = vector.extract_strided_slice %14 {offsets = [0, 16], sizes = [8, 8], strides = [1, 1]} : vector<16x96xf32> to vector<8x8xf32>
    %54 = vector.extract_strided_slice %14 {offsets = [0, 48], sizes = [8, 8], strides = [1, 1]} : vector<16x96xf32> to vector<8x8xf32>
    %55 = vector.extract_strided_slice %14 {offsets = [0, 80], sizes = [8, 8], strides = [1, 1]} : vector<16x96xf32> to vector<8x8xf32>
    %56 = tpu.transpose %54, [1, 0] : vector<8x8xf32> -> vector<8x8xf32>
    %cst_27 = arith.constant dense<0.000000e+00> : vector<8x8xf32>
    %57 = tpu.matmul %53, %56, %cst_27 {dimension_numbers = #tpu.dot_dimension_numbers<[1], [0], [0], [1], [0, 0, 1, 1], [], []>} : vector<8x8xf32>, vector<8x8xf32>, vector<8x8xf32> -> vector<8x8xf32>
    %cst_28 = arith.constant 0.353553385 : f32
    %58 = vector.broadcast %cst_28 : f32 to vector<8x8xf32>
    %59 = arith.mulf %57, %58 : vector<8x8xf32>
    %cst_29 = arith.constant dense<0xFF800000> : vector<8xf32>
    %60 = vector.multi_reduction <maximumf>, %59, %cst_29 [1] : vector<8x8xf32> to vector<8xf32>
    %61 = vector.shape_cast %60 : vector<8xf32> to vector<8x1xf32>
    %62 = vector.broadcast %61 : vector<8x1xf32> to vector<8x8xf32>
    %63 = arith.subf %59, %62 : vector<8x8xf32>
    %64 = math.exp %63 : vector<8x8xf32>
    %cst_30 = arith.constant dense<0.000000e+00> : vector<8xf32>
    %65 = vector.multi_reduction <add>, %64, %cst_30 [1] : vector<8x8xf32> to vector<8xf32>
    %66 = vector.shape_cast %65 : vector<8xf32> to vector<8x1xf32>
    %67 = tpu.reciprocal %66 {approx = true} : vector<8x1xf32> -> vector<8x1xf32>
    %68 = vector.broadcast %67 : vector<8x1xf32> to vector<8x8xf32>
    %69 = arith.mulf %64, %68 : vector<8x8xf32>
    %cst_31 = arith.constant dense<0.000000e+00> : vector<8x8xf32>
    %70 = tpu.matmul %69, %55, %cst_31 {dimension_numbers = #tpu.dot_dimension_numbers<[1], [0], [0], [1], [0, 0, 1, 1], [], []>} : vector<8x8xf32>, vector<8x8xf32>, vector<8x8xf32> -> vector<8x8xf32>
    %c0_32 = arith.constant 0 : index
    %c16 = arith.constant 16 : index
    %71 = vector.load %arg54[%c0_32, %c16] : memref<16x32xf32, #tpu.memory_space<vmem>>, vector<8x8xf32>
    tpu.vector_store %arg54[%c0_32, %c16], %70 {strides = array<i32>} : memref<16x32xf32, #tpu.memory_space<vmem>>, vector<8x8xf32>,
    %72 = vector.extract_strided_slice %14 {offsets = [0, 24], sizes = [8, 8], strides = [1, 1]} : vector<16x96xf32> to vector<8x8xf32>
    %73 = vector.extract_strided_slice %14 {offsets = [0, 56], sizes = [8, 8], strides = [1, 1]} : vector<16x96xf32> to vector<8x8xf32>
    %74 = vector.extract_strided_slice %14 {offsets = [0, 88], sizes = [8, 8], strides = [1, 1]} : vector<16x96xf32> to vector<8x8xf32>
    %75 = tpu.transpose %73, [1, 0] : vector<8x8xf32> -> vector<8x8xf32>
    %cst_33 = arith.constant dense<0.000000e+00> : vector<8x8xf32>
    %76 = tpu.matmul %72, %75, %cst_33 {dimension_numbers = #tpu.dot_dimension_numbers<[1], [0], [0], [1], [0, 0, 1, 1], [], []>} : vector<8x8xf32>, vector<8x8xf32>, vector<8x8xf32> -> vector<8x8xf32>
    %cst_34 = arith.constant 0.353553385 : f32
    %77 = vector.broadcast %cst_34 : f32 to vector<8x8xf32>
    %78 = arith.mulf %76, %77 : vector<8x8xf32>
    %cst_35 = arith.constant dense<0xFF800000> : vector<8xf32>
    %79 = vector.multi_reduction <maximumf>, %78, %cst_35 [1] : vector<8x8xf32> to vector<8xf32>
    %80 = vector.shape_cast %79 : vector<8xf32> to vector<8x1xf32>
    %81 = vector.broadcast %80 : vector<8x1xf32> to vector<8x8xf32>
    %82 = arith.subf %78, %81 : vector<8x8xf32>
    %83 = math.exp %82 : vector<8x8xf32>
    %cst_36 = arith.constant dense<0.000000e+00> : vector<8xf32>
    %84 = vector.multi_reduction <add>, %83, %cst_36 [1] : vector<8x8xf32> to vector<8xf32>
    %85 = vector.shape_cast %84 : vector<8xf32> to vector<8x1xf32>
    %86 = tpu.reciprocal %85 {approx = true} : vector<8x1xf32> -> vector<8x1xf32>
    %87 = vector.broadcast %86 : vector<8x1xf32> to vector<8x8xf32>
    %88 = arith.mulf %83, %87 : vector<8x8xf32>
    %cst_37 = arith.constant dense<0.000000e+00> : vector<8x8xf32>
    %89 = tpu.matmul %88, %74, %cst_37 {dimension_numbers = #tpu.dot_dimension_numbers<[1], [0], [0], [1], [0, 0, 1, 1], [], []>} : vector<8x8xf32>, vector<8x8xf32>, vector<8x8xf32> -> vector<8x8xf32>
    %c0_38 = arith.constant 0 : index
    %c24 = arith.constant 24 : index
    %90 = vector.load %arg54[%c0_38, %c24] : memref<16x32xf32, #tpu.memory_space<vmem>>, vector<8x8xf32>
    tpu.vector_store %arg54[%c0_38, %c24], %89 {strides = array<i32>} : memref<16x32xf32, #tpu.memory_space<vmem>>, vector<8x8xf32>,
    %91 = vector.extract_strided_slice %14 {offsets = [8, 0], sizes = [8, 8], strides = [1, 1]} : vector<16x96xf32> to vector<8x8xf32>
    %92 = vector.extract_strided_slice %14 {offsets = [8, 32], sizes = [8, 8], strides = [1, 1]} : vector<16x96xf32> to vector<8x8xf32>
    %93 = vector.extract_strided_slice %14 {offsets = [8, 64], sizes = [8, 8], strides = [1, 1]} : vector<16x96xf32> to vector<8x8xf32>
    %94 = tpu.transpose %92, [1, 0] : vector<8x8xf32> -> vector<8x8xf32>
    %cst_39 = arith.constant dense<0.000000e+00> : vector<8x8xf32>
    %95 = tpu.matmul %91, %94, %cst_39 {dimension_numbers = #tpu.dot_dimension_numbers<[1], [0], [0], [1], [0, 0, 1, 1], [], []>} : vector<8x8xf32>, vector<8x8xf32>, vector<8x8xf32> -> vector<8x8xf32>
    %cst_40 = arith.constant 0.353553385 : f32
    %96 = vector.broadcast %cst_40 : f32 to vector<8x8xf32>
    %97 = arith.mulf %95, %96 : vector<8x8xf32>
    %cst_41 = arith.constant dense<0xFF800000> : vector<8xf32>
    %98 = vector.multi_reduction <maximumf>, %97, %cst_41 [1] : vector<8x8xf32> to vector<8xf32>
    %99 = vector.shape_cast %98 : vector<8xf32> to vector<8x1xf32>
    %100 = vector.broadcast %99 : vector<8x1xf32> to vector<8x8xf32>
    %101 = arith.subf %97, %100 : vector<8x8xf32>
    %102 = math.exp %101 : vector<8x8xf32>
    %cst_42 = arith.constant dense<0.000000e+00> : vector<8xf32>
    %103 = vector.multi_reduction <add>, %102, %cst_42 [1] : vector<8x8xf32> to vector<8xf32>
    %104 = vector.shape_cast %103 : vector<8xf32> to vector<8x1xf32>
    %105 = tpu.reciprocal %104 {approx = true} : vector<8x1xf32> -> vector<8x1xf32>
    %106 = vector.broadcast %105 : vector<8x1xf32> to vector<8x8xf32>
    %107 = arith.mulf %102, %106 : vector<8x8xf32>
    %cst_43 = arith.constant dense<0.000000e+00> : vector<8x8xf32>
    %108 = tpu.matmul %107, %93, %cst_43 {dimension_numbers = #tpu.dot_dimension_numbers<[1], [0], [0], [1], [0, 0, 1, 1], [], []>} : vector<8x8xf32>, vector<8x8xf32>, vector<8x8xf32> -> vector<8x8xf32>
    %c8_44 = arith.constant 8 : index
    %c0_45 = arith.constant 0 : index
    %109 = vector.load %arg54[%c8_44, %c0_45] : memref<16x32xf32, #tpu.memory_space<vmem>>, vector<8x8xf32>
    tpu.vector_store %arg54[%c8_44, %c0_45], %108 {strides = array<i32>} : memref<16x32xf32, #tpu.memory_space<vmem>>, vector<8x8xf32>,
    %110 = vector.extract_strided_slice %14 {offsets = [8, 8], sizes = [8, 8], strides = [1, 1]} : vector<16x96xf32> to vector<8x8xf32>
    %111 = vector.extract_strided_slice %14 {offsets = [8, 40], sizes = [8, 8], strides = [1, 1]} : vector<16x96xf32> to vector<8x8xf32>
    %112 = vector.extract_strided_slice %14 {offsets = [8, 72], sizes = [8, 8], strides = [1, 1]} : vector<16x96xf32> to vector<8x8xf32>
    %113 = tpu.transpose %111, [1, 0] : vector<8x8xf32> -> vector<8x8xf32>
    %cst_46 = arith.constant dense<0.000000e+00> : vector<8x8xf32>
    %114 = tpu.matmul %110, %113, %cst_46 {dimension_numbers = #tpu.dot_dimension_numbers<[1], [0], [0], [1], [0, 0, 1, 1], [], []>} : vector<8x8xf32>, vector<8x8xf32>, vector<8x8xf32> -> vector<8x8xf32>
    %cst_47 = arith.constant 0.353553385 : f32
    %115 = vector.broadcast %cst_47 : f32 to vector<8x8xf32>
    %116 = arith.mulf %114, %115 : vector<8x8xf32>
    %cst_48 = arith.constant dense<0xFF800000> : vector<8xf32>
    %117 = vector.multi_reduction <maximumf>, %116, %cst_48 [1] : vector<8x8xf32> to vector<8xf32>
    %118 = vector.shape_cast %117 : vector<8xf32> to vector<8x1xf32>
    %119 = vector.broadcast %118 : vector<8x1xf32> to vector<8x8xf32>
    %120 = arith.subf %116, %119 : vector<8x8xf32>
    %121 = math.exp %120 : vector<8x8xf32>
    %cst_49 = arith.constant dense<0.000000e+00> : vector<8xf32>
    %122 = vector.multi_reduction <add>, %121, %cst_49 [1] : vector<8x8xf32> to vector<8xf32>
    %123 = vector.shape_cast %122 : vector<8xf32> to vector<8x1xf32>
    %124 = tpu.reciprocal %123 {approx = true} : vector<8x1xf32> -> vector<8x1xf32>
    %125 = vector.broadcast %124 : vector<8x1xf32> to vector<8x8xf32>
    %126 = arith.mulf %121, %125 : vector<8x8xf32>
    %cst_50 = arith.constant dense<0.000000e+00> : vector<8x8xf32>
    %127 = tpu.matmul %126, %112, %cst_50 {dimension_numbers = #tpu.dot_dimension_numbers<[1], [0], [0], [1], [0, 0, 1, 1], [], []>} : vector<8x8xf32>, vector<8x8xf32>, vector<8x8xf32> -> vector<8x8xf32>
    %c8_51 = arith.constant 8 : index
    %c8_52 = arith.constant 8 : index
    %128 = vector.load %arg54[%c8_51, %c8_52] : memref<16x32xf32, #tpu.memory_space<vmem>>, vector<8x8xf32>
    tpu.vector_store %arg54[%c8_51, %c8_52], %127 {strides = array<i32>} : memref<16x32xf32, #tpu.memory_space<vmem>>, vector<8x8xf32>,
    %129 = vector.extract_strided_slice %14 {offsets = [8, 16], sizes = [8, 8], strides = [1, 1]} : vector<16x96xf32> to vector<8x8xf32>
    %130 = vector.extract_strided_slice %14 {offsets = [8, 48], sizes = [8, 8], strides = [1, 1]} : vector<16x96xf32> to vector<8x8xf32>
    %131 = vector.extract_strided_slice %14 {offsets = [8, 80], sizes = [8, 8], strides = [1, 1]} : vector<16x96xf32> to vector<8x8xf32>
    %132 = tpu.transpose %130, [1, 0] : vector<8x8xf32> -> vector<8x8xf32>
    %cst_53 = arith.constant dense<0.000000e+00> : vector<8x8xf32>
    %133 = tpu.matmul %129, %132, %cst_53 {dimension_numbers = #tpu.dot_dimension_numbers<[1], [0], [0], [1], [0, 0, 1, 1], [], []>} : vector<8x8xf32>, vector<8x8xf32>, vector<8x8xf32> -> vector<8x8xf32>
    %cst_54 = arith.constant 0.353553385 : f32
    %134 = vector.broadcast %cst_54 : f32 to vector<8x8xf32>
    %135 = arith.mulf %133, %134 : vector<8x8xf32>
    %cst_55 = arith.constant dense<0xFF800000> : vector<8xf32>
    %136 = vector.multi_reduction <maximumf>, %135, %cst_55 [1] : vector<8x8xf32> to vector<8xf32>
    %137 = vector.shape_cast %136 : vector<8xf32> to vector<8x1xf32>
    %138 = vector.broadcast %137 : vector<8x1xf32> to vector<8x8xf32>
    %139 = arith.subf %135, %138 : vector<8x8xf32>
    %140 = math.exp %139 : vector<8x8xf32>
    %cst_56 = arith.constant dense<0.000000e+00> : vector<8xf32>
    %141 = vector.multi_reduction <add>, %140, %cst_56 [1] : vector<8x8xf32> to vector<8xf32>
    %142 = vector.shape_cast %141 : vector<8xf32> to vector<8x1xf32>
    %143 = tpu.reciprocal %142 {approx = true} : vector<8x1xf32> -> vector<8x1xf32>
    %144 = vector.broadcast %143 : vector<8x1xf32> to vector<8x8xf32>
    %145 = arith.mulf %140, %144 : vector<8x8xf32>
    %cst_57 = arith.constant dense<0.000000e+00> : vector<8x8xf32>
    %146 = tpu.matmul %145, %131, %cst_57 {dimension_numbers = #tpu.dot_dimension_numbers<[1], [0], [0], [1], [0, 0, 1, 1], [], []>} : vector<8x8xf32>, vector<8x8xf32>, vector<8x8xf32> -> vector<8x8xf32>
    %c8_58 = arith.constant 8 : index
    %c16_59 = arith.constant 16 : index
    %147 = vector.load %arg54[%c8_58, %c16_59] : memref<16x32xf32, #tpu.memory_space<vmem>>, vector<8x8xf32>
    tpu.vector_store %arg54[%c8_58, %c16_59], %146 {strides = array<i32>} : memref<16x32xf32, #tpu.memory_space<vmem>>, vector<8x8xf32>,
    %148 = vector.extract_strided_slice %14 {offsets = [8, 24], sizes = [8, 8], strides = [1, 1]} : vector<16x96xf32> to vector<8x8xf32>
    %149 = vector.extract_strided_slice %14 {offsets = [8, 56], sizes = [8, 8], strides = [1, 1]} : vector<16x96xf32> to vector<8x8xf32>
    %150 = vector.extract_strided_slice %14 {offsets = [8, 88], sizes = [8, 8], strides = [1, 1]} : vector<16x96xf32> to vector<8x8xf32>
    %151 = tpu.transpose %149, [1, 0] : vector<8x8xf32> -> vector<8x8xf32>
    %cst_60 = arith.constant dense<0.000000e+00> : vector<8x8xf32>
    %152 = tpu.matmul %148, %151, %cst_60 {dimension_numbers = #tpu.dot_dimension_numbers<[1], [0], [0], [1], [0, 0, 1, 1], [], []>} : vector<8x8xf32>, vector<8x8xf32>, vector<8x8xf32> -> vector<8x8xf32>
    %cst_61 = arith.constant 0.353553385 : f32
    %153 = vector.broadcast %cst_61 : f32 to vector<8x8xf32>
    %154 = arith.mulf %152, %153 : vector<8x8xf32>
    %cst_62 = arith.constant dense<0xFF800000> : vector<8xf32>
    %155 = vector.multi_reduction <maximumf>, %154, %cst_62 [1] : vector<8x8xf32> to vector<8xf32>
    %156 = vector.shape_cast %155 : vector<8xf32> to vector<8x1xf32>
    %157 = vector.broadcast %156 : vector<8x1xf32> to vector<8x8xf32>
    %158 = arith.subf %154, %157 : vector<8x8xf32>
    %159 = math.exp %158 : vector<8x8xf32>
    %cst_63 = arith.constant dense<0.000000e+00> : vector<8xf32>
    %160 = vector.multi_reduction <add>, %159, %cst_63 [1] : vector<8x8xf32> to vector<8xf32>
    %161 = vector.shape_cast %160 : vector<8xf32> to vector<8x1xf32>
    %162 = tpu.reciprocal %161 {approx = true} : vector<8x1xf32> -> vector<8x1xf32>
    %163 = vector.broadcast %162 : vector<8x1xf32> to vector<8x8xf32>
    %164 = arith.mulf %159, %163 : vector<8x8xf32>
    %cst_64 = arith.constant dense<0.000000e+00> : vector<8x8xf32>
    %165 = tpu.matmul %164, %150, %cst_64 {dimension_numbers = #tpu.dot_dimension_numbers<[1], [0], [0], [1], [0, 0, 1, 1], [], []>} : vector<8x8xf32>, vector<8x8xf32>, vector<8x8xf32> -> vector<8x8xf32>
    %c8_65 = arith.constant 8 : index
    %c24_66 = arith.constant 24 : index
    %166 = vector.load %arg54[%c8_65, %c24_66] : memref<16x32xf32, #tpu.memory_space<vmem>>, vector<8x8xf32>
    tpu.vector_store %arg54[%c8_65, %c24_66], %165 {strides = array<i32>} : memref<16x32xf32, #tpu.memory_space<vmem>>, vector<8x8xf32>,
    %c0_67 = arith.constant 0 : index
    %c0_68 = arith.constant 0 : index
    %167 = vector.load %arg54[%c0_67, %c0_68] : memref<16x32xf32, #tpu.memory_space<vmem>>, vector<16x32xf32>
    %c0_69 = arith.constant 0 : index
    %c0_70 = arith.constant 0 : index
    %c0_71 = arith.constant 0 : index
    %168 = vector.load %arg9[%c0_69, %c0_70, %c0_71] : memref<2x32x32xf32, #tpu.memory_space<vmem>>, vector<1x32x32xf32>
    %169 = vector.shape_cast %168 : vector<1x32x32xf32> to vector<32x32xf32>
    %cst_72 = arith.constant dense<0.000000e+00> : vector<16x32xf32>
    %170 = tpu.matmul %167, %169, %cst_72 {dimension_numbers = #tpu.dot_dimension_numbers<[1], [0], [0], [1], [0, 0, 1, 1], [], []>} : vector<16x32xf32>, vector<32x32xf32>, vector<16x32xf32> -> vector<16x32xf32>
    %c0_73 = arith.constant 0 : index
    %c0_74 = arith.constant 0 : index
    %c0_75 = arith.constant 0 : index
    %171 = vector.load %arg10[%c0_73, %c0_74, %c0_75] : memref<2x1x32xf32, #tpu.memory_space<vmem>>, vector<1x1x32xf32>
    %172 = vector.shape_cast %171 : vector<1x1x32xf32> to vector<1x32xf32>
    %173 = vector.broadcast %172 : vector<1x32xf32> to vector<16x32xf32>
    %174 = arith.addf %170, %173 : vector<16x32xf32>
    %175 = arith.addf %7, %174 : vector<16x32xf32>
    %c0_76 = arith.constant 0 : index
    %c0_77 = arith.constant 0 : index
    %c0_78 = arith.constant 0 : index
    %176 = vector.load %arg11[%c0_76, %c0_77, %c0_78] : memref<2x1x32xf32, #tpu.memory_space<vmem>>, vector<1x1x32xf32>
    %177 = vector.shape_cast %176 : vector<1x1x32xf32> to vector<1x32xf32>
    %c0_79 = arith.constant 0 : index
    %c0_80 = arith.constant 0 : index
    %c0_81 = arith.constant 0 : index
    %178 = vector.load %arg12[%c0_79, %c0_80, %c0_81] : memref<2x1x32xf32, #tpu.memory_space<vmem>>, vector<1x1x32xf32>
    %179 = vector.shape_cast %178 : vector<1x1x32xf32> to vector<1x32xf32>
    %cst_82 = arith.constant dense<0.000000e+00> : vector<16xf32>
    %180 = vector.multi_reduction <add>, %175, %cst_82 [1] : vector<16x32xf32> to vector<16xf32>
    %181 = vector.shape_cast %180 : vector<16xf32> to vector<16x1xf32>
    %cst_83 = arith.constant 3.200000e+01 : f32
    %182 = vector.broadcast %cst_83 : f32 to vector<16x1xf32>
    %183 = arith.divf %181, %182 : vector<16x1xf32>
    %184 = vector.broadcast %183 : vector<16x1xf32> to vector<16x32xf32>
    %185 = arith.subf %175, %184 : vector<16x32xf32>
    %186 = arith.mulf %185, %185 : vector<16x32xf32>
    %cst_84 = arith.constant dense<0.000000e+00> : vector<16xf32>
    %187 = vector.multi_reduction <add>, %186, %cst_84 [1] : vector<16x32xf32> to vector<16xf32>
    %188 = vector.shape_cast %187 : vector<16xf32> to vector<16x1xf32>
    %cst_85 = arith.constant 3.200000e+01 : f32
    %189 = vector.broadcast %cst_85 : f32 to vector<16x1xf32>
    %190 = arith.divf %188, %189 : vector<16x1xf32>
    %191 = vector.broadcast %183 : vector<16x1xf32> to vector<16x32xf32>
    %192 = arith.subf %175, %191 : vector<16x32xf32>
    %cst_86 = arith.constant 9.99999974E-6 : f32
    %193 = vector.broadcast %cst_86 : f32 to vector<16x1xf32>
    %194 = arith.addf %190, %193 : vector<16x1xf32>
    %195 = math.rsqrt %194 : vector<16x1xf32>
    %196 = vector.broadcast %195 : vector<16x1xf32> to vector<16x32xf32>
    %197 = arith.mulf %192, %196 : vector<16x32xf32>
    %198 = vector.broadcast %177 : vector<1x32xf32> to vector<16x32xf32>
    %199 = arith.mulf %197, %198 : vector<16x32xf32>
    %200 = vector.broadcast %179 : vector<1x32xf32> to vector<16x32xf32>
    %201 = arith.addf %199, %200 : vector<16x32xf32>
    %c0_87 = arith.constant 0 : index
    %c0_88 = arith.constant 0 : index
    %c0_89 = arith.constant 0 : index
    %202 = vector.load %arg13[%c0_87, %c0_88, %c0_89] : memref<2x32x64xf32, #tpu.memory_space<vmem>>, vector<1x32x64xf32>
    %203 = vector.shape_cast %202 : vector<1x32x64xf32> to vector<32x64xf32>
    %cst_90 = arith.constant dense<0.000000e+00> : vector<16x64xf32>
    %204 = tpu.matmul %201, %203, %cst_90 {dimension_numbers = #tpu.dot_dimension_numbers<[1], [0], [0], [1], [0, 0, 1, 1], [], []>} : vector<16x32xf32>, vector<32x64xf32>, vector<16x64xf32> -> vector<16x64xf32>
    %c0_91 = arith.constant 0 : index
    %c0_92 = arith.constant 0 : index
    %c0_93 = arith.constant 0 : index
    %205 = vector.load %arg14[%c0_91, %c0_92, %c0_93] : memref<2x1x64xf32, #tpu.memory_space<vmem>>, vector<1x1x64xf32>
    %206 = vector.shape_cast %205 : vector<1x1x64xf32> to vector<1x64xf32>
    %207 = vector.broadcast %206 : vector<1x64xf32> to vector<16x64xf32>
    %208 = arith.addf %204, %207 : vector<16x64xf32>
    %cst_94 = arith.constant 0.000000e+00 : f32
    %209 = vector.broadcast %cst_94 : f32 to vector<16x64xf32>
    %210 = arith.maximumf %208, %209 : vector<16x64xf32>
    %c0_95 = arith.constant 0 : index
    %c0_96 = arith.constant 0 : index
    %c0_97 = arith.constant 0 : index
    %211 = vector.load %arg15[%c0_95, %c0_96, %c0_97] : memref<2x64x32xf32, #tpu.memory_space<vmem>>, vector<1x64x32xf32>
    %212 = vector.shape_cast %211 : vector<1x64x32xf32> to vector<64x32xf32>
    %cst_98 = arith.constant dense<0.000000e+00> : vector<16x32xf32>
    %213 = tpu.matmul %210, %212, %cst_98 {dimension_numbers = #tpu.dot_dimension_numbers<[1], [0], [0], [1], [0, 0, 1, 1], [], []>} : vector<16x64xf32>, vector<64x32xf32>, vector<16x32xf32> -> vector<16x32xf32>
    %c0_99 = arith.constant 0 : index
    %c0_100 = arith.constant 0 : index
    %c0_101 = arith.constant 0 : index
    %214 = vector.load %arg16[%c0_99, %c0_100, %c0_101] : memref<2x1x32xf32, #tpu.memory_space<vmem>>, vector<1x1x32xf32>
    %215 = vector.shape_cast %214 : vector<1x1x32xf32> to vector<1x32xf32>
    %216 = vector.broadcast %215 : vector<1x32xf32> to vector<16x32xf32>
    %217 = arith.addf %213, %216 : vector<16x32xf32>
    %218 = arith.addf %201, %217 : vector<16x32xf32>
    %c0_102 = arith.constant 0 : index
    %c0_103 = arith.constant 0 : index
    %c0_104 = arith.constant 0 : index
    %219 = vector.load %arg17[%c0_102, %c0_103, %c0_104] : memref<2x1x32xf32, #tpu.memory_space<vmem>>, vector<1x1x32xf32>
    %220 = vector.shape_cast %219 : vector<1x1x32xf32> to vector<1x32xf32>
    %c0_105 = arith.constant 0 : index
    %c0_106 = arith.constant 0 : index
    %c0_107 = arith.constant 0 : index
    %221 = vector.load %arg18[%c0_105, %c0_106, %c0_107] : memref<2x1x32xf32, #tpu.memory_space<vmem>>, vector<1x1x32xf32>
    %222 = vector.shape_cast %221 : vector<1x1x32xf32> to vector<1x32xf32>
    %cst_108 = arith.constant dense<0.000000e+00> : vector<16xf32>
    %223 = vector.multi_reduction <add>, %218, %cst_108 [1] : vector<16x32xf32> to vector<16xf32>
    %224 = vector.shape_cast %223 : vector<16xf32> to vector<16x1xf32>
    %cst_109 = arith.constant 3.200000e+01 : f32
    %225 = vector.broadcast %cst_109 : f32 to vector<16x1xf32>
    %226 = arith.divf %224, %225 : vector<16x1xf32>
    %227 = vector.broadcast %226 : vector<16x1xf32> to vector<16x32xf32>
    %228 = arith.subf %218, %227 : vector<16x32xf32>
    %229 = arith.mulf %228, %228 : vector<16x32xf32>
    %cst_110 = arith.constant dense<0.000000e+00> : vector<16xf32>
    %230 = vector.multi_reduction <add>, %229, %cst_110 [1] : vector<16x32xf32> to vector<16xf32>
    %231 = vector.shape_cast %230 : vector<16xf32> to vector<16x1xf32>
    %cst_111 = arith.constant 3.200000e+01 : f32
    %232 = vector.broadcast %cst_111 : f32 to vector<16x1xf32>
    %233 = arith.divf %231, %232 : vector<16x1xf32>
    %234 = vector.broadcast %226 : vector<16x1xf32> to vector<16x32xf32>
    %235 = arith.subf %218, %234 : vector<16x32xf32>
    %cst_112 = arith.constant 9.99999974E-6 : f32
    %236 = vector.broadcast %cst_112 : f32 to vector<16x1xf32>
    %237 = arith.addf %233, %236 : vector<16x1xf32>
    %238 = math.rsqrt %237 : vector<16x1xf32>
    %239 = vector.broadcast %238 : vector<16x1xf32> to vector<16x32xf32>
    %240 = arith.mulf %235, %239 : vector<16x32xf32>
    %241 = vector.broadcast %220 : vector<1x32xf32> to vector<16x32xf32>
    %242 = arith.mulf %240, %241 : vector<16x32xf32>
    %243 = vector.broadcast %222 : vector<1x32xf32> to vector<16x32xf32>
    %244 = arith.addf %242, %243 : vector<16x32xf32>
    %c1 = arith.constant 1 : index
    %c0_113 = arith.constant 0 : index
    %c0_114 = arith.constant 0 : index
    %245 = vector.load %arg7[%c1, %c0_113, %c0_114] : memref<2x32x96xf32, #tpu.memory_space<vmem>>, vector<1x32x96xf32>
    %246 = vector.shape_cast %245 : vector<1x32x96xf32> to vector<32x96xf32>
    %cst_115 = arith.constant dense<0.000000e+00> : vector<16x96xf32>
    %247 = tpu.matmul %244, %246, %cst_115 {dimension_numbers = #tpu.dot_dimension_numbers<[1], [0], [0], [1], [0, 0, 1, 1], [], []>} : vector<16x32xf32>, vector<32x96xf32>, vector<16x96xf32> -> vector<16x96xf32>
    %c1_116 = arith.constant 1 : index
    %c0_117 = arith.constant 0 : index
    %c0_118 = arith.constant 0 : index
    %248 = vector.load %arg8[%c1_116, %c0_117, %c0_118] : memref<2x1x96xf32, #tpu.memory_space<vmem>>, vector<1x1x96xf32>
    %249 = vector.shape_cast %248 : vector<1x1x96xf32> to vector<1x96xf32>
    %250 = vector.broadcast %249 : vector<1x96xf32> to vector<16x96xf32>
    %251 = arith.addf %247, %250 : vector<16x96xf32>
    %252 = vector.extract_strided_slice %251 {offsets = [0, 0], sizes = [8, 8], strides = [1, 1]} : vector<16x96xf32> to vector<8x8xf32>
    %253 = vector.extract_strided_slice %251 {offsets = [0, 32], sizes = [8, 8], strides = [1, 1]} : vector<16x96xf32> to vector<8x8xf32>
    %254 = vector.extract_strided_slice %251 {offsets = [0, 64], sizes = [8, 8], strides = [1, 1]} : vector<16x96xf32> to vector<8x8xf32>
    %255 = tpu.transpose %253, [1, 0] : vector<8x8xf32> -> vector<8x8xf32>
    %cst_119 = arith.constant dense<0.000000e+00> : vector<8x8xf32>
    %256 = tpu.matmul %252, %255, %cst_119 {dimension_numbers = #tpu.dot_dimension_numbers<[1], [0], [0], [1], [0, 0, 1, 1], [], []>} : vector<8x8xf32>, vector<8x8xf32>, vector<8x8xf32> -> vector<8x8xf32>
    %cst_120 = arith.constant 0.353553385 : f32
    %257 = vector.broadcast %cst_120 : f32 to vector<8x8xf32>
    %258 = arith.mulf %256, %257 : vector<8x8xf32>
    %cst_121 = arith.constant dense<0xFF800000> : vector<8xf32>
    %259 = vector.multi_reduction <maximumf>, %258, %cst_121 [1] : vector<8x8xf32> to vector<8xf32>
    %260 = vector.shape_cast %259 : vector<8xf32> to vector<8x1xf32>
    %261 = vector.broadcast %260 : vector<8x1xf32> to vector<8x8xf32>
    %262 = arith.subf %258, %261 : vector<8x8xf32>
    %263 = math.exp %262 : vector<8x8xf32>
    %cst_122 = arith.constant dense<0.000000e+00> : vector<8xf32>
    %264 = vector.multi_reduction <add>, %263, %cst_122 [1] : vector<8x8xf32> to vector<8xf32>
    %265 = vector.shape_cast %264 : vector<8xf32> to vector<8x1xf32>
    %266 = tpu.reciprocal %265 {approx = true} : vector<8x1xf32> -> vector<8x1xf32>
    %267 = vector.broadcast %266 : vector<8x1xf32> to vector<8x8xf32>
    %268 = arith.mulf %263, %267 : vector<8x8xf32>
    %cst_123 = arith.constant dense<0.000000e+00> : vector<8x8xf32>
    %269 = tpu.matmul %268, %254, %cst_123 {dimension_numbers = #tpu.dot_dimension_numbers<[1], [0], [0], [1], [0, 0, 1, 1], [], []>} : vector<8x8xf32>, vector<8x8xf32>, vector<8x8xf32> -> vector<8x8xf32>
    %c0_124 = arith.constant 0 : index
    %c0_125 = arith.constant 0 : index
    %270 = vector.load %arg54[%c0_124, %c0_125] : memref<16x32xf32, #tpu.memory_space<vmem>>, vector<8x8xf32>
    tpu.vector_store %arg54[%c0_124, %c0_125], %269 {strides = array<i32>} : memref<16x32xf32, #tpu.memory_space<vmem>>, vector<8x8xf32>,
    %271 = vector.extract_strided_slice %251 {offsets = [0, 8], sizes = [8, 8], strides = [1, 1]} : vector<16x96xf32> to vector<8x8xf32>
    %272 = vector.extract_strided_slice %251 {offsets = [0, 40], sizes = [8, 8], strides = [1, 1]} : vector<16x96xf32> to vector<8x8xf32>
    %273 = vector.extract_strided_slice %251 {offsets = [0, 72], sizes = [8, 8], strides = [1, 1]} : vector<16x96xf32> to vector<8x8xf32>
    %274 = tpu.transpose %272, [1, 0] : vector<8x8xf32> -> vector<8x8xf32>
    %cst_126 = arith.constant dense<0.000000e+00> : vector<8x8xf32>
    %275 = tpu.matmul %271, %274, %cst_126 {dimension_numbers = #tpu.dot_dimension_numbers<[1], [0], [0], [1], [0, 0, 1, 1], [], []>} : vector<8x8xf32>, vector<8x8xf32>, vector<8x8xf32> -> vector<8x8xf32>
    %cst_127 = arith.constant 0.353553385 : f32
    %276 = vector.broadcast %cst_127 : f32 to vector<8x8xf32>
    %277 = arith.mulf %275, %276 : vector<8x8xf32>
    %cst_128 = arith.constant dense<0xFF800000> : vector<8xf32>
    %278 = vector.multi_reduction <maximumf>, %277, %cst_128 [1] : vector<8x8xf32> to vector<8xf32>
    %279 = vector.shape_cast %278 : vector<8xf32> to vector<8x1xf32>
    %280 = vector.broadcast %279 : vector<8x1xf32> to vector<8x8xf32>
    %281 = arith.subf %277, %280 : vector<8x8xf32>
    %282 = math.exp %281 : vector<8x8xf32>
    %cst_129 = arith.constant dense<0.000000e+00> : vector<8xf32>
    %283 = vector.multi_reduction <add>, %282, %cst_129 [1] : vector<8x8xf32> to vector<8xf32>
    %284 = vector.shape_cast %283 : vector<8xf32> to vector<8x1xf32>
    %285 = tpu.reciprocal %284 {approx = true} : vector<8x1xf32> -> vector<8x1xf32>
    %286 = vector.broadcast %285 : vector<8x1xf32> to vector<8x8xf32>
    %287 = arith.mulf %282, %286 : vector<8x8xf32>
    %cst_130 = arith.constant dense<0.000000e+00> : vector<8x8xf32>
    %288 = tpu.matmul %287, %273, %cst_130 {dimension_numbers = #tpu.dot_dimension_numbers<[1], [0], [0], [1], [0, 0, 1, 1], [], []>} : vector<8x8xf32>, vector<8x8xf32>, vector<8x8xf32> -> vector<8x8xf32>
    %c0_131 = arith.constant 0 : index
    %c8_132 = arith.constant 8 : index
    %289 = vector.load %arg54[%c0_131, %c8_132] : memref<16x32xf32, #tpu.memory_space<vmem>>, vector<8x8xf32>
    tpu.vector_store %arg54[%c0_131, %c8_132], %288 {strides = array<i32>} : memref<16x32xf32, #tpu.memory_space<vmem>>, vector<8x8xf32>,
    %290 = vector.extract_strided_slice %251 {offsets = [0, 16], sizes = [8, 8], strides = [1, 1]} : vector<16x96xf32> to vector<8x8xf32>
    %291 = vector.extract_strided_slice %251 {offsets = [0, 48], sizes = [8, 8], strides = [1, 1]} : vector<16x96xf32> to vector<8x8xf32>
    %292 = vector.extract_strided_slice %251 {offsets = [0, 80], sizes = [8, 8], strides = [1, 1]} : vector<16x96xf32> to vector<8x8xf32>
    %293 = tpu.transpose %291, [1, 0] : vector<8x8xf32> -> vector<8x8xf32>
    %cst_133 = arith.constant dense<0.000000e+00> : vector<8x8xf32>
    %294 = tpu.matmul %290, %293, %cst_133 {dimension_numbers = #tpu.dot_dimension_numbers<[1], [0], [0], [1], [0, 0, 1, 1], [], []>} : vector<8x8xf32>, vector<8x8xf32>, vector<8x8xf32> -> vector<8x8xf32>
    %cst_134 = arith.constant 0.353553385 : f32
    %295 = vector.broadcast %cst_134 : f32 to vector<8x8xf32>
    %296 = arith.mulf %294, %295 : vector<8x8xf32>
    %cst_135 = arith.constant dense<0xFF800000> : vector<8xf32>
    %297 = vector.multi_reduction <maximumf>, %296, %cst_135 [1] : vector<8x8xf32> to vector<8xf32>
    %298 = vector.shape_cast %297 : vector<8xf32> to vector<8x1xf32>
    %299 = vector.broadcast %298 : vector<8x1xf32> to vector<8x8xf32>
    %300 = arith.subf %296, %299 : vector<8x8xf32>
    %301 = math.exp %300 : vector<8x8xf32>
    %cst_136 = arith.constant dense<0.000000e+00> : vector<8xf32>
    %302 = vector.multi_reduction <add>, %301, %cst_136 [1] : vector<8x8xf32> to vector<8xf32>
    %303 = vector.shape_cast %302 : vector<8xf32> to vector<8x1xf32>
    %304 = tpu.reciprocal %303 {approx = true} : vector<8x1xf32> -> vector<8x1xf32>
    %305 = vector.broadcast %304 : vector<8x1xf32> to vector<8x8xf32>
    %306 = arith.mulf %301, %305 : vector<8x8xf32>
    %cst_137 = arith.constant dense<0.000000e+00> : vector<8x8xf32>
    %307 = tpu.matmul %306, %292, %cst_137 {dimension_numbers = #tpu.dot_dimension_numbers<[1], [0], [0], [1], [0, 0, 1, 1], [], []>} : vector<8x8xf32>, vector<8x8xf32>, vector<8x8xf32> -> vector<8x8xf32>
    %c0_138 = arith.constant 0 : index
    %c16_139 = arith.constant 16 : index
    %308 = vector.load %arg54[%c0_138, %c16_139] : memref<16x32xf32, #tpu.memory_space<vmem>>, vector<8x8xf32>
    tpu.vector_store %arg54[%c0_138, %c16_139], %307 {strides = array<i32>} : memref<16x32xf32, #tpu.memory_space<vmem>>, vector<8x8xf32>,
    %309 = vector.extract_strided_slice %251 {offsets = [0, 24], sizes = [8, 8], strides = [1, 1]} : vector<16x96xf32> to vector<8x8xf32>
    %310 = vector.extract_strided_slice %251 {offsets = [0, 56], sizes = [8, 8], strides = [1, 1]} : vector<16x96xf32> to vector<8x8xf32>
    %311 = vector.extract_strided_slice %251 {offsets = [0, 88], sizes = [8, 8], strides = [1, 1]} : vector<16x96xf32> to vector<8x8xf32>
    %312 = tpu.transpose %310, [1, 0] : vector<8x8xf32> -> vector<8x8xf32>
    %cst_140 = arith.constant dense<0.000000e+00> : vector<8x8xf32>
    %313 = tpu.matmul %309, %312, %cst_140 {dimension_numbers = #tpu.dot_dimension_numbers<[1], [0], [0], [1], [0, 0, 1, 1], [], []>} : vector<8x8xf32>, vector<8x8xf32>, vector<8x8xf32> -> vector<8x8xf32>
    %cst_141 = arith.constant 0.353553385 : f32
    %314 = vector.broadcast %cst_141 : f32 to vector<8x8xf32>
    %315 = arith.mulf %313, %314 : vector<8x8xf32>
    %cst_142 = arith.constant dense<0xFF800000> : vector<8xf32>
    %316 = vector.multi_reduction <maximumf>, %315, %cst_142 [1] : vector<8x8xf32> to vector<8xf32>
    %317 = vector.shape_cast %316 : vector<8xf32> to vector<8x1xf32>
    %318 = vector.broadcast %317 : vector<8x1xf32> to vector<8x8xf32>
    %319 = arith.subf %315, %318 : vector<8x8xf32>
    %320 = math.exp %319 : vector<8x8xf32>
    %cst_143 = arith.constant dense<0.000000e+00> : vector<8xf32>
    %321 = vector.multi_reduction <add>, %320, %cst_143 [1] : vector<8x8xf32> to vector<8xf32>
    %322 = vector.shape_cast %321 : vector<8xf32> to vector<8x1xf32>
    %323 = tpu.reciprocal %322 {approx = true} : vector<8x1xf32> -> vector<8x1xf32>
    %324 = vector.broadcast %323 : vector<8x1xf32> to vector<8x8xf32>
    %325 = arith.mulf %320, %324 : vector<8x8xf32>
    %cst_144 = arith.constant dense<0.000000e+00> : vector<8x8xf32>
    %326 = tpu.matmul %325, %311, %cst_144 {dimension_numbers = #tpu.dot_dimension_numbers<[1], [0], [0], [1], [0, 0, 1, 1], [], []>} : vector<8x8xf32>, vector<8x8xf32>, vector<8x8xf32> -> vector<8x8xf32>
    %c0_145 = arith.constant 0 : index
    %c24_146 = arith.constant 24 : index
    %327 = vector.load %arg54[%c0_145, %c24_146] : memref<16x32xf32, #tpu.memory_space<vmem>>, vector<8x8xf32>
    tpu.vector_store %arg54[%c0_145, %c24_146], %326 {strides = array<i32>} : memref<16x32xf32, #tpu.memory_space<vmem>>, vector<8x8xf32>,
    %328 = vector.extract_strided_slice %251 {offsets = [8, 0], sizes = [8, 8], strides = [1, 1]} : vector<16x96xf32> to vector<8x8xf32>
    %329 = vector.extract_strided_slice %251 {offsets = [8, 32], sizes = [8, 8], strides = [1, 1]} : vector<16x96xf32> to vector<8x8xf32>
    %330 = vector.extract_strided_slice %251 {offsets = [8, 64], sizes = [8, 8], strides = [1, 1]} : vector<16x96xf32> to vector<8x8xf32>
    %331 = tpu.transpose %329, [1, 0] : vector<8x8xf32> -> vector<8x8xf32>
    %cst_147 = arith.constant dense<0.000000e+00> : vector<8x8xf32>
    %332 = tpu.matmul %328, %331, %cst_147 {dimension_numbers = #tpu.dot_dimension_numbers<[1], [0], [0], [1], [0, 0, 1, 1], [], []>} : vector<8x8xf32>, vector<8x8xf32>, vector<8x8xf32> -> vector<8x8xf32>
    %cst_148 = arith.constant 0.353553385 : f32
    %333 = vector.broadcast %cst_148 : f32 to vector<8x8xf32>
    %334 = arith.mulf %332, %333 : vector<8x8xf32>
    %cst_149 = arith.constant dense<0xFF800000> : vector<8xf32>
    %335 = vector.multi_reduction <maximumf>, %334, %cst_149 [1] : vector<8x8xf32> to vector<8xf32>
    %336 = vector.shape_cast %335 : vector<8xf32> to vector<8x1xf32>
    %337 = vector.broadcast %336 : vector<8x1xf32> to vector<8x8xf32>
    %338 = arith.subf %334, %337 : vector<8x8xf32>
    %339 = math.exp %338 : vector<8x8xf32>
    %cst_150 = arith.constant dense<0.000000e+00> : vector<8xf32>
    %340 = vector.multi_reduction <add>, %339, %cst_150 [1] : vector<8x8xf32> to vector<8xf32>
    %341 = vector.shape_cast %340 : vector<8xf32> to vector<8x1xf32>
    %342 = tpu.reciprocal %341 {approx = true} : vector<8x1xf32> -> vector<8x1xf32>
    %343 = vector.broadcast %342 : vector<8x1xf32> to vector<8x8xf32>
    %344 = arith.mulf %339, %343 : vector<8x8xf32>
    %cst_151 = arith.constant dense<0.000000e+00> : vector<8x8xf32>
    %345 = tpu.matmul %344, %330, %cst_151 {dimension_numbers = #tpu.dot_dimension_numbers<[1], [0], [0], [1], [0, 0, 1, 1], [], []>} : vector<8x8xf32>, vector<8x8xf32>, vector<8x8xf32> -> vector<8x8xf32>
    %c8_152 = arith.constant 8 : index
    %c0_153 = arith.constant 0 : index
    %346 = vector.load %arg54[%c8_152, %c0_153] : memref<16x32xf32, #tpu.memory_space<vmem>>, vector<8x8xf32>
    tpu.vector_store %arg54[%c8_152, %c0_153], %345 {strides = array<i32>} : memref<16x32xf32, #tpu.memory_space<vmem>>, vector<8x8xf32>,
    %347 = vector.extract_strided_slice %251 {offsets = [8, 8], sizes = [8, 8], strides = [1, 1]} : vector<16x96xf32> to vector<8x8xf32>
    %348 = vector.extract_strided_slice %251 {offsets = [8, 40], sizes = [8, 8], strides = [1, 1]} : vector<16x96xf32> to vector<8x8xf32>
    %349 = vector.extract_strided_slice %251 {offsets = [8, 72], sizes = [8, 8], strides = [1, 1]} : vector<16x96xf32> to vector<8x8xf32>
    %350 = tpu.transpose %348, [1, 0] : vector<8x8xf32> -> vector<8x8xf32>
    %cst_154 = arith.constant dense<0.000000e+00> : vector<8x8xf32>
    %351 = tpu.matmul %347, %350, %cst_154 {dimension_numbers = #tpu.dot_dimension_numbers<[1], [0], [0], [1], [0, 0, 1, 1], [], []>} : vector<8x8xf32>, vector<8x8xf32>, vector<8x8xf32> -> vector<8x8xf32>
    %cst_155 = arith.constant 0.353553385 : f32
    %352 = vector.broadcast %cst_155 : f32 to vector<8x8xf32>
    %353 = arith.mulf %351, %352 : vector<8x8xf32>
    %cst_156 = arith.constant dense<0xFF800000> : vector<8xf32>
    %354 = vector.multi_reduction <maximumf>, %353, %cst_156 [1] : vector<8x8xf32> to vector<8xf32>
    %355 = vector.shape_cast %354 : vector<8xf32> to vector<8x1xf32>
    %356 = vector.broadcast %355 : vector<8x1xf32> to vector<8x8xf32>
    %357 = arith.subf %353, %356 : vector<8x8xf32>
    %358 = math.exp %357 : vector<8x8xf32>
    %cst_157 = arith.constant dense<0.000000e+00> : vector<8xf32>
    %359 = vector.multi_reduction <add>, %358, %cst_157 [1] : vector<8x8xf32> to vector<8xf32>
    %360 = vector.shape_cast %359 : vector<8xf32> to vector<8x1xf32>
    %361 = tpu.reciprocal %360 {approx = true} : vector<8x1xf32> -> vector<8x1xf32>
    %362 = vector.broadcast %361 : vector<8x1xf32> to vector<8x8xf32>
    %363 = arith.mulf %358, %362 : vector<8x8xf32>
    %cst_158 = arith.constant dense<0.000000e+00> : vector<8x8xf32>
    %364 = tpu.matmul %363, %349, %cst_158 {dimension_numbers = #tpu.dot_dimension_numbers<[1], [0], [0], [1], [0, 0, 1, 1], [], []>} : vector<8x8xf32>, vector<8x8xf32>, vector<8x8xf32> -> vector<8x8xf32>
    %c8_159 = arith.constant 8 : index
    %c8_160 = arith.constant 8 : index
    %365 = vector.load %arg54[%c8_159, %c8_160] : memref<16x32xf32, #tpu.memory_space<vmem>>, vector<8x8xf32>
    tpu.vector_store %arg54[%c8_159, %c8_160], %364 {strides = array<i32>} : memref<16x32xf32, #tpu.memory_space<vmem>>, vector<8x8xf32>,
    %366 = vector.extract_strided_slice %251 {offsets = [8, 16], sizes = [8, 8], strides = [1, 1]} : vector<16x96xf32> to vector<8x8xf32>
    %367 = vector.extract_strided_slice %251 {offsets = [8, 48], sizes = [8, 8], strides = [1, 1]} : vector<16x96xf32> to vector<8x8xf32>
    %368 = vector.extract_strided_slice %251 {offsets = [8, 80], sizes = [8, 8], strides = [1, 1]} : vector<16x96xf32> to vector<8x8xf32>
    %369 = tpu.transpose %367, [1, 0] : vector<8x8xf32> -> vector<8x8xf32>
    %cst_161 = arith.constant dense<0.000000e+00> : vector<8x8xf32>
    %370 = tpu.matmul %366, %369, %cst_161 {dimension_numbers = #tpu.dot_dimension_numbers<[1], [0], [0], [1], [0, 0, 1, 1], [], []>} : vector<8x8xf32>, vector<8x8xf32>, vector<8x8xf32> -> vector<8x8xf32>
    %cst_162 = arith.constant 0.353553385 : f32
    %371 = vector.broadcast %cst_162 : f32 to vector<8x8xf32>
    %372 = arith.mulf %370, %371 : vector<8x8xf32>
    %cst_163 = arith.constant dense<0xFF800000> : vector<8xf32>
    %373 = vector.multi_reduction <maximumf>, %372, %cst_163 [1] : vector<8x8xf32> to vector<8xf32>
    %374 = vector.shape_cast %373 : vector<8xf32> to vector<8x1xf32>
    %375 = vector.broadcast %374 : vector<8x1xf32> to vector<8x8xf32>
    %376 = arith.subf %372, %375 : vector<8x8xf32>
    %377 = math.exp %376 : vector<8x8xf32>
    %cst_164 = arith.constant dense<0.000000e+00> : vector<8xf32>
    %378 = vector.multi_reduction <add>, %377, %cst_164 [1] : vector<8x8xf32> to vector<8xf32>
    %379 = vector.shape_cast %378 : vector<8xf32> to vector<8x1xf32>
    %380 = tpu.reciprocal %379 {approx = true} : vector<8x1xf32> -> vector<8x1xf32>
    %381 = vector.broadcast %380 : vector<8x1xf32> to vector<8x8xf32>
    %382 = arith.mulf %377, %381 : vector<8x8xf32>
    %cst_165 = arith.constant dense<0.000000e+00> : vector<8x8xf32>
    %383 = tpu.matmul %382, %368, %cst_165 {dimension_numbers = #tpu.dot_dimension_numbers<[1], [0], [0], [1], [0, 0, 1, 1], [], []>} : vector<8x8xf32>, vector<8x8xf32>, vector<8x8xf32> -> vector<8x8xf32>
    %c8_166 = arith.constant 8 : index
    %c16_167 = arith.constant 16 : index
    %384 = vector.load %arg54[%c8_166, %c16_167] : memref<16x32xf32, #tpu.memory_space<vmem>>, vector<8x8xf32>
    tpu.vector_store %arg54[%c8_166, %c16_167], %383 {strides = array<i32>} : memref<16x32xf32, #tpu.memory_space<vmem>>, vector<8x8xf32>,
    %385 = vector.extract_strided_slice %251 {offsets = [8, 24], sizes = [8, 8], strides = [1, 1]} : vector<16x96xf32> to vector<8x8xf32>
    %386 = vector.extract_strided_slice %251 {offsets = [8, 56], sizes = [8, 8], strides = [1, 1]} : vector<16x96xf32> to vector<8x8xf32>
    %387 = vector.extract_strided_slice %251 {offsets = [8, 88], sizes = [8, 8], strides = [1, 1]} : vector<16x96xf32> to vector<8x8xf32>
    %388 = tpu.transpose %386, [1, 0] : vector<8x8xf32> -> vector<8x8xf32>
    %cst_168 = arith.constant dense<0.000000e+00> : vector<8x8xf32>
    %389 = tpu.matmul %385, %388, %cst_168 {dimension_numbers = #tpu.dot_dimension_numbers<[1], [0], [0], [1], [0, 0, 1, 1], [], []>} : vector<8x8xf32>, vector<8x8xf32>, vector<8x8xf32> -> vector<8x8xf32>
    %cst_169 = arith.constant 0.353553385 : f32
    %390 = vector.broadcast %cst_169 : f32 to vector<8x8xf32>
    %391 = arith.mulf %389, %390 : vector<8x8xf32>
    %cst_170 = arith.constant dense<0xFF800000> : vector<8xf32>
    %392 = vector.multi_reduction <maximumf>, %391, %cst_170 [1] : vector<8x8xf32> to vector<8xf32>
    %393 = vector.shape_cast %392 : vector<8xf32> to vector<8x1xf32>
    %394 = vector.broadcast %393 : vector<8x1xf32> to vector<8x8xf32>
    %395 = arith.subf %391, %394 : vector<8x8xf32>
    %396 = math.exp %395 : vector<8x8xf32>
    %cst_171 = arith.constant dense<0.000000e+00> : vector<8xf32>
    %397 = vector.multi_reduction <add>, %396, %cst_171 [1] : vector<8x8xf32> to vector<8xf32>
    %398 = vector.shape_cast %397 : vector<8xf32> to vector<8x1xf32>
    %399 = tpu.reciprocal %398 {approx = true} : vector<8x1xf32> -> vector<8x1xf32>
    %400 = vector.broadcast %399 : vector<8x1xf32> to vector<8x8xf32>
    %401 = arith.mulf %396, %400 : vector<8x8xf32>
    %cst_172 = arith.constant dense<0.000000e+00> : vector<8x8xf32>
    %402 = tpu.matmul %401, %387, %cst_172 {dimension_numbers = #tpu.dot_dimension_numbers<[1], [0], [0], [1], [0, 0, 1, 1], [], []>} : vector<8x8xf32>, vector<8x8xf32>, vector<8x8xf32> -> vector<8x8xf32>
    %c8_173 = arith.constant 8 : index
    %c24_174 = arith.constant 24 : index
    %403 = vector.load %arg54[%c8_173, %c24_174] : memref<16x32xf32, #tpu.memory_space<vmem>>, vector<8x8xf32>
    tpu.vector_store %arg54[%c8_173, %c24_174], %402 {strides = array<i32>} : memref<16x32xf32, #tpu.memory_space<vmem>>, vector<8x8xf32>,
    %c0_175 = arith.constant 0 : index
    %c0_176 = arith.constant 0 : index
    %404 = vector.load %arg54[%c0_175, %c0_176] : memref<16x32xf32, #tpu.memory_space<vmem>>, vector<16x32xf32>
    %c1_177 = arith.constant 1 : index
    %c0_178 = arith.constant 0 : index
    %c0_179 = arith.constant 0 : index
    %405 = vector.load %arg9[%c1_177, %c0_178, %c0_179] : memref<2x32x32xf32, #tpu.memory_space<vmem>>, vector<1x32x32xf32>
    %406 = vector.shape_cast %405 : vector<1x32x32xf32> to vector<32x32xf32>
    %cst_180 = arith.constant dense<0.000000e+00> : vector<16x32xf32>
    %407 = tpu.matmul %404, %406, %cst_180 {dimension_numbers = #tpu.dot_dimension_numbers<[1], [0], [0], [1], [0, 0, 1, 1], [], []>} : vector<16x32xf32>, vector<32x32xf32>, vector<16x32xf32> -> vector<16x32xf32>
    %c1_181 = arith.constant 1 : index
    %c0_182 = arith.constant 0 : index
    %c0_183 = arith.constant 0 : index
    %408 = vector.load %arg10[%c1_181, %c0_182, %c0_183] : memref<2x1x32xf32, #tpu.memory_space<vmem>>, vector<1x1x32xf32>
    %409 = vector.shape_cast %408 : vector<1x1x32xf32> to vector<1x32xf32>
    %410 = vector.broadcast %409 : vector<1x32xf32> to vector<16x32xf32>
    %411 = arith.addf %407, %410 : vector<16x32xf32>
    %412 = arith.addf %244, %411 : vector<16x32xf32>
    %c1_184 = arith.constant 1 : index
    %c0_185 = arith.constant 0 : index
    %c0_186 = arith.constant 0 : index
    %413 = vector.load %arg11[%c1_184, %c0_185, %c0_186] : memref<2x1x32xf32, #tpu.memory_space<vmem>>, vector<1x1x32xf32>
    %414 = vector.shape_cast %413 : vector<1x1x32xf32> to vector<1x32xf32>
    %c1_187 = arith.constant 1 : index
    %c0_188 = arith.constant 0 : index
    %c0_189 = arith.constant 0 : index
    %415 = vector.load %arg12[%c1_187, %c0_188, %c0_189] : memref<2x1x32xf32, #tpu.memory_space<vmem>>, vector<1x1x32xf32>
    %416 = vector.shape_cast %415 : vector<1x1x32xf32> to vector<1x32xf32>
    %cst_190 = arith.constant dense<0.000000e+00> : vector<16xf32>
    %417 = vector.multi_reduction <add>, %412, %cst_190 [1] : vector<16x32xf32> to vector<16xf32>
    %418 = vector.shape_cast %417 : vector<16xf32> to vector<16x1xf32>
    %cst_191 = arith.constant 3.200000e+01 : f32
    %419 = vector.broadcast %cst_191 : f32 to vector<16x1xf32>
    %420 = arith.divf %418, %419 : vector<16x1xf32>
    %421 = vector.broadcast %420 : vector<16x1xf32> to vector<16x32xf32>
    %422 = arith.subf %412, %421 : vector<16x32xf32>
    %423 = arith.mulf %422, %422 : vector<16x32xf32>
    %cst_192 = arith.constant dense<0.000000e+00> : vector<16xf32>
    %424 = vector.multi_reduction <add>, %423, %cst_192 [1] : vector<16x32xf32> to vector<16xf32>
    %425 = vector.shape_cast %424 : vector<16xf32> to vector<16x1xf32>
    %cst_193 = arith.constant 3.200000e+01 : f32
    %426 = vector.broadcast %cst_193 : f32 to vector<16x1xf32>
    %427 = arith.divf %425, %426 : vector<16x1xf32>
    %428 = vector.broadcast %420 : vector<16x1xf32> to vector<16x32xf32>
    %429 = arith.subf %412, %428 : vector<16x32xf32>
    %cst_194 = arith.constant 9.99999974E-6 : f32
    %430 = vector.broadcast %cst_194 : f32 to vector<16x1xf32>
    %431 = arith.addf %427, %430 : vector<16x1xf32>
    %432 = math.rsqrt %431 : vector<16x1xf32>
    %433 = vector.broadcast %432 : vector<16x1xf32> to vector<16x32xf32>
    %434 = arith.mulf %429, %433 : vector<16x32xf32>
    %435 = vector.broadcast %414 : vector<1x32xf32> to vector<16x32xf32>
    %436 = arith.mulf %434, %435 : vector<16x32xf32>
    %437 = vector.broadcast %416 : vector<1x32xf32> to vector<16x32xf32>
    %438 = arith.addf %436, %437 : vector<16x32xf32>
    %c1_195 = arith.constant 1 : index
    %c0_196 = arith.constant 0 : index
    %c0_197 = arith.constant 0 : index
    %439 = vector.load %arg13[%c1_195, %c0_196, %c0_197] : memref<2x32x64xf32, #tpu.memory_space<vmem>>, vector<1x32x64xf32>
    %440 = vector.shape_cast %439 : vector<1x32x64xf32> to vector<32x64xf32>
    %cst_198 = arith.constant dense<0.000000e+00> : vector<16x64xf32>
    %441 = tpu.matmul %438, %440, %cst_198 {dimension_numbers = #tpu.dot_dimension_numbers<[1], [0], [0], [1], [0, 0, 1, 1], [], []>} : vector<16x32xf32>, vector<32x64xf32>, vector<16x64xf32> -> vector<16x64xf32>
    %c1_199 = arith.constant 1 : index
    %c0_200 = arith.constant 0 : index
    %c0_201 = arith.constant 0 : index
    %442 = vector.load %arg14[%c1_199, %c0_200, %c0_201] : memref<2x1x64xf32, #tpu.memory_space<vmem>>, vector<1x1x64xf32>
    %443 = vector.shape_cast %442 : vector<1x1x64xf32> to vector<1x64xf32>
    %444 = vector.broadcast %443 : vector<1x64xf32> to vector<16x64xf32>
    %445 = arith.addf %441, %444 : vector<16x64xf32>
    %cst_202 = arith.constant 0.000000e+00 : f32
    %446 = vector.broadcast %cst_202 : f32 to vector<16x64xf32>
    %447 = arith.maximumf %445, %446 : vector<16x64xf32>
    %c1_203 = arith.constant 1 : index
    %c0_204 = arith.constant 0 : index
    %c0_205 = arith.constant 0 : index
    %448 = vector.load %arg15[%c1_203, %c0_204, %c0_205] : memref<2x64x32xf32, #tpu.memory_space<vmem>>, vector<1x64x32xf32>
    %449 = vector.shape_cast %448 : vector<1x64x32xf32> to vector<64x32xf32>
    %cst_206 = arith.constant dense<0.000000e+00> : vector<16x32xf32>
    %450 = tpu.matmul %447, %449, %cst_206 {dimension_numbers = #tpu.dot_dimension_numbers<[1], [0], [0], [1], [0, 0, 1, 1], [], []>} : vector<16x64xf32>, vector<64x32xf32>, vector<16x32xf32> -> vector<16x32xf32>
    %c1_207 = arith.constant 1 : index
    %c0_208 = arith.constant 0 : index
    %c0_209 = arith.constant 0 : index
    %451 = vector.load %arg16[%c1_207, %c0_208, %c0_209] : memref<2x1x32xf32, #tpu.memory_space<vmem>>, vector<1x1x32xf32>
    %452 = vector.shape_cast %451 : vector<1x1x32xf32> to vector<1x32xf32>
    %453 = vector.broadcast %452 : vector<1x32xf32> to vector<16x32xf32>
    %454 = arith.addf %450, %453 : vector<16x32xf32>
    %455 = arith.addf %438, %454 : vector<16x32xf32>
    %c1_210 = arith.constant 1 : index
    %c0_211 = arith.constant 0 : index
    %c0_212 = arith.constant 0 : index
    %456 = vector.load %arg17[%c1_210, %c0_211, %c0_212] : memref<2x1x32xf32, #tpu.memory_space<vmem>>, vector<1x1x32xf32>
    %457 = vector.shape_cast %456 : vector<1x1x32xf32> to vector<1x32xf32>
    %c1_213 = arith.constant 1 : index
    %c0_214 = arith.constant 0 : index
    %c0_215 = arith.constant 0 : index
    %458 = vector.load %arg18[%c1_213, %c0_214, %c0_215] : memref<2x1x32xf32, #tpu.memory_space<vmem>>, vector<1x1x32xf32>
    %459 = vector.shape_cast %458 : vector<1x1x32xf32> to vector<1x32xf32>
    %cst_216 = arith.constant dense<0.000000e+00> : vector<16xf32>
    %460 = vector.multi_reduction <add>, %455, %cst_216 [1] : vector<16x32xf32> to vector<16xf32>
    %461 = vector.shape_cast %460 : vector<16xf32> to vector<16x1xf32>
    %cst_217 = arith.constant 3.200000e+01 : f32
    %462 = vector.broadcast %cst_217 : f32 to vector<16x1xf32>
    %463 = arith.divf %461, %462 : vector<16x1xf32>
    %464 = vector.broadcast %463 : vector<16x1xf32> to vector<16x32xf32>
    %465 = arith.subf %455, %464 : vector<16x32xf32>
    %466 = arith.mulf %465, %465 : vector<16x32xf32>
    %cst_218 = arith.constant dense<0.000000e+00> : vector<16xf32>
    %467 = vector.multi_reduction <add>, %466, %cst_218 [1] : vector<16x32xf32> to vector<16xf32>
    %468 = vector.shape_cast %467 : vector<16xf32> to vector<16x1xf32>
    %cst_219 = arith.constant 3.200000e+01 : f32
    %469 = vector.broadcast %cst_219 : f32 to vector<16x1xf32>
    %470 = arith.divf %468, %469 : vector<16x1xf32>
    %471 = vector.broadcast %463 : vector<16x1xf32> to vector<16x32xf32>
    %472 = arith.subf %455, %471 : vector<16x32xf32>
    %cst_220 = arith.constant 9.99999974E-6 : f32
    %473 = vector.broadcast %cst_220 : f32 to vector<16x1xf32>
    %474 = arith.addf %470, %473 : vector<16x1xf32>
    %475 = math.rsqrt %474 : vector<16x1xf32>
    %476 = vector.broadcast %475 : vector<16x1xf32> to vector<16x32xf32>
    %477 = arith.mulf %472, %476 : vector<16x32xf32>
    %478 = vector.broadcast %457 : vector<1x32xf32> to vector<16x32xf32>
    %479 = arith.mulf %477, %478 : vector<16x32xf32>
    %480 = vector.broadcast %459 : vector<1x32xf32> to vector<16x32xf32>
    %481 = arith.addf %479, %480 : vector<16x32xf32>
    %c0_221 = arith.constant 0 : index
    %c0_222 = arith.constant 0 : index
    %482 = vector.load %arg5[%c0_221, %c0_222] : memref<32x15xf32, #tpu.memory_space<vmem>>, vector<32x15xf32>
    %cst_223 = arith.constant dense<0.000000e+00> : vector<16x15xf32>
    %483 = tpu.matmul %481, %482, %cst_223 {dimension_numbers = #tpu.dot_dimension_numbers<[1], [0], [0], [1], [0, 0, 1, 1], [], []>} : vector<16x32xf32>, vector<32x15xf32>, vector<16x15xf32> -> vector<16x15xf32>
    %c0_224 = arith.constant 0 : index
    %c0_225 = arith.constant 0 : index
    %484 = vector.load %arg6[%c0_224, %c0_225] : memref<1x15xf32, #tpu.memory_space<vmem>>, vector<1x15xf32>
    %485 = vector.broadcast %484 : vector<1x15xf32> to vector<16x15xf32>
    %486 = arith.addf %483, %485 : vector<16x15xf32>
    %c0_226 = arith.constant 0 : index
    %c0_227 = arith.constant 0 : index
    %487 = vector.load %arg51[%c0_226, %c0_227] : memref<16x15xf32, #tpu.memory_space<vmem>>, vector<16x15xf32>
    tpu.vector_store %arg51[%c0_226, %c0_227], %486 {strides = array<i32>} : memref<16x15xf32, #tpu.memory_space<vmem>>, vector<16x15xf32>,
    %c0_228 = arith.constant 0 : index
    %c0_229 = arith.constant 0 : index
    %488 = vector.load %arg19[%c0_228, %c0_229] : memref<27x32xf32, #tpu.memory_space<vmem>>, vector<27x32xf32>
    %489 = vector.extract_strided_slice %488 {offsets = [0, 0], sizes = [12, 32], strides = [1, 1]} : vector<27x32xf32> to vector<12x32xf32>
    %cst_230 = arith.constant dense<0.000000e+00> : vector<16x32xf32>
    %490 = tpu.matmul %0, %489, %cst_230 {dimension_numbers = #tpu.dot_dimension_numbers<[1], [0], [0], [1], [0, 0, 1, 1], [], []>} : vector<16x12xf32>, vector<12x32xf32>, vector<16x32xf32> -> vector<16x32xf32>
    %491 = vector.extract_strided_slice %488 {offsets = [12, 0], sizes = [15, 32], strides = [1, 1]} : vector<27x32xf32> to vector<15x32xf32>
    %cst_231 = arith.constant dense<0.000000e+00> : vector<16x32xf32>
    %492 = tpu.matmul %486, %491, %cst_231 {dimension_numbers = #tpu.dot_dimension_numbers<[1], [0], [0], [1], [0, 0, 1, 1], [], []>} : vector<16x15xf32>, vector<15x32xf32>, vector<16x32xf32> -> vector<16x32xf32>
    %493 = arith.addf %490, %492 : vector<16x32xf32>
    %c0_232 = arith.constant 0 : index
    %c0_233 = arith.constant 0 : index
    %494 = vector.load %arg20[%c0_232, %c0_233] : memref<1x32xf32, #tpu.memory_space<vmem>>, vector<1x32xf32>
    %495 = vector.broadcast %494 : vector<1x32xf32> to vector<16x32xf32>
    %496 = arith.addf %493, %495 : vector<16x32xf32>
    %497 = arith.addf %496, %1 : vector<16x32xf32>
    %c0_234 = arith.constant 0 : index
    %c0_235 = arith.constant 0 : index
    %c0_236 = arith.constant 0 : index
    %498 = vector.load %arg23[%c0_234, %c0_235, %c0_236] : memref<2x32x96xf32, #tpu.memory_space<vmem>>, vector<1x32x96xf32>
    %499 = vector.shape_cast %498 : vector<1x32x96xf32> to vector<32x96xf32>
    %cst_237 = arith.constant dense<0.000000e+00> : vector<16x96xf32>
    %500 = tpu.matmul %497, %499, %cst_237 {dimension_numbers = #tpu.dot_dimension_numbers<[1], [0], [0], [1], [0, 0, 1, 1], [], []>} : vector<16x32xf32>, vector<32x96xf32>, vector<16x96xf32> -> vector<16x96xf32>
    %c0_238 = arith.constant 0 : index
    %c0_239 = arith.constant 0 : index
    %c0_240 = arith.constant 0 : index
    %501 = vector.load %arg24[%c0_238, %c0_239, %c0_240] : memref<2x1x96xf32, #tpu.memory_space<vmem>>, vector<1x1x96xf32>
    %502 = vector.shape_cast %501 : vector<1x1x96xf32> to vector<1x96xf32>
    %503 = vector.broadcast %502 : vector<1x96xf32> to vector<16x96xf32>
    %504 = arith.addf %500, %503 : vector<16x96xf32>
    %505 = vector.extract_strided_slice %504 {offsets = [0, 0], sizes = [8, 8], strides = [1, 1]} : vector<16x96xf32> to vector<8x8xf32>
    %506 = vector.extract_strided_slice %504 {offsets = [0, 32], sizes = [8, 8], strides = [1, 1]} : vector<16x96xf32> to vector<8x8xf32>
    %507 = vector.extract_strided_slice %504 {offsets = [0, 64], sizes = [8, 8], strides = [1, 1]} : vector<16x96xf32> to vector<8x8xf32>
    %508 = tpu.transpose %506, [1, 0] : vector<8x8xf32> -> vector<8x8xf32>
    %cst_241 = arith.constant dense<0.000000e+00> : vector<8x8xf32>
    %509 = tpu.matmul %505, %508, %cst_241 {dimension_numbers = #tpu.dot_dimension_numbers<[1], [0], [0], [1], [0, 0, 1, 1], [], []>} : vector<8x8xf32>, vector<8x8xf32>, vector<8x8xf32> -> vector<8x8xf32>
    %cst_242 = arith.constant 0.353553385 : f32
    %510 = vector.broadcast %cst_242 : f32 to vector<8x8xf32>
    %511 = arith.mulf %509, %510 : vector<8x8xf32>
    %cst_243 = arith.constant dense<0xFF800000> : vector<8xf32>
    %512 = vector.multi_reduction <maximumf>, %511, %cst_243 [1] : vector<8x8xf32> to vector<8xf32>
    %513 = vector.shape_cast %512 : vector<8xf32> to vector<8x1xf32>
    %514 = vector.broadcast %513 : vector<8x1xf32> to vector<8x8xf32>
    %515 = arith.subf %511, %514 : vector<8x8xf32>
    %516 = math.exp %515 : vector<8x8xf32>
    %cst_244 = arith.constant dense<0.000000e+00> : vector<8xf32>
    %517 = vector.multi_reduction <add>, %516, %cst_244 [1] : vector<8x8xf32> to vector<8xf32>
    %518 = vector.shape_cast %517 : vector<8xf32> to vector<8x1xf32>
    %519 = tpu.reciprocal %518 {approx = true} : vector<8x1xf32> -> vector<8x1xf32>
    %520 = vector.broadcast %519 : vector<8x1xf32> to vector<8x8xf32>
    %521 = arith.mulf %516, %520 : vector<8x8xf32>
    %cst_245 = arith.constant dense<0.000000e+00> : vector<8x8xf32>
    %522 = tpu.matmul %521, %507, %cst_245 {dimension_numbers = #tpu.dot_dimension_numbers<[1], [0], [0], [1], [0, 0, 1, 1], [], []>} : vector<8x8xf32>, vector<8x8xf32>, vector<8x8xf32> -> vector<8x8xf32>
    %c0_246 = arith.constant 0 : index
    %c0_247 = arith.constant 0 : index
    %523 = vector.load %arg54[%c0_246, %c0_247] : memref<16x32xf32, #tpu.memory_space<vmem>>, vector<8x8xf32>
    tpu.vector_store %arg54[%c0_246, %c0_247], %522 {strides = array<i32>} : memref<16x32xf32, #tpu.memory_space<vmem>>, vector<8x8xf32>,
    %524 = vector.extract_strided_slice %504 {offsets = [0, 8], sizes = [8, 8], strides = [1, 1]} : vector<16x96xf32> to vector<8x8xf32>
    %525 = vector.extract_strided_slice %504 {offsets = [0, 40], sizes = [8, 8], strides = [1, 1]} : vector<16x96xf32> to vector<8x8xf32>
    %526 = vector.extract_strided_slice %504 {offsets = [0, 72], sizes = [8, 8], strides = [1, 1]} : vector<16x96xf32> to vector<8x8xf32>
    %527 = tpu.transpose %525, [1, 0] : vector<8x8xf32> -> vector<8x8xf32>
    %cst_248 = arith.constant dense<0.000000e+00> : vector<8x8xf32>
    %528 = tpu.matmul %524, %527, %cst_248 {dimension_numbers = #tpu.dot_dimension_numbers<[1], [0], [0], [1], [0, 0, 1, 1], [], []>} : vector<8x8xf32>, vector<8x8xf32>, vector<8x8xf32> -> vector<8x8xf32>
    %cst_249 = arith.constant 0.353553385 : f32
    %529 = vector.broadcast %cst_249 : f32 to vector<8x8xf32>
    %530 = arith.mulf %528, %529 : vector<8x8xf32>
    %cst_250 = arith.constant dense<0xFF800000> : vector<8xf32>
    %531 = vector.multi_reduction <maximumf>, %530, %cst_250 [1] : vector<8x8xf32> to vector<8xf32>
    %532 = vector.shape_cast %531 : vector<8xf32> to vector<8x1xf32>
    %533 = vector.broadcast %532 : vector<8x1xf32> to vector<8x8xf32>
    %534 = arith.subf %530, %533 : vector<8x8xf32>
    %535 = math.exp %534 : vector<8x8xf32>
    %cst_251 = arith.constant dense<0.000000e+00> : vector<8xf32>
    %536 = vector.multi_reduction <add>, %535, %cst_251 [1] : vector<8x8xf32> to vector<8xf32>
    %537 = vector.shape_cast %536 : vector<8xf32> to vector<8x1xf32>
    %538 = tpu.reciprocal %537 {approx = true} : vector<8x1xf32> -> vector<8x1xf32>
    %539 = vector.broadcast %538 : vector<8x1xf32> to vector<8x8xf32>
    %540 = arith.mulf %535, %539 : vector<8x8xf32>
    %cst_252 = arith.constant dense<0.000000e+00> : vector<8x8xf32>
    %541 = tpu.matmul %540, %526, %cst_252 {dimension_numbers = #tpu.dot_dimension_numbers<[1], [0], [0], [1], [0, 0, 1, 1], [], []>} : vector<8x8xf32>, vector<8x8xf32>, vector<8x8xf32> -> vector<8x8xf32>
    %c0_253 = arith.constant 0 : index
    %c8_254 = arith.constant 8 : index
    %542 = vector.load %arg54[%c0_253, %c8_254] : memref<16x32xf32, #tpu.memory_space<vmem>>, vector<8x8xf32>
    tpu.vector_store %arg54[%c0_253, %c8_254], %541 {strides = array<i32>} : memref<16x32xf32, #tpu.memory_space<vmem>>, vector<8x8xf32>,
    %543 = vector.extract_strided_slice %504 {offsets = [0, 16], sizes = [8, 8], strides = [1, 1]} : vector<16x96xf32> to vector<8x8xf32>
    %544 = vector.extract_strided_slice %504 {offsets = [0, 48], sizes = [8, 8], strides = [1, 1]} : vector<16x96xf32> to vector<8x8xf32>
    %545 = vector.extract_strided_slice %504 {offsets = [0, 80], sizes = [8, 8], strides = [1, 1]} : vector<16x96xf32> to vector<8x8xf32>
    %546 = tpu.transpose %544, [1, 0] : vector<8x8xf32> -> vector<8x8xf32>
    %cst_255 = arith.constant dense<0.000000e+00> : vector<8x8xf32>
    %547 = tpu.matmul %543, %546, %cst_255 {dimension_numbers = #tpu.dot_dimension_numbers<[1], [0], [0], [1], [0, 0, 1, 1], [], []>} : vector<8x8xf32>, vector<8x8xf32>, vector<8x8xf32> -> vector<8x8xf32>
    %cst_256 = arith.constant 0.353553385 : f32
    %548 = vector.broadcast %cst_256 : f32 to vector<8x8xf32>
    %549 = arith.mulf %547, %548 : vector<8x8xf32>
    %cst_257 = arith.constant dense<0xFF800000> : vector<8xf32>
    %550 = vector.multi_reduction <maximumf>, %549, %cst_257 [1] : vector<8x8xf32> to vector<8xf32>
    %551 = vector.shape_cast %550 : vector<8xf32> to vector<8x1xf32>
    %552 = vector.broadcast %551 : vector<8x1xf32> to vector<8x8xf32>
    %553 = arith.subf %549, %552 : vector<8x8xf32>
    %554 = math.exp %553 : vector<8x8xf32>
    %cst_258 = arith.constant dense<0.000000e+00> : vector<8xf32>
    %555 = vector.multi_reduction <add>, %554, %cst_258 [1] : vector<8x8xf32> to vector<8xf32>
    %556 = vector.shape_cast %555 : vector<8xf32> to vector<8x1xf32>
    %557 = tpu.reciprocal %556 {approx = true} : vector<8x1xf32> -> vector<8x1xf32>
    %558 = vector.broadcast %557 : vector<8x1xf32> to vector<8x8xf32>
    %559 = arith.mulf %554, %558 : vector<8x8xf32>
    %cst_259 = arith.constant dense<0.000000e+00> : vector<8x8xf32>
    %560 = tpu.matmul %559, %545, %cst_259 {dimension_numbers = #tpu.dot_dimension_numbers<[1], [0], [0], [1], [0, 0, 1, 1], [], []>} : vector<8x8xf32>, vector<8x8xf32>, vector<8x8xf32> -> vector<8x8xf32>
    %c0_260 = arith.constant 0 : index
    %c16_261 = arith.constant 16 : index
    %561 = vector.load %arg54[%c0_260, %c16_261] : memref<16x32xf32, #tpu.memory_space<vmem>>, vector<8x8xf32>
    tpu.vector_store %arg54[%c0_260, %c16_261], %560 {strides = array<i32>} : memref<16x32xf32, #tpu.memory_space<vmem>>, vector<8x8xf32>,
    %562 = vector.extract_strided_slice %504 {offsets = [0, 24], sizes = [8, 8], strides = [1, 1]} : vector<16x96xf32> to vector<8x8xf32>
    %563 = vector.extract_strided_slice %504 {offsets = [0, 56], sizes = [8, 8], strides = [1, 1]} : vector<16x96xf32> to vector<8x8xf32>
    %564 = vector.extract_strided_slice %504 {offsets = [0, 88], sizes = [8, 8], strides = [1, 1]} : vector<16x96xf32> to vector<8x8xf32>
    %565 = tpu.transpose %563, [1, 0] : vector<8x8xf32> -> vector<8x8xf32>
    %cst_262 = arith.constant dense<0.000000e+00> : vector<8x8xf32>
    %566 = tpu.matmul %562, %565, %cst_262 {dimension_numbers = #tpu.dot_dimension_numbers<[1], [0], [0], [1], [0, 0, 1, 1], [], []>} : vector<8x8xf32>, vector<8x8xf32>, vector<8x8xf32> -> vector<8x8xf32>
    %cst_263 = arith.constant 0.353553385 : f32
    %567 = vector.broadcast %cst_263 : f32 to vector<8x8xf32>
    %568 = arith.mulf %566, %567 : vector<8x8xf32>
    %cst_264 = arith.constant dense<0xFF800000> : vector<8xf32>
    %569 = vector.multi_reduction <maximumf>, %568, %cst_264 [1] : vector<8x8xf32> to vector<8xf32>
    %570 = vector.shape_cast %569 : vector<8xf32> to vector<8x1xf32>
    %571 = vector.broadcast %570 : vector<8x1xf32> to vector<8x8xf32>
    %572 = arith.subf %568, %571 : vector<8x8xf32>
    %573 = math.exp %572 : vector<8x8xf32>
    %cst_265 = arith.constant dense<0.000000e+00> : vector<8xf32>
    %574 = vector.multi_reduction <add>, %573, %cst_265 [1] : vector<8x8xf32> to vector<8xf32>
    %575 = vector.shape_cast %574 : vector<8xf32> to vector<8x1xf32>
    %576 = tpu.reciprocal %575 {approx = true} : vector<8x1xf32> -> vector<8x1xf32>
    %577 = vector.broadcast %576 : vector<8x1xf32> to vector<8x8xf32>
    %578 = arith.mulf %573, %577 : vector<8x8xf32>
    %cst_266 = arith.constant dense<0.000000e+00> : vector<8x8xf32>
    %579 = tpu.matmul %578, %564, %cst_266 {dimension_numbers = #tpu.dot_dimension_numbers<[1], [0], [0], [1], [0, 0, 1, 1], [], []>} : vector<8x8xf32>, vector<8x8xf32>, vector<8x8xf32> -> vector<8x8xf32>
    %c0_267 = arith.constant 0 : index
    %c24_268 = arith.constant 24 : index
    %580 = vector.load %arg54[%c0_267, %c24_268] : memref<16x32xf32, #tpu.memory_space<vmem>>, vector<8x8xf32>
    tpu.vector_store %arg54[%c0_267, %c24_268], %579 {strides = array<i32>} : memref<16x32xf32, #tpu.memory_space<vmem>>, vector<8x8xf32>,
    %581 = vector.extract_strided_slice %504 {offsets = [8, 0], sizes = [8, 8], strides = [1, 1]} : vector<16x96xf32> to vector<8x8xf32>
    %582 = vector.extract_strided_slice %504 {offsets = [8, 32], sizes = [8, 8], strides = [1, 1]} : vector<16x96xf32> to vector<8x8xf32>
    %583 = vector.extract_strided_slice %504 {offsets = [8, 64], sizes = [8, 8], strides = [1, 1]} : vector<16x96xf32> to vector<8x8xf32>
    %584 = tpu.transpose %582, [1, 0] : vector<8x8xf32> -> vector<8x8xf32>
    %cst_269 = arith.constant dense<0.000000e+00> : vector<8x8xf32>
    %585 = tpu.matmul %581, %584, %cst_269 {dimension_numbers = #tpu.dot_dimension_numbers<[1], [0], [0], [1], [0, 0, 1, 1], [], []>} : vector<8x8xf32>, vector<8x8xf32>, vector<8x8xf32> -> vector<8x8xf32>
    %cst_270 = arith.constant 0.353553385 : f32
    %586 = vector.broadcast %cst_270 : f32 to vector<8x8xf32>
    %587 = arith.mulf %585, %586 : vector<8x8xf32>
    %cst_271 = arith.constant dense<0xFF800000> : vector<8xf32>
    %588 = vector.multi_reduction <maximumf>, %587, %cst_271 [1] : vector<8x8xf32> to vector<8xf32>
    %589 = vector.shape_cast %588 : vector<8xf32> to vector<8x1xf32>
    %590 = vector.broadcast %589 : vector<8x1xf32> to vector<8x8xf32>
    %591 = arith.subf %587, %590 : vector<8x8xf32>
    %592 = math.exp %591 : vector<8x8xf32>
    %cst_272 = arith.constant dense<0.000000e+00> : vector<8xf32>
    %593 = vector.multi_reduction <add>, %592, %cst_272 [1] : vector<8x8xf32> to vector<8xf32>
    %594 = vector.shape_cast %593 : vector<8xf32> to vector<8x1xf32>
    %595 = tpu.reciprocal %594 {approx = true} : vector<8x1xf32> -> vector<8x1xf32>
    %596 = vector.broadcast %595 : vector<8x1xf32> to vector<8x8xf32>
    %597 = arith.mulf %592, %596 : vector<8x8xf32>
    %cst_273 = arith.constant dense<0.000000e+00> : vector<8x8xf32>
    %598 = tpu.matmul %597, %583, %cst_273 {dimension_numbers = #tpu.dot_dimension_numbers<[1], [0], [0], [1], [0, 0, 1, 1], [], []>} : vector<8x8xf32>, vector<8x8xf32>, vector<8x8xf32> -> vector<8x8xf32>
    %c8_274 = arith.constant 8 : index
    %c0_275 = arith.constant 0 : index
    %599 = vector.load %arg54[%c8_274, %c0_275] : memref<16x32xf32, #tpu.memory_space<vmem>>, vector<8x8xf32>
    tpu.vector_store %arg54[%c8_274, %c0_275], %598 {strides = array<i32>} : memref<16x32xf32, #tpu.memory_space<vmem>>, vector<8x8xf32>,
    %600 = vector.extract_strided_slice %504 {offsets = [8, 8], sizes = [8, 8], strides = [1, 1]} : vector<16x96xf32> to vector<8x8xf32>
    %601 = vector.extract_strided_slice %504 {offsets = [8, 40], sizes = [8, 8], strides = [1, 1]} : vector<16x96xf32> to vector<8x8xf32>
    %602 = vector.extract_strided_slice %504 {offsets = [8, 72], sizes = [8, 8], strides = [1, 1]} : vector<16x96xf32> to vector<8x8xf32>
    %603 = tpu.transpose %601, [1, 0] : vector<8x8xf32> -> vector<8x8xf32>
    %cst_276 = arith.constant dense<0.000000e+00> : vector<8x8xf32>
    %604 = tpu.matmul %600, %603, %cst_276 {dimension_numbers = #tpu.dot_dimension_numbers<[1], [0], [0], [1], [0, 0, 1, 1], [], []>} : vector<8x8xf32>, vector<8x8xf32>, vector<8x8xf32> -> vector<8x8xf32>
    %cst_277 = arith.constant 0.353553385 : f32
    %605 = vector.broadcast %cst_277 : f32 to vector<8x8xf32>
    %606 = arith.mulf %604, %605 : vector<8x8xf32>
    %cst_278 = arith.constant dense<0xFF800000> : vector<8xf32>
    %607 = vector.multi_reduction <maximumf>, %606, %cst_278 [1] : vector<8x8xf32> to vector<8xf32>
    %608 = vector.shape_cast %607 : vector<8xf32> to vector<8x1xf32>
    %609 = vector.broadcast %608 : vector<8x1xf32> to vector<8x8xf32>
    %610 = arith.subf %606, %609 : vector<8x8xf32>
    %611 = math.exp %610 : vector<8x8xf32>
    %cst_279 = arith.constant dense<0.000000e+00> : vector<8xf32>
    %612 = vector.multi_reduction <add>, %611, %cst_279 [1] : vector<8x8xf32> to vector<8xf32>
    %613 = vector.shape_cast %612 : vector<8xf32> to vector<8x1xf32>
    %614 = tpu.reciprocal %613 {approx = true} : vector<8x1xf32> -> vector<8x1xf32>
    %615 = vector.broadcast %614 : vector<8x1xf32> to vector<8x8xf32>
    %616 = arith.mulf %611, %615 : vector<8x8xf32>
    %cst_280 = arith.constant dense<0.000000e+00> : vector<8x8xf32>
    %617 = tpu.matmul %616, %602, %cst_280 {dimension_numbers = #tpu.dot_dimension_numbers<[1], [0], [0], [1], [0, 0, 1, 1], [], []>} : vector<8x8xf32>, vector<8x8xf32>, vector<8x8xf32> -> vector<8x8xf32>
    %c8_281 = arith.constant 8 : index
    %c8_282 = arith.constant 8 : index
    %618 = vector.load %arg54[%c8_281, %c8_282] : memref<16x32xf32, #tpu.memory_space<vmem>>, vector<8x8xf32>
    tpu.vector_store %arg54[%c8_281, %c8_282], %617 {strides = array<i32>} : memref<16x32xf32, #tpu.memory_space<vmem>>, vector<8x8xf32>,
    %619 = vector.extract_strided_slice %504 {offsets = [8, 16], sizes = [8, 8], strides = [1, 1]} : vector<16x96xf32> to vector<8x8xf32>
    %620 = vector.extract_strided_slice %504 {offsets = [8, 48], sizes = [8, 8], strides = [1, 1]} : vector<16x96xf32> to vector<8x8xf32>
    %621 = vector.extract_strided_slice %504 {offsets = [8, 80], sizes = [8, 8], strides = [1, 1]} : vector<16x96xf32> to vector<8x8xf32>
    %622 = tpu.transpose %620, [1, 0] : vector<8x8xf32> -> vector<8x8xf32>
    %cst_283 = arith.constant dense<0.000000e+00> : vector<8x8xf32>
    %623 = tpu.matmul %619, %622, %cst_283 {dimension_numbers = #tpu.dot_dimension_numbers<[1], [0], [0], [1], [0, 0, 1, 1], [], []>} : vector<8x8xf32>, vector<8x8xf32>, vector<8x8xf32> -> vector<8x8xf32>
    %cst_284 = arith.constant 0.353553385 : f32
    %624 = vector.broadcast %cst_284 : f32 to vector<8x8xf32>
    %625 = arith.mulf %623, %624 : vector<8x8xf32>
    %cst_285 = arith.constant dense<0xFF800000> : vector<8xf32>
    %626 = vector.multi_reduction <maximumf>, %625, %cst_285 [1] : vector<8x8xf32> to vector<8xf32>
    %627 = vector.shape_cast %626 : vector<8xf32> to vector<8x1xf32>
    %628 = vector.broadcast %627 : vector<8x1xf32> to vector<8x8xf32>
    %629 = arith.subf %625, %628 : vector<8x8xf32>
    %630 = math.exp %629 : vector<8x8xf32>
    %cst_286 = arith.constant dense<0.000000e+00> : vector<8xf32>
    %631 = vector.multi_reduction <add>, %630, %cst_286 [1] : vector<8x8xf32> to vector<8xf32>
    %632 = vector.shape_cast %631 : vector<8xf32> to vector<8x1xf32>
    %633 = tpu.reciprocal %632 {approx = true} : vector<8x1xf32> -> vector<8x1xf32>
    %634 = vector.broadcast %633 : vector<8x1xf32> to vector<8x8xf32>
    %635 = arith.mulf %630, %634 : vector<8x8xf32>
    %cst_287 = arith.constant dense<0.000000e+00> : vector<8x8xf32>
    %636 = tpu.matmul %635, %621, %cst_287 {dimension_numbers = #tpu.dot_dimension_numbers<[1], [0], [0], [1], [0, 0, 1, 1], [], []>} : vector<8x8xf32>, vector<8x8xf32>, vector<8x8xf32> -> vector<8x8xf32>
    %c8_288 = arith.constant 8 : index
    %c16_289 = arith.constant 16 : index
    %637 = vector.load %arg54[%c8_288, %c16_289] : memref<16x32xf32, #tpu.memory_space<vmem>>, vector<8x8xf32>
    tpu.vector_store %arg54[%c8_288, %c16_289], %636 {strides = array<i32>} : memref<16x32xf32, #tpu.memory_space<vmem>>, vector<8x8xf32>,
    %638 = vector.extract_strided_slice %504 {offsets = [8, 24], sizes = [8, 8], strides = [1, 1]} : vector<16x96xf32> to vector<8x8xf32>
    %639 = vector.extract_strided_slice %504 {offsets = [8, 56], sizes = [8, 8], strides = [1, 1]} : vector<16x96xf32> to vector<8x8xf32>
    %640 = vector.extract_strided_slice %504 {offsets = [8, 88], sizes = [8, 8], strides = [1, 1]} : vector<16x96xf32> to vector<8x8xf32>
    %641 = tpu.transpose %639, [1, 0] : vector<8x8xf32> -> vector<8x8xf32>
    %cst_290 = arith.constant dense<0.000000e+00> : vector<8x8xf32>
    %642 = tpu.matmul %638, %641, %cst_290 {dimension_numbers = #tpu.dot_dimension_numbers<[1], [0], [0], [1], [0, 0, 1, 1], [], []>} : vector<8x8xf32>, vector<8x8xf32>, vector<8x8xf32> -> vector<8x8xf32>
    %cst_291 = arith.constant 0.353553385 : f32
    %643 = vector.broadcast %cst_291 : f32 to vector<8x8xf32>
    %644 = arith.mulf %642, %643 : vector<8x8xf32>
    %cst_292 = arith.constant dense<0xFF800000> : vector<8xf32>
    %645 = vector.multi_reduction <maximumf>, %644, %cst_292 [1] : vector<8x8xf32> to vector<8xf32>
    %646 = vector.shape_cast %645 : vector<8xf32> to vector<8x1xf32>
    %647 = vector.broadcast %646 : vector<8x1xf32> to vector<8x8xf32>
    %648 = arith.subf %644, %647 : vector<8x8xf32>
    %649 = math.exp %648 : vector<8x8xf32>
    %cst_293 = arith.constant dense<0.000000e+00> : vector<8xf32>
    %650 = vector.multi_reduction <add>, %649, %cst_293 [1] : vector<8x8xf32> to vector<8xf32>
    %651 = vector.shape_cast %650 : vector<8xf32> to vector<8x1xf32>
    %652 = tpu.reciprocal %651 {approx = true} : vector<8x1xf32> -> vector<8x1xf32>
    %653 = vector.broadcast %652 : vector<8x1xf32> to vector<8x8xf32>
    %654 = arith.mulf %649, %653 : vector<8x8xf32>
    %cst_294 = arith.constant dense<0.000000e+00> : vector<8x8xf32>
    %655 = tpu.matmul %654, %640, %cst_294 {dimension_numbers = #tpu.dot_dimension_numbers<[1], [0], [0], [1], [0, 0, 1, 1], [], []>} : vector<8x8xf32>, vector<8x8xf32>, vector<8x8xf32> -> vector<8x8xf32>
    %c8_295 = arith.constant 8 : index
    %c24_296 = arith.constant 24 : index
    %656 = vector.load %arg54[%c8_295, %c24_296] : memref<16x32xf32, #tpu.memory_space<vmem>>, vector<8x8xf32>
    tpu.vector_store %arg54[%c8_295, %c24_296], %655 {strides = array<i32>} : memref<16x32xf32, #tpu.memory_space<vmem>>, vector<8x8xf32>,
    %c0_297 = arith.constant 0 : index
    %c0_298 = arith.constant 0 : index
    %657 = vector.load %arg54[%c0_297, %c0_298] : memref<16x32xf32, #tpu.memory_space<vmem>>, vector<16x32xf32>
    %c0_299 = arith.constant 0 : index
    %c0_300 = arith.constant 0 : index
    %c0_301 = arith.constant 0 : index
    %658 = vector.load %arg25[%c0_299, %c0_300, %c0_301] : memref<2x32x32xf32, #tpu.memory_space<vmem>>, vector<1x32x32xf32>
    %659 = vector.shape_cast %658 : vector<1x32x32xf32> to vector<32x32xf32>
    %cst_302 = arith.constant dense<0.000000e+00> : vector<16x32xf32>
    %660 = tpu.matmul %657, %659, %cst_302 {dimension_numbers = #tpu.dot_dimension_numbers<[1], [0], [0], [1], [0, 0, 1, 1], [], []>} : vector<16x32xf32>, vector<32x32xf32>, vector<16x32xf32> -> vector<16x32xf32>
    %c0_303 = arith.constant 0 : index
    %c0_304 = arith.constant 0 : index
    %c0_305 = arith.constant 0 : index
    %661 = vector.load %arg26[%c0_303, %c0_304, %c0_305] : memref<2x1x32xf32, #tpu.memory_space<vmem>>, vector<1x1x32xf32>
    %662 = vector.shape_cast %661 : vector<1x1x32xf32> to vector<1x32xf32>
    %663 = vector.broadcast %662 : vector<1x32xf32> to vector<16x32xf32>
    %664 = arith.addf %660, %663 : vector<16x32xf32>
    %665 = arith.addf %497, %664 : vector<16x32xf32>
    %c0_306 = arith.constant 0 : index
    %c0_307 = arith.constant 0 : index
    %c0_308 = arith.constant 0 : index
    %666 = vector.load %arg27[%c0_306, %c0_307, %c0_308] : memref<2x1x32xf32, #tpu.memory_space<vmem>>, vector<1x1x32xf32>
    %667 = vector.shape_cast %666 : vector<1x1x32xf32> to vector<1x32xf32>
    %c0_309 = arith.constant 0 : index
    %c0_310 = arith.constant 0 : index
    %c0_311 = arith.constant 0 : index
    %668 = vector.load %arg28[%c0_309, %c0_310, %c0_311] : memref<2x1x32xf32, #tpu.memory_space<vmem>>, vector<1x1x32xf32>
    %669 = vector.shape_cast %668 : vector<1x1x32xf32> to vector<1x32xf32>
    %cst_312 = arith.constant dense<0.000000e+00> : vector<16xf32>
    %670 = vector.multi_reduction <add>, %665, %cst_312 [1] : vector<16x32xf32> to vector<16xf32>
    %671 = vector.shape_cast %670 : vector<16xf32> to vector<16x1xf32>
    %cst_313 = arith.constant 3.200000e+01 : f32
    %672 = vector.broadcast %cst_313 : f32 to vector<16x1xf32>
    %673 = arith.divf %671, %672 : vector<16x1xf32>
    %674 = vector.broadcast %673 : vector<16x1xf32> to vector<16x32xf32>
    %675 = arith.subf %665, %674 : vector<16x32xf32>
    %676 = arith.mulf %675, %675 : vector<16x32xf32>
    %cst_314 = arith.constant dense<0.000000e+00> : vector<16xf32>
    %677 = vector.multi_reduction <add>, %676, %cst_314 [1] : vector<16x32xf32> to vector<16xf32>
    %678 = vector.shape_cast %677 : vector<16xf32> to vector<16x1xf32>
    %cst_315 = arith.constant 3.200000e+01 : f32
    %679 = vector.broadcast %cst_315 : f32 to vector<16x1xf32>
    %680 = arith.divf %678, %679 : vector<16x1xf32>
    %681 = vector.broadcast %673 : vector<16x1xf32> to vector<16x32xf32>
    %682 = arith.subf %665, %681 : vector<16x32xf32>
    %cst_316 = arith.constant 9.99999974E-6 : f32
    %683 = vector.broadcast %cst_316 : f32 to vector<16x1xf32>
    %684 = arith.addf %680, %683 : vector<16x1xf32>
    %685 = math.rsqrt %684 : vector<16x1xf32>
    %686 = vector.broadcast %685 : vector<16x1xf32> to vector<16x32xf32>
    %687 = arith.mulf %682, %686 : vector<16x32xf32>
    %688 = vector.broadcast %667 : vector<1x32xf32> to vector<16x32xf32>
    %689 = arith.mulf %687, %688 : vector<16x32xf32>
    %690 = vector.broadcast %669 : vector<1x32xf32> to vector<16x32xf32>
    %691 = arith.addf %689, %690 : vector<16x32xf32>
    %c0_317 = arith.constant 0 : index
    %c0_318 = arith.constant 0 : index
    %c0_319 = arith.constant 0 : index
    %692 = vector.load %arg29[%c0_317, %c0_318, %c0_319] : memref<2x32x64xf32, #tpu.memory_space<vmem>>, vector<1x32x64xf32>
    %693 = vector.shape_cast %692 : vector<1x32x64xf32> to vector<32x64xf32>
    %cst_320 = arith.constant dense<0.000000e+00> : vector<16x64xf32>
    %694 = tpu.matmul %691, %693, %cst_320 {dimension_numbers = #tpu.dot_dimension_numbers<[1], [0], [0], [1], [0, 0, 1, 1], [], []>} : vector<16x32xf32>, vector<32x64xf32>, vector<16x64xf32> -> vector<16x64xf32>
    %c0_321 = arith.constant 0 : index
    %c0_322 = arith.constant 0 : index
    %c0_323 = arith.constant 0 : index
    %695 = vector.load %arg30[%c0_321, %c0_322, %c0_323] : memref<2x1x64xf32, #tpu.memory_space<vmem>>, vector<1x1x64xf32>
    %696 = vector.shape_cast %695 : vector<1x1x64xf32> to vector<1x64xf32>
    %697 = vector.broadcast %696 : vector<1x64xf32> to vector<16x64xf32>
    %698 = arith.addf %694, %697 : vector<16x64xf32>
    %cst_324 = arith.constant 0.000000e+00 : f32
    %699 = vector.broadcast %cst_324 : f32 to vector<16x64xf32>
    %700 = arith.maximumf %698, %699 : vector<16x64xf32>
    %c0_325 = arith.constant 0 : index
    %c0_326 = arith.constant 0 : index
    %c0_327 = arith.constant 0 : index
    %701 = vector.load %arg31[%c0_325, %c0_326, %c0_327] : memref<2x64x32xf32, #tpu.memory_space<vmem>>, vector<1x64x32xf32>
    %702 = vector.shape_cast %701 : vector<1x64x32xf32> to vector<64x32xf32>
    %cst_328 = arith.constant dense<0.000000e+00> : vector<16x32xf32>
    %703 = tpu.matmul %700, %702, %cst_328 {dimension_numbers = #tpu.dot_dimension_numbers<[1], [0], [0], [1], [0, 0, 1, 1], [], []>} : vector<16x64xf32>, vector<64x32xf32>, vector<16x32xf32> -> vector<16x32xf32>
    %c0_329 = arith.constant 0 : index
    %c0_330 = arith.constant 0 : index
    %c0_331 = arith.constant 0 : index
    %704 = vector.load %arg32[%c0_329, %c0_330, %c0_331] : memref<2x1x32xf32, #tpu.memory_space<vmem>>, vector<1x1x32xf32>
    %705 = vector.shape_cast %704 : vector<1x1x32xf32> to vector<1x32xf32>
    %706 = vector.broadcast %705 : vector<1x32xf32> to vector<16x32xf32>
    %707 = arith.addf %703, %706 : vector<16x32xf32>
    %708 = arith.addf %691, %707 : vector<16x32xf32>
    %c0_332 = arith.constant 0 : index
    %c0_333 = arith.constant 0 : index
    %c0_334 = arith.constant 0 : index
    %709 = vector.load %arg33[%c0_332, %c0_333, %c0_334] : memref<2x1x32xf32, #tpu.memory_space<vmem>>, vector<1x1x32xf32>
    %710 = vector.shape_cast %709 : vector<1x1x32xf32> to vector<1x32xf32>
    %c0_335 = arith.constant 0 : index
    %c0_336 = arith.constant 0 : index
    %c0_337 = arith.constant 0 : index
    %711 = vector.load %arg34[%c0_335, %c0_336, %c0_337] : memref<2x1x32xf32, #tpu.memory_space<vmem>>, vector<1x1x32xf32>
    %712 = vector.shape_cast %711 : vector<1x1x32xf32> to vector<1x32xf32>
    %cst_338 = arith.constant dense<0.000000e+00> : vector<16xf32>
    %713 = vector.multi_reduction <add>, %708, %cst_338 [1] : vector<16x32xf32> to vector<16xf32>
    %714 = vector.shape_cast %713 : vector<16xf32> to vector<16x1xf32>
    %cst_339 = arith.constant 3.200000e+01 : f32
    %715 = vector.broadcast %cst_339 : f32 to vector<16x1xf32>
    %716 = arith.divf %714, %715 : vector<16x1xf32>
    %717 = vector.broadcast %716 : vector<16x1xf32> to vector<16x32xf32>
    %718 = arith.subf %708, %717 : vector<16x32xf32>
    %719 = arith.mulf %718, %718 : vector<16x32xf32>
    %cst_340 = arith.constant dense<0.000000e+00> : vector<16xf32>
    %720 = vector.multi_reduction <add>, %719, %cst_340 [1] : vector<16x32xf32> to vector<16xf32>
    %721 = vector.shape_cast %720 : vector<16xf32> to vector<16x1xf32>
    %cst_341 = arith.constant 3.200000e+01 : f32
    %722 = vector.broadcast %cst_341 : f32 to vector<16x1xf32>
    %723 = arith.divf %721, %722 : vector<16x1xf32>
    %724 = vector.broadcast %716 : vector<16x1xf32> to vector<16x32xf32>
    %725 = arith.subf %708, %724 : vector<16x32xf32>
    %cst_342 = arith.constant 9.99999974E-6 : f32
    %726 = vector.broadcast %cst_342 : f32 to vector<16x1xf32>
    %727 = arith.addf %723, %726 : vector<16x1xf32>
    %728 = math.rsqrt %727 : vector<16x1xf32>
    %729 = vector.broadcast %728 : vector<16x1xf32> to vector<16x32xf32>
    %730 = arith.mulf %725, %729 : vector<16x32xf32>
    %731 = vector.broadcast %710 : vector<1x32xf32> to vector<16x32xf32>
    %732 = arith.mulf %730, %731 : vector<16x32xf32>
    %733 = vector.broadcast %712 : vector<1x32xf32> to vector<16x32xf32>
    %734 = arith.addf %732, %733 : vector<16x32xf32>
    %c1_343 = arith.constant 1 : index
    %c0_344 = arith.constant 0 : index
    %c0_345 = arith.constant 0 : index
    %735 = vector.load %arg23[%c1_343, %c0_344, %c0_345] : memref<2x32x96xf32, #tpu.memory_space<vmem>>, vector<1x32x96xf32>
    %736 = vector.shape_cast %735 : vector<1x32x96xf32> to vector<32x96xf32>
    %cst_346 = arith.constant dense<0.000000e+00> : vector<16x96xf32>
    %737 = tpu.matmul %734, %736, %cst_346 {dimension_numbers = #tpu.dot_dimension_numbers<[1], [0], [0], [1], [0, 0, 1, 1], [], []>} : vector<16x32xf32>, vector<32x96xf32>, vector<16x96xf32> -> vector<16x96xf32>
    %c1_347 = arith.constant 1 : index
    %c0_348 = arith.constant 0 : index
    %c0_349 = arith.constant 0 : index
    %738 = vector.load %arg24[%c1_347, %c0_348, %c0_349] : memref<2x1x96xf32, #tpu.memory_space<vmem>>, vector<1x1x96xf32>
    %739 = vector.shape_cast %738 : vector<1x1x96xf32> to vector<1x96xf32>
    %740 = vector.broadcast %739 : vector<1x96xf32> to vector<16x96xf32>
    %741 = arith.addf %737, %740 : vector<16x96xf32>
    %742 = vector.extract_strided_slice %741 {offsets = [0, 0], sizes = [8, 8], strides = [1, 1]} : vector<16x96xf32> to vector<8x8xf32>
    %743 = vector.extract_strided_slice %741 {offsets = [0, 32], sizes = [8, 8], strides = [1, 1]} : vector<16x96xf32> to vector<8x8xf32>
    %744 = vector.extract_strided_slice %741 {offsets = [0, 64], sizes = [8, 8], strides = [1, 1]} : vector<16x96xf32> to vector<8x8xf32>
    %745 = tpu.transpose %743, [1, 0] : vector<8x8xf32> -> vector<8x8xf32>
    %cst_350 = arith.constant dense<0.000000e+00> : vector<8x8xf32>
    %746 = tpu.matmul %742, %745, %cst_350 {dimension_numbers = #tpu.dot_dimension_numbers<[1], [0], [0], [1], [0, 0, 1, 1], [], []>} : vector<8x8xf32>, vector<8x8xf32>, vector<8x8xf32> -> vector<8x8xf32>
    %cst_351 = arith.constant 0.353553385 : f32
    %747 = vector.broadcast %cst_351 : f32 to vector<8x8xf32>
    %748 = arith.mulf %746, %747 : vector<8x8xf32>
    %cst_352 = arith.constant dense<0xFF800000> : vector<8xf32>
    %749 = vector.multi_reduction <maximumf>, %748, %cst_352 [1] : vector<8x8xf32> to vector<8xf32>
    %750 = vector.shape_cast %749 : vector<8xf32> to vector<8x1xf32>
    %751 = vector.broadcast %750 : vector<8x1xf32> to vector<8x8xf32>
    %752 = arith.subf %748, %751 : vector<8x8xf32>
    %753 = math.exp %752 : vector<8x8xf32>
    %cst_353 = arith.constant dense<0.000000e+00> : vector<8xf32>
    %754 = vector.multi_reduction <add>, %753, %cst_353 [1] : vector<8x8xf32> to vector<8xf32>
    %755 = vector.shape_cast %754 : vector<8xf32> to vector<8x1xf32>
    %756 = tpu.reciprocal %755 {approx = true} : vector<8x1xf32> -> vector<8x1xf32>
    %757 = vector.broadcast %756 : vector<8x1xf32> to vector<8x8xf32>
    %758 = arith.mulf %753, %757 : vector<8x8xf32>
    %cst_354 = arith.constant dense<0.000000e+00> : vector<8x8xf32>
    %759 = tpu.matmul %758, %744, %cst_354 {dimension_numbers = #tpu.dot_dimension_numbers<[1], [0], [0], [1], [0, 0, 1, 1], [], []>} : vector<8x8xf32>, vector<8x8xf32>, vector<8x8xf32> -> vector<8x8xf32>
    %c0_355 = arith.constant 0 : index
    %c0_356 = arith.constant 0 : index
    %760 = vector.load %arg54[%c0_355, %c0_356] : memref<16x32xf32, #tpu.memory_space<vmem>>, vector<8x8xf32>
    tpu.vector_store %arg54[%c0_355, %c0_356], %759 {strides = array<i32>} : memref<16x32xf32, #tpu.memory_space<vmem>>, vector<8x8xf32>,
    %761 = vector.extract_strided_slice %741 {offsets = [0, 8], sizes = [8, 8], strides = [1, 1]} : vector<16x96xf32> to vector<8x8xf32>
    %762 = vector.extract_strided_slice %741 {offsets = [0, 40], sizes = [8, 8], strides = [1, 1]} : vector<16x96xf32> to vector<8x8xf32>
    %763 = vector.extract_strided_slice %741 {offsets = [0, 72], sizes = [8, 8], strides = [1, 1]} : vector<16x96xf32> to vector<8x8xf32>
    %764 = tpu.transpose %762, [1, 0] : vector<8x8xf32> -> vector<8x8xf32>
    %cst_357 = arith.constant dense<0.000000e+00> : vector<8x8xf32>
    %765 = tpu.matmul %761, %764, %cst_357 {dimension_numbers = #tpu.dot_dimension_numbers<[1], [0], [0], [1], [0, 0, 1, 1], [], []>} : vector<8x8xf32>, vector<8x8xf32>, vector<8x8xf32> -> vector<8x8xf32>
    %cst_358 = arith.constant 0.353553385 : f32
    %766 = vector.broadcast %cst_358 : f32 to vector<8x8xf32>
    %767 = arith.mulf %765, %766 : vector<8x8xf32>
    %cst_359 = arith.constant dense<0xFF800000> : vector<8xf32>
    %768 = vector.multi_reduction <maximumf>, %767, %cst_359 [1] : vector<8x8xf32> to vector<8xf32>
    %769 = vector.shape_cast %768 : vector<8xf32> to vector<8x1xf32>
    %770 = vector.broadcast %769 : vector<8x1xf32> to vector<8x8xf32>
    %771 = arith.subf %767, %770 : vector<8x8xf32>
    %772 = math.exp %771 : vector<8x8xf32>
    %cst_360 = arith.constant dense<0.000000e+00> : vector<8xf32>
    %773 = vector.multi_reduction <add>, %772, %cst_360 [1] : vector<8x8xf32> to vector<8xf32>
    %774 = vector.shape_cast %773 : vector<8xf32> to vector<8x1xf32>
    %775 = tpu.reciprocal %774 {approx = true} : vector<8x1xf32> -> vector<8x1xf32>
    %776 = vector.broadcast %775 : vector<8x1xf32> to vector<8x8xf32>
    %777 = arith.mulf %772, %776 : vector<8x8xf32>
    %cst_361 = arith.constant dense<0.000000e+00> : vector<8x8xf32>
    %778 = tpu.matmul %777, %763, %cst_361 {dimension_numbers = #tpu.dot_dimension_numbers<[1], [0], [0], [1], [0, 0, 1, 1], [], []>} : vector<8x8xf32>, vector<8x8xf32>, vector<8x8xf32> -> vector<8x8xf32>
    %c0_362 = arith.constant 0 : index
    %c8_363 = arith.constant 8 : index
    %779 = vector.load %arg54[%c0_362, %c8_363] : memref<16x32xf32, #tpu.memory_space<vmem>>, vector<8x8xf32>
    tpu.vector_store %arg54[%c0_362, %c8_363], %778 {strides = array<i32>} : memref<16x32xf32, #tpu.memory_space<vmem>>, vector<8x8xf32>,
    %780 = vector.extract_strided_slice %741 {offsets = [0, 16], sizes = [8, 8], strides = [1, 1]} : vector<16x96xf32> to vector<8x8xf32>
    %781 = vector.extract_strided_slice %741 {offsets = [0, 48], sizes = [8, 8], strides = [1, 1]} : vector<16x96xf32> to vector<8x8xf32>
    %782 = vector.extract_strided_slice %741 {offsets = [0, 80], sizes = [8, 8], strides = [1, 1]} : vector<16x96xf32> to vector<8x8xf32>
    %783 = tpu.transpose %781, [1, 0] : vector<8x8xf32> -> vector<8x8xf32>
    %cst_364 = arith.constant dense<0.000000e+00> : vector<8x8xf32>
    %784 = tpu.matmul %780, %783, %cst_364 {dimension_numbers = #tpu.dot_dimension_numbers<[1], [0], [0], [1], [0, 0, 1, 1], [], []>} : vector<8x8xf32>, vector<8x8xf32>, vector<8x8xf32> -> vector<8x8xf32>
    %cst_365 = arith.constant 0.353553385 : f32
    %785 = vector.broadcast %cst_365 : f32 to vector<8x8xf32>
    %786 = arith.mulf %784, %785 : vector<8x8xf32>
    %cst_366 = arith.constant dense<0xFF800000> : vector<8xf32>
    %787 = vector.multi_reduction <maximumf>, %786, %cst_366 [1] : vector<8x8xf32> to vector<8xf32>
    %788 = vector.shape_cast %787 : vector<8xf32> to vector<8x1xf32>
    %789 = vector.broadcast %788 : vector<8x1xf32> to vector<8x8xf32>
    %790 = arith.subf %786, %789 : vector<8x8xf32>
    %791 = math.exp %790 : vector<8x8xf32>
    %cst_367 = arith.constant dense<0.000000e+00> : vector<8xf32>
    %792 = vector.multi_reduction <add>, %791, %cst_367 [1] : vector<8x8xf32> to vector<8xf32>
    %793 = vector.shape_cast %792 : vector<8xf32> to vector<8x1xf32>
    %794 = tpu.reciprocal %793 {approx = true} : vector<8x1xf32> -> vector<8x1xf32>
    %795 = vector.broadcast %794 : vector<8x1xf32> to vector<8x8xf32>
    %796 = arith.mulf %791, %795 : vector<8x8xf32>
    %cst_368 = arith.constant dense<0.000000e+00> : vector<8x8xf32>
    %797 = tpu.matmul %796, %782, %cst_368 {dimension_numbers = #tpu.dot_dimension_numbers<[1], [0], [0], [1], [0, 0, 1, 1], [], []>} : vector<8x8xf32>, vector<8x8xf32>, vector<8x8xf32> -> vector<8x8xf32>
    %c0_369 = arith.constant 0 : index
    %c16_370 = arith.constant 16 : index
    %798 = vector.load %arg54[%c0_369, %c16_370] : memref<16x32xf32, #tpu.memory_space<vmem>>, vector<8x8xf32>
    tpu.vector_store %arg54[%c0_369, %c16_370], %797 {strides = array<i32>} : memref<16x32xf32, #tpu.memory_space<vmem>>, vector<8x8xf32>,
    %799 = vector.extract_strided_slice %741 {offsets = [0, 24], sizes = [8, 8], strides = [1, 1]} : vector<16x96xf32> to vector<8x8xf32>
    %800 = vector.extract_strided_slice %741 {offsets = [0, 56], sizes = [8, 8], strides = [1, 1]} : vector<16x96xf32> to vector<8x8xf32>
    %801 = vector.extract_strided_slice %741 {offsets = [0, 88], sizes = [8, 8], strides = [1, 1]} : vector<16x96xf32> to vector<8x8xf32>
    %802 = tpu.transpose %800, [1, 0] : vector<8x8xf32> -> vector<8x8xf32>
    %cst_371 = arith.constant dense<0.000000e+00> : vector<8x8xf32>
    %803 = tpu.matmul %799, %802, %cst_371 {dimension_numbers = #tpu.dot_dimension_numbers<[1], [0], [0], [1], [0, 0, 1, 1], [], []>} : vector<8x8xf32>, vector<8x8xf32>, vector<8x8xf32> -> vector<8x8xf32>
    %cst_372 = arith.constant 0.353553385 : f32
    %804 = vector.broadcast %cst_372 : f32 to vector<8x8xf32>
    %805 = arith.mulf %803, %804 : vector<8x8xf32>
    %cst_373 = arith.constant dense<0xFF800000> : vector<8xf32>
    %806 = vector.multi_reduction <maximumf>, %805, %cst_373 [1] : vector<8x8xf32> to vector<8xf32>
    %807 = vector.shape_cast %806 : vector<8xf32> to vector<8x1xf32>
    %808 = vector.broadcast %807 : vector<8x1xf32> to vector<8x8xf32>
    %809 = arith.subf %805, %808 : vector<8x8xf32>
    %810 = math.exp %809 : vector<8x8xf32>
    %cst_374 = arith.constant dense<0.000000e+00> : vector<8xf32>
    %811 = vector.multi_reduction <add>, %810, %cst_374 [1] : vector<8x8xf32> to vector<8xf32>
    %812 = vector.shape_cast %811 : vector<8xf32> to vector<8x1xf32>
    %813 = tpu.reciprocal %812 {approx = true} : vector<8x1xf32> -> vector<8x1xf32>
    %814 = vector.broadcast %813 : vector<8x1xf32> to vector<8x8xf32>
    %815 = arith.mulf %810, %814 : vector<8x8xf32>
    %cst_375 = arith.constant dense<0.000000e+00> : vector<8x8xf32>
    %816 = tpu.matmul %815, %801, %cst_375 {dimension_numbers = #tpu.dot_dimension_numbers<[1], [0], [0], [1], [0, 0, 1, 1], [], []>} : vector<8x8xf32>, vector<8x8xf32>, vector<8x8xf32> -> vector<8x8xf32>
    %c0_376 = arith.constant 0 : index
    %c24_377 = arith.constant 24 : index
    %817 = vector.load %arg54[%c0_376, %c24_377] : memref<16x32xf32, #tpu.memory_space<vmem>>, vector<8x8xf32>
    tpu.vector_store %arg54[%c0_376, %c24_377], %816 {strides = array<i32>} : memref<16x32xf32, #tpu.memory_space<vmem>>, vector<8x8xf32>,
    %818 = vector.extract_strided_slice %741 {offsets = [8, 0], sizes = [8, 8], strides = [1, 1]} : vector<16x96xf32> to vector<8x8xf32>
    %819 = vector.extract_strided_slice %741 {offsets = [8, 32], sizes = [8, 8], strides = [1, 1]} : vector<16x96xf32> to vector<8x8xf32>
    %820 = vector.extract_strided_slice %741 {offsets = [8, 64], sizes = [8, 8], strides = [1, 1]} : vector<16x96xf32> to vector<8x8xf32>
    %821 = tpu.transpose %819, [1, 0] : vector<8x8xf32> -> vector<8x8xf32>
    %cst_378 = arith.constant dense<0.000000e+00> : vector<8x8xf32>
    %822 = tpu.matmul %818, %821, %cst_378 {dimension_numbers = #tpu.dot_dimension_numbers<[1], [0], [0], [1], [0, 0, 1, 1], [], []>} : vector<8x8xf32>, vector<8x8xf32>, vector<8x8xf32> -> vector<8x8xf32>
    %cst_379 = arith.constant 0.353553385 : f32
    %823 = vector.broadcast %cst_379 : f32 to vector<8x8xf32>
    %824 = arith.mulf %822, %823 : vector<8x8xf32>
    %cst_380 = arith.constant dense<0xFF800000> : vector<8xf32>
    %825 = vector.multi_reduction <maximumf>, %824, %cst_380 [1] : vector<8x8xf32> to vector<8xf32>
    %826 = vector.shape_cast %825 : vector<8xf32> to vector<8x1xf32>
    %827 = vector.broadcast %826 : vector<8x1xf32> to vector<8x8xf32>
    %828 = arith.subf %824, %827 : vector<8x8xf32>
    %829 = math.exp %828 : vector<8x8xf32>
    %cst_381 = arith.constant dense<0.000000e+00> : vector<8xf32>
    %830 = vector.multi_reduction <add>, %829, %cst_381 [1] : vector<8x8xf32> to vector<8xf32>
    %831 = vector.shape_cast %830 : vector<8xf32> to vector<8x1xf32>
    %832 = tpu.reciprocal %831 {approx = true} : vector<8x1xf32> -> vector<8x1xf32>
    %833 = vector.broadcast %832 : vector<8x1xf32> to vector<8x8xf32>
    %834 = arith.mulf %829, %833 : vector<8x8xf32>
    %cst_382 = arith.constant dense<0.000000e+00> : vector<8x8xf32>
    %835 = tpu.matmul %834, %820, %cst_382 {dimension_numbers = #tpu.dot_dimension_numbers<[1], [0], [0], [1], [0, 0, 1, 1], [], []>} : vector<8x8xf32>, vector<8x8xf32>, vector<8x8xf32> -> vector<8x8xf32>
    %c8_383 = arith.constant 8 : index
    %c0_384 = arith.constant 0 : index
    %836 = vector.load %arg54[%c8_383, %c0_384] : memref<16x32xf32, #tpu.memory_space<vmem>>, vector<8x8xf32>
    tpu.vector_store %arg54[%c8_383, %c0_384], %835 {strides = array<i32>} : memref<16x32xf32, #tpu.memory_space<vmem>>, vector<8x8xf32>,
    %837 = vector.extract_strided_slice %741 {offsets = [8, 8], sizes = [8, 8], strides = [1, 1]} : vector<16x96xf32> to vector<8x8xf32>
    %838 = vector.extract_strided_slice %741 {offsets = [8, 40], sizes = [8, 8], strides = [1, 1]} : vector<16x96xf32> to vector<8x8xf32>
    %839 = vector.extract_strided_slice %741 {offsets = [8, 72], sizes = [8, 8], strides = [1, 1]} : vector<16x96xf32> to vector<8x8xf32>
    %840 = tpu.transpose %838, [1, 0] : vector<8x8xf32> -> vector<8x8xf32>
    %cst_385 = arith.constant dense<0.000000e+00> : vector<8x8xf32>
    %841 = tpu.matmul %837, %840, %cst_385 {dimension_numbers = #tpu.dot_dimension_numbers<[1], [0], [0], [1], [0, 0, 1, 1], [], []>} : vector<8x8xf32>, vector<8x8xf32>, vector<8x8xf32> -> vector<8x8xf32>
    %cst_386 = arith.constant 0.353553385 : f32
    %842 = vector.broadcast %cst_386 : f32 to vector<8x8xf32>
    %843 = arith.mulf %841, %842 : vector<8x8xf32>
    %cst_387 = arith.constant dense<0xFF800000> : vector<8xf32>
    %844 = vector.multi_reduction <maximumf>, %843, %cst_387 [1] : vector<8x8xf32> to vector<8xf32>
    %845 = vector.shape_cast %844 : vector<8xf32> to vector<8x1xf32>
    %846 = vector.broadcast %845 : vector<8x1xf32> to vector<8x8xf32>
    %847 = arith.subf %843, %846 : vector<8x8xf32>
    %848 = math.exp %847 : vector<8x8xf32>
    %cst_388 = arith.constant dense<0.000000e+00> : vector<8xf32>
    %849 = vector.multi_reduction <add>, %848, %cst_388 [1] : vector<8x8xf32> to vector<8xf32>
    %850 = vector.shape_cast %849 : vector<8xf32> to vector<8x1xf32>
    %851 = tpu.reciprocal %850 {approx = true} : vector<8x1xf32> -> vector<8x1xf32>
    %852 = vector.broadcast %851 : vector<8x1xf32> to vector<8x8xf32>
    %853 = arith.mulf %848, %852 : vector<8x8xf32>
    %cst_389 = arith.constant dense<0.000000e+00> : vector<8x8xf32>
    %854 = tpu.matmul %853, %839, %cst_389 {dimension_numbers = #tpu.dot_dimension_numbers<[1], [0], [0], [1], [0, 0, 1, 1], [], []>} : vector<8x8xf32>, vector<8x8xf32>, vector<8x8xf32> -> vector<8x8xf32>
    %c8_390 = arith.constant 8 : index
    %c8_391 = arith.constant 8 : index
    %855 = vector.load %arg54[%c8_390, %c8_391] : memref<16x32xf32, #tpu.memory_space<vmem>>, vector<8x8xf32>
    tpu.vector_store %arg54[%c8_390, %c8_391], %854 {strides = array<i32>} : memref<16x32xf32, #tpu.memory_space<vmem>>, vector<8x8xf32>,
    %856 = vector.extract_strided_slice %741 {offsets = [8, 16], sizes = [8, 8], strides = [1, 1]} : vector<16x96xf32> to vector<8x8xf32>
    %857 = vector.extract_strided_slice %741 {offsets = [8, 48], sizes = [8, 8], strides = [1, 1]} : vector<16x96xf32> to vector<8x8xf32>
    %858 = vector.extract_strided_slice %741 {offsets = [8, 80], sizes = [8, 8], strides = [1, 1]} : vector<16x96xf32> to vector<8x8xf32>
    %859 = tpu.transpose %857, [1, 0] : vector<8x8xf32> -> vector<8x8xf32>
    %cst_392 = arith.constant dense<0.000000e+00> : vector<8x8xf32>
    %860 = tpu.matmul %856, %859, %cst_392 {dimension_numbers = #tpu.dot_dimension_numbers<[1], [0], [0], [1], [0, 0, 1, 1], [], []>} : vector<8x8xf32>, vector<8x8xf32>, vector<8x8xf32> -> vector<8x8xf32>
    %cst_393 = arith.constant 0.353553385 : f32
    %861 = vector.broadcast %cst_393 : f32 to vector<8x8xf32>
    %862 = arith.mulf %860, %861 : vector<8x8xf32>
    %cst_394 = arith.constant dense<0xFF800000> : vector<8xf32>
    %863 = vector.multi_reduction <maximumf>, %862, %cst_394 [1] : vector<8x8xf32> to vector<8xf32>
    %864 = vector.shape_cast %863 : vector<8xf32> to vector<8x1xf32>
    %865 = vector.broadcast %864 : vector<8x1xf32> to vector<8x8xf32>
    %866 = arith.subf %862, %865 : vector<8x8xf32>
    %867 = math.exp %866 : vector<8x8xf32>
    %cst_395 = arith.constant dense<0.000000e+00> : vector<8xf32>
    %868 = vector.multi_reduction <add>, %867, %cst_395 [1] : vector<8x8xf32> to vector<8xf32>
    %869 = vector.shape_cast %868 : vector<8xf32> to vector<8x1xf32>
    %870 = tpu.reciprocal %869 {approx = true} : vector<8x1xf32> -> vector<8x1xf32>
    %871 = vector.broadcast %870 : vector<8x1xf32> to vector<8x8xf32>
    %872 = arith.mulf %867, %871 : vector<8x8xf32>
    %cst_396 = arith.constant dense<0.000000e+00> : vector<8x8xf32>
    %873 = tpu.matmul %872, %858, %cst_396 {dimension_numbers = #tpu.dot_dimension_numbers<[1], [0], [0], [1], [0, 0, 1, 1], [], []>} : vector<8x8xf32>, vector<8x8xf32>, vector<8x8xf32> -> vector<8x8xf32>
    %c8_397 = arith.constant 8 : index
    %c16_398 = arith.constant 16 : index
    %874 = vector.load %arg54[%c8_397, %c16_398] : memref<16x32xf32, #tpu.memory_space<vmem>>, vector<8x8xf32>
    tpu.vector_store %arg54[%c8_397, %c16_398], %873 {strides = array<i32>} : memref<16x32xf32, #tpu.memory_space<vmem>>, vector<8x8xf32>,
    %875 = vector.extract_strided_slice %741 {offsets = [8, 24], sizes = [8, 8], strides = [1, 1]} : vector<16x96xf32> to vector<8x8xf32>
    %876 = vector.extract_strided_slice %741 {offsets = [8, 56], sizes = [8, 8], strides = [1, 1]} : vector<16x96xf32> to vector<8x8xf32>
    %877 = vector.extract_strided_slice %741 {offsets = [8, 88], sizes = [8, 8], strides = [1, 1]} : vector<16x96xf32> to vector<8x8xf32>
    %878 = tpu.transpose %876, [1, 0] : vector<8x8xf32> -> vector<8x8xf32>
    %cst_399 = arith.constant dense<0.000000e+00> : vector<8x8xf32>
    %879 = tpu.matmul %875, %878, %cst_399 {dimension_numbers = #tpu.dot_dimension_numbers<[1], [0], [0], [1], [0, 0, 1, 1], [], []>} : vector<8x8xf32>, vector<8x8xf32>, vector<8x8xf32> -> vector<8x8xf32>
    %cst_400 = arith.constant 0.353553385 : f32
    %880 = vector.broadcast %cst_400 : f32 to vector<8x8xf32>
    %881 = arith.mulf %879, %880 : vector<8x8xf32>
    %cst_401 = arith.constant dense<0xFF800000> : vector<8xf32>
    %882 = vector.multi_reduction <maximumf>, %881, %cst_401 [1] : vector<8x8xf32> to vector<8xf32>
    %883 = vector.shape_cast %882 : vector<8xf32> to vector<8x1xf32>
    %884 = vector.broadcast %883 : vector<8x1xf32> to vector<8x8xf32>
    %885 = arith.subf %881, %884 : vector<8x8xf32>
    %886 = math.exp %885 : vector<8x8xf32>
    %cst_402 = arith.constant dense<0.000000e+00> : vector<8xf32>
    %887 = vector.multi_reduction <add>, %886, %cst_402 [1] : vector<8x8xf32> to vector<8xf32>
    %888 = vector.shape_cast %887 : vector<8xf32> to vector<8x1xf32>
    %889 = tpu.reciprocal %888 {approx = true} : vector<8x1xf32> -> vector<8x1xf32>
    %890 = vector.broadcast %889 : vector<8x1xf32> to vector<8x8xf32>
    %891 = arith.mulf %886, %890 : vector<8x8xf32>
    %cst_403 = arith.constant dense<0.000000e+00> : vector<8x8xf32>
    %892 = tpu.matmul %891, %877, %cst_403 {dimension_numbers = #tpu.dot_dimension_numbers<[1], [0], [0], [1], [0, 0, 1, 1], [], []>} : vector<8x8xf32>, vector<8x8xf32>, vector<8x8xf32> -> vector<8x8xf32>
    %c8_404 = arith.constant 8 : index
    %c24_405 = arith.constant 24 : index
    %893 = vector.load %arg54[%c8_404, %c24_405] : memref<16x32xf32, #tpu.memory_space<vmem>>, vector<8x8xf32>
    tpu.vector_store %arg54[%c8_404, %c24_405], %892 {strides = array<i32>} : memref<16x32xf32, #tpu.memory_space<vmem>>, vector<8x8xf32>,
    %c0_406 = arith.constant 0 : index
    %c0_407 = arith.constant 0 : index
    %894 = vector.load %arg54[%c0_406, %c0_407] : memref<16x32xf32, #tpu.memory_space<vmem>>, vector<16x32xf32>
    %c1_408 = arith.constant 1 : index
    %c0_409 = arith.constant 0 : index
    %c0_410 = arith.constant 0 : index
    %895 = vector.load %arg25[%c1_408, %c0_409, %c0_410] : memref<2x32x32xf32, #tpu.memory_space<vmem>>, vector<1x32x32xf32>
    %896 = vector.shape_cast %895 : vector<1x32x32xf32> to vector<32x32xf32>
    %cst_411 = arith.constant dense<0.000000e+00> : vector<16x32xf32>
    %897 = tpu.matmul %894, %896, %cst_411 {dimension_numbers = #tpu.dot_dimension_numbers<[1], [0], [0], [1], [0, 0, 1, 1], [], []>} : vector<16x32xf32>, vector<32x32xf32>, vector<16x32xf32> -> vector<16x32xf32>
    %c1_412 = arith.constant 1 : index
    %c0_413 = arith.constant 0 : index
    %c0_414 = arith.constant 0 : index
    %898 = vector.load %arg26[%c1_412, %c0_413, %c0_414] : memref<2x1x32xf32, #tpu.memory_space<vmem>>, vector<1x1x32xf32>
    %899 = vector.shape_cast %898 : vector<1x1x32xf32> to vector<1x32xf32>
    %900 = vector.broadcast %899 : vector<1x32xf32> to vector<16x32xf32>
    %901 = arith.addf %897, %900 : vector<16x32xf32>
    %902 = arith.addf %734, %901 : vector<16x32xf32>
    %c1_415 = arith.constant 1 : index
    %c0_416 = arith.constant 0 : index
    %c0_417 = arith.constant 0 : index
    %903 = vector.load %arg27[%c1_415, %c0_416, %c0_417] : memref<2x1x32xf32, #tpu.memory_space<vmem>>, vector<1x1x32xf32>
    %904 = vector.shape_cast %903 : vector<1x1x32xf32> to vector<1x32xf32>
    %c1_418 = arith.constant 1 : index
    %c0_419 = arith.constant 0 : index
    %c0_420 = arith.constant 0 : index
    %905 = vector.load %arg28[%c1_418, %c0_419, %c0_420] : memref<2x1x32xf32, #tpu.memory_space<vmem>>, vector<1x1x32xf32>
    %906 = vector.shape_cast %905 : vector<1x1x32xf32> to vector<1x32xf32>
    %cst_421 = arith.constant dense<0.000000e+00> : vector<16xf32>
    %907 = vector.multi_reduction <add>, %902, %cst_421 [1] : vector<16x32xf32> to vector<16xf32>
    %908 = vector.shape_cast %907 : vector<16xf32> to vector<16x1xf32>
    %cst_422 = arith.constant 3.200000e+01 : f32
    %909 = vector.broadcast %cst_422 : f32 to vector<16x1xf32>
    %910 = arith.divf %908, %909 : vector<16x1xf32>
    %911 = vector.broadcast %910 : vector<16x1xf32> to vector<16x32xf32>
    %912 = arith.subf %902, %911 : vector<16x32xf32>
    %913 = arith.mulf %912, %912 : vector<16x32xf32>
    %cst_423 = arith.constant dense<0.000000e+00> : vector<16xf32>
    %914 = vector.multi_reduction <add>, %913, %cst_423 [1] : vector<16x32xf32> to vector<16xf32>
    %915 = vector.shape_cast %914 : vector<16xf32> to vector<16x1xf32>
    %cst_424 = arith.constant 3.200000e+01 : f32
    %916 = vector.broadcast %cst_424 : f32 to vector<16x1xf32>
    %917 = arith.divf %915, %916 : vector<16x1xf32>
    %918 = vector.broadcast %910 : vector<16x1xf32> to vector<16x32xf32>
    %919 = arith.subf %902, %918 : vector<16x32xf32>
    %cst_425 = arith.constant 9.99999974E-6 : f32
    %920 = vector.broadcast %cst_425 : f32 to vector<16x1xf32>
    %921 = arith.addf %917, %920 : vector<16x1xf32>
    %922 = math.rsqrt %921 : vector<16x1xf32>
    %923 = vector.broadcast %922 : vector<16x1xf32> to vector<16x32xf32>
    %924 = arith.mulf %919, %923 : vector<16x32xf32>
    %925 = vector.broadcast %904 : vector<1x32xf32> to vector<16x32xf32>
    %926 = arith.mulf %924, %925 : vector<16x32xf32>
    %927 = vector.broadcast %906 : vector<1x32xf32> to vector<16x32xf32>
    %928 = arith.addf %926, %927 : vector<16x32xf32>
    %c1_426 = arith.constant 1 : index
    %c0_427 = arith.constant 0 : index
    %c0_428 = arith.constant 0 : index
    %929 = vector.load %arg29[%c1_426, %c0_427, %c0_428] : memref<2x32x64xf32, #tpu.memory_space<vmem>>, vector<1x32x64xf32>
    %930 = vector.shape_cast %929 : vector<1x32x64xf32> to vector<32x64xf32>
    %cst_429 = arith.constant dense<0.000000e+00> : vector<16x64xf32>
    %931 = tpu.matmul %928, %930, %cst_429 {dimension_numbers = #tpu.dot_dimension_numbers<[1], [0], [0], [1], [0, 0, 1, 1], [], []>} : vector<16x32xf32>, vector<32x64xf32>, vector<16x64xf32> -> vector<16x64xf32>
    %c1_430 = arith.constant 1 : index
    %c0_431 = arith.constant 0 : index
    %c0_432 = arith.constant 0 : index
    %932 = vector.load %arg30[%c1_430, %c0_431, %c0_432] : memref<2x1x64xf32, #tpu.memory_space<vmem>>, vector<1x1x64xf32>
    %933 = vector.shape_cast %932 : vector<1x1x64xf32> to vector<1x64xf32>
    %934 = vector.broadcast %933 : vector<1x64xf32> to vector<16x64xf32>
    %935 = arith.addf %931, %934 : vector<16x64xf32>
    %cst_433 = arith.constant 0.000000e+00 : f32
    %936 = vector.broadcast %cst_433 : f32 to vector<16x64xf32>
    %937 = arith.maximumf %935, %936 : vector<16x64xf32>
    %c1_434 = arith.constant 1 : index
    %c0_435 = arith.constant 0 : index
    %c0_436 = arith.constant 0 : index
    %938 = vector.load %arg31[%c1_434, %c0_435, %c0_436] : memref<2x64x32xf32, #tpu.memory_space<vmem>>, vector<1x64x32xf32>
    %939 = vector.shape_cast %938 : vector<1x64x32xf32> to vector<64x32xf32>
    %cst_437 = arith.constant dense<0.000000e+00> : vector<16x32xf32>
    %940 = tpu.matmul %937, %939, %cst_437 {dimension_numbers = #tpu.dot_dimension_numbers<[1], [0], [0], [1], [0, 0, 1, 1], [], []>} : vector<16x64xf32>, vector<64x32xf32>, vector<16x32xf32> -> vector<16x32xf32>
    %c1_438 = arith.constant 1 : index
    %c0_439 = arith.constant 0 : index
    %c0_440 = arith.constant 0 : index
    %941 = vector.load %arg32[%c1_438, %c0_439, %c0_440] : memref<2x1x32xf32, #tpu.memory_space<vmem>>, vector<1x1x32xf32>
    %942 = vector.shape_cast %941 : vector<1x1x32xf32> to vector<1x32xf32>
    %943 = vector.broadcast %942 : vector<1x32xf32> to vector<16x32xf32>
    %944 = arith.addf %940, %943 : vector<16x32xf32>
    %945 = arith.addf %928, %944 : vector<16x32xf32>
    %c1_441 = arith.constant 1 : index
    %c0_442 = arith.constant 0 : index
    %c0_443 = arith.constant 0 : index
    %946 = vector.load %arg33[%c1_441, %c0_442, %c0_443] : memref<2x1x32xf32, #tpu.memory_space<vmem>>, vector<1x1x32xf32>
    %947 = vector.shape_cast %946 : vector<1x1x32xf32> to vector<1x32xf32>
    %c1_444 = arith.constant 1 : index
    %c0_445 = arith.constant 0 : index
    %c0_446 = arith.constant 0 : index
    %948 = vector.load %arg34[%c1_444, %c0_445, %c0_446] : memref<2x1x32xf32, #tpu.memory_space<vmem>>, vector<1x1x32xf32>
    %949 = vector.shape_cast %948 : vector<1x1x32xf32> to vector<1x32xf32>
    %cst_447 = arith.constant dense<0.000000e+00> : vector<16xf32>
    %950 = vector.multi_reduction <add>, %945, %cst_447 [1] : vector<16x32xf32> to vector<16xf32>
    %951 = vector.shape_cast %950 : vector<16xf32> to vector<16x1xf32>
    %cst_448 = arith.constant 3.200000e+01 : f32
    %952 = vector.broadcast %cst_448 : f32 to vector<16x1xf32>
    %953 = arith.divf %951, %952 : vector<16x1xf32>
    %954 = vector.broadcast %953 : vector<16x1xf32> to vector<16x32xf32>
    %955 = arith.subf %945, %954 : vector<16x32xf32>
    %956 = arith.mulf %955, %955 : vector<16x32xf32>
    %cst_449 = arith.constant dense<0.000000e+00> : vector<16xf32>
    %957 = vector.multi_reduction <add>, %956, %cst_449 [1] : vector<16x32xf32> to vector<16xf32>
    %958 = vector.shape_cast %957 : vector<16xf32> to vector<16x1xf32>
    %cst_450 = arith.constant 3.200000e+01 : f32
    %959 = vector.broadcast %cst_450 : f32 to vector<16x1xf32>
    %960 = arith.divf %958, %959 : vector<16x1xf32>
    %961 = vector.broadcast %953 : vector<16x1xf32> to vector<16x32xf32>
    %962 = arith.subf %945, %961 : vector<16x32xf32>
    %cst_451 = arith.constant 9.99999974E-6 : f32
    %963 = vector.broadcast %cst_451 : f32 to vector<16x1xf32>
    %964 = arith.addf %960, %963 : vector<16x1xf32>
    %965 = math.rsqrt %964 : vector<16x1xf32>
    %966 = vector.broadcast %965 : vector<16x1xf32> to vector<16x32xf32>
    %967 = arith.mulf %962, %966 : vector<16x32xf32>
    %968 = vector.broadcast %947 : vector<1x32xf32> to vector<16x32xf32>
    %969 = arith.mulf %967, %968 : vector<16x32xf32>
    %970 = vector.broadcast %949 : vector<1x32xf32> to vector<16x32xf32>
    %971 = arith.addf %969, %970 : vector<16x32xf32>
    %c0_452 = arith.constant 0 : index
    %c0_453 = arith.constant 0 : index
    %972 = vector.load %arg21[%c0_452, %c0_453] : memref<32x24xf32, #tpu.memory_space<vmem>>, vector<32x24xf32>
    %cst_454 = arith.constant dense<0.000000e+00> : vector<16x24xf32>
    %973 = tpu.matmul %971, %972, %cst_454 {dimension_numbers = #tpu.dot_dimension_numbers<[1], [0], [0], [1], [0, 0, 1, 1], [], []>} : vector<16x32xf32>, vector<32x24xf32>, vector<16x24xf32> -> vector<16x24xf32>
    %c0_455 = arith.constant 0 : index
    %c0_456 = arith.constant 0 : index
    %974 = vector.load %arg22[%c0_455, %c0_456] : memref<1x24xf32, #tpu.memory_space<vmem>>, vector<1x24xf32>
    %975 = vector.broadcast %974 : vector<1x24xf32> to vector<16x24xf32>
    %976 = arith.addf %973, %975 : vector<16x24xf32>
    %c0_457 = arith.constant 0 : index
    %c0_458 = arith.constant 0 : index
    %977 = vector.load %arg52[%c0_457, %c0_458] : memref<16x24xf32, #tpu.memory_space<vmem>>, vector<16x24xf32>
    tpu.vector_store %arg52[%c0_457, %c0_458], %976 {strides = array<i32>} : memref<16x24xf32, #tpu.memory_space<vmem>>, vector<16x24xf32>,
    %c0_459 = arith.constant 0 : index
    %c0_460 = arith.constant 0 : index
    %978 = vector.load %arg35[%c0_459, %c0_460] : memref<27x32xf32, #tpu.memory_space<vmem>>, vector<27x32xf32>
    %979 = vector.extract_strided_slice %978 {offsets = [0, 0], sizes = [12, 32], strides = [1, 1]} : vector<27x32xf32> to vector<12x32xf32>
    %cst_461 = arith.constant dense<0.000000e+00> : vector<16x32xf32>
    %980 = tpu.matmul %0, %979, %cst_461 {dimension_numbers = #tpu.dot_dimension_numbers<[1], [0], [0], [1], [0, 0, 1, 1], [], []>} : vector<16x12xf32>, vector<12x32xf32>, vector<16x32xf32> -> vector<16x32xf32>
    %981 = vector.extract_strided_slice %978 {offsets = [12, 0], sizes = [15, 32], strides = [1, 1]} : vector<27x32xf32> to vector<15x32xf32>
    %cst_462 = arith.constant dense<0.000000e+00> : vector<16x32xf32>
    %982 = tpu.matmul %486, %981, %cst_462 {dimension_numbers = #tpu.dot_dimension_numbers<[1], [0], [0], [1], [0, 0, 1, 1], [], []>} : vector<16x15xf32>, vector<15x32xf32>, vector<16x32xf32> -> vector<16x32xf32>
    %983 = arith.addf %980, %982 : vector<16x32xf32>
    %c0_463 = arith.constant 0 : index
    %c0_464 = arith.constant 0 : index
    %984 = vector.load %arg36[%c0_463, %c0_464] : memref<1x32xf32, #tpu.memory_space<vmem>>, vector<1x32xf32>
    %985 = vector.broadcast %984 : vector<1x32xf32> to vector<16x32xf32>
    %986 = arith.addf %983, %985 : vector<16x32xf32>
    %987 = arith.addf %986, %1 : vector<16x32xf32>
    %c0_465 = arith.constant 0 : index
    %c0_466 = arith.constant 0 : index
    %c0_467 = arith.constant 0 : index
    %988 = vector.load %arg39[%c0_465, %c0_466, %c0_467] : memref<2x32x96xf32, #tpu.memory_space<vmem>>, vector<1x32x96xf32>
    %989 = vector.shape_cast %988 : vector<1x32x96xf32> to vector<32x96xf32>
    %cst_468 = arith.constant dense<0.000000e+00> : vector<16x96xf32>
    %990 = tpu.matmul %987, %989, %cst_468 {dimension_numbers = #tpu.dot_dimension_numbers<[1], [0], [0], [1], [0, 0, 1, 1], [], []>} : vector<16x32xf32>, vector<32x96xf32>, vector<16x96xf32> -> vector<16x96xf32>
    %c0_469 = arith.constant 0 : index
    %c0_470 = arith.constant 0 : index
    %c0_471 = arith.constant 0 : index
    %991 = vector.load %arg40[%c0_469, %c0_470, %c0_471] : memref<2x1x96xf32, #tpu.memory_space<vmem>>, vector<1x1x96xf32>
    %992 = vector.shape_cast %991 : vector<1x1x96xf32> to vector<1x96xf32>
    %993 = vector.broadcast %992 : vector<1x96xf32> to vector<16x96xf32>
    %994 = arith.addf %990, %993 : vector<16x96xf32>
    %995 = vector.extract_strided_slice %994 {offsets = [0, 0], sizes = [8, 8], strides = [1, 1]} : vector<16x96xf32> to vector<8x8xf32>
    %996 = vector.extract_strided_slice %994 {offsets = [0, 32], sizes = [8, 8], strides = [1, 1]} : vector<16x96xf32> to vector<8x8xf32>
    %997 = vector.extract_strided_slice %994 {offsets = [0, 64], sizes = [8, 8], strides = [1, 1]} : vector<16x96xf32> to vector<8x8xf32>
    %998 = tpu.transpose %996, [1, 0] : vector<8x8xf32> -> vector<8x8xf32>
    %cst_472 = arith.constant dense<0.000000e+00> : vector<8x8xf32>
    %999 = tpu.matmul %995, %998, %cst_472 {dimension_numbers = #tpu.dot_dimension_numbers<[1], [0], [0], [1], [0, 0, 1, 1], [], []>} : vector<8x8xf32>, vector<8x8xf32>, vector<8x8xf32> -> vector<8x8xf32>
    %cst_473 = arith.constant 0.353553385 : f32
    %1000 = vector.broadcast %cst_473 : f32 to vector<8x8xf32>
    %1001 = arith.mulf %999, %1000 : vector<8x8xf32>
    %cst_474 = arith.constant dense<0xFF800000> : vector<8xf32>
    %1002 = vector.multi_reduction <maximumf>, %1001, %cst_474 [1] : vector<8x8xf32> to vector<8xf32>
    %1003 = vector.shape_cast %1002 : vector<8xf32> to vector<8x1xf32>
    %1004 = vector.broadcast %1003 : vector<8x1xf32> to vector<8x8xf32>
    %1005 = arith.subf %1001, %1004 : vector<8x8xf32>
    %1006 = math.exp %1005 : vector<8x8xf32>
    %cst_475 = arith.constant dense<0.000000e+00> : vector<8xf32>
    %1007 = vector.multi_reduction <add>, %1006, %cst_475 [1] : vector<8x8xf32> to vector<8xf32>
    %1008 = vector.shape_cast %1007 : vector<8xf32> to vector<8x1xf32>
    %1009 = tpu.reciprocal %1008 {approx = true} : vector<8x1xf32> -> vector<8x1xf32>
    %1010 = vector.broadcast %1009 : vector<8x1xf32> to vector<8x8xf32>
    %1011 = arith.mulf %1006, %1010 : vector<8x8xf32>
    %cst_476 = arith.constant dense<0.000000e+00> : vector<8x8xf32>
    %1012 = tpu.matmul %1011, %997, %cst_476 {dimension_numbers = #tpu.dot_dimension_numbers<[1], [0], [0], [1], [0, 0, 1, 1], [], []>} : vector<8x8xf32>, vector<8x8xf32>, vector<8x8xf32> -> vector<8x8xf32>
    %c0_477 = arith.constant 0 : index
    %c0_478 = arith.constant 0 : index
    %1013 = vector.load %arg54[%c0_477, %c0_478] : memref<16x32xf32, #tpu.memory_space<vmem>>, vector<8x8xf32>
    tpu.vector_store %arg54[%c0_477, %c0_478], %1012 {strides = array<i32>} : memref<16x32xf32, #tpu.memory_space<vmem>>, vector<8x8xf32>,
    %1014 = vector.extract_strided_slice %994 {offsets = [0, 8], sizes = [8, 8], strides = [1, 1]} : vector<16x96xf32> to vector<8x8xf32>
    %1015 = vector.extract_strided_slice %994 {offsets = [0, 40], sizes = [8, 8], strides = [1, 1]} : vector<16x96xf32> to vector<8x8xf32>
    %1016 = vector.extract_strided_slice %994 {offsets = [0, 72], sizes = [8, 8], strides = [1, 1]} : vector<16x96xf32> to vector<8x8xf32>
    %1017 = tpu.transpose %1015, [1, 0] : vector<8x8xf32> -> vector<8x8xf32>
    %cst_479 = arith.constant dense<0.000000e+00> : vector<8x8xf32>
    %1018 = tpu.matmul %1014, %1017, %cst_479 {dimension_numbers = #tpu.dot_dimension_numbers<[1], [0], [0], [1], [0, 0, 1, 1], [], []>} : vector<8x8xf32>, vector<8x8xf32>, vector<8x8xf32> -> vector<8x8xf32>
    %cst_480 = arith.constant 0.353553385 : f32
    %1019 = vector.broadcast %cst_480 : f32 to vector<8x8xf32>
    %1020 = arith.mulf %1018, %1019 : vector<8x8xf32>
    %cst_481 = arith.constant dense<0xFF800000> : vector<8xf32>
    %1021 = vector.multi_reduction <maximumf>, %1020, %cst_481 [1] : vector<8x8xf32> to vector<8xf32>
    %1022 = vector.shape_cast %1021 : vector<8xf32> to vector<8x1xf32>
    %1023 = vector.broadcast %1022 : vector<8x1xf32> to vector<8x8xf32>
    %1024 = arith.subf %1020, %1023 : vector<8x8xf32>
    %1025 = math.exp %1024 : vector<8x8xf32>
    %cst_482 = arith.constant dense<0.000000e+00> : vector<8xf32>
    %1026 = vector.multi_reduction <add>, %1025, %cst_482 [1] : vector<8x8xf32> to vector<8xf32>
    %1027 = vector.shape_cast %1026 : vector<8xf32> to vector<8x1xf32>
    %1028 = tpu.reciprocal %1027 {approx = true} : vector<8x1xf32> -> vector<8x1xf32>
    %1029 = vector.broadcast %1028 : vector<8x1xf32> to vector<8x8xf32>
    %1030 = arith.mulf %1025, %1029 : vector<8x8xf32>
    %cst_483 = arith.constant dense<0.000000e+00> : vector<8x8xf32>
    %1031 = tpu.matmul %1030, %1016, %cst_483 {dimension_numbers = #tpu.dot_dimension_numbers<[1], [0], [0], [1], [0, 0, 1, 1], [], []>} : vector<8x8xf32>, vector<8x8xf32>, vector<8x8xf32> -> vector<8x8xf32>
    %c0_484 = arith.constant 0 : index
    %c8_485 = arith.constant 8 : index
    %1032 = vector.load %arg54[%c0_484, %c8_485] : memref<16x32xf32, #tpu.memory_space<vmem>>, vector<8x8xf32>
    tpu.vector_store %arg54[%c0_484, %c8_485], %1031 {strides = array<i32>} : memref<16x32xf32, #tpu.memory_space<vmem>>, vector<8x8xf32>,
    %1033 = vector.extract_strided_slice %994 {offsets = [0, 16], sizes = [8, 8], strides = [1, 1]} : vector<16x96xf32> to vector<8x8xf32>
    %1034 = vector.extract_strided_slice %994 {offsets = [0, 48], sizes = [8, 8], strides = [1, 1]} : vector<16x96xf32> to vector<8x8xf32>
    %1035 = vector.extract_strided_slice %994 {offsets = [0, 80], sizes = [8, 8], strides = [1, 1]} : vector<16x96xf32> to vector<8x8xf32>
    %1036 = tpu.transpose %1034, [1, 0] : vector<8x8xf32> -> vector<8x8xf32>
    %cst_486 = arith.constant dense<0.000000e+00> : vector<8x8xf32>
    %1037 = tpu.matmul %1033, %1036, %cst_486 {dimension_numbers = #tpu.dot_dimension_numbers<[1], [0], [0], [1], [0, 0, 1, 1], [], []>} : vector<8x8xf32>, vector<8x8xf32>, vector<8x8xf32> -> vector<8x8xf32>
    %cst_487 = arith.constant 0.353553385 : f32
    %1038 = vector.broadcast %cst_487 : f32 to vector<8x8xf32>
    %1039 = arith.mulf %1037, %1038 : vector<8x8xf32>
    %cst_488 = arith.constant dense<0xFF800000> : vector<8xf32>
    %1040 = vector.multi_reduction <maximumf>, %1039, %cst_488 [1] : vector<8x8xf32> to vector<8xf32>
    %1041 = vector.shape_cast %1040 : vector<8xf32> to vector<8x1xf32>
    %1042 = vector.broadcast %1041 : vector<8x1xf32> to vector<8x8xf32>
    %1043 = arith.subf %1039, %1042 : vector<8x8xf32>
    %1044 = math.exp %1043 : vector<8x8xf32>
    %cst_489 = arith.constant dense<0.000000e+00> : vector<8xf32>
    %1045 = vector.multi_reduction <add>, %1044, %cst_489 [1] : vector<8x8xf32> to vector<8xf32>
    %1046 = vector.shape_cast %1045 : vector<8xf32> to vector<8x1xf32>
    %1047 = tpu.reciprocal %1046 {approx = true} : vector<8x1xf32> -> vector<8x1xf32>
    %1048 = vector.broadcast %1047 : vector<8x1xf32> to vector<8x8xf32>
    %1049 = arith.mulf %1044, %1048 : vector<8x8xf32>
    %cst_490 = arith.constant dense<0.000000e+00> : vector<8x8xf32>
    %1050 = tpu.matmul %1049, %1035, %cst_490 {dimension_numbers = #tpu.dot_dimension_numbers<[1], [0], [0], [1], [0, 0, 1, 1], [], []>} : vector<8x8xf32>, vector<8x8xf32>, vector<8x8xf32> -> vector<8x8xf32>
    %c0_491 = arith.constant 0 : index
    %c16_492 = arith.constant 16 : index
    %1051 = vector.load %arg54[%c0_491, %c16_492] : memref<16x32xf32, #tpu.memory_space<vmem>>, vector<8x8xf32>
    tpu.vector_store %arg54[%c0_491, %c16_492], %1050 {strides = array<i32>} : memref<16x32xf32, #tpu.memory_space<vmem>>, vector<8x8xf32>,
    %1052 = vector.extract_strided_slice %994 {offsets = [0, 24], sizes = [8, 8], strides = [1, 1]} : vector<16x96xf32> to vector<8x8xf32>
    %1053 = vector.extract_strided_slice %994 {offsets = [0, 56], sizes = [8, 8], strides = [1, 1]} : vector<16x96xf32> to vector<8x8xf32>
    %1054 = vector.extract_strided_slice %994 {offsets = [0, 88], sizes = [8, 8], strides = [1, 1]} : vector<16x96xf32> to vector<8x8xf32>
    %1055 = tpu.transpose %1053, [1, 0] : vector<8x8xf32> -> vector<8x8xf32>
    %cst_493 = arith.constant dense<0.000000e+00> : vector<8x8xf32>
    %1056 = tpu.matmul %1052, %1055, %cst_493 {dimension_numbers = #tpu.dot_dimension_numbers<[1], [0], [0], [1], [0, 0, 1, 1], [], []>} : vector<8x8xf32>, vector<8x8xf32>, vector<8x8xf32> -> vector<8x8xf32>
    %cst_494 = arith.constant 0.353553385 : f32
    %1057 = vector.broadcast %cst_494 : f32 to vector<8x8xf32>
    %1058 = arith.mulf %1056, %1057 : vector<8x8xf32>
    %cst_495 = arith.constant dense<0xFF800000> : vector<8xf32>
    %1059 = vector.multi_reduction <maximumf>, %1058, %cst_495 [1] : vector<8x8xf32> to vector<8xf32>
    %1060 = vector.shape_cast %1059 : vector<8xf32> to vector<8x1xf32>
    %1061 = vector.broadcast %1060 : vector<8x1xf32> to vector<8x8xf32>
    %1062 = arith.subf %1058, %1061 : vector<8x8xf32>
    %1063 = math.exp %1062 : vector<8x8xf32>
    %cst_496 = arith.constant dense<0.000000e+00> : vector<8xf32>
    %1064 = vector.multi_reduction <add>, %1063, %cst_496 [1] : vector<8x8xf32> to vector<8xf32>
    %1065 = vector.shape_cast %1064 : vector<8xf32> to vector<8x1xf32>
    %1066 = tpu.reciprocal %1065 {approx = true} : vector<8x1xf32> -> vector<8x1xf32>
    %1067 = vector.broadcast %1066 : vector<8x1xf32> to vector<8x8xf32>
    %1068 = arith.mulf %1063, %1067 : vector<8x8xf32>
    %cst_497 = arith.constant dense<0.000000e+00> : vector<8x8xf32>
    %1069 = tpu.matmul %1068, %1054, %cst_497 {dimension_numbers = #tpu.dot_dimension_numbers<[1], [0], [0], [1], [0, 0, 1, 1], [], []>} : vector<8x8xf32>, vector<8x8xf32>, vector<8x8xf32> -> vector<8x8xf32>
    %c0_498 = arith.constant 0 : index
    %c24_499 = arith.constant 24 : index
    %1070 = vector.load %arg54[%c0_498, %c24_499] : memref<16x32xf32, #tpu.memory_space<vmem>>, vector<8x8xf32>
    tpu.vector_store %arg54[%c0_498, %c24_499], %1069 {strides = array<i32>} : memref<16x32xf32, #tpu.memory_space<vmem>>, vector<8x8xf32>,
    %1071 = vector.extract_strided_slice %994 {offsets = [8, 0], sizes = [8, 8], strides = [1, 1]} : vector<16x96xf32> to vector<8x8xf32>
    %1072 = vector.extract_strided_slice %994 {offsets = [8, 32], sizes = [8, 8], strides = [1, 1]} : vector<16x96xf32> to vector<8x8xf32>
    %1073 = vector.extract_strided_slice %994 {offsets = [8, 64], sizes = [8, 8], strides = [1, 1]} : vector<16x96xf32> to vector<8x8xf32>
    %1074 = tpu.transpose %1072, [1, 0] : vector<8x8xf32> -> vector<8x8xf32>
    %cst_500 = arith.constant dense<0.000000e+00> : vector<8x8xf32>
    %1075 = tpu.matmul %1071, %1074, %cst_500 {dimension_numbers = #tpu.dot_dimension_numbers<[1], [0], [0], [1], [0, 0, 1, 1], [], []>} : vector<8x8xf32>, vector<8x8xf32>, vector<8x8xf32> -> vector<8x8xf32>
    %cst_501 = arith.constant 0.353553385 : f32
    %1076 = vector.broadcast %cst_501 : f32 to vector<8x8xf32>
    %1077 = arith.mulf %1075, %1076 : vector<8x8xf32>
    %cst_502 = arith.constant dense<0xFF800000> : vector<8xf32>
    %1078 = vector.multi_reduction <maximumf>, %1077, %cst_502 [1] : vector<8x8xf32> to vector<8xf32>
    %1079 = vector.shape_cast %1078 : vector<8xf32> to vector<8x1xf32>
    %1080 = vector.broadcast %1079 : vector<8x1xf32> to vector<8x8xf32>
    %1081 = arith.subf %1077, %1080 : vector<8x8xf32>
    %1082 = math.exp %1081 : vector<8x8xf32>
    %cst_503 = arith.constant dense<0.000000e+00> : vector<8xf32>
    %1083 = vector.multi_reduction <add>, %1082, %cst_503 [1] : vector<8x8xf32> to vector<8xf32>
    %1084 = vector.shape_cast %1083 : vector<8xf32> to vector<8x1xf32>
    %1085 = tpu.reciprocal %1084 {approx = true} : vector<8x1xf32> -> vector<8x1xf32>
    %1086 = vector.broadcast %1085 : vector<8x1xf32> to vector<8x8xf32>
    %1087 = arith.mulf %1082, %1086 : vector<8x8xf32>
    %cst_504 = arith.constant dense<0.000000e+00> : vector<8x8xf32>
    %1088 = tpu.matmul %1087, %1073, %cst_504 {dimension_numbers = #tpu.dot_dimension_numbers<[1], [0], [0], [1], [0, 0, 1, 1], [], []>} : vector<8x8xf32>, vector<8x8xf32>, vector<8x8xf32> -> vector<8x8xf32>
    %c8_505 = arith.constant 8 : index
    %c0_506 = arith.constant 0 : index
    %1089 = vector.load %arg54[%c8_505, %c0_506] : memref<16x32xf32, #tpu.memory_space<vmem>>, vector<8x8xf32>
    tpu.vector_store %arg54[%c8_505, %c0_506], %1088 {strides = array<i32>} : memref<16x32xf32, #tpu.memory_space<vmem>>, vector<8x8xf32>,
    %1090 = vector.extract_strided_slice %994 {offsets = [8, 8], sizes = [8, 8], strides = [1, 1]} : vector<16x96xf32> to vector<8x8xf32>
    %1091 = vector.extract_strided_slice %994 {offsets = [8, 40], sizes = [8, 8], strides = [1, 1]} : vector<16x96xf32> to vector<8x8xf32>
    %1092 = vector.extract_strided_slice %994 {offsets = [8, 72], sizes = [8, 8], strides = [1, 1]} : vector<16x96xf32> to vector<8x8xf32>
    %1093 = tpu.transpose %1091, [1, 0] : vector<8x8xf32> -> vector<8x8xf32>
    %cst_507 = arith.constant dense<0.000000e+00> : vector<8x8xf32>
    %1094 = tpu.matmul %1090, %1093, %cst_507 {dimension_numbers = #tpu.dot_dimension_numbers<[1], [0], [0], [1], [0, 0, 1, 1], [], []>} : vector<8x8xf32>, vector<8x8xf32>, vector<8x8xf32> -> vector<8x8xf32>
    %cst_508 = arith.constant 0.353553385 : f32
    %1095 = vector.broadcast %cst_508 : f32 to vector<8x8xf32>
    %1096 = arith.mulf %1094, %1095 : vector<8x8xf32>
    %cst_509 = arith.constant dense<0xFF800000> : vector<8xf32>
    %1097 = vector.multi_reduction <maximumf>, %1096, %cst_509 [1] : vector<8x8xf32> to vector<8xf32>
    %1098 = vector.shape_cast %1097 : vector<8xf32> to vector<8x1xf32>
    %1099 = vector.broadcast %1098 : vector<8x1xf32> to vector<8x8xf32>
    %1100 = arith.subf %1096, %1099 : vector<8x8xf32>
    %1101 = math.exp %1100 : vector<8x8xf32>
    %cst_510 = arith.constant dense<0.000000e+00> : vector<8xf32>
    %1102 = vector.multi_reduction <add>, %1101, %cst_510 [1] : vector<8x8xf32> to vector<8xf32>
    %1103 = vector.shape_cast %1102 : vector<8xf32> to vector<8x1xf32>
    %1104 = tpu.reciprocal %1103 {approx = true} : vector<8x1xf32> -> vector<8x1xf32>
    %1105 = vector.broadcast %1104 : vector<8x1xf32> to vector<8x8xf32>
    %1106 = arith.mulf %1101, %1105 : vector<8x8xf32>
    %cst_511 = arith.constant dense<0.000000e+00> : vector<8x8xf32>
    %1107 = tpu.matmul %1106, %1092, %cst_511 {dimension_numbers = #tpu.dot_dimension_numbers<[1], [0], [0], [1], [0, 0, 1, 1], [], []>} : vector<8x8xf32>, vector<8x8xf32>, vector<8x8xf32> -> vector<8x8xf32>
    %c8_512 = arith.constant 8 : index
    %c8_513 = arith.constant 8 : index
    %1108 = vector.load %arg54[%c8_512, %c8_513] : memref<16x32xf32, #tpu.memory_space<vmem>>, vector<8x8xf32>
    tpu.vector_store %arg54[%c8_512, %c8_513], %1107 {strides = array<i32>} : memref<16x32xf32, #tpu.memory_space<vmem>>, vector<8x8xf32>,
    %1109 = vector.extract_strided_slice %994 {offsets = [8, 16], sizes = [8, 8], strides = [1, 1]} : vector<16x96xf32> to vector<8x8xf32>
    %1110 = vector.extract_strided_slice %994 {offsets = [8, 48], sizes = [8, 8], strides = [1, 1]} : vector<16x96xf32> to vector<8x8xf32>
    %1111 = vector.extract_strided_slice %994 {offsets = [8, 80], sizes = [8, 8], strides = [1, 1]} : vector<16x96xf32> to vector<8x8xf32>
    %1112 = tpu.transpose %1110, [1, 0] : vector<8x8xf32> -> vector<8x8xf32>
    %cst_514 = arith.constant dense<0.000000e+00> : vector<8x8xf32>
    %1113 = tpu.matmul %1109, %1112, %cst_514 {dimension_numbers = #tpu.dot_dimension_numbers<[1], [0], [0], [1], [0, 0, 1, 1], [], []>} : vector<8x8xf32>, vector<8x8xf32>, vector<8x8xf32> -> vector<8x8xf32>
    %cst_515 = arith.constant 0.353553385 : f32
    %1114 = vector.broadcast %cst_515 : f32 to vector<8x8xf32>
    %1115 = arith.mulf %1113, %1114 : vector<8x8xf32>
    %cst_516 = arith.constant dense<0xFF800000> : vector<8xf32>
    %1116 = vector.multi_reduction <maximumf>, %1115, %cst_516 [1] : vector<8x8xf32> to vector<8xf32>
    %1117 = vector.shape_cast %1116 : vector<8xf32> to vector<8x1xf32>
    %1118 = vector.broadcast %1117 : vector<8x1xf32> to vector<8x8xf32>
    %1119 = arith.subf %1115, %1118 : vector<8x8xf32>
    %1120 = math.exp %1119 : vector<8x8xf32>
    %cst_517 = arith.constant dense<0.000000e+00> : vector<8xf32>
    %1121 = vector.multi_reduction <add>, %1120, %cst_517 [1] : vector<8x8xf32> to vector<8xf32>
    %1122 = vector.shape_cast %1121 : vector<8xf32> to vector<8x1xf32>
    %1123 = tpu.reciprocal %1122 {approx = true} : vector<8x1xf32> -> vector<8x1xf32>
    %1124 = vector.broadcast %1123 : vector<8x1xf32> to vector<8x8xf32>
    %1125 = arith.mulf %1120, %1124 : vector<8x8xf32>
    %cst_518 = arith.constant dense<0.000000e+00> : vector<8x8xf32>
    %1126 = tpu.matmul %1125, %1111, %cst_518 {dimension_numbers = #tpu.dot_dimension_numbers<[1], [0], [0], [1], [0, 0, 1, 1], [], []>} : vector<8x8xf32>, vector<8x8xf32>, vector<8x8xf32> -> vector<8x8xf32>
    %c8_519 = arith.constant 8 : index
    %c16_520 = arith.constant 16 : index
    %1127 = vector.load %arg54[%c8_519, %c16_520] : memref<16x32xf32, #tpu.memory_space<vmem>>, vector<8x8xf32>
    tpu.vector_store %arg54[%c8_519, %c16_520], %1126 {strides = array<i32>} : memref<16x32xf32, #tpu.memory_space<vmem>>, vector<8x8xf32>,
    %1128 = vector.extract_strided_slice %994 {offsets = [8, 24], sizes = [8, 8], strides = [1, 1]} : vector<16x96xf32> to vector<8x8xf32>
    %1129 = vector.extract_strided_slice %994 {offsets = [8, 56], sizes = [8, 8], strides = [1, 1]} : vector<16x96xf32> to vector<8x8xf32>
    %1130 = vector.extract_strided_slice %994 {offsets = [8, 88], sizes = [8, 8], strides = [1, 1]} : vector<16x96xf32> to vector<8x8xf32>
    %1131 = tpu.transpose %1129, [1, 0] : vector<8x8xf32> -> vector<8x8xf32>
    %cst_521 = arith.constant dense<0.000000e+00> : vector<8x8xf32>
    %1132 = tpu.matmul %1128, %1131, %cst_521 {dimension_numbers = #tpu.dot_dimension_numbers<[1], [0], [0], [1], [0, 0, 1, 1], [], []>} : vector<8x8xf32>, vector<8x8xf32>, vector<8x8xf32> -> vector<8x8xf32>
    %cst_522 = arith.constant 0.353553385 : f32
    %1133 = vector.broadcast %cst_522 : f32 to vector<8x8xf32>
    %1134 = arith.mulf %1132, %1133 : vector<8x8xf32>
    %cst_523 = arith.constant dense<0xFF800000> : vector<8xf32>
    %1135 = vector.multi_reduction <maximumf>, %1134, %cst_523 [1] : vector<8x8xf32> to vector<8xf32>
    %1136 = vector.shape_cast %1135 : vector<8xf32> to vector<8x1xf32>
    %1137 = vector.broadcast %1136 : vector<8x1xf32> to vector<8x8xf32>
    %1138 = arith.subf %1134, %1137 : vector<8x8xf32>
    %1139 = math.exp %1138 : vector<8x8xf32>
    %cst_524 = arith.constant dense<0.000000e+00> : vector<8xf32>
    %1140 = vector.multi_reduction <add>, %1139, %cst_524 [1] : vector<8x8xf32> to vector<8xf32>
    %1141 = vector.shape_cast %1140 : vector<8xf32> to vector<8x1xf32>
    %1142 = tpu.reciprocal %1141 {approx = true} : vector<8x1xf32> -> vector<8x1xf32>
    %1143 = vector.broadcast %1142 : vector<8x1xf32> to vector<8x8xf32>
    %1144 = arith.mulf %1139, %1143 : vector<8x8xf32>
    %cst_525 = arith.constant dense<0.000000e+00> : vector<8x8xf32>
    %1145 = tpu.matmul %1144, %1130, %cst_525 {dimension_numbers = #tpu.dot_dimension_numbers<[1], [0], [0], [1], [0, 0, 1, 1], [], []>} : vector<8x8xf32>, vector<8x8xf32>, vector<8x8xf32> -> vector<8x8xf32>
    %c8_526 = arith.constant 8 : index
    %c24_527 = arith.constant 24 : index
    %1146 = vector.load %arg54[%c8_526, %c24_527] : memref<16x32xf32, #tpu.memory_space<vmem>>, vector<8x8xf32>
    tpu.vector_store %arg54[%c8_526, %c24_527], %1145 {strides = array<i32>} : memref<16x32xf32, #tpu.memory_space<vmem>>, vector<8x8xf32>,
    %c0_528 = arith.constant 0 : index
    %c0_529 = arith.constant 0 : index
    %1147 = vector.load %arg54[%c0_528, %c0_529] : memref<16x32xf32, #tpu.memory_space<vmem>>, vector<16x32xf32>
    %c0_530 = arith.constant 0 : index
    %c0_531 = arith.constant 0 : index
    %c0_532 = arith.constant 0 : index
    %1148 = vector.load %arg41[%c0_530, %c0_531, %c0_532] : memref<2x32x32xf32, #tpu.memory_space<vmem>>, vector<1x32x32xf32>
    %1149 = vector.shape_cast %1148 : vector<1x32x32xf32> to vector<32x32xf32>
    %cst_533 = arith.constant dense<0.000000e+00> : vector<16x32xf32>
    %1150 = tpu.matmul %1147, %1149, %cst_533 {dimension_numbers = #tpu.dot_dimension_numbers<[1], [0], [0], [1], [0, 0, 1, 1], [], []>} : vector<16x32xf32>, vector<32x32xf32>, vector<16x32xf32> -> vector<16x32xf32>
    %c0_534 = arith.constant 0 : index
    %c0_535 = arith.constant 0 : index
    %c0_536 = arith.constant 0 : index
    %1151 = vector.load %arg42[%c0_534, %c0_535, %c0_536] : memref<2x1x32xf32, #tpu.memory_space<vmem>>, vector<1x1x32xf32>
    %1152 = vector.shape_cast %1151 : vector<1x1x32xf32> to vector<1x32xf32>
    %1153 = vector.broadcast %1152 : vector<1x32xf32> to vector<16x32xf32>
    %1154 = arith.addf %1150, %1153 : vector<16x32xf32>
    %1155 = arith.addf %987, %1154 : vector<16x32xf32>
    %c0_537 = arith.constant 0 : index
    %c0_538 = arith.constant 0 : index
    %c0_539 = arith.constant 0 : index
    %1156 = vector.load %arg43[%c0_537, %c0_538, %c0_539] : memref<2x1x32xf32, #tpu.memory_space<vmem>>, vector<1x1x32xf32>
    %1157 = vector.shape_cast %1156 : vector<1x1x32xf32> to vector<1x32xf32>
    %c0_540 = arith.constant 0 : index
    %c0_541 = arith.constant 0 : index
    %c0_542 = arith.constant 0 : index
    %1158 = vector.load %arg44[%c0_540, %c0_541, %c0_542] : memref<2x1x32xf32, #tpu.memory_space<vmem>>, vector<1x1x32xf32>
    %1159 = vector.shape_cast %1158 : vector<1x1x32xf32> to vector<1x32xf32>
    %cst_543 = arith.constant dense<0.000000e+00> : vector<16xf32>
    %1160 = vector.multi_reduction <add>, %1155, %cst_543 [1] : vector<16x32xf32> to vector<16xf32>
    %1161 = vector.shape_cast %1160 : vector<16xf32> to vector<16x1xf32>
    %cst_544 = arith.constant 3.200000e+01 : f32
    %1162 = vector.broadcast %cst_544 : f32 to vector<16x1xf32>
    %1163 = arith.divf %1161, %1162 : vector<16x1xf32>
    %1164 = vector.broadcast %1163 : vector<16x1xf32> to vector<16x32xf32>
    %1165 = arith.subf %1155, %1164 : vector<16x32xf32>
    %1166 = arith.mulf %1165, %1165 : vector<16x32xf32>
    %cst_545 = arith.constant dense<0.000000e+00> : vector<16xf32>
    %1167 = vector.multi_reduction <add>, %1166, %cst_545 [1] : vector<16x32xf32> to vector<16xf32>
    %1168 = vector.shape_cast %1167 : vector<16xf32> to vector<16x1xf32>
    %cst_546 = arith.constant 3.200000e+01 : f32
    %1169 = vector.broadcast %cst_546 : f32 to vector<16x1xf32>
    %1170 = arith.divf %1168, %1169 : vector<16x1xf32>
    %1171 = vector.broadcast %1163 : vector<16x1xf32> to vector<16x32xf32>
    %1172 = arith.subf %1155, %1171 : vector<16x32xf32>
    %cst_547 = arith.constant 9.99999974E-6 : f32
    %1173 = vector.broadcast %cst_547 : f32 to vector<16x1xf32>
    %1174 = arith.addf %1170, %1173 : vector<16x1xf32>
    %1175 = math.rsqrt %1174 : vector<16x1xf32>
    %1176 = vector.broadcast %1175 : vector<16x1xf32> to vector<16x32xf32>
    %1177 = arith.mulf %1172, %1176 : vector<16x32xf32>
    %1178 = vector.broadcast %1157 : vector<1x32xf32> to vector<16x32xf32>
    %1179 = arith.mulf %1177, %1178 : vector<16x32xf32>
    %1180 = vector.broadcast %1159 : vector<1x32xf32> to vector<16x32xf32>
    %1181 = arith.addf %1179, %1180 : vector<16x32xf32>
    %c0_548 = arith.constant 0 : index
    %c0_549 = arith.constant 0 : index
    %c0_550 = arith.constant 0 : index
    %1182 = vector.load %arg45[%c0_548, %c0_549, %c0_550] : memref<2x32x65xf32, #tpu.memory_space<vmem>>, vector<1x32x65xf32>
    %1183 = vector.shape_cast %1182 : vector<1x32x65xf32> to vector<32x65xf32>
    %cst_551 = arith.constant dense<0.000000e+00> : vector<16x65xf32>
    %1184 = tpu.matmul %1181, %1183, %cst_551 {dimension_numbers = #tpu.dot_dimension_numbers<[1], [0], [0], [1], [0, 0, 1, 1], [], []>} : vector<16x32xf32>, vector<32x65xf32>, vector<16x65xf32> -> vector<16x65xf32>
    %c0_552 = arith.constant 0 : index
    %c0_553 = arith.constant 0 : index
    %c0_554 = arith.constant 0 : index
    %1185 = vector.load %arg46[%c0_552, %c0_553, %c0_554] : memref<2x1x65xf32, #tpu.memory_space<vmem>>, vector<1x1x65xf32>
    %1186 = vector.shape_cast %1185 : vector<1x1x65xf32> to vector<1x65xf32>
    %1187 = vector.broadcast %1186 : vector<1x65xf32> to vector<16x65xf32>
    %1188 = arith.addf %1184, %1187 : vector<16x65xf32>
    %cst_555 = arith.constant 0.000000e+00 : f32
    %1189 = vector.broadcast %cst_555 : f32 to vector<16x65xf32>
    %1190 = arith.maximumf %1188, %1189 : vector<16x65xf32>
    %c0_556 = arith.constant 0 : index
    %c0_557 = arith.constant 0 : index
    %c0_558 = arith.constant 0 : index
    %1191 = vector.load %arg47[%c0_556, %c0_557, %c0_558] : memref<2x65x32xf32, #tpu.memory_space<vmem>>, vector<1x65x32xf32>
    %1192 = vector.shape_cast %1191 : vector<1x65x32xf32> to vector<65x32xf32>
    %cst_559 = arith.constant dense<0.000000e+00> : vector<16x32xf32>
    %1193 = tpu.matmul %1190, %1192, %cst_559 {dimension_numbers = #tpu.dot_dimension_numbers<[1], [0], [0], [1], [0, 0, 1, 1], [], []>} : vector<16x65xf32>, vector<65x32xf32>, vector<16x32xf32> -> vector<16x32xf32>
    %c0_560 = arith.constant 0 : index
    %c0_561 = arith.constant 0 : index
    %c0_562 = arith.constant 0 : index
    %1194 = vector.load %arg48[%c0_560, %c0_561, %c0_562] : memref<2x1x32xf32, #tpu.memory_space<vmem>>, vector<1x1x32xf32>
    %1195 = vector.shape_cast %1194 : vector<1x1x32xf32> to vector<1x32xf32>
    %1196 = vector.broadcast %1195 : vector<1x32xf32> to vector<16x32xf32>
    %1197 = arith.addf %1193, %1196 : vector<16x32xf32>
    %1198 = arith.addf %1181, %1197 : vector<16x32xf32>
    %c0_563 = arith.constant 0 : index
    %c0_564 = arith.constant 0 : index
    %c0_565 = arith.constant 0 : index
    %1199 = vector.load %arg49[%c0_563, %c0_564, %c0_565] : memref<2x1x32xf32, #tpu.memory_space<vmem>>, vector<1x1x32xf32>
    %1200 = vector.shape_cast %1199 : vector<1x1x32xf32> to vector<1x32xf32>
    %c0_566 = arith.constant 0 : index
    %c0_567 = arith.constant 0 : index
    %c0_568 = arith.constant 0 : index
    %1201 = vector.load %arg50[%c0_566, %c0_567, %c0_568] : memref<2x1x32xf32, #tpu.memory_space<vmem>>, vector<1x1x32xf32>
    %1202 = vector.shape_cast %1201 : vector<1x1x32xf32> to vector<1x32xf32>
    %cst_569 = arith.constant dense<0.000000e+00> : vector<16xf32>
    %1203 = vector.multi_reduction <add>, %1198, %cst_569 [1] : vector<16x32xf32> to vector<16xf32>
    %1204 = vector.shape_cast %1203 : vector<16xf32> to vector<16x1xf32>
    %cst_570 = arith.constant 3.200000e+01 : f32
    %1205 = vector.broadcast %cst_570 : f32 to vector<16x1xf32>
    %1206 = arith.divf %1204, %1205 : vector<16x1xf32>
    %1207 = vector.broadcast %1206 : vector<16x1xf32> to vector<16x32xf32>
    %1208 = arith.subf %1198, %1207 : vector<16x32xf32>
    %1209 = arith.mulf %1208, %1208 : vector<16x32xf32>
    %cst_571 = arith.constant dense<0.000000e+00> : vector<16xf32>
    %1210 = vector.multi_reduction <add>, %1209, %cst_571 [1] : vector<16x32xf32> to vector<16xf32>
    %1211 = vector.shape_cast %1210 : vector<16xf32> to vector<16x1xf32>
    %cst_572 = arith.constant 3.200000e+01 : f32
    %1212 = vector.broadcast %cst_572 : f32 to vector<16x1xf32>
    %1213 = arith.divf %1211, %1212 : vector<16x1xf32>
    %1214 = vector.broadcast %1206 : vector<16x1xf32> to vector<16x32xf32>
    %1215 = arith.subf %1198, %1214 : vector<16x32xf32>
    %cst_573 = arith.constant 9.99999974E-6 : f32
    %1216 = vector.broadcast %cst_573 : f32 to vector<16x1xf32>
    %1217 = arith.addf %1213, %1216 : vector<16x1xf32>
    %1218 = math.rsqrt %1217 : vector<16x1xf32>
    %1219 = vector.broadcast %1218 : vector<16x1xf32> to vector<16x32xf32>
    %1220 = arith.mulf %1215, %1219 : vector<16x32xf32>
    %1221 = vector.broadcast %1200 : vector<1x32xf32> to vector<16x32xf32>
    %1222 = arith.mulf %1220, %1221 : vector<16x32xf32>
    %1223 = vector.broadcast %1202 : vector<1x32xf32> to vector<16x32xf32>
    %1224 = arith.addf %1222, %1223 : vector<16x32xf32>
    %c1_574 = arith.constant 1 : index
    %c0_575 = arith.constant 0 : index
    %c0_576 = arith.constant 0 : index
    %1225 = vector.load %arg39[%c1_574, %c0_575, %c0_576] : memref<2x32x96xf32, #tpu.memory_space<vmem>>, vector<1x32x96xf32>
    %1226 = vector.shape_cast %1225 : vector<1x32x96xf32> to vector<32x96xf32>
    %cst_577 = arith.constant dense<0.000000e+00> : vector<16x96xf32>
    %1227 = tpu.matmul %1224, %1226, %cst_577 {dimension_numbers = #tpu.dot_dimension_numbers<[1], [0], [0], [1], [0, 0, 1, 1], [], []>} : vector<16x32xf32>, vector<32x96xf32>, vector<16x96xf32> -> vector<16x96xf32>
    %c1_578 = arith.constant 1 : index
    %c0_579 = arith.constant 0 : index
    %c0_580 = arith.constant 0 : index
    %1228 = vector.load %arg40[%c1_578, %c0_579, %c0_580] : memref<2x1x96xf32, #tpu.memory_space<vmem>>, vector<1x1x96xf32>
    %1229 = vector.shape_cast %1228 : vector<1x1x96xf32> to vector<1x96xf32>
    %1230 = vector.broadcast %1229 : vector<1x96xf32> to vector<16x96xf32>
    %1231 = arith.addf %1227, %1230 : vector<16x96xf32>
    %1232 = vector.extract_strided_slice %1231 {offsets = [0, 0], sizes = [8, 8], strides = [1, 1]} : vector<16x96xf32> to vector<8x8xf32>
    %1233 = vector.extract_strided_slice %1231 {offsets = [0, 32], sizes = [8, 8], strides = [1, 1]} : vector<16x96xf32> to vector<8x8xf32>
    %1234 = vector.extract_strided_slice %1231 {offsets = [0, 64], sizes = [8, 8], strides = [1, 1]} : vector<16x96xf32> to vector<8x8xf32>
    %1235 = tpu.transpose %1233, [1, 0] : vector<8x8xf32> -> vector<8x8xf32>
    %cst_581 = arith.constant dense<0.000000e+00> : vector<8x8xf32>
    %1236 = tpu.matmul %1232, %1235, %cst_581 {dimension_numbers = #tpu.dot_dimension_numbers<[1], [0], [0], [1], [0, 0, 1, 1], [], []>} : vector<8x8xf32>, vector<8x8xf32>, vector<8x8xf32> -> vector<8x8xf32>
    %cst_582 = arith.constant 0.353553385 : f32
    %1237 = vector.broadcast %cst_582 : f32 to vector<8x8xf32>
    %1238 = arith.mulf %1236, %1237 : vector<8x8xf32>
    %cst_583 = arith.constant dense<0xFF800000> : vector<8xf32>
    %1239 = vector.multi_reduction <maximumf>, %1238, %cst_583 [1] : vector<8x8xf32> to vector<8xf32>
    %1240 = vector.shape_cast %1239 : vector<8xf32> to vector<8x1xf32>
    %1241 = vector.broadcast %1240 : vector<8x1xf32> to vector<8x8xf32>
    %1242 = arith.subf %1238, %1241 : vector<8x8xf32>
    %1243 = math.exp %1242 : vector<8x8xf32>
    %cst_584 = arith.constant dense<0.000000e+00> : vector<8xf32>
    %1244 = vector.multi_reduction <add>, %1243, %cst_584 [1] : vector<8x8xf32> to vector<8xf32>
    %1245 = vector.shape_cast %1244 : vector<8xf32> to vector<8x1xf32>
    %1246 = tpu.reciprocal %1245 {approx = true} : vector<8x1xf32> -> vector<8x1xf32>
    %1247 = vector.broadcast %1246 : vector<8x1xf32> to vector<8x8xf32>
    %1248 = arith.mulf %1243, %1247 : vector<8x8xf32>
    %cst_585 = arith.constant dense<0.000000e+00> : vector<8x8xf32>
    %1249 = tpu.matmul %1248, %1234, %cst_585 {dimension_numbers = #tpu.dot_dimension_numbers<[1], [0], [0], [1], [0, 0, 1, 1], [], []>} : vector<8x8xf32>, vector<8x8xf32>, vector<8x8xf32> -> vector<8x8xf32>
    %c0_586 = arith.constant 0 : index
    %c0_587 = arith.constant 0 : index
    %1250 = vector.load %arg54[%c0_586, %c0_587] : memref<16x32xf32, #tpu.memory_space<vmem>>, vector<8x8xf32>
    tpu.vector_store %arg54[%c0_586, %c0_587], %1249 {strides = array<i32>} : memref<16x32xf32, #tpu.memory_space<vmem>>, vector<8x8xf32>,
    %1251 = vector.extract_strided_slice %1231 {offsets = [0, 8], sizes = [8, 8], strides = [1, 1]} : vector<16x96xf32> to vector<8x8xf32>
    %1252 = vector.extract_strided_slice %1231 {offsets = [0, 40], sizes = [8, 8], strides = [1, 1]} : vector<16x96xf32> to vector<8x8xf32>
    %1253 = vector.extract_strided_slice %1231 {offsets = [0, 72], sizes = [8, 8], strides = [1, 1]} : vector<16x96xf32> to vector<8x8xf32>
    %1254 = tpu.transpose %1252, [1, 0] : vector<8x8xf32> -> vector<8x8xf32>
    %cst_588 = arith.constant dense<0.000000e+00> : vector<8x8xf32>
    %1255 = tpu.matmul %1251, %1254, %cst_588 {dimension_numbers = #tpu.dot_dimension_numbers<[1], [0], [0], [1], [0, 0, 1, 1], [], []>} : vector<8x8xf32>, vector<8x8xf32>, vector<8x8xf32> -> vector<8x8xf32>
    %cst_589 = arith.constant 0.353553385 : f32
    %1256 = vector.broadcast %cst_589 : f32 to vector<8x8xf32>
    %1257 = arith.mulf %1255, %1256 : vector<8x8xf32>
    %cst_590 = arith.constant dense<0xFF800000> : vector<8xf32>
    %1258 = vector.multi_reduction <maximumf>, %1257, %cst_590 [1] : vector<8x8xf32> to vector<8xf32>
    %1259 = vector.shape_cast %1258 : vector<8xf32> to vector<8x1xf32>
    %1260 = vector.broadcast %1259 : vector<8x1xf32> to vector<8x8xf32>
    %1261 = arith.subf %1257, %1260 : vector<8x8xf32>
    %1262 = math.exp %1261 : vector<8x8xf32>
    %cst_591 = arith.constant dense<0.000000e+00> : vector<8xf32>
    %1263 = vector.multi_reduction <add>, %1262, %cst_591 [1] : vector<8x8xf32> to vector<8xf32>
    %1264 = vector.shape_cast %1263 : vector<8xf32> to vector<8x1xf32>
    %1265 = tpu.reciprocal %1264 {approx = true} : vector<8x1xf32> -> vector<8x1xf32>
    %1266 = vector.broadcast %1265 : vector<8x1xf32> to vector<8x8xf32>
    %1267 = arith.mulf %1262, %1266 : vector<8x8xf32>
    %cst_592 = arith.constant dense<0.000000e+00> : vector<8x8xf32>
    %1268 = tpu.matmul %1267, %1253, %cst_592 {dimension_numbers = #tpu.dot_dimension_numbers<[1], [0], [0], [1], [0, 0, 1, 1], [], []>} : vector<8x8xf32>, vector<8x8xf32>, vector<8x8xf32> -> vector<8x8xf32>
    %c0_593 = arith.constant 0 : index
    %c8_594 = arith.constant 8 : index
    %1269 = vector.load %arg54[%c0_593, %c8_594] : memref<16x32xf32, #tpu.memory_space<vmem>>, vector<8x8xf32>
    tpu.vector_store %arg54[%c0_593, %c8_594], %1268 {strides = array<i32>} : memref<16x32xf32, #tpu.memory_space<vmem>>, vector<8x8xf32>,
    %1270 = vector.extract_strided_slice %1231 {offsets = [0, 16], sizes = [8, 8], strides = [1, 1]} : vector<16x96xf32> to vector<8x8xf32>
    %1271 = vector.extract_strided_slice %1231 {offsets = [0, 48], sizes = [8, 8], strides = [1, 1]} : vector<16x96xf32> to vector<8x8xf32>
    %1272 = vector.extract_strided_slice %1231 {offsets = [0, 80], sizes = [8, 8], strides = [1, 1]} : vector<16x96xf32> to vector<8x8xf32>
    %1273 = tpu.transpose %1271, [1, 0] : vector<8x8xf32> -> vector<8x8xf32>
    %cst_595 = arith.constant dense<0.000000e+00> : vector<8x8xf32>
    %1274 = tpu.matmul %1270, %1273, %cst_595 {dimension_numbers = #tpu.dot_dimension_numbers<[1], [0], [0], [1], [0, 0, 1, 1], [], []>} : vector<8x8xf32>, vector<8x8xf32>, vector<8x8xf32> -> vector<8x8xf32>
    %cst_596 = arith.constant 0.353553385 : f32
    %1275 = vector.broadcast %cst_596 : f32 to vector<8x8xf32>
    %1276 = arith.mulf %1274, %1275 : vector<8x8xf32>
    %cst_597 = arith.constant dense<0xFF800000> : vector<8xf32>
    %1277 = vector.multi_reduction <maximumf>, %1276, %cst_597 [1] : vector<8x8xf32> to vector<8xf32>
    %1278 = vector.shape_cast %1277 : vector<8xf32> to vector<8x1xf32>
    %1279 = vector.broadcast %1278 : vector<8x1xf32> to vector<8x8xf32>
    %1280 = arith.subf %1276, %1279 : vector<8x8xf32>
    %1281 = math.exp %1280 : vector<8x8xf32>
    %cst_598 = arith.constant dense<0.000000e+00> : vector<8xf32>
    %1282 = vector.multi_reduction <add>, %1281, %cst_598 [1] : vector<8x8xf32> to vector<8xf32>
    %1283 = vector.shape_cast %1282 : vector<8xf32> to vector<8x1xf32>
    %1284 = tpu.reciprocal %1283 {approx = true} : vector<8x1xf32> -> vector<8x1xf32>
    %1285 = vector.broadcast %1284 : vector<8x1xf32> to vector<8x8xf32>
    %1286 = arith.mulf %1281, %1285 : vector<8x8xf32>
    %cst_599 = arith.constant dense<0.000000e+00> : vector<8x8xf32>
    %1287 = tpu.matmul %1286, %1272, %cst_599 {dimension_numbers = #tpu.dot_dimension_numbers<[1], [0], [0], [1], [0, 0, 1, 1], [], []>} : vector<8x8xf32>, vector<8x8xf32>, vector<8x8xf32> -> vector<8x8xf32>
    %c0_600 = arith.constant 0 : index
    %c16_601 = arith.constant 16 : index
    %1288 = vector.load %arg54[%c0_600, %c16_601] : memref<16x32xf32, #tpu.memory_space<vmem>>, vector<8x8xf32>
    tpu.vector_store %arg54[%c0_600, %c16_601], %1287 {strides = array<i32>} : memref<16x32xf32, #tpu.memory_space<vmem>>, vector<8x8xf32>,
    %1289 = vector.extract_strided_slice %1231 {offsets = [0, 24], sizes = [8, 8], strides = [1, 1]} : vector<16x96xf32> to vector<8x8xf32>
    %1290 = vector.extract_strided_slice %1231 {offsets = [0, 56], sizes = [8, 8], strides = [1, 1]} : vector<16x96xf32> to vector<8x8xf32>
    %1291 = vector.extract_strided_slice %1231 {offsets = [0, 88], sizes = [8, 8], strides = [1, 1]} : vector<16x96xf32> to vector<8x8xf32>
    %1292 = tpu.transpose %1290, [1, 0] : vector<8x8xf32> -> vector<8x8xf32>
    %cst_602 = arith.constant dense<0.000000e+00> : vector<8x8xf32>
    %1293 = tpu.matmul %1289, %1292, %cst_602 {dimension_numbers = #tpu.dot_dimension_numbers<[1], [0], [0], [1], [0, 0, 1, 1], [], []>} : vector<8x8xf32>, vector<8x8xf32>, vector<8x8xf32> -> vector<8x8xf32>
    %cst_603 = arith.constant 0.353553385 : f32
    %1294 = vector.broadcast %cst_603 : f32 to vector<8x8xf32>
    %1295 = arith.mulf %1293, %1294 : vector<8x8xf32>
    %cst_604 = arith.constant dense<0xFF800000> : vector<8xf32>
    %1296 = vector.multi_reduction <maximumf>, %1295, %cst_604 [1] : vector<8x8xf32> to vector<8xf32>
    %1297 = vector.shape_cast %1296 : vector<8xf32> to vector<8x1xf32>
    %1298 = vector.broadcast %1297 : vector<8x1xf32> to vector<8x8xf32>
    %1299 = arith.subf %1295, %1298 : vector<8x8xf32>
    %1300 = math.exp %1299 : vector<8x8xf32>
    %cst_605 = arith.constant dense<0.000000e+00> : vector<8xf32>
    %1301 = vector.multi_reduction <add>, %1300, %cst_605 [1] : vector<8x8xf32> to vector<8xf32>
    %1302 = vector.shape_cast %1301 : vector<8xf32> to vector<8x1xf32>
    %1303 = tpu.reciprocal %1302 {approx = true} : vector<8x1xf32> -> vector<8x1xf32>
    %1304 = vector.broadcast %1303 : vector<8x1xf32> to vector<8x8xf32>
    %1305 = arith.mulf %1300, %1304 : vector<8x8xf32>
    %cst_606 = arith.constant dense<0.000000e+00> : vector<8x8xf32>
    %1306 = tpu.matmul %1305, %1291, %cst_606 {dimension_numbers = #tpu.dot_dimension_numbers<[1], [0], [0], [1], [0, 0, 1, 1], [], []>} : vector<8x8xf32>, vector<8x8xf32>, vector<8x8xf32> -> vector<8x8xf32>
    %c0_607 = arith.constant 0 : index
    %c24_608 = arith.constant 24 : index
    %1307 = vector.load %arg54[%c0_607, %c24_608] : memref<16x32xf32, #tpu.memory_space<vmem>>, vector<8x8xf32>
    tpu.vector_store %arg54[%c0_607, %c24_608], %1306 {strides = array<i32>} : memref<16x32xf32, #tpu.memory_space<vmem>>, vector<8x8xf32>,
    %1308 = vector.extract_strided_slice %1231 {offsets = [8, 0], sizes = [8, 8], strides = [1, 1]} : vector<16x96xf32> to vector<8x8xf32>
    %1309 = vector.extract_strided_slice %1231 {offsets = [8, 32], sizes = [8, 8], strides = [1, 1]} : vector<16x96xf32> to vector<8x8xf32>
    %1310 = vector.extract_strided_slice %1231 {offsets = [8, 64], sizes = [8, 8], strides = [1, 1]} : vector<16x96xf32> to vector<8x8xf32>
    %1311 = tpu.transpose %1309, [1, 0] : vector<8x8xf32> -> vector<8x8xf32>
    %cst_609 = arith.constant dense<0.000000e+00> : vector<8x8xf32>
    %1312 = tpu.matmul %1308, %1311, %cst_609 {dimension_numbers = #tpu.dot_dimension_numbers<[1], [0], [0], [1], [0, 0, 1, 1], [], []>} : vector<8x8xf32>, vector<8x8xf32>, vector<8x8xf32> -> vector<8x8xf32>
    %cst_610 = arith.constant 0.353553385 : f32
    %1313 = vector.broadcast %cst_610 : f32 to vector<8x8xf32>
    %1314 = arith.mulf %1312, %1313 : vector<8x8xf32>
    %cst_611 = arith.constant dense<0xFF800000> : vector<8xf32>
    %1315 = vector.multi_reduction <maximumf>, %1314, %cst_611 [1] : vector<8x8xf32> to vector<8xf32>
    %1316 = vector.shape_cast %1315 : vector<8xf32> to vector<8x1xf32>
    %1317 = vector.broadcast %1316 : vector<8x1xf32> to vector<8x8xf32>
    %1318 = arith.subf %1314, %1317 : vector<8x8xf32>
    %1319 = math.exp %1318 : vector<8x8xf32>
    %cst_612 = arith.constant dense<0.000000e+00> : vector<8xf32>
    %1320 = vector.multi_reduction <add>, %1319, %cst_612 [1] : vector<8x8xf32> to vector<8xf32>
    %1321 = vector.shape_cast %1320 : vector<8xf32> to vector<8x1xf32>
    %1322 = tpu.reciprocal %1321 {approx = true} : vector<8x1xf32> -> vector<8x1xf32>
    %1323 = vector.broadcast %1322 : vector<8x1xf32> to vector<8x8xf32>
    %1324 = arith.mulf %1319, %1323 : vector<8x8xf32>
    %cst_613 = arith.constant dense<0.000000e+00> : vector<8x8xf32>
    %1325 = tpu.matmul %1324, %1310, %cst_613 {dimension_numbers = #tpu.dot_dimension_numbers<[1], [0], [0], [1], [0, 0, 1, 1], [], []>} : vector<8x8xf32>, vector<8x8xf32>, vector<8x8xf32> -> vector<8x8xf32>
    %c8_614 = arith.constant 8 : index
    %c0_615 = arith.constant 0 : index
    %1326 = vector.load %arg54[%c8_614, %c0_615] : memref<16x32xf32, #tpu.memory_space<vmem>>, vector<8x8xf32>
    tpu.vector_store %arg54[%c8_614, %c0_615], %1325 {strides = array<i32>} : memref<16x32xf32, #tpu.memory_space<vmem>>, vector<8x8xf32>,
    %1327 = vector.extract_strided_slice %1231 {offsets = [8, 8], sizes = [8, 8], strides = [1, 1]} : vector<16x96xf32> to vector<8x8xf32>
    %1328 = vector.extract_strided_slice %1231 {offsets = [8, 40], sizes = [8, 8], strides = [1, 1]} : vector<16x96xf32> to vector<8x8xf32>
    %1329 = vector.extract_strided_slice %1231 {offsets = [8, 72], sizes = [8, 8], strides = [1, 1]} : vector<16x96xf32> to vector<8x8xf32>
    %1330 = tpu.transpose %1328, [1, 0] : vector<8x8xf32> -> vector<8x8xf32>
    %cst_616 = arith.constant dense<0.000000e+00> : vector<8x8xf32>
    %1331 = tpu.matmul %1327, %1330, %cst_616 {dimension_numbers = #tpu.dot_dimension_numbers<[1], [0], [0], [1], [0, 0, 1, 1], [], []>} : vector<8x8xf32>, vector<8x8xf32>, vector<8x8xf32> -> vector<8x8xf32>
    %cst_617 = arith.constant 0.353553385 : f32
    %1332 = vector.broadcast %cst_617 : f32 to vector<8x8xf32>
    %1333 = arith.mulf %1331, %1332 : vector<8x8xf32>
    %cst_618 = arith.constant dense<0xFF800000> : vector<8xf32>
    %1334 = vector.multi_reduction <maximumf>, %1333, %cst_618 [1] : vector<8x8xf32> to vector<8xf32>
    %1335 = vector.shape_cast %1334 : vector<8xf32> to vector<8x1xf32>
    %1336 = vector.broadcast %1335 : vector<8x1xf32> to vector<8x8xf32>
    %1337 = arith.subf %1333, %1336 : vector<8x8xf32>
    %1338 = math.exp %1337 : vector<8x8xf32>
    %cst_619 = arith.constant dense<0.000000e+00> : vector<8xf32>
    %1339 = vector.multi_reduction <add>, %1338, %cst_619 [1] : vector<8x8xf32> to vector<8xf32>
    %1340 = vector.shape_cast %1339 : vector<8xf32> to vector<8x1xf32>
    %1341 = tpu.reciprocal %1340 {approx = true} : vector<8x1xf32> -> vector<8x1xf32>
    %1342 = vector.broadcast %1341 : vector<8x1xf32> to vector<8x8xf32>
    %1343 = arith.mulf %1338, %1342 : vector<8x8xf32>
    %cst_620 = arith.constant dense<0.000000e+00> : vector<8x8xf32>
    %1344 = tpu.matmul %1343, %1329, %cst_620 {dimension_numbers = #tpu.dot_dimension_numbers<[1], [0], [0], [1], [0, 0, 1, 1], [], []>} : vector<8x8xf32>, vector<8x8xf32>, vector<8x8xf32> -> vector<8x8xf32>
    %c8_621 = arith.constant 8 : index
    %c8_622 = arith.constant 8 : index
    %1345 = vector.load %arg54[%c8_621, %c8_622] : memref<16x32xf32, #tpu.memory_space<vmem>>, vector<8x8xf32>
    tpu.vector_store %arg54[%c8_621, %c8_622], %1344 {strides = array<i32>} : memref<16x32xf32, #tpu.memory_space<vmem>>, vector<8x8xf32>,
    %1346 = vector.extract_strided_slice %1231 {offsets = [8, 16], sizes = [8, 8], strides = [1, 1]} : vector<16x96xf32> to vector<8x8xf32>
    %1347 = vector.extract_strided_slice %1231 {offsets = [8, 48], sizes = [8, 8], strides = [1, 1]} : vector<16x96xf32> to vector<8x8xf32>
    %1348 = vector.extract_strided_slice %1231 {offsets = [8, 80], sizes = [8, 8], strides = [1, 1]} : vector<16x96xf32> to vector<8x8xf32>
    %1349 = tpu.transpose %1347, [1, 0] : vector<8x8xf32> -> vector<8x8xf32>
    %cst_623 = arith.constant dense<0.000000e+00> : vector<8x8xf32>
    %1350 = tpu.matmul %1346, %1349, %cst_623 {dimension_numbers = #tpu.dot_dimension_numbers<[1], [0], [0], [1], [0, 0, 1, 1], [], []>} : vector<8x8xf32>, vector<8x8xf32>, vector<8x8xf32> -> vector<8x8xf32>
    %cst_624 = arith.constant 0.353553385 : f32
    %1351 = vector.broadcast %cst_624 : f32 to vector<8x8xf32>
    %1352 = arith.mulf %1350, %1351 : vector<8x8xf32>
    %cst_625 = arith.constant dense<0xFF800000> : vector<8xf32>
    %1353 = vector.multi_reduction <maximumf>, %1352, %cst_625 [1] : vector<8x8xf32> to vector<8xf32>
    %1354 = vector.shape_cast %1353 : vector<8xf32> to vector<8x1xf32>
    %1355 = vector.broadcast %1354 : vector<8x1xf32> to vector<8x8xf32>
    %1356 = arith.subf %1352, %1355 : vector<8x8xf32>
    %1357 = math.exp %1356 : vector<8x8xf32>
    %cst_626 = arith.constant dense<0.000000e+00> : vector<8xf32>
    %1358 = vector.multi_reduction <add>, %1357, %cst_626 [1] : vector<8x8xf32> to vector<8xf32>
    %1359 = vector.shape_cast %1358 : vector<8xf32> to vector<8x1xf32>
    %1360 = tpu.reciprocal %1359 {approx = true} : vector<8x1xf32> -> vector<8x1xf32>
    %1361 = vector.broadcast %1360 : vector<8x1xf32> to vector<8x8xf32>
    %1362 = arith.mulf %1357, %1361 : vector<8x8xf32>
    %cst_627 = arith.constant dense<0.000000e+00> : vector<8x8xf32>
    %1363 = tpu.matmul %1362, %1348, %cst_627 {dimension_numbers = #tpu.dot_dimension_numbers<[1], [0], [0], [1], [0, 0, 1, 1], [], []>} : vector<8x8xf32>, vector<8x8xf32>, vector<8x8xf32> -> vector<8x8xf32>
    %c8_628 = arith.constant 8 : index
    %c16_629 = arith.constant 16 : index
    %1364 = vector.load %arg54[%c8_628, %c16_629] : memref<16x32xf32, #tpu.memory_space<vmem>>, vector<8x8xf32>
    tpu.vector_store %arg54[%c8_628, %c16_629], %1363 {strides = array<i32>} : memref<16x32xf32, #tpu.memory_space<vmem>>, vector<8x8xf32>,
    %1365 = vector.extract_strided_slice %1231 {offsets = [8, 24], sizes = [8, 8], strides = [1, 1]} : vector<16x96xf32> to vector<8x8xf32>
    %1366 = vector.extract_strided_slice %1231 {offsets = [8, 56], sizes = [8, 8], strides = [1, 1]} : vector<16x96xf32> to vector<8x8xf32>
    %1367 = vector.extract_strided_slice %1231 {offsets = [8, 88], sizes = [8, 8], strides = [1, 1]} : vector<16x96xf32> to vector<8x8xf32>
    %1368 = tpu.transpose %1366, [1, 0] : vector<8x8xf32> -> vector<8x8xf32>
    %cst_630 = arith.constant dense<0.000000e+00> : vector<8x8xf32>
    %1369 = tpu.matmul %1365, %1368, %cst_630 {dimension_numbers = #tpu.dot_dimension_numbers<[1], [0], [0], [1], [0, 0, 1, 1], [], []>} : vector<8x8xf32>, vector<8x8xf32>, vector<8x8xf32> -> vector<8x8xf32>
    %cst_631 = arith.constant 0.353553385 : f32
    %1370 = vector.broadcast %cst_631 : f32 to vector<8x8xf32>
    %1371 = arith.mulf %1369, %1370 : vector<8x8xf32>
    %cst_632 = arith.constant dense<0xFF800000> : vector<8xf32>
    %1372 = vector.multi_reduction <maximumf>, %1371, %cst_632 [1] : vector<8x8xf32> to vector<8xf32>
    %1373 = vector.shape_cast %1372 : vector<8xf32> to vector<8x1xf32>
    %1374 = vector.broadcast %1373 : vector<8x1xf32> to vector<8x8xf32>
    %1375 = arith.subf %1371, %1374 : vector<8x8xf32>
    %1376 = math.exp %1375 : vector<8x8xf32>
    %cst_633 = arith.constant dense<0.000000e+00> : vector<8xf32>
    %1377 = vector.multi_reduction <add>, %1376, %cst_633 [1] : vector<8x8xf32> to vector<8xf32>
    %1378 = vector.shape_cast %1377 : vector<8xf32> to vector<8x1xf32>
    %1379 = tpu.reciprocal %1378 {approx = true} : vector<8x1xf32> -> vector<8x1xf32>
    %1380 = vector.broadcast %1379 : vector<8x1xf32> to vector<8x8xf32>
    %1381 = arith.mulf %1376, %1380 : vector<8x8xf32>
    %cst_634 = arith.constant dense<0.000000e+00> : vector<8x8xf32>
    %1382 = tpu.matmul %1381, %1367, %cst_634 {dimension_numbers = #tpu.dot_dimension_numbers<[1], [0], [0], [1], [0, 0, 1, 1], [], []>} : vector<8x8xf32>, vector<8x8xf32>, vector<8x8xf32> -> vector<8x8xf32>
    %c8_635 = arith.constant 8 : index
    %c24_636 = arith.constant 24 : index
    %1383 = vector.load %arg54[%c8_635, %c24_636] : memref<16x32xf32, #tpu.memory_space<vmem>>, vector<8x8xf32>
    tpu.vector_store %arg54[%c8_635, %c24_636], %1382 {strides = array<i32>} : memref<16x32xf32, #tpu.memory_space<vmem>>, vector<8x8xf32>,
    %c0_637 = arith.constant 0 : index
    %c0_638 = arith.constant 0 : index
    %1384 = vector.load %arg54[%c0_637, %c0_638] : memref<16x32xf32, #tpu.memory_space<vmem>>, vector<16x32xf32>
    %c1_639 = arith.constant 1 : index
    %c0_640 = arith.constant 0 : index
    %c0_641 = arith.constant 0 : index
    %1385 = vector.load %arg41[%c1_639, %c0_640, %c0_641] : memref<2x32x32xf32, #tpu.memory_space<vmem>>, vector<1x32x32xf32>
    %1386 = vector.shape_cast %1385 : vector<1x32x32xf32> to vector<32x32xf32>
    %cst_642 = arith.constant dense<0.000000e+00> : vector<16x32xf32>
    %1387 = tpu.matmul %1384, %1386, %cst_642 {dimension_numbers = #tpu.dot_dimension_numbers<[1], [0], [0], [1], [0, 0, 1, 1], [], []>} : vector<16x32xf32>, vector<32x32xf32>, vector<16x32xf32> -> vector<16x32xf32>
    %c1_643 = arith.constant 1 : index
    %c0_644 = arith.constant 0 : index
    %c0_645 = arith.constant 0 : index
    %1388 = vector.load %arg42[%c1_643, %c0_644, %c0_645] : memref<2x1x32xf32, #tpu.memory_space<vmem>>, vector<1x1x32xf32>
    %1389 = vector.shape_cast %1388 : vector<1x1x32xf32> to vector<1x32xf32>
    %1390 = vector.broadcast %1389 : vector<1x32xf32> to vector<16x32xf32>
    %1391 = arith.addf %1387, %1390 : vector<16x32xf32>
    %1392 = arith.addf %1224, %1391 : vector<16x32xf32>
    %c1_646 = arith.constant 1 : index
    %c0_647 = arith.constant 0 : index
    %c0_648 = arith.constant 0 : index
    %1393 = vector.load %arg43[%c1_646, %c0_647, %c0_648] : memref<2x1x32xf32, #tpu.memory_space<vmem>>, vector<1x1x32xf32>
    %1394 = vector.shape_cast %1393 : vector<1x1x32xf32> to vector<1x32xf32>
    %c1_649 = arith.constant 1 : index
    %c0_650 = arith.constant 0 : index
    %c0_651 = arith.constant 0 : index
    %1395 = vector.load %arg44[%c1_649, %c0_650, %c0_651] : memref<2x1x32xf32, #tpu.memory_space<vmem>>, vector<1x1x32xf32>
    %1396 = vector.shape_cast %1395 : vector<1x1x32xf32> to vector<1x32xf32>
    %cst_652 = arith.constant dense<0.000000e+00> : vector<16xf32>
    %1397 = vector.multi_reduction <add>, %1392, %cst_652 [1] : vector<16x32xf32> to vector<16xf32>
    %1398 = vector.shape_cast %1397 : vector<16xf32> to vector<16x1xf32>
    %cst_653 = arith.constant 3.200000e+01 : f32
    %1399 = vector.broadcast %cst_653 : f32 to vector<16x1xf32>
    %1400 = arith.divf %1398, %1399 : vector<16x1xf32>
    %1401 = vector.broadcast %1400 : vector<16x1xf32> to vector<16x32xf32>
    %1402 = arith.subf %1392, %1401 : vector<16x32xf32>
    %1403 = arith.mulf %1402, %1402 : vector<16x32xf32>
    %cst_654 = arith.constant dense<0.000000e+00> : vector<16xf32>
    %1404 = vector.multi_reduction <add>, %1403, %cst_654 [1] : vector<16x32xf32> to vector<16xf32>
    %1405 = vector.shape_cast %1404 : vector<16xf32> to vector<16x1xf32>
    %cst_655 = arith.constant 3.200000e+01 : f32
    %1406 = vector.broadcast %cst_655 : f32 to vector<16x1xf32>
    %1407 = arith.divf %1405, %1406 : vector<16x1xf32>
    %1408 = vector.broadcast %1400 : vector<16x1xf32> to vector<16x32xf32>
    %1409 = arith.subf %1392, %1408 : vector<16x32xf32>
    %cst_656 = arith.constant 9.99999974E-6 : f32
    %1410 = vector.broadcast %cst_656 : f32 to vector<16x1xf32>
    %1411 = arith.addf %1407, %1410 : vector<16x1xf32>
    %1412 = math.rsqrt %1411 : vector<16x1xf32>
    %1413 = vector.broadcast %1412 : vector<16x1xf32> to vector<16x32xf32>
    %1414 = arith.mulf %1409, %1413 : vector<16x32xf32>
    %1415 = vector.broadcast %1394 : vector<1x32xf32> to vector<16x32xf32>
    %1416 = arith.mulf %1414, %1415 : vector<16x32xf32>
    %1417 = vector.broadcast %1396 : vector<1x32xf32> to vector<16x32xf32>
    %1418 = arith.addf %1416, %1417 : vector<16x32xf32>
    %c1_657 = arith.constant 1 : index
    %c0_658 = arith.constant 0 : index
    %c0_659 = arith.constant 0 : index
    %1419 = vector.load %arg45[%c1_657, %c0_658, %c0_659] : memref<2x32x65xf32, #tpu.memory_space<vmem>>, vector<1x32x65xf32>
    %1420 = vector.shape_cast %1419 : vector<1x32x65xf32> to vector<32x65xf32>
    %cst_660 = arith.constant dense<0.000000e+00> : vector<16x65xf32>
    %1421 = tpu.matmul %1418, %1420, %cst_660 {dimension_numbers = #tpu.dot_dimension_numbers<[1], [0], [0], [1], [0, 0, 1, 1], [], []>} : vector<16x32xf32>, vector<32x65xf32>, vector<16x65xf32> -> vector<16x65xf32>
    %c1_661 = arith.constant 1 : index
    %c0_662 = arith.constant 0 : index
    %c0_663 = arith.constant 0 : index
    %1422 = vector.load %arg46[%c1_661, %c0_662, %c0_663] : memref<2x1x65xf32, #tpu.memory_space<vmem>>, vector<1x1x65xf32>
    %1423 = vector.shape_cast %1422 : vector<1x1x65xf32> to vector<1x65xf32>
    %1424 = vector.broadcast %1423 : vector<1x65xf32> to vector<16x65xf32>
    %1425 = arith.addf %1421, %1424 : vector<16x65xf32>
    %cst_664 = arith.constant 0.000000e+00 : f32
    %1426 = vector.broadcast %cst_664 : f32 to vector<16x65xf32>
    %1427 = arith.maximumf %1425, %1426 : vector<16x65xf32>
    %c1_665 = arith.constant 1 : index
    %c0_666 = arith.constant 0 : index
    %c0_667 = arith.constant 0 : index
    %1428 = vector.load %arg47[%c1_665, %c0_666, %c0_667] : memref<2x65x32xf32, #tpu.memory_space<vmem>>, vector<1x65x32xf32>
    %1429 = vector.shape_cast %1428 : vector<1x65x32xf32> to vector<65x32xf32>
    %cst_668 = arith.constant dense<0.000000e+00> : vector<16x32xf32>
    %1430 = tpu.matmul %1427, %1429, %cst_668 {dimension_numbers = #tpu.dot_dimension_numbers<[1], [0], [0], [1], [0, 0, 1, 1], [], []>} : vector<16x65xf32>, vector<65x32xf32>, vector<16x32xf32> -> vector<16x32xf32>
    %c1_669 = arith.constant 1 : index
    %c0_670 = arith.constant 0 : index
    %c0_671 = arith.constant 0 : index
    %1431 = vector.load %arg48[%c1_669, %c0_670, %c0_671] : memref<2x1x32xf32, #tpu.memory_space<vmem>>, vector<1x1x32xf32>
    %1432 = vector.shape_cast %1431 : vector<1x1x32xf32> to vector<1x32xf32>
    %1433 = vector.broadcast %1432 : vector<1x32xf32> to vector<16x32xf32>
    %1434 = arith.addf %1430, %1433 : vector<16x32xf32>
    %1435 = arith.addf %1418, %1434 : vector<16x32xf32>
    %c1_672 = arith.constant 1 : index
    %c0_673 = arith.constant 0 : index
    %c0_674 = arith.constant 0 : index
    %1436 = vector.load %arg49[%c1_672, %c0_673, %c0_674] : memref<2x1x32xf32, #tpu.memory_space<vmem>>, vector<1x1x32xf32>
    %1437 = vector.shape_cast %1436 : vector<1x1x32xf32> to vector<1x32xf32>
    %c1_675 = arith.constant 1 : index
    %c0_676 = arith.constant 0 : index
    %c0_677 = arith.constant 0 : index
    %1438 = vector.load %arg50[%c1_675, %c0_676, %c0_677] : memref<2x1x32xf32, #tpu.memory_space<vmem>>, vector<1x1x32xf32>
    %1439 = vector.shape_cast %1438 : vector<1x1x32xf32> to vector<1x32xf32>
    %cst_678 = arith.constant dense<0.000000e+00> : vector<16xf32>
    %1440 = vector.multi_reduction <add>, %1435, %cst_678 [1] : vector<16x32xf32> to vector<16xf32>
    %1441 = vector.shape_cast %1440 : vector<16xf32> to vector<16x1xf32>
    %cst_679 = arith.constant 3.200000e+01 : f32
    %1442 = vector.broadcast %cst_679 : f32 to vector<16x1xf32>
    %1443 = arith.divf %1441, %1442 : vector<16x1xf32>
    %1444 = vector.broadcast %1443 : vector<16x1xf32> to vector<16x32xf32>
    %1445 = arith.subf %1435, %1444 : vector<16x32xf32>
    %1446 = arith.mulf %1445, %1445 : vector<16x32xf32>
    %cst_680 = arith.constant dense<0.000000e+00> : vector<16xf32>
    %1447 = vector.multi_reduction <add>, %1446, %cst_680 [1] : vector<16x32xf32> to vector<16xf32>
    %1448 = vector.shape_cast %1447 : vector<16xf32> to vector<16x1xf32>
    %cst_681 = arith.constant 3.200000e+01 : f32
    %1449 = vector.broadcast %cst_681 : f32 to vector<16x1xf32>
    %1450 = arith.divf %1448, %1449 : vector<16x1xf32>
    %1451 = vector.broadcast %1443 : vector<16x1xf32> to vector<16x32xf32>
    %1452 = arith.subf %1435, %1451 : vector<16x32xf32>
    %cst_682 = arith.constant 9.99999974E-6 : f32
    %1453 = vector.broadcast %cst_682 : f32 to vector<16x1xf32>
    %1454 = arith.addf %1450, %1453 : vector<16x1xf32>
    %1455 = math.rsqrt %1454 : vector<16x1xf32>
    %1456 = vector.broadcast %1455 : vector<16x1xf32> to vector<16x32xf32>
    %1457 = arith.mulf %1452, %1456 : vector<16x32xf32>
    %1458 = vector.broadcast %1437 : vector<1x32xf32> to vector<16x32xf32>
    %1459 = arith.mulf %1457, %1458 : vector<16x32xf32>
    %1460 = vector.broadcast %1439 : vector<1x32xf32> to vector<16x32xf32>
    %1461 = arith.addf %1459, %1460 : vector<16x32xf32>
    %c0_683 = arith.constant 0 : index
    %c0_684 = arith.constant 0 : index
    %1462 = vector.load %arg37[%c0_683, %c0_684] : memref<32x3xf32, #tpu.memory_space<vmem>>, vector<32x3xf32>
    %cst_685 = arith.constant dense<0.000000e+00> : vector<16x3xf32>
    %1463 = tpu.matmul %1461, %1462, %cst_685 {dimension_numbers = #tpu.dot_dimension_numbers<[1], [0], [0], [1], [0, 0, 1, 1], [], []>} : vector<16x32xf32>, vector<32x3xf32>, vector<16x3xf32> -> vector<16x3xf32>
    %c0_686 = arith.constant 0 : index
    %c0_687 = arith.constant 0 : index
    %1464 = vector.load %arg38[%c0_686, %c0_687] : memref<1x3xf32, #tpu.memory_space<vmem>>, vector<1x3xf32>
    %1465 = vector.broadcast %1464 : vector<1x3xf32> to vector<16x3xf32>
    %1466 = arith.addf %1463, %1465 : vector<16x3xf32>
    %c0_688 = arith.constant 0 : index
    %c0_689 = arith.constant 0 : index
    %1467 = vector.load %arg53[%c0_688, %c0_689] : memref<16x3xf32, #tpu.memory_space<vmem>>, vector<16x3xf32>
    tpu.vector_store %arg53[%c0_688, %c0_689], %1466 {strides = array<i32>} : memref<16x3xf32, #tpu.memory_space<vmem>>, vector<16x3xf32>,
    return
  }
  func.func @transform_0(%arg0: i32) -> (i32, i32) {
    %c0_i32 = arith.constant 0 : i32
    %c0_i32_0 = arith.constant 0 : i32
    %c0_i32_1 = arith.constant 0 : i32
    return %c0_i32, %c0_i32_0 : i32, i32
  }
  func.func @transform_1(%arg0: i32) -> (i32, i32) {
    %c0_i32 = arith.constant 0 : i32
    %c0_i32_0 = arith.constant 0 : i32
    %c0_i32_1 = arith.constant 0 : i32
    return %c0_i32, %c0_i32_0 : i32, i32
  }
  func.func @transform_2(%arg0: i32) -> (i32, i32) {
    %c0_i32 = arith.constant 0 : i32
    %c0_i32_0 = arith.constant 0 : i32
    %c0_i32_1 = arith.constant 0 : i32
    return %c0_i32, %c0_i32_0 : i32, i32
  }
  func.func @transform_3(%arg0: i32) -> (i32, i32) {
    %c0_i32 = arith.constant 0 : i32
    %c0_i32_0 = arith.constant 0 : i32
    %c0_i32_1 = arith.constant 0 : i32
    return %c0_i32, %c0_i32_0 : i32, i32
  }
  func.func @transform_4(%arg0: i32) -> (i32, i32) {
    %c0_i32 = arith.constant 0 : i32
    %c0_i32_0 = arith.constant 0 : i32
    %c0_i32_1 = arith.constant 0 : i32
    return %c0_i32, %c0_i32_0 : i32, i32
  }
  func.func @transform_5(%arg0: i32) -> (i32, i32) {
    %c0_i32 = arith.constant 0 : i32
    %c0_i32_0 = arith.constant 0 : i32
    %c0_i32_1 = arith.constant 0 : i32
    return %c0_i32, %c0_i32_0 : i32, i32
  }
  func.func @transform_6(%arg0: i32) -> (i32, i32, i32) {
    %c0_i32 = arith.constant 0 : i32
    %c0_i32_0 = arith.constant 0 : i32
    %c0_i32_1 = arith.constant 0 : i32
    %c0_i32_2 = arith.constant 0 : i32
    return %c0_i32, %c0_i32_0, %c0_i32_1 : i32, i32, i32
  }
  func.func @transform_7(%arg0: i32) -> (i32, i32, i32) {
    %c0_i32 = arith.constant 0 : i32
    %c0_i32_0 = arith.constant 0 : i32
    %c0_i32_1 = arith.constant 0 : i32
    %c0_i32_2 = arith.constant 0 : i32
    return %c0_i32, %c0_i32_0, %c0_i32_1 : i32, i32, i32
  }
  func.func @transform_8(%arg0: i32) -> (i32, i32, i32) {
    %c0_i32 = arith.constant 0 : i32
    %c0_i32_0 = arith.constant 0 : i32
    %c0_i32_1 = arith.constant 0 : i32
    %c0_i32_2 = arith.constant 0 : i32
    return %c0_i32, %c0_i32_0, %c0_i32_1 : i32, i32, i32
  }
  func.func @transform_9(%arg0: i32) -> (i32, i32, i32) {
    %c0_i32 = arith.constant 0 : i32
    %c0_i32_0 = arith.constant 0 : i32
    %c0_i32_1 = arith.constant 0 : i32
    %c0_i32_2 = arith.constant 0 : i32
    return %c0_i32, %c0_i32_0, %c0_i32_1 : i32, i32, i32
  }
  func.func @transform_10(%arg0: i32) -> (i32, i32, i32) {
    %c0_i32 = arith.constant 0 : i32
    %c0_i32_0 = arith.constant 0 : i32
    %c0_i32_1 = arith.constant 0 : i32
    %c0_i32_2 = arith.constant 0 : i32
    return %c0_i32, %c0_i32_0, %c0_i32_1 : i32, i32, i32
  }
  func.func @transform_11(%arg0: i32) -> (i32, i32, i32) {
    %c0_i32 = arith.constant 0 : i32
    %c0_i32_0 = arith.constant 0 : i32
    %c0_i32_1 = arith.constant 0 : i32
    %c0_i32_2 = arith.constant 0 : i32
    return %c0_i32, %c0_i32_0, %c0_i32_1 : i32, i32, i32
  }
  func.func @transform_12(%arg0: i32) -> (i32, i32, i32) {
    %c0_i32 = arith.constant 0 : i32
    %c0_i32_0 = arith.constant 0 : i32
    %c0_i32_1 = arith.constant 0 : i32
    %c0_i32_2 = arith.constant 0 : i32
    return %c0_i32, %c0_i32_0, %c0_i32_1 : i32, i32, i32
  }
  func.func @transform_13(%arg0: i32) -> (i32, i32, i32) {
    %c0_i32 = arith.constant 0 : i32
    %c0_i32_0 = arith.constant 0 : i32
    %c0_i32_1 = arith.constant 0 : i32
    %c0_i32_2 = arith.constant 0 : i32
    return %c0_i32, %c0_i32_0, %c0_i32_1 : i32, i32, i32
  }
  func.func @transform_14(%arg0: i32) -> (i32, i32, i32) {
    %c0_i32 = arith.constant 0 : i32
    %c0_i32_0 = arith.constant 0 : i32
    %c0_i32_1 = arith.constant 0 : i32
    %c0_i32_2 = arith.constant 0 : i32
    return %c0_i32, %c0_i32_0, %c0_i32_1 : i32, i32, i32
  }
  func.func @transform_15(%arg0: i32) -> (i32, i32, i32) {
    %c0_i32 = arith.constant 0 : i32
    %c0_i32_0 = arith.constant 0 : i32
    %c0_i32_1 = arith.constant 0 : i32
    %c0_i32_2 = arith.constant 0 : i32
    return %c0_i32, %c0_i32_0, %c0_i32_1 : i32, i32, i32
  }
  func.func @transform_16(%arg0: i32) -> (i32, i32, i32) {
    %c0_i32 = arith.constant 0 : i32
    %c0_i32_0 = arith.constant 0 : i32
    %c0_i32_1 = arith.constant 0 : i32
    %c0_i32_2 = arith.constant 0 : i32
    return %c0_i32, %c0_i32_0, %c0_i32_1 : i32, i32, i32
  }
  func.func @transform_17(%arg0: i32) -> (i32, i32, i32) {
    %c0_i32 = arith.constant 0 : i32
    %c0_i32_0 = arith.constant 0 : i32
    %c0_i32_1 = arith.constant 0 : i32
    %c0_i32_2 = arith.constant 0 : i32
    return %c0_i32, %c0_i32_0, %c0_i32_1 : i32, i32, i32
  }
  func.func @transform_18(%arg0: i32) -> (i32, i32) {
    %c0_i32 = arith.constant 0 : i32
    %c0_i32_0 = arith.constant 0 : i32
    %c0_i32_1 = arith.constant 0 : i32
    return %c0_i32, %c0_i32_0 : i32, i32
  }
  func.func @transform_19(%arg0: i32) -> (i32, i32) {
    %c0_i32 = arith.constant 0 : i32
    %c0_i32_0 = arith.constant 0 : i32
    %c0_i32_1 = arith.constant 0 : i32
    return %c0_i32, %c0_i32_0 : i32, i32
  }
  func.func @transform_20(%arg0: i32) -> (i32, i32) {
    %c0_i32 = arith.constant 0 : i32
    %c0_i32_0 = arith.constant 0 : i32
    %c0_i32_1 = arith.constant 0 : i32
    return %c0_i32, %c0_i32_0 : i32, i32
  }
  func.func @transform_21(%arg0: i32) -> (i32, i32) {
    %c0_i32 = arith.constant 0 : i32
    %c0_i32_0 = arith.constant 0 : i32
    %c0_i32_1 = arith.constant 0 : i32
    return %c0_i32, %c0_i32_0 : i32, i32
  }
  func.func @transform_22(%arg0: i32) -> (i32, i32, i32) {
    %c0_i32 = arith.constant 0 : i32
    %c0_i32_0 = arith.constant 0 : i32
    %c0_i32_1 = arith.constant 0 : i32
    %c0_i32_2 = arith.constant 0 : i32
    return %c0_i32, %c0_i32_0, %c0_i32_1 : i32, i32, i32
  }
  func.func @transform_23(%arg0: i32) -> (i32, i32, i32) {
    %c0_i32 = arith.constant 0 : i32
    %c0_i32_0 = arith.constant 0 : i32
    %c0_i32_1 = arith.constant 0 : i32
    %c0_i32_2 = arith.constant 0 : i32
    return %c0_i32, %c0_i32_0, %c0_i32_1 : i32, i32, i32
  }
  func.func @transform_24(%arg0: i32) -> (i32, i32, i32) {
    %c0_i32 = arith.constant 0 : i32
    %c0_i32_0 = arith.constant 0 : i32
    %c0_i32_1 = arith.constant 0 : i32
    %c0_i32_2 = arith.constant 0 : i32
    return %c0_i32, %c0_i32_0, %c0_i32_1 : i32, i32, i32
  }
  func.func @transform_25(%arg0: i32) -> (i32, i32, i32) {
    %c0_i32 = arith.constant 0 : i32
    %c0_i32_0 = arith.constant 0 : i32
    %c0_i32_1 = arith.constant 0 : i32
    %c0_i32_2 = arith.constant 0 : i32
    return %c0_i32, %c0_i32_0, %c0_i32_1 : i32, i32, i32
  }
  func.func @transform_26(%arg0: i32) -> (i32, i32, i32) {
    %c0_i32 = arith.constant 0 : i32
    %c0_i32_0 = arith.constant 0 : i32
    %c0_i32_1 = arith.constant 0 : i32
    %c0_i32_2 = arith.constant 0 : i32
    return %c0_i32, %c0_i32_0, %c0_i32_1 : i32, i32, i32
  }
  func.func @transform_27(%arg0: i32) -> (i32, i32, i32) {
    %c0_i32 = arith.constant 0 : i32
    %c0_i32_0 = arith.constant 0 : i32
    %c0_i32_1 = arith.constant 0 : i32
    %c0_i32_2 = arith.constant 0 : i32
    return %c0_i32, %c0_i32_0, %c0_i32_1 : i32, i32, i32
  }
  func.func @transform_28(%arg0: i32) -> (i32, i32, i32) {
    %c0_i32 = arith.constant 0 : i32
    %c0_i32_0 = arith.constant 0 : i32
    %c0_i32_1 = arith.constant 0 : i32
    %c0_i32_2 = arith.constant 0 : i32
    return %c0_i32, %c0_i32_0, %c0_i32_1 : i32, i32, i32
  }
  func.func @transform_29(%arg0: i32) -> (i32, i32, i32) {
    %c0_i32 = arith.constant 0 : i32
    %c0_i32_0 = arith.constant 0 : i32
    %c0_i32_1 = arith.constant 0 : i32
    %c0_i32_2 = arith.constant 0 : i32
    return %c0_i32, %c0_i32_0, %c0_i32_1 : i32, i32, i32
  }
  func.func @transform_30(%arg0: i32) -> (i32, i32, i32) {
    %c0_i32 = arith.constant 0 : i32
    %c0_i32_0 = arith.constant 0 : i32
    %c0_i32_1 = arith.constant 0 : i32
    %c0_i32_2 = arith.constant 0 : i32
    return %c0_i32, %c0_i32_0, %c0_i32_1 : i32, i32, i32
  }
  func.func @transform_31(%arg0: i32) -> (i32, i32, i32) {
    %c0_i32 = arith.constant 0 : i32
    %c0_i32_0 = arith.constant 0 : i32
    %c0_i32_1 = arith.constant 0 : i32
    %c0_i32_2 = arith.constant 0 : i32
    return %c0_i32, %c0_i32_0, %c0_i32_1 : i32, i32, i32
  }
  func.func @transform_32(%arg0: i32) -> (i32, i32, i32) {
    %c0_i32 = arith.constant 0 : i32
    %c0_i32_0 = arith.constant 0 : i32
    %c0_i32_1 = arith.constant 0 : i32
    %c0_i32_2 = arith.constant 0 : i32
    return %c0_i32, %c0_i32_0, %c0_i32_1 : i32, i32, i32
  }
  func.func @transform_33(%arg0: i32) -> (i32, i32, i32) {
    %c0_i32 = arith.constant 0 : i32
    %c0_i32_0 = arith.constant 0 : i32
    %c0_i32_1 = arith.constant 0 : i32
    %c0_i32_2 = arith.constant 0 : i32
    return %c0_i32, %c0_i32_0, %c0_i32_1 : i32, i32, i32
  }
  func.func @transform_34(%arg0: i32) -> (i32, i32) {
    %c0_i32 = arith.constant 0 : i32
    %c0_i32_0 = arith.constant 0 : i32
    %c0_i32_1 = arith.constant 0 : i32
    return %c0_i32, %c0_i32_0 : i32, i32
  }
  func.func @transform_35(%arg0: i32) -> (i32, i32) {
    %c0_i32 = arith.constant 0 : i32
    %c0_i32_0 = arith.constant 0 : i32
    %c0_i32_1 = arith.constant 0 : i32
    return %c0_i32, %c0_i32_0 : i32, i32
  }
  func.func @transform_36(%arg0: i32) -> (i32, i32) {
    %c0_i32 = arith.constant 0 : i32
    %c0_i32_0 = arith.constant 0 : i32
    %c0_i32_1 = arith.constant 0 : i32
    return %c0_i32, %c0_i32_0 : i32, i32
  }
  func.func @transform_37(%arg0: i32) -> (i32, i32) {
    %c0_i32 = arith.constant 0 : i32
    %c0_i32_0 = arith.constant 0 : i32
    %c0_i32_1 = arith.constant 0 : i32
    return %c0_i32, %c0_i32_0 : i32, i32
  }
  func.func @transform_38(%arg0: i32) -> (i32, i32, i32) {
    %c0_i32 = arith.constant 0 : i32
    %c0_i32_0 = arith.constant 0 : i32
    %c0_i32_1 = arith.constant 0 : i32
    %c0_i32_2 = arith.constant 0 : i32
    return %c0_i32, %c0_i32_0, %c0_i32_1 : i32, i32, i32
  }
  func.func @transform_39(%arg0: i32) -> (i32, i32, i32) {
    %c0_i32 = arith.constant 0 : i32
    %c0_i32_0 = arith.constant 0 : i32
    %c0_i32_1 = arith.constant 0 : i32
    %c0_i32_2 = arith.constant 0 : i32
    return %c0_i32, %c0_i32_0, %c0_i32_1 : i32, i32, i32
  }
  func.func @transform_40(%arg0: i32) -> (i32, i32, i32) {
    %c0_i32 = arith.constant 0 : i32
    %c0_i32_0 = arith.constant 0 : i32
    %c0_i32_1 = arith.constant 0 : i32
    %c0_i32_2 = arith.constant 0 : i32
    return %c0_i32, %c0_i32_0, %c0_i32_1 : i32, i32, i32
  }
  func.func @transform_41(%arg0: i32) -> (i32, i32, i32) {
    %c0_i32 = arith.constant 0 : i32
    %c0_i32_0 = arith.constant 0 : i32
    %c0_i32_1 = arith.constant 0 : i32
    %c0_i32_2 = arith.constant 0 : i32
    return %c0_i32, %c0_i32_0, %c0_i32_1 : i32, i32, i32
  }
  func.func @transform_42(%arg0: i32) -> (i32, i32, i32) {
    %c0_i32 = arith.constant 0 : i32
    %c0_i32_0 = arith.constant 0 : i32
    %c0_i32_1 = arith.constant 0 : i32
    %c0_i32_2 = arith.constant 0 : i32
    return %c0_i32, %c0_i32_0, %c0_i32_1 : i32, i32, i32
  }
  func.func @transform_43(%arg0: i32) -> (i32, i32, i32) {
    %c0_i32 = arith.constant 0 : i32
    %c0_i32_0 = arith.constant 0 : i32
    %c0_i32_1 = arith.constant 0 : i32
    %c0_i32_2 = arith.constant 0 : i32
    return %c0_i32, %c0_i32_0, %c0_i32_1 : i32, i32, i32
  }
  func.func @transform_44(%arg0: i32) -> (i32, i32, i32) {
    %c0_i32 = arith.constant 0 : i32
    %c0_i32_0 = arith.constant 0 : i32
    %c0_i32_1 = arith.constant 0 : i32
    %c0_i32_2 = arith.constant 0 : i32
    return %c0_i32, %c0_i32_0, %c0_i32_1 : i32, i32, i32
  }
  func.func @transform_45(%arg0: i32) -> (i32, i32, i32) {
    %c0_i32 = arith.constant 0 : i32
    %c0_i32_0 = arith.constant 0 : i32
    %c0_i32_1 = arith.constant 0 : i32
    %c0_i32_2 = arith.constant 0 : i32
    return %c0_i32, %c0_i32_0, %c0_i32_1 : i32, i32, i32
  }
  func.func @transform_46(%arg0: i32) -> (i32, i32, i32) {
    %c0_i32 = arith.constant 0 : i32
    %c0_i32_0 = arith.constant 0 : i32
    %c0_i32_1 = arith.constant 0 : i32
    %c0_i32_2 = arith.constant 0 : i32
    return %c0_i32, %c0_i32_0, %c0_i32_1 : i32, i32, i32
  }
  func.func @transform_47(%arg0: i32) -> (i32, i32, i32) {
    %c0_i32 = arith.constant 0 : i32
    %c0_i32_0 = arith.constant 0 : i32
    %c0_i32_1 = arith.constant 0 : i32
    %c0_i32_2 = arith.constant 0 : i32
    return %c0_i32, %c0_i32_0, %c0_i32_1 : i32, i32, i32
  }
  func.func @transform_48(%arg0: i32) -> (i32, i32, i32) {
    %c0_i32 = arith.constant 0 : i32
    %c0_i32_0 = arith.constant 0 : i32
    %c0_i32_1 = arith.constant 0 : i32
    %c0_i32_2 = arith.constant 0 : i32
    return %c0_i32, %c0_i32_0, %c0_i32_1 : i32, i32, i32
  }
  func.func @transform_49(%arg0: i32) -> (i32, i32, i32) {
    %c0_i32 = arith.constant 0 : i32
    %c0_i32_0 = arith.constant 0 : i32
    %c0_i32_1 = arith.constant 0 : i32
    %c0_i32_2 = arith.constant 0 : i32
    return %c0_i32, %c0_i32_0, %c0_i32_1 : i32, i32, i32
  }
  func.func @transform_50(%arg0: i32) -> (i32, i32) {
    %c0_i32 = arith.constant 0 : i32
    %c0_i32_0 = arith.constant 0 : i32
    %c0_i32_1 = arith.constant 0 : i32
    return %c0_i32, %c0_i32_0 : i32, i32
  }
  func.func @transform_51(%arg0: i32) -> (i32, i32) {
    %c0_i32 = arith.constant 0 : i32
    %c0_i32_0 = arith.constant 0 : i32
    %c0_i32_1 = arith.constant 0 : i32
    return %c0_i32, %c0_i32_0 : i32, i32
  }
  func.func @transform_52(%arg0: i32) -> (i32, i32) {
    %c0_i32 = arith.constant 0 : i32
    %c0_i32_0 = arith.constant 0 : i32
    %c0_i32_1 = arith.constant 0 : i32
    return %c0_i32, %c0_i32_0 : i32, i32
  }
}

</mosaic_0001>

<bundles_post_ra>
// kernel: watch_poser_forward.1
= control target key start
LH: loop header
LB: loop body
LE: loop exit
PB: predicated region body
PF: predicated region fallthrough
CT: control target
= control target key end

     0   :  { %s14937_s6 = smov 1   ;;  %s14938_s10 = smov 2   ;;  %s16889_s0 = inlined_call_operand.smem [shape: u32[53], index: -1, kind: input, shape index: {}] }
   0x1   :  { %s15034_s5 = sld [smem:[%s16889_s0]]   ;;  %s14939_s14 = smov 3  }
   0x2   :  { %s15039_s9 = sld [smem:[%s16889_s0 + %s14937_s6]]   ;;  %s14940_s18 = smov 4  }
   0x3   :  { %s15044_s13 = sld [smem:[%s16889_s0 + %s14938_s10]]   ;;  %s14941_s22 = smov 5  }
   0x4   :  { %s15049_s17 = sld [smem:[%s16889_s0 + %s14939_s14]]   ;;  %s14942_s26 = smov 6  }
   0x5   :  { %s15054_s21 = sld [smem:[%s16889_s0 + %s14940_s18]]   ;;  %s14943_s30 = smov 7  }
   0x6   :  { %s15059_s25 = sld [smem:[%s16889_s0 + %s14941_s22]]   ;;  %s14944_s4 = smov 8  }
   0x7   :  { %16923 = sst [smem:[#allocation43_spill]] %s15034_s5  ;;  %s14945_s10 = smov 9  }
   0x8   :  { %16924 = sst [smem:[#allocation44_spill]] %s15039_s9  ;;  %s14946_s15 = smov 10  }
   0x9   :  { %s15064_s29 = sld [smem:[%s16889_s0 + %s14942_s26]]   ;;  %s14947_s20 = smov 11  }
   0xa   :  { %s15069_s3 = sld [smem:[%s16889_s0 + %s14943_s30]]   ;;  %s14948_s26 = smov 12  }
   0xb   :  { %16925 = sst [smem:[#allocation45_spill]] %s15054_s21  ;;  %s14949_s1 = smov 13  }
   0xc   :  { %s15074_s8 = sld [smem:[%s16889_s0 + %s14944_s4]]   ;;  %s14950_s7 = smov 14  }
   0xd   :  { %s15079_s14 = sld [smem:[%s16889_s0 + %s14945_s10]]   ;;  %s14952_s22 = smov 16  }
   0xe   :  { %s15084_s19 = sld [smem:[%s16889_s0 + %s14946_s15]]   ;;  %s14951_s15 = smov 15  }
   0xf   :  { %16926 = sst [smem:[#allocation46_spill]] %s15064_s29  ;;  %s14953_s28 = smov 17  }
  0x10   :  { %s15089_s24 = sld [smem:[%s16889_s0 + %s14947_s20]]  }
  0x11   :  { %s15094_s30 = sld [smem:[%s16889_s0 + %s14948_s26]]  }
  0x12   :  { %16927 = sst [smem:[#allocation47_spill]] %s15074_s8 }
  0x13   :  { %s15099_s6 = sld [smem:[%s16889_s0 + %s14949_s1]]  }
  0x14   :  { %s15104_s12 = sld [smem:[%s16889_s0 + %s14950_s7]]   ;;  %s14954_s7 = smov 18  }
  0x15   :  { %s15109_s20 = sld [smem:[%s16889_s0 + %s14951_s15]]   ;;  %s14955_s15 = smov 19  }
  0x16   :  { %s15114_s27 = sld [smem:[%s16889_s0 + %s14952_s22]]   ;;  %s14956_s22 = smov 20  }
  0x17   :  { %16928 = sst [smem:[#allocation48_spill]] %s15094_s30 }
  0x18   :  { %s15119_s4 = sld [smem:[%s16889_s0 + %s14953_s28]]   ;;  %s14957_s28 = smov 21  }
  0x19   :  { %s15124_s21 = sld [smem:[%s16889_s0 + %s14954_s7]]   ;;  %s14958_s7 = smov 22  }
  0x1a   :  { %16929 = sst [smem:[#allocation49_spill]] %s15104_s12 }
  0x1b   :  { %s15129_s12 = sld [smem:[%s16889_s0 + %s14955_s15]]   ;;  %s14959_s15 = smov 23  }
  0x1c   :  { %s15134_s30 = sld [smem:[%s16889_s0 + %s14956_s22]]   ;;  %s14960_s22 = smov 24  }
  0x1d   :  { %s15139_s8 = sld [smem:[%s16889_s0 + %s14957_s28]]   ;;  %s14961_s28 = smov 25  }
  0x1e   :  { %s15149_s9 = sld [smem:[%s16889_s0 + %s14959_s15]]   ;;  %s14963_s15 = smov 27  }
  0x1f   :  { %16930 = sst [smem:[#allocation50_spill]] %s15124_s21 }
  0x20   :  { %s15144_s21 = sld [smem:[%s16889_s0 + %s14958_s7]]   ;;  %s14962_s7 = smov 26  }
  0x21   :  { %s15159_s29 = sld [smem:[%s16889_s0 + %s14961_s28]]   ;;  %s14965_s28 = smov 29  }
  0x22   :  { %16931 = sst [smem:[#allocation51_spill]] %s15134_s30 }
  0x23   :  { %s15154_s30 = sld [smem:[%s16889_s0 + %s14960_s22]]   ;;  %s14964_s22 = smov 28  }
  0x24   :  { %16933 = sst [smem:[#allocation53_spill]] %s15149_s9 }
  0x25   :  { %s15169_s9 = sld [smem:[%s16889_s0 + %s14963_s15]]   ;;  %s14967_s15 = smov 31  }
  0x26   :  { %16932 = sst [smem:[#allocation52_spill]] %s15144_s21 }
  0x27   :  { %s15164_s21 = sld [smem:[%s16889_s0 + %s14962_s7]]   ;;  %s14966_s7 = smov 30  }
  0x28   :  { %s15179_s5 = sld [smem:[%s16889_s0 + %s14965_s28]]   ;;  %s14969_s28 = smov 33  }
  0x29   :  { %16934 = sst [smem:[#allocation54_spill]] %s15154_s30 }
  0x2a   :  { %s15174_s30 = sld [smem:[%s16889_s0 + %s14964_s22]]   ;;  %s14968_s22 = smov 32  }
  0x2b   :  { %16936 = sst [smem:[#allocation56_spill]] %s15169_s9 }
  0x2c   :  { %s15189_s9 = sld [smem:[%s16889_s0 + %s14967_s15]]   ;;  %s14971_s15 = smov 35  }
  0x2d   :  { %16935 = sst [smem:[#allocation55_spill]] %s15164_s21 }
  0x2e   :  { %16938 = sst [smem:[#allocation58_spill]] %s15179_s5 }
  0x2f   :  { %s15184_s21 = sld [smem:[%s16889_s0 + %s14966_s7]]   ;;  %s14970_s7 = smov 34  }
  0x30   :  { %16937 = sst [smem:[#allocation57_spill]] %s15174_s30 }
  0x31   :  { %s15194_s30 = sld [smem:[%s16889_s0 + %s14968_s22]]   ;;  %s14972_s22 = smov 36  }
  0x32   :  { %16940 = sst [smem:[#allocation60_spill]] %s15189_s9 }
  0x33   :  { %s15199_s5 = sld [smem:[%s16889_s0 + %s14969_s28]]   ;;  %s14973_s28 = smov 37  }
  0x34   :  { %s15209_s9 = sld [smem:[%s16889_s0 + %s14971_s15]]   ;;  %s14975_s15 = smov 39  }
  0x35   :  { %16939 = sst [smem:[#allocation59_spill]] %s15184_s21 }
  0x36   :  { %s15204_s21 = sld [smem:[%s16889_s0 + %s14970_s7]]   ;;  %s14974_s7 = smov 38  }
  0x37   :  { %16941 = sst [smem:[#allocation61_spill]] %s15194_s30 }
  0x38   :  { %s15214_s30 = sld [smem:[%s16889_s0 + %s14972_s22]]   ;;  %s14976_s22 = smov 40  }
  0x39   :  { %16942 = sst [smem:[#allocation62_spill]] %s15199_s5 }
  0x3a   :  { %16944 = sst [smem:[#allocation64_spill]] %s15209_s9 }
  0x3b   :  { %s15219_s5 = sld [smem:[%s16889_s0 + %s14973_s28]]   ;;  %s14977_s28 = smov 41  }
  0x3c   :  { %16943 = sst [smem:[#allocation63_spill]] %s15204_s21 }
  0x3d   :  { %s15224_s21 = sld [smem:[%s16889_s0 + %s14974_s7]]   ;;  %s14978_s7 = smov 42  }
  0x3e   :  { %16945 = sst [smem:[#allocation65_spill]] %s15214_s30 }
  0x3f   :  { %s15229_s9 = sld [smem:[%s16889_s0 + %s14975_s15]]   ;;  %s14979_s15 = smov 43  }
  0x40   :  { %s15234_s30 = sld [smem:[%s16889_s0 + %s14976_s22]]   ;;  %s14980_s22 = smov 44  }
  0x41   :  { %16946 = sst [smem:[#allocation66_spill]] %s15219_s5 }
  0x42   :  { %s15239_s5 = sld [smem:[%s16889_s0 + %s14977_s28]]   ;;  %s14981_s28 = smov 45  }
  0x43   :  { %16947 = sst [smem:[#allocation67_spill]] %s15224_s21 }
  0x44   :  { %s15244_s21 = sld [smem:[%s16889_s0 + %s14978_s7]]   ;;  %s14982_s7 = smov 46  }
  0x45   :  { %16948 = sst [smem:[#allocation68_spill]] %s15229_s9 }
  0x46   :  { %16949 = sst [smem:[#allocation69_spill]] %s15234_s30 }
  0x47   :  { %s15249_s9 = sld [smem:[%s16889_s0 + %s14979_s15]]   ;;  %s14983_s15 = smov 47  }
  0x48   :  { %16950 = sst [smem:[#allocation70_spill]] %s15239_s5 }
  0x49   :  { %s15254_s30 = sld [smem:[%s16889_s0 + %s14980_s22]]   ;;  %s14984_s22 = smov 48  }
  0x4a   :  { %16951 = sst [smem:[#allocation71_spill]] %s15244_s21 }
  0x4b   :  { %s15259_s5 = sld [smem:[%s16889_s0 + %s14981_s28]]   ;;  %s14985_s28 = smov 49  }
  0x4c   :  { %s15264_s21 = sld [smem:[%s16889_s0 + %s14982_s7]]   ;;  %s14986_s7 = smov 50  }
  0x4d   :  { %16952 = sst [smem:[#allocation72_spill]] %s15249_s9 }
  0x4e   :  { %s15269_s9 = sld [smem:[%s16889_s0 + %s14983_s15]]   ;;  %s14987_s15 = smov 51  }
  0x4f   :  { %16953 = sst [smem:[#allocation73_spill]] %s15254_s30 }
  0x50   :  { %s15274_s30 = sld [smem:[%s16889_s0 + %s14984_s22]]   ;;  %s14988_s22 = smov 52  }
  0x51   :  { %16954 = sst [smem:[#allocation74_spill]] %s15259_s5 }
  0x52   :  { %16955 = sst [smem:[#allocation75_spill]] %s15264_s21 }
  0x53   :  { %s15279_s5 = sld [smem:[%s16889_s0 + %s14985_s28]]  }
  0x54   :  { %16956 = sst [smem:[#allocation76_spill]] %s15269_s9 }
  0x55   :  { %s15284_s21 = sld [smem:[%s16889_s0 + %s14986_s7]]  }
  0x56   :  { %16957 = sst [smem:[#allocation77_spill]] %s15274_s30 }
  0x57   :  { %s15289_s9 = sld [smem:[%s16889_s0 + %s14987_s15]]  }
  0x58   :  { %s15294_s30 = sld [smem:[%s16889_s0 + %s14988_s22]]  }
  0x59   :  { %111 = vsyncpa [#allocation4], 0 }
  0x5a   :  { %112 = vsyncpa [#allocation7], 0 }
  0x5b   :  { %113 = vsyncpa [#allocation10], 0 }
  0x5c   :  { %114 = vsyncpa [#allocation13], 0 }
  0x5d   :  { %115 = vsyncpa [#allocation16], 0 }
  0x5e   :  { %116 = vsyncpa [#allocation19], 0 }
  0x5f   :  { %117 = vsyncpa [#allocation22], 0 }
  0x60   :  { %118 = vsyncpa [#allocation25], 0 }
  0x61   :  { %119 = vsyncpa [#allocation28], 0 }
  0x62   :  { %120 = vsyncpa [#allocation5], 0 }
  0x63   :  { %121 = vsyncpa [#allocation31], 0  ;;  %s14989_s28 = smov [#allocation6]   ;;  %s14990_s2 = smov [#allocation9]  }
  0x64   :  { %s144_s1 = sshll.u32 %s14989_s28, 4  ;;  %s167_s7 = sshll.u32 %s14990_s2, 4  ;;  %s145_s1 = int_to_ptr.vmem [resolvable:$true] %s144_s1  ;;  %s15296_s7 = int_to_ptr.vmem [resolvable:$true] %s167_s7 }
  0x65   :  { %s14519_s0 = scalar_lea.hbm %s15049_s17, 16 }
  0x66   :  { %p14520_p0 = scmp.ne.s32.totalorder %s15049_s17, %s14519_s0  ;;  %p14523_p1 = scmp.lt.u32.totalorder %s14519_s0, %s15049_s17 }
  0x68   :  { %p14525_p2 = pnand %p14523_p1, %p14520_p0 }
  0x6a   :  { %14528 = shalt.err (!%p14525_p2)
}
  0x6b   :  { %s14529_s10 = scalar_lea.vmem %s145_s1, 16  ;;  %s14533_s11 = scalar_lea.vmem %s145_s1, 32 }
  0x6c   :  { %p14530_p3 = scmp.ne.s32.totalorder %s145_s1, %s14529_s10  ;;  %p14534_p4 = scmp.lt.s32.totalorder %s145_s1, %s145_s1 }
  0x6d   :  { %p14535_p5 = scmp.lt.s32.totalorder %s14533_s11, %s14529_s10 }
  0x6f   :  { %p14536_p6 = por %p14535_p5, %p14534_p4 }
  0x71   :  { %p14537_p7 = pnand %p14536_p6, %p14530_p3 }
  0x73   :  { %14540 = shalt.err (!%p14537_p7)
}
  0x74   :  { %147 = dma.hbm_to_vmem [thread:$0]  %s15049_s17, 16, %s145_s1, [#allocation7]  }
  0x75   :  { %s14541_s15 = scalar_lea.hbm %s15069_s3, 32 }
  0x76   :  { %p14542_p8 = scmp.ne.s32.totalorder %s15069_s3, %s14541_s15  ;;  %p14545_p9 = scmp.lt.u32.totalorder %s14541_s15, %s15069_s3 }
  0x78   :  { %p14547_p10 = pnand %p14545_p9, %p14542_p8 }
  0x7a   :  { %14550 = shalt.err (!%p14547_p10)
}
  0x7b   :  { %s14551_s16 = scalar_lea.vmem %s15296_s7, 32  ;;  %p14556_p12 = scmp.lt.s32.totalorder %s15296_s7, %s15296_s7 }
  0x7c   :  { %p14552_p11 = scmp.ne.s32.totalorder %s15296_s7, %s14551_s16  ;;  %p14557_p13 = scmp.lt.s32.totalorder %s14551_s16, %s14551_s16 }
  0x7e   :  { %p14558_p0 = por %p14557_p13, %p14556_p12 }
  0x80   :  { %p14559_p1 = pnand %p14558_p0, %p14552_p11 }
  0x82   :  { %14562 = shalt.err (!%p14559_p1)
}
  0x83   :  { %s14991_s18 = smov 16   ;;  %s14992_s17 = smov 1  }
  0x84   :  { %173 = dma.hbm_to_vmem [thread:$0]  %s15069_s3, 32, %s15296_s7, [#allocation10], %s14991_s18, %s14991_s18, %s14992_s17  }
  0x85   :  { %s14993_s22 = smov [#allocation12]   ;;  %s14994_s26 = smov [#allocation15]  }
  0x86   :  { %s193_s23 = sshll.u32 %s14993_s22, 4  ;;  %s219_s28 = sshll.u32 %s14994_s26, 4  ;;  %s194_s23 = int_to_ptr.vmem [resolvable:$true] %s193_s23  ;;  %s15314_s28 = int_to_ptr.vmem [resolvable:$true] %s219_s28 }
  0x87   :  { %s14563_s1 = scalar_lea.hbm %s15084_s19, 32 }
  0x88   :  { %p14564_p2 = scmp.ne.s32.totalorder %s15084_s19, %s14563_s1  ;;  %p14567_p3 = scmp.lt.u32.totalorder %s14563_s1, %s15084_s19 }
  0x8a   :  { %p14569_p4 = pnand %p14567_p3, %p14564_p2 }
  0x8c   :  { %14572 = shalt.err (!%p14569_p4)
}
  0x8d   :  { %s14573_s2 = scalar_lea.vmem %s194_s23, 32  ;;  %p14578_p6 = scmp.lt.s32.totalorder %s194_s23, %s194_s23 }
  0x8e   :  { %p14574_p5 = scmp.ne.s32.totalorder %s194_s23, %s14573_s2  ;;  %p14579_p7 = scmp.lt.s32.totalorder %s14573_s2, %s14573_s2 }
  0x90   :  { %p14580_p8 = por %p14579_p7, %p14578_p6 }
  0x92   :  { %p14581_p9 = pnand %p14580_p8, %p14574_p5 }
  0x94   :  { %14584 = shalt.err (!%p14581_p9)
}
  0x95   :  { %199 = dma.hbm_to_vmem [thread:$0]  %s15084_s19, 32, %s194_s23, [#allocation13], %s14991_s18, %s14991_s18, %s14992_s17  }
  0x96   :  { %s14585_s3 = scalar_lea.hbm %s15099_s6, 32 }
  0x97   :  { %p14586_p10 = scmp.ne.s32.totalorder %s15099_s6, %s14585_s3  ;;  %p14589_p11 = scmp.lt.u32.totalorder %s14585_s3, %s15099_s6 }
  0x99   :  { %p14591_p12 = pnand %p14589_p11, %p14586_p10 }
  0x9b   :  { %14594 = shalt.err (!%p14591_p12)
}
  0x9c   :  { %s14595_s7 = scalar_lea.vmem %s15314_s28, 32  ;;  %p14600_p0 = scmp.lt.s32.totalorder %s15314_s28, %s15314_s28 }
  0x9d   :  { %p14596_p13 = scmp.ne.s32.totalorder %s15314_s28, %s14595_s7  ;;  %p14601_p1 = scmp.lt.s32.totalorder %s14595_s7, %s14595_s7 }
  0x9f   :  { %p14602_p2 = por %p14601_p1, %p14600_p0 }
  0xa1   :  { %p14603_p3 = pnand %p14602_p2, %p14596_p13 }
  0xa3   :  { %14606 = shalt.err (!%p14603_p3)
}
  0xa4   :  { %225 = dma.hbm_to_vmem [thread:$0]  %s15099_s6, 32, %s15314_s28, [#allocation16], %s14991_s18, %s14991_s18, %s14992_s17  }
  0xa5   :  { %s14995_s19 = smov [#allocation18]   ;;  %s14996_s10 = smov [#allocation21]  }
  0xa6   :  { %s245_s0 = sshll.u32 %s14995_s19, 4  ;;  %s272_s11 = sshll.u32 %s14996_s10, 4  ;;  %s246_s0 = int_to_ptr.vmem [resolvable:$true] %s245_s0  ;;  %s273_s11 = int_to_ptr.vmem [resolvable:$true] %s272_s11 }
  0xa7   :  { %s14607_s15 = scalar_lea.hbm %s15114_s27, 32 }
  0xa8   :  { %p14608_p4 = scmp.ne.s32.totalorder %s15114_s27, %s14607_s15  ;;  %p14611_p5 = scmp.lt.u32.totalorder %s14607_s15, %s15114_s27 }
  0xaa   :  { %p14613_p6 = pnand %p14611_p5, %p14608_p4 }
  0xac   :  { %14616 = shalt.err (!%p14613_p6)
}
  0xad   :  { %s14617_s16 = scalar_lea.vmem %s246_s0, 32  ;;  %p14622_p8 = scmp.lt.s32.totalorder %s246_s0, %s246_s0 }
  0xae   :  { %p14618_p7 = scmp.ne.s32.totalorder %s246_s0, %s14617_s16  ;;  %p14623_p9 = scmp.lt.s32.totalorder %s14617_s16, %s14617_s16 }
  0xb0   :  { %p14624_p10 = por %p14623_p9, %p14622_p8 }
  0xb2   :  { %p14625_p11 = pnand %p14624_p10, %p14618_p7 }
  0xb4   :  { %14628 = shalt.err (!%p14625_p11)
}
  0xb5   :  { %251 = dma.hbm_to_vmem [thread:$0]  %s15114_s27, 32, %s246_s0, [#allocation19], %s14991_s18, %s14991_s18, %s14992_s17  }
  0xb6   :  { %s14629_s6 = scalar_lea.hbm %s15129_s12, 16 }
  0xb7   :  { %p14630_p12 = scmp.ne.s32.totalorder %s15129_s12, %s14629_s6  ;;  %p14633_p13 = scmp.lt.u32.totalorder %s14629_s6, %s15129_s12 }
  0xb9   :  { %p14635_p0 = pnand %p14633_p13, %p14630_p12 }
  0xbb   :  { %14638 = shalt.err (!%p14635_p0)
}
  0xbc   :  { %s14639_s22 = scalar_lea.vmem %s273_s11, 16  ;;  %s14643_s23 = scalar_lea.vmem %s273_s11, 32 }
  0xbd   :  { %p14640_p1 = scmp.ne.s32.totalorder %s273_s11, %s14639_s22  ;;  %p14644_p2 = scmp.lt.s32.totalorder %s273_s11, %s273_s11 }
  0xbe   :  { %p14645_p3 = scmp.lt.s32.totalorder %s14643_s23, %s14639_s22 }
  0xc0   :  { %p14646_p4 = por %p14645_p3, %p14644_p2 }
  0xc2   :  { %p14647_p5 = pnand %p14646_p4, %p14640_p1 }
  0xc4   :  { %14650 = shalt.err (!%p14647_p5)
}
  0xc5   :  { %275 = dma.hbm_to_vmem [thread:$0]  %s15129_s12, 16, %s273_s11, [#allocation22]  }
  0xc6   :  { %s14997_s26 = smov [#allocation24]   ;;  %s14998_s28 = smov [#allocation3]  }
  0xc7   :  { %s299_s27 = sshll.u32 %s14997_s26, 4  ;;  %s131_s1 = sshll.u32 %s14998_s28, 4  ;;  %s300_s27 = int_to_ptr.vmem [resolvable:$true] %s299_s27  ;;  %s15346_s1 = int_to_ptr.vmem [resolvable:$true] %s131_s1 }
  0xc8   :  { %s14651_s2 = scalar_lea.hbm %s15159_s29, 32 }
  0xc9   :  { %p14652_p6 = scmp.ne.s32.totalorder %s15159_s29, %s14651_s2  ;;  %p14655_p7 = scmp.lt.u32.totalorder %s14651_s2, %s15159_s29 }
  0xcb   :  { %p14657_p8 = pnand %p14655_p7, %p14652_p6 }
  0xcd   :  { %14660 = shalt.err (!%p14657_p8)
}
  0xce   :  { %s14661_s3 = scalar_lea.vmem %s300_s27, 32  ;;  %p14666_p10 = scmp.lt.s32.totalorder %s300_s27, %s300_s27 }
  0xcf   :  { %p14662_p9 = scmp.ne.s32.totalorder %s300_s27, %s14661_s3  ;;  %p14667_p11 = scmp.lt.s32.totalorder %s14661_s3, %s14661_s3 }
  0xd1   :  { %p14668_p12 = por %p14667_p11, %p14666_p10 }
  0xd3   :  { %p14669_p13 = pnand %p14668_p12, %p14662_p9 }
  0xd5   :  { %14672 = shalt.err (!%p14669_p13)
}
  0xd6   :  { %305 = dma.hbm_to_vmem [thread:$0]  %s15159_s29, 32, %s300_s27, [#allocation25], %s14991_s18, %s14991_s18, %s14992_s17  }
  0xd7   :  { %s14673_s12 = scalar_lea.hbm %s15044_s13, 256 }
  0xd8   :  { %p14674_p0 = scmp.ne.s32.totalorder %s15044_s13, %s14673_s12  ;;  %p14677_p1 = scmp.lt.u32.totalorder %s14673_s12, %s15044_s13 }
  0xda   :  { %p14679_p2 = pnand %p14677_p1, %p14674_p0 }
  0xdc   :  { %14682 = shalt.err (!%p14679_p2)
}
  0xdd   :  { %s14683_s7 = scalar_lea.vmem %s15346_s1, 256  ;;  %p14688_p4 = scmp.lt.s32.totalorder %s15346_s1, %s15346_s1 }
  0xde   :  { %p14684_p3 = scmp.ne.s32.totalorder %s15346_s1, %s14683_s7  ;;  %p14689_p5 = scmp.lt.s32.totalorder %s14683_s7, %s14683_s7 }
  0xe0   :  { %p14690_p6 = por %p14689_p5, %p14688_p4 }
  0xe2   :  { %p14691_p7 = pnand %p14690_p6, %p14684_p3 }
  0xe4   :  { %14694 = shalt.err (!%p14691_p7)
}
  0xe5   :  { %s14999_s19 = smov 128   ;;  %s15000_s29 = smov 8  }
  0xe6   :  { %137 = dma.hbm_to_vmem [thread:$0]  %s15044_s13, 256, %s15346_s1, [#allocation4], %s14999_s19, %s14999_s19, %s15000_s29  }
  0xe7   :  { %s15001_s0 = smov [#allocation8]   ;;  %s15002_s11 = smov [#allocation11]  }
  0xe8   :  { %s156_s10 = sshll.u32 %s15001_s0, 4  ;;  %s181_s15 = sshll.u32 %s15002_s11, 4  ;;  %s157_s10 = int_to_ptr.vmem [resolvable:$true] %s156_s10  ;;  %s15367_s15 = int_to_ptr.vmem [resolvable:$true] %s181_s15 }
  0xe9   :  { %s14695_s16 = scalar_lea.hbm %s15059_s25, 16 }
  0xea   :  { %p14696_p8 = scmp.ne.s32.totalorder %s15059_s25, %s14695_s16  ;;  %p14699_p9 = scmp.lt.u32.totalorder %s14695_s16, %s15059_s25 }
  0xec   :  { %p14701_p10 = pnand %p14699_p9, %p14696_p8 }
  0xee   :  { %14704 = shalt.err (!%p14701_p10)
}
  0xef   :  { %s14705_s6 = scalar_lea.vmem %s157_s10, 16  ;;  %s14709_s22 = scalar_lea.vmem %s157_s10, 32 }
  0xf0   :  { %p14706_p11 = scmp.ne.s32.totalorder %s157_s10, %s14705_s6  ;;  %p14710_p12 = scmp.lt.s32.totalorder %s157_s10, %s157_s10 }
  0xf1   :  { %p14711_p13 = scmp.lt.s32.totalorder %s14709_s22, %s14705_s6 }
  0xf3   :  { %p14712_p0 = por %p14711_p13, %p14710_p12 }
  0xf5   :  { %p14713_p1 = pnand %p14712_p0, %p14706_p11 }
  0xf7   :  { %14716 = shalt.err (!%p14713_p1)
}
  0xf8   :  { %159 = dma.hbm_to_vmem [thread:$0]  %s15059_s25, 16, %s157_s10, [#allocation7]  }
  0xf9   :  { %s14717_s13 = scalar_lea.hbm %s15079_s14, 32 }
  0xfa   :  { %p14718_p2 = scmp.ne.s32.totalorder %s15079_s14, %s14717_s13  ;;  %p14721_p3 = scmp.lt.u32.totalorder %s14717_s13, %s15079_s14 }
  0xfc   :  { %p14723_p4 = pnand %p14721_p3, %p14718_p2 }
  0xfe   :  { %14726 = shalt.err (!%p14723_p4)
}
  0xff   :  { %s14727_s23 = scalar_lea.vmem %s15367_s15, 32  ;;  %p14732_p6 = scmp.lt.s32.totalorder %s15367_s15, %s15367_s15 }
 0x100   :  { %p14728_p5 = scmp.ne.s32.totalorder %s15367_s15, %s14727_s23  ;;  %p14733_p7 = scmp.lt.s32.totalorder %s14727_s23, %s14727_s23 }
 0x102   :  { %p14734_p8 = por %p14733_p7, %p14732_p6 }
 0x104   :  { %p14735_p9 = pnand %p14734_p8, %p14728_p5 }
 0x106   :  { %14738 = shalt.err (!%p14735_p9)
}
 0x107   :  { %187 = dma.hbm_to_vmem [thread:$0]  %s15079_s14, 32, %s15367_s15, [#allocation10], %s14991_s18, %s14991_s18, %s14992_s17  }
 0x108   :  { %s15003_s25 = smov [#allocation14]   ;;  %s15004_s27 = smov [#allocation17]  }
 0x109   :  { %s205_s26 = sshll.u32 %s15003_s25, 4  ;;  %s233_s28 = sshll.u32 %s15004_s27, 4  ;;  %s206_s26 = int_to_ptr.vmem [resolvable:$true] %s205_s26  ;;  %s15385_s28 = int_to_ptr.vmem [resolvable:$true] %s233_s28 }
 0x10a   :  { %s14739_s1 = scalar_lea.hbm %s15089_s24, 32 }
 0x10b   :  { %p14740_p10 = scmp.ne.s32.totalorder %s15089_s24, %s14739_s1  ;;  %p14743_p11 = scmp.lt.u32.totalorder %s14739_s1, %s15089_s24 }
 0x10d   :  { %p14745_p12 = pnand %p14743_p11, %p14740_p10 }
 0x10f   :  { %14748 = shalt.err (!%p14745_p12)
}
 0x110   :  { %s14749_s2 = scalar_lea.vmem %s206_s26, 32  ;;  %p14754_p0 = scmp.lt.s32.totalorder %s206_s26, %s206_s26 }
 0x111   :  { %p14750_p13 = scmp.ne.s32.totalorder %s206_s26, %s14749_s2  ;;  %p14755_p1 = scmp.lt.s32.totalorder %s14749_s2, %s14749_s2 }
 0x113   :  { %p14756_p2 = por %p14755_p1, %p14754_p0 }
 0x115   :  { %p14757_p3 = pnand %p14756_p2, %p14750_p13 }
 0x117   :  { %14760 = shalt.err (!%p14757_p3)
}
 0x118   :  { %211 = dma.hbm_to_vmem [thread:$0]  %s15089_s24, 32, %s206_s26, [#allocation13], %s14991_s18, %s14991_s18, %s14992_s17  }
 0x119   :  { %s14761_s14 = scalar_lea.hbm %s15109_s20, 32 }
 0x11a   :  { %p14762_p4 = scmp.ne.s32.totalorder %s15109_s20, %s14761_s14  ;;  %p14765_p5 = scmp.lt.u32.totalorder %s14761_s14, %s15109_s20 }
 0x11c   :  { %p14767_p6 = pnand %p14765_p5, %p14762_p4 }
 0x11e   :  { %14770 = shalt.err (!%p14767_p6)
}
 0x11f   :  { %s14771_s3 = scalar_lea.vmem %s15385_s28, 32  ;;  %p14776_p8 = scmp.lt.s32.totalorder %s15385_s28, %s15385_s28 }
 0x120   :  { %p14772_p7 = scmp.ne.s32.totalorder %s15385_s28, %s14771_s3  ;;  %p14777_p9 = scmp.lt.s32.totalorder %s14771_s3, %s14771_s3 }
 0x122   :  { %p14778_p10 = por %p14777_p9, %p14776_p8 }
 0x124   :  { %p14779_p11 = pnand %p14778_p10, %p14772_p7 }
 0x126   :  { %14782 = shalt.err (!%p14779_p11)
}
 0x127   :  { %239 = dma.hbm_to_vmem [thread:$0]  %s15109_s20, 32, %s15385_s28, [#allocation16], %s14991_s18, %s14991_s18, %s14992_s17  }
 0x128   :  { %s15005_s24 = smov [#allocation20]   ;;  %s15006_s7 = smov [#allocation23]  }
 0x129   :  { %s257_s12 = sshll.u32 %s15005_s24, 4  ;;  %s284_s0 = sshll.u32 %s15006_s7, 4  ;;  %s258_s12 = int_to_ptr.vmem [resolvable:$true] %s257_s12  ;;  %s285_s0 = int_to_ptr.vmem [resolvable:$true] %s284_s0 }
 0x12a   :  { %s14783_s10 = scalar_lea.hbm %s15119_s4, 32 }
 0x12b   :  { %p14784_p12 = scmp.ne.s32.totalorder %s15119_s4, %s14783_s10  ;;  %p14787_p13 = scmp.lt.u32.totalorder %s14783_s10, %s15119_s4 }
 0x12d   :  { %p14789_p0 = pnand %p14787_p13, %p14784_p12 }
 0x12f   :  { %14792 = shalt.err (!%p14789_p0)
}
 0x130   :  { %s14793_s11 = scalar_lea.vmem %s258_s12, 32  ;;  %p14798_p2 = scmp.lt.s32.totalorder %s258_s12, %s258_s12 }
 0x131   :  { %p14794_p1 = scmp.ne.s32.totalorder %s258_s12, %s14793_s11  ;;  %p14799_p3 = scmp.lt.s32.totalorder %s14793_s11, %s14793_s11 }
 0x133   :  { %p14800_p4 = por %p14799_p3, %p14798_p2 }
 0x135   :  { %p14801_p5 = pnand %p14800_p4, %p14794_p1 }
 0x137   :  { %14804 = shalt.err (!%p14801_p5)
}
 0x138   :  { %263 = dma.hbm_to_vmem [thread:$0]  %s15119_s4, 32, %s258_s12, [#allocation19], %s14991_s18, %s14991_s18, %s14992_s17  }
 0x139   :  { %s14805_s20 = scalar_lea.hbm %s15139_s8, 16 }
 0x13a   :  { %p14806_p6 = scmp.ne.s32.totalorder %s15139_s8, %s14805_s20  ;;  %p14809_p7 = scmp.lt.u32.totalorder %s14805_s20, %s15139_s8 }
 0x13c   :  { %p14811_p8 = pnand %p14809_p7, %p14806_p6 }
 0x13e   :  { %14814 = shalt.err (!%p14811_p8)
}
 0x13f   :  { %s14815_s15 = scalar_lea.vmem %s285_s0, 16  ;;  %s14819_s16 = scalar_lea.vmem %s285_s0, 32 }
 0x140   :  { %p14816_p9 = scmp.ne.s32.totalorder %s285_s0, %s14815_s15  ;;  %p14820_p10 = scmp.lt.s32.totalorder %s285_s0, %s285_s0 }
 0x141   :  { %p14821_p11 = scmp.lt.s32.totalorder %s14819_s16, %s14815_s15 }
 0x143   :  { %p14822_p12 = por %p14821_p11, %p14820_p10 }
 0x145   :  { %p14823_p13 = pnand %p14822_p12, %p14816_p9 }
 0x147   :  { %14826 = shalt.err (!%p14823_p13)
}
 0x148   :  { %s16958_s6 = sld [smem:[#allocation58_spill]]  ;;  %s15007_s22 = smov [#allocation26]  }
 0x149   :  { %287 = dma.hbm_to_vmem [thread:$0]  %s15139_s8, 16, %s285_s0, [#allocation22]  }
 0x14a   :  { %s317_s4 = sshll.u32 %s15007_s22, 4  ;;  %s15008_s13 = smov [#allocation27]   ;;  %s318_s4 = int_to_ptr.vmem [resolvable:$true] %s317_s4 }
 0x14b   :  { %s331_s23 = sshll.u32 %s15008_s13, 4  ;;  %s15417_s23 = int_to_ptr.vmem [resolvable:$true] %s331_s23 }
 0x14e   :  { %s14827_s25 = scalar_lea.hbm %s16958_s6, 32 }
 0x14f   :  { %p14828_p0 = scmp.ne.s32.totalorder %s16958_s6, %s14827_s25  ;;  %p14831_p1 = scmp.lt.u32.totalorder %s14827_s25, %s16958_s6 }
 0x151   :  { %p14833_p2 = pnand %p14831_p1, %p14828_p0 }
 0x153   :  { %14836 = shalt.err (!%p14833_p2)
}
 0x154   :  { %s14837_s26 = scalar_lea.vmem %s318_s4, 32  ;;  %p14842_p4 = scmp.lt.s32.totalorder %s318_s4, %s318_s4 }
 0x155   :  { %p14838_p3 = scmp.ne.s32.totalorder %s318_s4, %s14837_s26  ;;  %p14843_p5 = scmp.lt.s32.totalorder %s14837_s26, %s14837_s26 }
 0x157   :  { %p14844_p6 = por %p14843_p5, %p14842_p4 }
 0x159   :  { %p14845_p7 = pnand %p14844_p6, %p14838_p3 }
 0x15b   :  { %14848 = shalt.err (!%p14845_p7)
}
 0x15c   :  { %s16959_s8 = sld [smem:[#allocation60_spill]] }
 0x15d   :  { %323 = dma.hbm_to_vmem [thread:$0]  %s16958_s6, 32, %s318_s4, [#allocation25], %s14991_s18, %s14991_s18, %s14992_s17  }
 0x162   :  { %s14849_s27 = scalar_lea.hbm %s16959_s8, 32 }
 0x163   :  { %p14850_p8 = scmp.ne.s32.totalorder %s16959_s8, %s14849_s27  ;;  %p14853_p9 = scmp.lt.u32.totalorder %s14849_s27, %s16959_s8 }
 0x165   :  { %p14855_p10 = pnand %p14853_p9, %p14850_p8 }
 0x167   :  { %14858 = shalt.err (!%p14855_p10)
}
 0x168   :  { %s14859_s28 = scalar_lea.vmem %s15417_s23, 32  ;;  %p14864_p12 = scmp.lt.s32.totalorder %s15417_s23, %s15417_s23 }
 0x169   :  { %p14860_p11 = scmp.ne.s32.totalorder %s15417_s23, %s14859_s28  ;;  %p14865_p13 = scmp.lt.s32.totalorder %s14859_s28, %s14859_s28 }
 0x16b   :  { %p14866_p0 = por %p14865_p13, %p14864_p12 }
 0x16d   :  { %p14867_p1 = pnand %p14866_p0, %p14860_p11 }
 0x16f   :  { %14870 = shalt.err (!%p14867_p1)
}
 0x170   :  { %337 = dma.hbm_to_vmem [thread:$0]  %s16959_s8, 32, %s15417_s23, [#allocation28], %s14991_s18, %s14991_s18, %s14992_s17  }
 0x171   :  { %14915 = dma.done.wait [#allocation4], 256  }
 0x172   :  { %14916 = vsyncadd [#allocation4], 4294967040 }
 0x173   :  { %14917 = dma.done.wait [#allocation7], 32  }
 0x174   :  { %14918 = vsyncadd [#allocation7], 4294967264 }
 0x175   :  { %14919 = dma.done.wait [#allocation10], 64  }
 0x176   :  { %14920 = vsyncadd [#allocation10], 4294967232 }
 0x177   :  { %14921 = dma.done.wait [#allocation13], 64  }
 0x178   :  { %14922 = vsyncadd [#allocation13], 4294967232 }
 0x179   :  { %14923 = dma.done.wait [#allocation16], 64  }
 0x17a   :  { %14924 = vsyncadd [#allocation16], 4294967232 }
 0x17b   :  { %14925 = dma.done.wait [#allocation19], 64  }
 0x17c   :  { %14926 = vsyncadd [#allocation19], 4294967232 }
 0x17d   :  { %14927 = dma.done.wait [#allocation22], 32  }
 0x17e   :  { %14928 = vsyncadd [#allocation22], 4294967264 }
 0x17f   :  { %14929 = dma.done.wait [#allocation25], 64  }
 0x180   :  { %14930 = vsyncadd [#allocation25], 4294967232 }
 0x181   :  { %14931 = dma.done.wait [#allocation28], 32  }
 0x182   :  { %14932 = vsyncadd [#allocation28], 4294967264  ;;  %s16960_s1 = sld [smem:[#allocation43_spill]]  ;;  %s16961_s17 = sld [smem:[#allocation46_spill]]  ;;  %vm442_vm0 = vcmask 1043456   ;;  %vm435_vm1 = vcmask 97280  }
 0x183   :  { %vm15009_vm2 = vmmov 1   ;;  %v426_v1 = vld [vmem:[#allocation3] sm:$0xff]  ;;  %v427_v2 = vld [vmem:[#allocation3 + $0x8] sm:$0xf]  ;;  %s16964_s2 = sld [smem:[#allocation44_spill]]  ;;  %vm534_vm4 = vcmask 261120  }
 0x184   :  { %vm15440_vm3 = vmpackc.low %vm442_vm0, %vm15009_vm2  ;;  %v13884_v4 = vpack.c.bf16 %v427_v2, %v426_v1  ;;  %v12277_v12 = vld [vmem:[#allocation6] ss:$0 sm:$0xff]  ;;  %v15010_v21 = vmov 0.0   ;;  %vm15011_vm5 = vmmov 0   ;;  %v12281_v22 = vld [vmem:[#allocation9] ss:$0 sm:$0xff] }
 0x185   :  { %s15012_s14 = smov 64   ;;  %s15013_s3 = smov 96   ;;  %vm619_vm6 = vcmask 64512   ;;  %vm953_vm7 = vcmask 130112   ;;  %vm1125_vm8 = vcmask 195712   ;;  %vm1297_vm9 = vcmask 261312  }
 0x186   :  { %13886 = vmatprep.subr.msk.bf16.mxu0 %vm15440_vm3, %v13884_v4  ;;  %s15014_s24 = smov 88   ;;  %s15015_s12 = smov 120   ;;  %vm2228_vm10 = vcmask 523264   ;;  %vm4308_vm11 = vcmask 1046528   ;;  %vm4286_vm13 = vcmask 121856   ;;  %vm8230_vm14 = vcmask 195584  }
 0x187   :  { %13889 = vmatpush3.bf16.msk.msra.mxu0 %vm15440_vm3, %v13884_v4  ;;  %s15016_s7 = smov 80   ;;  %s15017_s0 = smov 112   ;;  %vm15905_vm12 = vmpackc.low %vm4308_vm11, %vm15009_vm2  ;;  %vm10118_vm15 = vcmask 1040384  }
 0x188   :  { %v422_v3 = vld [vmem:[%s16960_s1] sm:$0xff]  ;;  %v524_v6 = vld [vmem:[%s16961_s17 + $0x8] sm:$0xff]  ;;  %v525_v9 = vld [vmem:[%s16961_s17 + $0x10] sm:$0xff]  ;;  %13038 = vmatprep.subr.mxu0 %v15010_v21  ;;  %s15018_s10 = smov 104   ;;  %s15019_s11 = smov 72  }
 0x189   :  { %13024 = vmatprep.mubr.msk.f32.mxu0 %vm435_vm1, %v422_v3  ;;  %v523_v5 = vld [vmem:[%s16961_s17] sm:$0xff]  ;;  %v423_v8 = vld [vmem:[%s16960_s1 + $0x8] sm:$0xff]  ;;  %v526_v10 = vld [vmem:[%s16961_s17 + $0x18] sm:$0xff]  ;;  %s15020_s20 = smov 48   ;;  %s15021_s15 = smov 56  }
 0x18a   :  { %v13890_v7 = vpack.c.bf16 %v524_v6, %v523_v5  ;;  %13025 = vmatmul.mubr.msk.f32.vlgmr.msra.gmra.mrb[0].mxu0 %vm435_vm1, %v423_v8  ;;  %v13894_v11 = vpack.c.bf16 %v526_v10, %v525_v9  ;;  %v424_v16 = vld [vmem:[%s16964_s2] sm:$0xff]  ;;  %v425_v17 = vld [vmem:[%s16964_s2 + $0x8] sm:$0xff]  ;;  %s15022_s16 = smov 40   ;;  %s16965_s6 = sld [smem:[#allocation47_spill]] }
 0x18b   :  { %13040 = vmatprep.mubr.msk.f32.mxu0 %vm15011_vm5, %v15010_v21  ;;  %s15023_s22 = smov 24   ;;  %s16966_s4 = sld [smem:[#allocation48_spill]] }
 0x18c   :  { %13891 = vmatprep.subr.bf16.mxu1 %v13890_v7  ;;  %s16967_s13 = sld [smem:[#allocation49_spill]]  ;;  %s16968_s23 = sld [smem:[#allocation45_spill]] }
 0x18d   :  { %13893 = vmatpush3.bf16.msra.mxu1 %v13890_v7  ;;  %s16969_s25 = sld [smem:[#allocation50_spill]]  ;;  %s16970_s26 = sld [smem:[#allocation52_spill]] }
 0x18e   :  { %13895 = vmatprep.subr.bf16.mxu1 %v13894_v11  ;;  %s16973_s8 = sld [smem:[#allocation53_spill]]  ;;  %s16974_s27 = sld [smem:[#allocation54_spill]] }
 0x18f   :  { %s16975_s28 = sld [smem:[#allocation57_spill]] }
 0x191   :  { %13897 = vmatpush3.bf16.msra.mxu1 %v13894_v11 }
 0x192   :  { %13058 = vmatprep.subr.mxu1 %v15010_v21 }
 0x25d   :  { %v13026_v13 = vpop.f32.mrb[0].mxu0 }
 0x25e   :  { %v518_v14 = vadd.f32 %v13026_v13, %v12277_v12  ;;  %v512_v15 = vpop.f32.mrb[1].mxu0 }
 0x25f   :  { %v513_v18 = vadd.f32 %v12277_v12, %v512_v15 }
 0x260   :  { %v15460_v20 = vadd.f32 %v518_v14, %v425_v17 }
 0x261   :  { %v15458_v19 = vadd.f32 %v513_v18, %v424_v16 }
 0x263   :  { %13035 = vmatprep.mubr.msk.f32.mxu1 %vm534_vm4, %v15458_v19 }
 0x264   :  { %13036 = vmatmul.mubr.msk.f32.vlgmr.msra.gmra.mrb[0].mxu1 %vm534_vm4, %v15460_v20 }
 0x265   :  { %13060 = vmatprep.mubr.msk.f32.mxu1 %vm15011_vm5, %v15010_v21 }
 0x337   :  { %v13037_v23 = vpop.f32.mrb[0].mxu1 }
 0x338   :  { %v15472_v24 = vadd.f32 %v13037_v23, %v12281_v22  ;;  %v607_v25 = vpop.f32.mrb[1].mxu1 }
 0x339   :  { %v15474_v26 = vadd.f32 %v12281_v22, %v607_v25 }
 0x33b   :  { %706 = vrot.lane.b32.xlu1 %v15474_v26, %s15012_s14  ;;  %617 = vrot.lane.b32.xlu0 %v15474_v26, %s15013_s3 }
 0x33f   :  { %785 = vrot.lane.b32.xlu1 %v15474_v26, %s15014_s24 }
 0x343   :  { %783 = vrot.lane.b32.xlu1 %v15474_v26, %s15015_s12 }
 0x347   :  { %957 = vrot.lane.b32.xlu1 %v15474_v26, %s15016_s7 }
 0x34b   :  { %955 = vrot.lane.b32.xlu1 %v15474_v26, %s15017_s0 }
 0x34f   :  { %1127 = vrot.lane.b32.xlu1 %v15474_v26, %s15018_s10 }
 0x3ad   :  { %v707_v27 = vpop.permute.xlu1 %706  ;;  %v618_v28 = vpop.permute.xlu0 %617 }
 0x3ae   :  { %13039 = vmatpush3.xpose.msk.msra.mxu0 %vm619_vm6, %v618_v28 }
 0x3af   :  { %13043 = vmatprep.subr.mxu0 %v15010_v21 }
 0x3b1   :  { %v786_v29 = vpop.permute.xlu1 %785  ;;  %13041 = vmatmul.mubr.msk.f32.vlgmr.msra.gmra.mrb[2].mxu0 %vm619_vm6, %v15474_v26 }
 0x3b2   :  { %13044 = vmatpush3.msra.mxu0 %v707_v27  ;;  %13045 = vmatprep.mubr.msk.f32.mxu0 %vm15011_vm5, %v15010_v21 }
 0x3b3   :  { %13048 = vmatprep.subr.mxu0 %v15010_v21 }
 0x3b5   :  { %v784_v30 = vpop.permute.xlu1 %783 }
 0x3b9   :  { %v958_v31 = vpop.permute.xlu1 %957 }
 0x3ba   :  { %13059 = vmatpush3.xpose.msk.msra.mxu1 %vm619_vm6, %v958_v31 }
 0x3bb   :  { %13068 = vmatprep.subr.mxu1 %v15010_v21 }
 0x3bd   :  { %v956_v32 = vpop.permute.xlu1 %955 }
 0x3be   :  { %13061 = vmatmul.mubr.msk.f32.vlgmr.msra.gmra.mrb[2].mxu1 %vm619_vm6, %v956_v32 }
 0x3bf   :  { %13070 = vmatprep.mubr.msk.f32.mxu1 %vm15011_vm5, %v15010_v21 }
 0x3c1   :  { %v1128_v45 = vpop.permute.xlu1 %1127 }
 0x484   :  { %v690_v33 = vpop.f32.mrb[2].mxu0 }
 0x485   :  { %v694_v34 = vmul.f32 0.35355338, %v690_v33  ;;  %v13042_v35 = vpop.f32.mrb[3].mxu0 }
 0x487   :  { %v695_v36 = vsel %vm619_vm6, %v694_v34, -inf }
 0x488   :  { %696 = vmax.xlane.f32.xlu0 %v695_v36 }
 0x491   :  { %v1029_v37 = vpop.f32.mrb[2].mxu1 }
 0x492   :  { %v13062_v38 = vpop.f32.mrb[3].mxu1  ;;  %v15509_v39 = vmul.f32 0.35355338, %v1029_v37 }
 0x494   :  { %v1034_v40 = vsel %vm619_vm6, %v15509_v39, -inf }
 0x49e   :  { %1129 = vrot.lane.b32.xlu0 %v15474_v26, %s15019_s11 }
 0x4a2   :  { %1636 = vrot.lane.b32.xlu0 %v15472_v24, %s15017_s0 }
 0x4a6   :  { %1807 = vrot.lane.b32.xlu0 %v15472_v24, %s15018_s10 }
 0x4c5   :  { %1035 = vmax.xlane.f32.xlu0 %v1034_v40 }
 0x515   :  { %v697_v41 = vpop.xlane.xlu0 %696 }
 0x516   :  { %v698_v42 = vsub.f32 %v694_v34, %v697_v41 }
 0x518   :  { %v699_v43 = vmul.f32 1.442695, %v698_v42 }
 0x519   :  { %v1130_v44 = vpop.permute.xlu0 %1129 }
 0x51a   :  { %14271 = vpow2.f32 %v699_v43  ;;  %13069 = vmatpush3.xpose.msk.msra.mxu1 %vm619_vm6, %v1130_v44 }
 0x51b   :  { %13078 = vmatprep.subr.mxu1 %v15010_v21 }
 0x51d   :  { %13071 = vmatmul.mubr.msk.f32.vlgmr.msra.gmra.mrb[4].mxu1 %vm619_vm6, %v1128_v45  ;;  %v1637_v55 = vpop.permute.xlu0 %1636 }
 0x51e   :  { %13080 = vmatprep.mubr.msk.f32.mxu1 %vm15011_vm5, %v15010_v21 }
 0x521   :  { %v1808_v57 = vpop.permute.xlu0 %1807 }
 0x524   :  { %v14272_v46 = vpop.eup %14271 }
 0x525   :  { %v701_v47 = vsel %vm619_vm6, %v14272_v46, 0.0 }
 0x526   :  { %702 = vadd.xlane.f32.xlu1 %v701_v47 }
 0x537   :  { %1300 = vrot.lane.b32.xlu1 %v15472_v24, %s15013_s3 }
 0x53b   :  { %1467 = vrot.lane.b32.xlu1 %v15472_v24, %s15014_s24 }
 0x53f   :  { %1465 = vrot.lane.b32.xlu1 %v15472_v24, %s15015_s12 }
 0x543   :  { %1638 = vrot.lane.b32.xlu1 %v15472_v24, %s15016_s7 }
 0x547   :  { %1809 = vrot.lane.b32.xlu1 %v15472_v24, %s15019_s11 }
 0x552   :  { %v1036_v62 = vpop.xlane.xlu0 %1035 }
 0x553   :  { %v1037_v3 = vsub.f32 %v15509_v39, %v1036_v62 }
 0x555   :  { %v1038_v6 = vmul.f32 1.442695, %v1037_v3 }
 0x5b3   :  { %v703_v48 = vpop.xlane.xlu1 %702 }
 0x5b4   :  { %14273 = vrcp.f32 %v703_v48 }
 0x5b5   :  { %14275 = vpow2.f32 %v1038_v6 }
 0x5b7   :  { %v1301_v49 = vpop.permute.xlu1 %1300 }
 0x5b8   :  { %13079 = vmatpush3.xpose.msk.msra.mxu1 %vm619_vm6, %v1301_v49 }
 0x5b9   :  { %13088 = vmatprep.subr.mxu1 %v15010_v21 }
 0x5bb   :  { %v1468_v50 = vpop.permute.xlu1 %1467  ;;  %13081 = vmatmul.mubr.msk.f32.vlgmr.msra.gmra.mrb[6].mxu1 %vm619_vm6, %v15472_v24 }
 0x5bc   :  { %13089 = vmatpush3.xpose.msk.msra.mxu1 %vm619_vm6, %v1468_v50  ;;  %13090 = vmatprep.mubr.msk.f32.mxu1 %vm15011_vm5, %v15010_v21 }
 0x5bd   :  { %13098 = vmatprep.subr.mxu1 %v15010_v21 }
 0x5be   :  { %v14274_v51 = vpop.eup %14273 }
 0x5bf   :  { %v1466_v52 = vpop.permute.xlu1 %1465  ;;  %v705_v53 = vmul.f32 %v14274_v51, %v14272_v46  ;;  %v15562_v31 = vpop.eup %14275 }
 0x5c0   :  { %13091 = vmatmul.mubr.msk.f32.vlgmr.msra.gmra.mrb[8].mxu1 %vm619_vm6, %v1466_v52  ;;  %v1040_v34 = vsel %vm619_vm6, %v15562_v31, 0.0 }
 0x5c1   :  { %13046 = vmatmul.mubr.msk.f32.vlgmr.msra.gmra.mrb[4].mxu0 %vm619_vm6, %v705_v53  ;;  %13100 = vmatprep.mubr.msk.f32.mxu1 %vm15011_vm5, %v15010_v21 }
 0x5c2   :  { %13049 = vmatpush3.xpose.msk.msra.mxu0 %vm619_vm6, %v786_v29  ;;  %13050 = vmatprep.mubr.msk.f32.mxu0 %vm15011_vm5, %v15010_v21 }
 0x5c3   :  { %v1639_v54 = vpop.permute.xlu1 %1638  ;;  %13053 = vmatprep.subr.mxu0 %v15010_v21 }
 0x5c4   :  { %13099 = vmatpush3.xpose.msk.msra.mxu1 %vm619_vm6, %v1639_v54 }
 0x5c5   :  { %13051 = vmatmul.mubr.msk.f32.vlgmr.msra.gmra.mrb[6].mxu0 %vm619_vm6, %v784_v30  ;;  %13108 = vmatprep.subr.mxu1 %v15010_v21 }
 0x5c6   :  { %13055 = vmatprep.mubr.msk.f32.mxu0 %vm15011_vm5, %v15010_v21 }
 0x5c7   :  { %v1810_v56 = vpop.permute.xlu1 %1809  ;;  %13101 = vmatmul.mubr.msk.f32.vlgmr.msra.gmra.mrb[10].mxu1 %vm619_vm6, %v1637_v55 }
 0x5c8   :  { %13109 = vmatpush3.xpose.msk.msra.mxu1 %vm619_vm6, %v1810_v56  ;;  %13110 = vmatprep.mubr.msk.f32.mxu1 %vm15011_vm5, %v15010_v21 }
 0x5cb   :  { %13111 = vmatmul.mubr.msk.f32.vlgmr.msra.gmra.mrb[12].mxu1 %vm619_vm6, %v1808_v57 }
 0x5f0   :  { %v1201_v58 = vpop.f32.mrb[4].mxu1 }
 0x5f1   :  { %v1205_v59 = vmul.f32 0.35355338, %v1201_v58  ;;  %v13072_v60 = vpop.f32.mrb[5].mxu1 }
 0x5f3   :  { %v1206_v61 = vsel %vm619_vm6, %v1205_v59, -inf }
 0x5f4   :  { %1207 = vmax.xlane.f32.xlu0 %v1206_v61 }
 0x681   :  { %v1208_v1 = vpop.xlane.xlu0 %1207 }
 0x682   :  { %v1209_v4 = vsub.f32 %v1205_v59, %v1208_v1 }
 0x684   :  { %v1210_v11 = vmul.f32 1.442695, %v1209_v4 }
 0x686   :  { %14277 = vpow2.f32 %v1210_v11 }
 0x68e   :  { %v1372_v63 = vpop.f32.mrb[6].mxu1 }
 0x68f   :  { %v13082_v2 = vpop.f32.mrb[7].mxu1  ;;  %v1376_v17 = vmul.f32 0.35355338, %v1372_v63 }
 0x690   :  { %v15565_v33 = vpop.eup %14277 }
 0x691   :  { %v1377_v29 = vsel %vm619_vm6, %v1376_v17, -inf  ;;  %v1212_v35 = vsel %vm619_vm6, %v15565_v33, 0.0 }
 0x693   :  { %v1539_v5 = vpop.f32.mrb[8].mxu1 }
 0x694   :  { %v1543_v7 = vmul.f32 0.35355338, %v1539_v5  ;;  %v778_v8 = vpop.f32.mrb[4].mxu0  ;;  %v13092_v9 = vpop.f32.mrb[9].mxu1 }
 0x695   :  { %782 = vst.msk [vmem:[#allocation2] sm:$0xff] %vm619_vm6, %v778_v8  ;;  %v13047_v10 = vpop.f32.mrb[5].mxu0 }
 0x696   :  { %v1544_v12 = vsel %vm619_vm6, %v1543_v7, -inf }
 0x697   :  { %1545 = vmax.xlane.f32.xlu0 %v1544_v12 }
 0x698   :  { %v857_v13 = vpop.f32.mrb[6].mxu0 }
 0x699   :  { %v861_v14 = vmul.f32 0.35355338, %v857_v13  ;;  %v13052_v15 = vpop.f32.mrb[7].mxu0 }
 0x69a   :  { %v1710_v16 = vpop.f32.mrb[10].mxu1 }
 0x69b   :  { %v13102_v18 = vpop.f32.mrb[11].mxu1  ;;  %v862_v22 = vsel %vm619_vm6, %v861_v14, -inf  ;;  %v1714_v25 = vmul.f32 0.35355338, %v1710_v16 }
 0x69c   :  { %863 = vmax.xlane.f32.xlu1 %v862_v22 }
 0x69d   :  { %v1715_v32 = vsel %vm619_vm6, %v1714_v25, -inf }
 0x69e   :  { %v1881_v23 = vpop.f32.mrb[12].mxu1 }
 0x69f   :  { %v1885_v27 = vmul.f32 0.35355338, %v1881_v23  ;;  %v13112_v28 = vpop.f32.mrb[13].mxu1 }
 0x6a0   :  { %1378 = vmax.xlane.f32.xlu1 %v1377_v29 }
 0x6a1   :  { %v1886_v30 = vsel %vm619_vm6, %v1885_v27, -inf }
 0x6a2   :  { %1887 = vmax.xlane.f32.xlu0 %v1886_v30 }
 0x6a4   :  { %1716 = vmax.xlane.f32.xlu1 %v1715_v32 }
 0x6a6   :  { %1041 = vadd.xlane.f32.xlu0 %v1040_v34 }
 0x6a8   :  { %1213 = vadd.xlane.f32.xlu1 %v1212_v35  ;;  %v1980_v35 = vld [vmem:[%s16965_s6] sm:$0xff] }
 0x724   :  { %v1546_v36 = vpop.xlane.xlu0 %1545 }
 0x725   :  { %v1547_v37 = vsub.f32 %v1543_v7, %v1546_v36  ;;  %v1981_v36 = vld [vmem:[%s16965_s6 + $0x8] sm:$0xff] }
 0x727   :  { %v1548_v38 = vmul.f32 1.442695, %v1547_v37  ;;  %v13898_v37 = vpack.c.bf16 %v1981_v36, %v1980_v35  ;;  %v12311_v36 = vld [vmem:[#allocation12] ss:$0 sm:$0xff] }
 0x729   :  { %14279 = vpow2.f32 %v1548_v38  ;;  %v864_v39 = vpop.xlane.xlu1 %863  ;;  %13899 = vmatprep.subr.bf16.mxu1 %v13898_v37 }
 0x72a   :  { %v865_v57 = vsub.f32 %v861_v14, %v864_v39  ;;  %v1982_v39 = vld [vmem:[%s16965_s6 + $0x10] sm:$0xff]  ;;  %13901 = vmatpush3.bf16.msra.mxu1 %v13898_v37 }
 0x72c   :  { %v866_v58 = vmul.f32 1.442695, %v865_v57  ;;  %v12308_v57 = vld [vmem:[#allocation11] ss:$0 sm:$0xff] }
 0x72d   :  { %v1379_v40 = vpop.xlane.xlu1 %1378 }
 0x72e   :  { %v1380_v41 = vsub.f32 %v1376_v17, %v1379_v40  ;;  %v1983_v40 = vld [vmem:[%s16965_s6 + $0x18] sm:$0xff] }
 0x72f   :  { %v1888_v42 = vpop.xlane.xlu0 %1887 }
 0x730   :  { %v1381_v43 = vmul.f32 1.442695, %v1380_v41  ;;  %v1889_v44 = vsub.f32 %v1885_v27, %v1888_v42  ;;  %v13902_v42 = vpack.c.bf16 %v1983_v40, %v1982_v39 }
 0x731   :  { %v1717_v45 = vpop.xlane.xlu1 %1716 }
 0x732   :  { %14281 = vpow2.f32 %v1381_v43  ;;  %v1890_v46 = vmul.f32 1.442695, %v1889_v44  ;;  %v1718_v47 = vsub.f32 %v1714_v25, %v1717_v45  ;;  %13903 = vmatprep.subr.bf16.mxu1 %v13902_v42 }
 0x733   :  { %v15571_v48 = vpop.eup %14279  ;;  %v1042_v61 = vpop.xlane.xlu0 %1041  ;;  %13905 = vmatpush3.bf16.msra.mxu1 %v13902_v42 }
 0x734   :  { %14283 = vpow2.f32 %v1890_v46  ;;  %v1719_v49 = vmul.f32 1.442695, %v1718_v47  ;;  %v1550_v50 = vsel %vm619_vm6, %v15571_v48, 0.0 }
 0x735   :  { %1551 = vadd.xlane.f32.xlu1 %v1550_v50  ;;  %v1214_v2 = vpop.xlane.xlu1 %1213 }
 0x736   :  { %14285 = vpow2.f32 %v1719_v49 }
 0x737   :  { %14287 = vpow2.f32 %v866_v58 }
 0x73c   :  { %v15575_v51 = vpop.eup %14281 }
 0x73d   :  { %v1383_v52 = vsel %vm619_vm6, %v15575_v51, 0.0 }
 0x73e   :  { %v15579_v53 = vpop.eup %14283  ;;  %1384 = vadd.xlane.f32.xlu0 %v1383_v52 }
 0x73f   :  { %v1892_v54 = vsel %vm619_vm6, %v15579_v53, 0.0 }
 0x740   :  { %v15583_v55 = vpop.eup %14285  ;;  %1893 = vadd.xlane.f32.xlu1 %v1892_v54 }
 0x741   :  { %v1721_v56 = vsel %vm619_vm6, %v15583_v55, 0.0  ;;  %v14288_v59 = vpop.eup %14287 }
 0x742   :  { %1722 = vadd.xlane.f32.xlu0 %v1721_v56  ;;  %v868_v60 = vsel %vm619_vm6, %v14288_v59, 0.0 }
 0x751   :  { %1045 = vrot.lane.b32.xlu1 %v15474_v26, %s15020_s20 }
 0x758   :  { %873 = vrot.lane.b32.xlu0 %v15474_v26, %s15021_s15 }
 0x75c   :  { %1388 = vrot.lane.b32.xlu0 %v15472_v24, %s15012_s14 }
 0x760   :  { %1726 = vrot.lane.b32.xlu0 %v15472_v24, %s15020_s20 }
 0x775   :  { %869 = vadd.xlane.f32.xlu1 %v868_v60 }
 0x786   :  { %1217 = vrot.lane.b32.xlu1 %v15474_v26, %s15022_s16 }
 0x78a   :  { %1555 = vrot.lane.b32.xlu1 %v15472_v24, %s15021_s15 }
 0x78e   :  { %1897 = vrot.lane.b32.xlu1 %v15472_v24, %s15022_s16 }
 0x7c2   :  { %v1552_v3 = vpop.xlane.xlu1 %1551 }
 0x7cb   :  { %v1385_v62 = vpop.xlane.xlu0 %1384 }
 0x7cd   :  { %v1894_v4 = vpop.xlane.xlu1 %1893 }
 0x7cf   :  { %v1723_v63 = vpop.xlane.xlu0 %1722 }
 0x7d1   :  { %v1046_v5 = vpop.permute.xlu1 %1045 }
 0x7d3   :  { %v874_v1 = vpop.permute.xlu0 %873 }
 0x7d4   :  { %13054 = vmatpush3.msra.mxu0 %v874_v1 }
 0x7d5   :  { %13063 = vmatprep.subr.mxu0 %v15010_v21 }
 0x7d7   :  { %v1389_v13 = vpop.permute.xlu0 %1388 }
 0x7db   :  { %v1727_v22 = vpop.permute.xlu0 %1726 }
 0x802   :  { %v870_v6 = vpop.xlane.xlu1 %869 }
 0x803   :  { %14289 = vrcp.f32 %v870_v6 }
 0x804   :  { %14291 = vrcp.f32 %v1042_v61 }
 0x805   :  { %14293 = vrcp.f32 %v1214_v2 }
 0x806   :  { %14295 = vrcp.f32 %v1385_v62  ;;  %v1218_v10 = vpop.permute.xlu1 %1217 }
 0x807   :  { %14297 = vrcp.f32 %v1552_v3 }
 0x808   :  { %14299 = vrcp.f32 %v1723_v63 }
 0x809   :  { %14301 = vrcp.f32 %v1894_v4 }
 0x80a   :  { %v1556_v16 = vpop.permute.xlu1 %1555 }
 0x80d   :  { %v14290_v26 = vpop.eup %14289 }
 0x80e   :  { %v872_v7 = vmul.f32 %v14290_v26, %v14288_v59  ;;  %v14292_v8 = vpop.eup %14291  ;;  %v1898_v27 = vpop.permute.xlu1 %1897 }
 0x80f   :  { %v1044_v24 = vmul.f32 %v14292_v8, %v15562_v31  ;;  %v14294_v9 = vpop.eup %14293 }
 0x810   :  { %13056 = vmatmul.mubr.msk.f32.vlgmr.msra.gmra.mrb[8].mxu0 %vm619_vm6, %v872_v7  ;;  %v1216_v11 = vmul.f32 %v14294_v9, %v15565_v33  ;;  %v14296_v12 = vpop.eup %14295  ;;  %v2119_v9 = vld [vmem:[%s16966_s4] sm:$0xff] }
 0x811   :  { %13064 = vmatpush3.msra.mxu0 %v1046_v5  ;;  %13065 = vmatprep.mubr.msk.f32.mxu0 %vm15011_vm5, %v15010_v21  ;;  %v1387_v14 = vmul.f32 %v14296_v12, %v15575_v51  ;;  %v14298_v15 = vpop.eup %14297 }
 0x812   :  { %13073 = vmatprep.subr.mxu0 %v15010_v21  ;;  %v1554_v17 = vmul.f32 %v14298_v15, %v15571_v48  ;;  %v14300_v18 = vpop.eup %14299  ;;  %v2213_v15 = vld [vmem:[%s16967_s13] sm:$0xff] }
 0x813   :  { %v1725_v23 = vmul.f32 %v14300_v18, %v15583_v55  ;;  %v14302_v25 = vpop.eup %14301 }
 0x814   :  { %13066 = vmatmul.mubr.msk.f32.vlgmr.msra.gmra.mrb[10].mxu0 %vm619_vm6, %v1044_v24  ;;  %v1896_v28 = vmul.f32 %v14302_v25, %v15579_v53  ;;  %v2217_v25 = vld [vmem:[%s16967_s13 + $0x20] sm:$0xff] }
 0x815   :  { %13074 = vmatpush3.msra.mxu0 %v1218_v10  ;;  %13075 = vmatprep.mubr.msk.f32.mxu0 %vm15011_vm5, %v15010_v21  ;;  %v2120_v10 = vld [vmem:[%s16966_s4 + $0x8] sm:$0xff] }
 0x816   :  { %13083 = vmatprep.subr.mxu0 %v15010_v21  ;;  %v13906_v12 = vpack.c.bf16 %v2120_v10, %v2119_v9  ;;  %v12323_v9 = vld [vmem:[%s16961_s17 + $0x30] sm:$0xff] }
 0x818   :  { %13076 = vmatmul.mubr.msk.f32.vlgmr.msra.gmra.mrb[12].mxu0 %vm619_vm6, %v1216_v11  ;;  %v2121_v11 = vld [vmem:[%s16966_s4 + $0x10] sm:$0xff] }
 0x819   :  { %13084 = vmatpush3.msra.mxu0 %v1389_v13  ;;  %13085 = vmatprep.mubr.msk.f32.mxu0 %vm15011_vm5, %v15010_v21  ;;  %v2122_v13 = vld [vmem:[%s16966_s4 + $0x18] sm:$0xff] }
 0x81a   :  { %13093 = vmatprep.subr.mxu0 %v15010_v21 }
 0x81c   :  { %13086 = vmatmul.mubr.msk.f32.vlgmr.msra.gmra.mrb[14].mxu0 %vm619_vm6, %v1387_v14  ;;  %v13910_v14 = vpack.c.bf16 %v2122_v13, %v2121_v11  ;;  %v12324_v11 = vld [vmem:[%s16961_s17 + $0x38] sm:$0xff] }
 0x81d   :  { %13094 = vmatpush3.msra.mxu0 %v1556_v16  ;;  %13095 = vmatprep.mubr.msk.f32.mxu0 %vm15011_vm5, %v15010_v21  ;;  %v2214_v16 = vld [vmem:[%s16967_s13 + $0x8] sm:$0xff] }
 0x81e   :  { %13103 = vmatprep.subr.mxu0 %v15010_v21  ;;  %v13914_v18 = vpack.c.bf16 %v2214_v16, %v2213_v15 }
 0x820   :  { %13096 = vmatmul.mubr.msk.f32.vlgmr.msra.gmra.mrb[16].mxu0 %vm619_vm6, %v1554_v17  ;;  %v2215_v17 = vld [vmem:[%s16967_s13 + $0x10] sm:$0xff]  ;;  %13915 = vmatprep.subr.bf16.mxu1 %v13914_v18 }
 0x821   :  { %13104 = vmatpush3.msra.mxu0 %v1727_v22  ;;  %13105 = vmatprep.mubr.msk.f32.mxu0 %vm15011_vm5, %v15010_v21  ;;  %v2216_v22 = vld [vmem:[%s16967_s13 + $0x18] sm:$0xff] }
 0x822   :  { %13113 = vmatprep.subr.mxu0 %v15010_v21 }
 0x824   :  { %13106 = vmatmul.mubr.msk.f32.vlgmr.msra.gmra.mrb[18].mxu0 %vm619_vm6, %v1725_v23  ;;  %v13918_v23 = vpack.c.bf16 %v2216_v22, %v2215_v17 }
 0x825   :  { %13114 = vmatpush3.msra.mxu0 %v1898_v27  ;;  %13115 = vmatprep.mubr.msk.f32.mxu0 %vm15011_vm5, %v15010_v21  ;;  %v2218_v27 = vld [vmem:[%s16967_s13 + $0x28] sm:$0xff] }
 0x826   :  { %13907 = vmatprep.subr.bf16.mxu0 %v13906_v12 }
 0x828   :  { %13116 = vmatmul.mubr.msk.f32.vlgmr.msra.gmra.mrb[20].mxu0 %vm619_vm6, %v1896_v28  ;;  %v13922_v28 = vpack.c.bf16 %v2218_v27, %v2217_v25 }
 0x829   :  { %13909 = vmatpush3.bf16.msra.mxu0 %v13906_v12  ;;  %v13934_v12 = vpack.c.bf16 %v12324_v11, %v12323_v9 }
 0x82a   :  { %13911 = vmatprep.subr.bf16.mxu0 %v13910_v14 }
 0x82d   :  { %13913 = vmatpush3.bf16.msra.mxu0 %v13910_v14 }
 0x8e3   :  { %v945_v29 = vpop.f32.mrb[8].mxu0 }
 0x8e4   :  { %950 = vrot.lane.b32.xlu0 %v945_v29, %s15000_s29  ;;  %v13057_v30 = vpop.f32.mrb[9].mxu0 }
 0x8e7   :  { %v1117_v31 = vpop.f32.mrb[10].mxu0 }
 0x8e8   :  { %1122 = vrot.lane.b32.xlu1 %v1117_v31, %s14991_s18  ;;  %v13067_v32 = vpop.f32.mrb[11].mxu0 }
 0x8eb   :  { %v1289_v33 = vpop.f32.mrb[12].mxu0 }
 0x8ec   :  { %1294 = vrot.lane.b32.xlu1 %v1289_v33, %s15023_s22  ;;  %v13077_v34 = vpop.f32.mrb[13].mxu0 }
 0x8ef   :  { %v1460_v38 = vpop.f32.mrb[14].mxu0 }
 0x8f0   :  { %1464 = vst.msk [vmem:[#allocation2 + $0x8] sm:$0xff] %vm619_vm6, %v1460_v38  ;;  %v13087_v41 = vpop.f32.mrb[15].mxu0  ;;  %v12312_v38 = vld [vmem:[#allocation14] ss:$0 sm:$0xff] }
 0x8f3   :  { %v1627_v43 = vpop.f32.mrb[16].mxu0 }
 0x8f4   :  { %1632 = vrot.lane.b32.xlu0 %v1627_v43, %s15000_s29  ;;  %v13097_v44 = vpop.f32.mrb[17].mxu0 }
 0x8f7   :  { %v1798_v45 = vpop.f32.mrb[18].mxu0 }
 0x8f8   :  { %1803 = vrot.lane.b32.xlu0 %v1798_v45, %s14991_s18  ;;  %v13107_v46 = vpop.f32.mrb[19].mxu0  ;;  %v2219_v45 = vld [vmem:[%s16967_s13 + $0x30] sm:$0xff] }
 0x8f9   :  { %v2220_v46 = vld [vmem:[%s16967_s13 + $0x38] sm:$0xff] }
 0x8fb   :  { %v1969_v47 = vpop.f32.mrb[20].mxu0 }
 0x8fc   :  { %1974 = vrot.lane.b32.xlu1 %v1969_v47, %s15023_s22  ;;  %v13117_v48 = vpop.f32.mrb[21].mxu0  ;;  %v13926_v47 = vpack.c.bf16 %v2220_v46, %v2219_v45 }
 0x8fd   :  { %v12313_v48 = vld [vmem:[#allocation15] ss:$0 sm:$0xff] }
 0x956   :  { %v951_v49 = vpop.permute.xlu0 %950 }
 0x957   :  { %954 = vst.msk [vmem:[#allocation2] sm:$0xff] %vm953_vm7, %v951_v49 }
 0x95a   :  { %v1123_v50 = vpop.permute.xlu1 %1122 }
 0x95b   :  { %1126 = vst.msk [vmem:[#allocation2] sm:$0xff] %vm1125_vm8, %v1123_v50 }
 0x95e   :  { %v1295_v51 = vpop.permute.xlu1 %1294 }
 0x95f   :  { %1298 = vst.msk [vmem:[#allocation2] sm:$0xff] %vm1297_vm9, %v1295_v51 }
 0x966   :  { %v1633_v52 = vpop.permute.xlu0 %1632  ;;  %v1978_v53 = vld [vmem:[#allocation2] sm:$0xff] }
 0x967   :  { %1635 = vst.msk [vmem:[#allocation2 + $0x8] sm:$0xff] %vm953_vm7, %v1633_v52  ;;  %13126 = vmatprep.mubr.msk.f32.mxu1 %vm534_vm4, %v1978_v53 }
 0x96a   :  { %v1804_v54 = vpop.permute.xlu0 %1803 }
 0x96b   :  { %1806 = vst.msk [vmem:[#allocation2 + $0x8] sm:$0xff] %vm1125_vm8, %v1804_v54 }
 0x96e   :  { %v1975_v55 = vpop.permute.xlu1 %1974 }
 0x96f   :  { %1977 = vst.msk [vmem:[#allocation2 + $0x8] sm:$0xff] %vm1297_vm9, %v1975_v55  ;;  %v12316_v55 = vld [vmem:[#allocation17] ss:$0 sm:$0xff] }
 0x976   :  { %v1979_v56 = vld [vmem:[#allocation2 + $0x8] sm:$0xff] }
 0x977   :  { %13127 = vmatmul.mubr.msk.f32.vlgmr.msra.gmra.mrb[14].mxu1 %vm534_vm4, %v1979_v56 }
 0x978   :  { %13917 = vmatpush3.bf16.msra.mxu1 %v13914_v18 }
 0x979   :  { %13919 = vmatprep.subr.bf16.mxu1 %v13918_v23 }
 0x97c   :  { %13921 = vmatpush3.bf16.msra.mxu1 %v13918_v23  ;;  %v12319_v23 = vld [vmem:[#allocation18] ss:$0 sm:$0xff] }
 0x97d   :  { %13923 = vmatprep.subr.bf16.mxu1 %v13922_v28 }
 0x980   :  { %13925 = vmatpush3.bf16.msra.mxu1 %v13922_v28 }
 0x981   :  { %13927 = vmatprep.subr.bf16.mxu1 %v13926_v47 }
 0x984   :  { %13929 = vmatpush3.bf16.msra.mxu1 %v13926_v47 }
 0x985   :  { %13180 = vmatprep.subr.mxu1 %v15010_v21 }
 0xa4a   :  { %v13128_v58 = vpop.f32.mrb[14].mxu1 }
 0xa4b   :  { %v2069_v59 = vadd.f32 %v13128_v58, %v12308_v57  ;;  %v2063_v60 = vpop.f32.mrb[15].mxu1 }
 0xa4c   :  { %v2064_v61 = vadd.f32 %v12308_v57, %v2063_v60 }
 0xa4d   :  { %v2073_v62 = vadd.f32 %v2069_v59, %v15460_v20 }
 0xa4e   :  { %v2072_v63 = vadd.f32 %v2064_v61, %v15458_v19 }
 0xa4f   :  { %v2079_v1 = vsel %vm534_vm4, %v2073_v62, 0.0 }
 0xa50   :  { %2080 = vadd.xlane.f32.xlu1 %v2079_v1  ;;  %v2076_v2 = vsel %vm534_vm4, %v2072_v63, 0.0 }
 0xa51   :  { %2077 = vadd.xlane.f32.xlu0 %v2076_v2 }
 0xadd   :  { %v2081_v3 = vpop.xlane.xlu1 %2080 }
 0xade   :  { %v2084_v4 = vmul.f32 0.03125, %v2081_v3  ;;  %v2078_v5 = vpop.xlane.xlu0 %2077 }
 0xadf   :  { %v2083_v6 = vmul.f32 0.03125, %v2078_v5 }
 0xae0   :  { %v2086_v26 = vsub.f32 %v2073_v62, %v2084_v4 }
 0xae1   :  { %v2085_v7 = vsub.f32 %v2072_v63, %v2083_v6 }
 0xae2   :  { %v2088_v20 = vmul.f32 %v2086_v26, %v2086_v26 }
 0xae3   :  { %v2087_v8 = vmul.f32 %v2085_v7, %v2085_v7 }
 0xae4   :  { %v2092_v24 = vsel %vm534_vm4, %v2088_v20, 0.0  ;;  %v12321_v20 = vld [vmem:[%s16961_s17 + $0x20] sm:$0xff] }
 0xae5   :  { %v2089_v19 = vsel %vm534_vm4, %v2087_v8, 0.0 }
 0xae6   :  { %2090 = vadd.xlane.f32.xlu0 %v2089_v19 }
 0xaea   :  { %2093 = vadd.xlane.f32.xlu0 %v2092_v24  ;;  %v12322_v24 = vld [vmem:[%s16961_s17 + $0x28] sm:$0xff]  ;;  %s16976_s17 = sld [smem:[#allocation59_spill]] }
 0xaeb   :  { %v13930_v10 = vpack.c.bf16 %v12322_v24, %v12321_v20 }
 0xaed   :  { %13931 = vmatprep.subr.bf16.mxu0 %v13930_v10 }
 0xb73   :  { %v2091_v29 = vpop.xlane.xlu0 %2090 }
 0xb74   :  { %v2095_v30 = vmul.f32 0.03125, %v2091_v29  ;;  %v12320_v29 = vld [vmem:[#allocation20] ss:$0 sm:$0xff] }
 0xb76   :  { %v2097_v31 = vadd.f32 1e-05, %v2095_v30 }
 0xb77   :  { %v2094_v32 = vpop.xlane.xlu0 %2093 }
 0xb78   :  { %14303 = vrsqrt.f32 %v2097_v31  ;;  %v2096_v33 = vmul.f32 0.03125, %v2094_v32 }
 0xb7a   :  { %v2098_v34 = vadd.f32 1e-05, %v2096_v33 }
 0xb7c   :  { %14305 = vrsqrt.f32 %v2098_v34  ;;  %v12325_v34 = vld [vmem:[#allocation9 + $0x1] ss:$0 sm:$0xff] }
 0xb82   :  { %v14304_v35 = vpop.eup %14303 }
 0xb83   :  { %v2101_v37 = vmul.f32 %v14304_v35, %v2085_v7 }
 0xb85   :  { %v2109_v39 = vmul.f32 %v12311_v36, %v2101_v37 }
 0xb86   :  { %v14306_v40 = vpop.eup %14305 }
 0xb87   :  { %v2102_v41 = vmul.f32 %v14306_v40, %v2086_v26  ;;  %v2117_v42 = vadd.f32 %v12312_v38, %v2109_v39 }
 0xb89   :  { %v2110_v43 = vmul.f32 %v12311_v36, %v2102_v41  ;;  %13137 = vmatprep.mubr.msk.f32.mxu0 %vm534_vm4, %v2117_v42 }
 0xb8b   :  { %v2118_v44 = vadd.f32 %v12312_v38, %v2110_v43 }
 0xb8d   :  { %13138 = vmatmul.mubr.msk.f32.vlgmr.msra.gmra.mrb[22].mxu0 %vm534_vm4, %v2118_v44 }
 0xb8e   :  { %13933 = vmatpush3.bf16.msra.mxu0 %v13930_v10 }
 0xb8f   :  { %13935 = vmatprep.subr.bf16.mxu0 %v13934_v12 }
 0xb92   :  { %13937 = vmatpush3.bf16.msra.mxu0 %v13934_v12 }
 0xb93   :  { %13170 = vmatprep.subr.mxu0 %v15010_v21 }
 0xc60   :  { %v13139_v49 = vpop.f32.mrb[22].mxu0 }
 0xc61   :  { %v2208_v50 = vadd.f32 %v13139_v49, %v12313_v48  ;;  %v2202_v51 = vpop.f32.mrb[23].mxu0 }
 0xc62   :  { %v2203_v52 = vadd.f32 %v12313_v48, %v2202_v51 }
 0xc63   :  { %v2212_v54 = vmax.f32 %v2208_v50, 0.0 }
 0xc64   :  { %v2211_v53 = vmax.f32 %v2203_v52, 0.0 }
 0xc66   :  { %13156 = vmatprep.mubr.msk.f32.mxu1 %vm2228_vm10, %v2211_v53 }
 0xc67   :  { %13157 = vmatmul.mubr.msk.f32.vlgmr.msra.gmra.mrb[16].mxu1 %vm2228_vm10, %v2212_v54 }
 0xc68   :  { %13182 = vmatprep.mubr.msk.f32.mxu1 %vm15011_vm5, %v15010_v21 }
 0xd3a   :  { %v13158_v56 = vpop.f32.mrb[16].mxu1 }
 0xd3b   :  { %v2307_v57 = vadd.f32 %v13158_v56, %v12316_v55  ;;  %v2301_v58 = vpop.f32.mrb[17].mxu1 }
 0xd3c   :  { %v2302_v59 = vadd.f32 %v12316_v55, %v2301_v58 }
 0xd3d   :  { %v2311_v60 = vadd.f32 %v2307_v57, %v2118_v44 }
 0xd3e   :  { %v2310_v61 = vadd.f32 %v2302_v59, %v2117_v42 }
 0xd3f   :  { %v2317_v62 = vsel %vm534_vm4, %v2311_v60, 0.0 }
 0xd40   :  { %2318 = vadd.xlane.f32.xlu0 %v2317_v62  ;;  %v2314_v63 = vsel %vm534_vm4, %v2310_v61, 0.0 }
 0xd41   :  { %2315 = vadd.xlane.f32.xlu1 %v2314_v63 }
 0xdcd   :  { %v2319_v1 = vpop.xlane.xlu0 %2318 }
 0xdce   :  { %v2321_v2 = vmul.f32 0.03125, %v2319_v1  ;;  %v2316_v3 = vpop.xlane.xlu1 %2315 }
 0xdcf   :  { %v2320_v4 = vmul.f32 0.03125, %v2316_v3 }
 0xdd0   :  { %v2323_v5 = vsub.f32 %v2311_v60, %v2321_v2 }
 0xdd1   :  { %v2322_v6 = vsub.f32 %v2310_v61, %v2320_v4 }
 0xdd2   :  { %v2325_v26 = vmul.f32 %v2323_v5, %v2323_v5 }
 0xdd3   :  { %v2324_v7 = vmul.f32 %v2322_v6, %v2322_v6 }
 0xdd4   :  { %v2329_v8 = vsel %vm534_vm4, %v2325_v26, 0.0 }
 0xdd5   :  { %2330 = vadd.xlane.f32.xlu0 %v2329_v8  ;;  %v2326_v19 = vsel %vm534_vm4, %v2324_v7, 0.0 }
 0xdd6   :  { %2327 = vadd.xlane.f32.xlu1 %v2326_v19 }
 0xe62   :  { %v2331_v13 = vpop.xlane.xlu0 %2330 }
 0xe63   :  { %v2333_v14 = vmul.f32 0.03125, %v2331_v13  ;;  %v2328_v15 = vpop.xlane.xlu1 %2327 }
 0xe64   :  { %v2332_v16 = vmul.f32 0.03125, %v2328_v15 }
 0xe65   :  { %v2335_v17 = vadd.f32 1e-05, %v2333_v14 }
 0xe66   :  { %v2334_v18 = vadd.f32 1e-05, %v2332_v16 }
 0xe67   :  { %14307 = vrsqrt.f32 %v2335_v17 }
 0xe68   :  { %14309 = vrsqrt.f32 %v2334_v18 }
 0xe71   :  { %v14308_v22 = vpop.eup %14307 }
 0xe72   :  { %v14310_v25 = vpop.eup %14309  ;;  %v2339_v27 = vmul.f32 %v14308_v22, %v2323_v5 }
 0xe73   :  { %v2338_v28 = vmul.f32 %v14310_v25, %v2322_v6 }
 0xe74   :  { %v2347_v30 = vmul.f32 %v12319_v23, %v2339_v27 }
 0xe75   :  { %v2346_v31 = vmul.f32 %v12319_v23, %v2338_v28 }
 0xe76   :  { %v15688_v33 = vadd.f32 %v12320_v29, %v2347_v30 }
 0xe77   :  { %v15686_v32 = vadd.f32 %v12320_v29, %v2346_v31 }
 0xe79   :  { %13167 = vmatprep.mubr.msk.f32.mxu0 %vm534_vm4, %v15686_v32 }
 0xe7a   :  { %13168 = vmatmul.mubr.msk.f32.vlgmr.msra.gmra.mrb[24].mxu0 %vm534_vm4, %v15688_v33 }
 0xe7b   :  { %13172 = vmatprep.mubr.msk.f32.mxu0 %vm15011_vm5, %v15010_v21 }
 0xf4d   :  { %v13169_v35 = vpop.f32.mrb[24].mxu0 }
 0xf4e   :  { %v2441_v36 = vpop.f32.mrb[25].mxu0  ;;  %v15710_v38 = vadd.f32 %v13169_v35, %v12325_v34 }
 0xf4f   :  { %v15696_v37 = vadd.f32 %v12325_v34, %v2441_v36 }
 0xf51   :  { %2618 = vrot.lane.b32.xlu0 %v15696_v37, %s15014_s24  ;;  %2451 = vrot.lane.b32.xlu1 %v15696_v37, %s15013_s3 }
 0xf55   :  { %2787 = vrot.lane.b32.xlu0 %v15696_v37, %s15017_s0  ;;  %2616 = vrot.lane.b32.xlu1 %v15696_v37, %s15015_s12 }
 0xf59   :  { %2958 = vrot.lane.b32.xlu0 %v15696_v37, %s15018_s10  ;;  %2789 = vrot.lane.b32.xlu1 %v15696_v37, %s15016_s7 }
 0xf5d   :  { %3297 = vrot.lane.b32.xlu0 %v15710_v38, %s15014_s24  ;;  %2960 = vrot.lane.b32.xlu1 %v15696_v37, %s15019_s11 }
 0xf61   :  { %3468 = vrot.lane.b32.xlu0 %v15710_v38, %s15016_s7  ;;  %3130 = vrot.lane.b32.xlu1 %v15710_v38, %s15013_s3 }
 0xf65   :  { %3639 = vrot.lane.b32.xlu0 %v15710_v38, %s15019_s11  ;;  %3295 = vrot.lane.b32.xlu1 %v15710_v38, %s15015_s12 }
 0xf69   :  { %2539 = vrot.lane.b32.xlu0 %v15696_v37, %s15012_s14  ;;  %3466 = vrot.lane.b32.xlu1 %v15710_v38, %s15017_s0 }
 0xf6d   :  { %3637 = vrot.lane.b32.xlu1 %v15710_v38, %s15018_s10 }
 0xf71   :  { %2706 = vrot.lane.b32.xlu1 %v15696_v37, %s15021_s15 }
 0xfc3   :  { %v2619_v39 = vpop.permute.xlu0 %2618  ;;  %v2452_v40 = vpop.permute.xlu1 %2451 }
 0xfc4   :  { %13171 = vmatpush3.xpose.msk.msra.mxu0 %vm619_vm6, %v2452_v40  ;;  %13181 = vmatpush3.xpose.msk.msra.mxu1 %vm619_vm6, %v2619_v39 }
 0xfc5   :  { %13190 = vmatprep.subr.mxu1 %v15010_v21  ;;  %13175 = vmatprep.subr.mxu0 %v15010_v21 }
 0xfc7   :  { %v2788_v41 = vpop.permute.xlu0 %2787  ;;  %13173 = vmatmul.mubr.msk.f32.vlgmr.msra.gmra.mrb[26].mxu0 %vm619_vm6, %v15696_v37  ;;  %v2617_v42 = vpop.permute.xlu1 %2616 }
 0xfc8   :  { %13183 = vmatmul.mubr.msk.f32.vlgmr.msra.gmra.mrb[18].mxu1 %vm619_vm6, %v2617_v42  ;;  %13177 = vmatprep.mubr.msk.f32.mxu0 %vm15011_vm5, %v15010_v21 }
 0xfc9   :  { %13192 = vmatprep.mubr.msk.f32.mxu1 %vm15011_vm5, %v15010_v21 }
 0xfcb   :  { %v2959_v43 = vpop.permute.xlu0 %2958  ;;  %v2790_v44 = vpop.permute.xlu1 %2789 }
 0xfcc   :  { %13191 = vmatpush3.xpose.msk.msra.mxu1 %vm619_vm6, %v2790_v44 }
 0xfcd   :  { %13200 = vmatprep.subr.mxu1 %v15010_v21 }
 0xfcf   :  { %v3298_v45 = vpop.permute.xlu0 %3297  ;;  %13193 = vmatmul.mubr.msk.f32.vlgmr.msra.gmra.mrb[20].mxu1 %vm619_vm6, %v2788_v41  ;;  %v2961_v46 = vpop.permute.xlu1 %2960 }
 0xfd0   :  { %13201 = vmatpush3.xpose.msk.msra.mxu1 %vm619_vm6, %v2961_v46  ;;  %13202 = vmatprep.mubr.msk.f32.mxu1 %vm15011_vm5, %v15010_v21 }
 0xfd1   :  { %13210 = vmatprep.subr.mxu1 %v15010_v21 }
 0xfd3   :  { %v3469_v47 = vpop.permute.xlu0 %3468  ;;  %13203 = vmatmul.mubr.msk.f32.vlgmr.msra.gmra.mrb[22].mxu1 %vm619_vm6, %v2959_v43  ;;  %v3131_v48 = vpop.permute.xlu1 %3130 }
 0xfd4   :  { %13211 = vmatpush3.xpose.msk.msra.mxu1 %vm619_vm6, %v3131_v48  ;;  %13212 = vmatprep.mubr.msk.f32.mxu1 %vm15011_vm5, %v15010_v21 }
 0xfd5   :  { %13220 = vmatprep.subr.mxu1 %v15010_v21 }
 0xfd7   :  { %v3640_v49 = vpop.permute.xlu0 %3639  ;;  %13213 = vmatmul.mubr.msk.f32.vlgmr.msra.gmra.mrb[24].mxu1 %vm619_vm6, %v15710_v38  ;;  %v3296_v50 = vpop.permute.xlu1 %3295 }
 0xfd8   :  { %13221 = vmatpush3.xpose.msk.msra.mxu1 %vm619_vm6, %v3298_v45  ;;  %13222 = vmatprep.mubr.msk.f32.mxu1 %vm15011_vm5, %v15010_v21 }
 0xfd9   :  { %13230 = vmatprep.subr.mxu1 %v15010_v21 }
 0xfdb   :  { %v2540_v51 = vpop.permute.xlu0 %2539  ;;  %13223 = vmatmul.mubr.msk.f32.vlgmr.msra.gmra.mrb[26].mxu1 %vm619_vm6, %v3296_v50  ;;  %v3467_v52 = vpop.permute.xlu1 %3466 }
 0xfdc   :  { %13176 = vmatpush3.msra.mxu0 %v2540_v51  ;;  %13231 = vmatpush3.xpose.msk.msra.mxu1 %vm619_vm6, %v3469_v47 }
 0xfdd   :  { %13232 = vmatprep.mubr.msk.f32.mxu1 %vm15011_vm5, %v15010_v21  ;;  %13240 = vmatprep.subr.mxu1 %v15010_v21 }
 0xfde   :  { %13185 = vmatprep.subr.mxu0 %v15010_v21 }
 0xfdf   :  { %13233 = vmatmul.mubr.msk.f32.vlgmr.msra.gmra.mrb[28].mxu1 %vm619_vm6, %v3467_v52  ;;  %v3638_v53 = vpop.permute.xlu1 %3637 }
 0xfe0   :  { %13241 = vmatpush3.xpose.msk.msra.mxu1 %vm619_vm6, %v3640_v49  ;;  %13242 = vmatprep.mubr.msk.f32.mxu1 %vm15011_vm5, %v15010_v21 }
 0xfe3   :  { %13243 = vmatmul.mubr.msk.f32.vlgmr.msra.gmra.mrb[30].mxu1 %vm619_vm6, %v3638_v53  ;;  %v15784_v22 = vpop.permute.xlu1 %2706 }
0x109a   :  { %v2523_v54 = vpop.f32.mrb[26].mxu0 }
0x109b   :  { %v2527_v55 = vmul.f32 0.35355338, %v2523_v54  ;;  %v13174_v56 = vpop.f32.mrb[27].mxu0  ;;  %v2690_v57 = vpop.f32.mrb[18].mxu1 }
0x109c   :  { %v2694_v58 = vmul.f32 0.35355338, %v2690_v57  ;;  %v13184_v59 = vpop.f32.mrb[19].mxu1 }
0x109d   :  { %v2528_v60 = vsel %vm619_vm6, %v2527_v55, -inf }
0x109e   :  { %2529 = vmax.xlane.f32.xlu0 %v2528_v60  ;;  %v2695_v61 = vsel %vm619_vm6, %v2694_v58, -inf }
0x109f   :  { %2696 = vmax.xlane.f32.xlu1 %v2695_v61 }
0x10a2   :  { %v2861_v62 = vpop.f32.mrb[20].mxu1 }
0x10a3   :  { %v2865_v63 = vmul.f32 0.35355338, %v2861_v62  ;;  %v13194_v1 = vpop.f32.mrb[21].mxu1 }
0x10a5   :  { %v2866_v2 = vsel %vm619_vm6, %v2865_v63, -inf }
0x10a6   :  { %2867 = vmax.xlane.f32.xlu0 %v2866_v2  ;;  %v3032_v3 = vpop.f32.mrb[22].mxu1 }
0x10a7   :  { %v3036_v4 = vmul.f32 0.35355338, %v3032_v3  ;;  %v13204_v5 = vpop.f32.mrb[23].mxu1 }
0x10a9   :  { %v3037_v6 = vsel %vm619_vm6, %v3036_v4, -inf }
0x10aa   :  { %3038 = vmax.xlane.f32.xlu0 %v3037_v6  ;;  %v3202_v26 = vpop.f32.mrb[24].mxu1 }
0x10ab   :  { %v3206_v7 = vmul.f32 0.35355338, %v3202_v26  ;;  %v13214_v8 = vpop.f32.mrb[25].mxu1 }
0x10ad   :  { %v3207_v19 = vsel %vm619_vm6, %v3206_v7, -inf }
0x10ae   :  { %3208 = vmax.xlane.f32.xlu1 %v3207_v19  ;;  %v3369_v20 = vpop.f32.mrb[26].mxu1 }
0x10af   :  { %v3373_v24 = vmul.f32 0.35355338, %v3369_v20  ;;  %v13224_v9 = vpop.f32.mrb[27].mxu1 }
0x10b1   :  { %v3374_v10 = vsel %vm619_vm6, %v3373_v24, -inf }
0x10b2   :  { %3375 = vmax.xlane.f32.xlu0 %v3374_v10  ;;  %v3540_v11 = vpop.f32.mrb[28].mxu1 }
0x10b3   :  { %v3544_v12 = vmul.f32 0.35355338, %v3540_v11  ;;  %v13234_v13 = vpop.f32.mrb[29].mxu1 }
0x10b5   :  { %v3545_v14 = vsel %vm619_vm6, %v3544_v12, -inf }
0x10b6   :  { %3546 = vmax.xlane.f32.xlu1 %v3545_v14  ;;  %v3711_v15 = vpop.f32.mrb[30].mxu1 }
0x10b7   :  { %v3715_v16 = vmul.f32 0.35355338, %v3711_v15  ;;  %v13244_v17 = vpop.f32.mrb[31].mxu1 }
0x10b9   :  { %v3716_v18 = vsel %vm619_vm6, %v3715_v16, -inf }
0x10ba   :  { %3717 = vmax.xlane.f32.xlu0 %v3716_v18 }
0x10c7   :  { %3048 = vrot.lane.b32.xlu1 %v15696_v37, %s15022_s16 }
0x10d0   :  { %2877 = vrot.lane.b32.xlu0 %v15696_v37, %s15020_s20 }
0x112b   :  { %v2530_v23 = vpop.xlane.xlu0 %2529 }
0x112c   :  { %v2531_v25 = vsub.f32 %v2527_v55, %v2530_v23  ;;  %v2697_v27 = vpop.xlane.xlu1 %2696 }
0x112d   :  { %v2698_v28 = vsub.f32 %v2694_v58, %v2697_v27 }
0x112e   :  { %v2532_v29 = vmul.f32 1.442695, %v2531_v25 }
0x112f   :  { %v2699_v30 = vmul.f32 1.442695, %v2698_v28 }
0x1130   :  { %14311 = vpow2.f32 %v2532_v29 }
0x1131   :  { %14313 = vpow2.f32 %v2699_v30 }
0x1133   :  { %v2868_v31 = vpop.xlane.xlu0 %2867 }
0x1134   :  { %v2869_v34 = vsub.f32 %v2865_v63, %v2868_v31 }
0x1136   :  { %v2870_v35 = vmul.f32 1.442695, %v2869_v34 }
0x1137   :  { %v3039_v36 = vpop.xlane.xlu0 %3038 }
0x1138   :  { %14315 = vpow2.f32 %v2870_v35  ;;  %v3040_v39 = vsub.f32 %v3036_v4, %v3039_v36 }
0x113a   :  { %v14312_v40 = vpop.eup %14311  ;;  %v3041_v41 = vmul.f32 1.442695, %v3040_v39 }
0x113b   :  { %v14314_v42 = vpop.eup %14313  ;;  %v2534_v37 = vsel %vm619_vm6, %v14312_v40, 0.0  ;;  %v3209_v48 = vpop.xlane.xlu1 %3208 }
0x113c   :  { %14317 = vpow2.f32 %v3041_v41  ;;  %2535 = vadd.xlane.f32.xlu1 %v2534_v37  ;;  %v2701_v43 = vsel %vm619_vm6, %v14314_v42, 0.0  ;;  %v3210_v49 = vsub.f32 %v3206_v7, %v3209_v48 }
0x113d   :  { %2702 = vadd.xlane.f32.xlu0 %v2701_v43 }
0x113e   :  { %v3211_v53 = vmul.f32 1.442695, %v3210_v49 }
0x113f   :  { %v3376_v50 = vpop.xlane.xlu0 %3375 }
0x1140   :  { %v3377_v52 = vsub.f32 %v3373_v24, %v3376_v50  ;;  %14319 = vpow2.f32 %v3211_v53  ;;  %v12354_v50 = vld [vmem:[%s16965_s6 + $0x30] sm:$0xff] }
0x1142   :  { %v14316_v44 = vpop.eup %14315  ;;  %v3378_v56 = vmul.f32 1.442695, %v3377_v52 }
0x1143   :  { %v2872_v45 = vsel %vm619_vm6, %v14316_v44, 0.0  ;;  %v3547_v51 = vpop.xlane.xlu1 %3546 }
0x1144   :  { %2873 = vadd.xlane.f32.xlu1 %v2872_v45  ;;  %v3548_v54 = vsub.f32 %v3544_v12, %v3547_v51  ;;  %14321 = vpow2.f32 %v3378_v56  ;;  %v12355_v51 = vld [vmem:[%s16965_s6 + $0x38] sm:$0xff] }
0x1145   :  { %v13942_v53 = vpack.c.bf16 %v12355_v51, %v12354_v50 }
0x1146   :  { %v15789_v46 = vpop.eup %14317  ;;  %v3549_v57 = vmul.f32 1.442695, %v3548_v54 }
0x1147   :  { %v3043_v47 = vsel %vm619_vm6, %v15789_v46, 0.0  ;;  %v3718_v55 = vpop.xlane.xlu0 %3717  ;;  %v3049_v5 = vpop.permute.xlu1 %3048 }
0x1148   :  { %3044 = vadd.xlane.f32.xlu0 %v3043_v47  ;;  %v3719_v58 = vsub.f32 %v3715_v16, %v3718_v55  ;;  %14323 = vpow2.f32 %v3549_v57  ;;  %v12353_v47 = vld [vmem:[%s16965_s6 + $0x28] sm:$0xff] }
0x114a   :  { %v3720_v59 = vmul.f32 1.442695, %v3719_v58  ;;  %v14320_v60 = vpop.eup %14319 }
0x114b   :  { %v3213_v62 = vsel %vm619_vm6, %v14320_v60, 0.0  ;;  %v2878_v6 = vpop.permute.xlu0 %2877 }
0x114c   :  { %14325 = vpow2.f32 %v3720_v59 }
0x114e   :  { %v15797_v61 = vpop.eup %14321 }
0x114f   :  { %v3380_v1 = vsel %vm619_vm6, %v15797_v61, 0.0 }
0x1152   :  { %v15800_v63 = vpop.eup %14323 }
0x1153   :  { %v3551_v2 = vsel %vm619_vm6, %v15800_v63, 0.0 }
0x1155   :  { %3385 = vrot.lane.b32.xlu1 %v15710_v38, %s15021_s15 }
0x1156   :  { %v15806_v3 = vpop.eup %14325 }
0x1157   :  { %v3722_v4 = vsel %vm619_vm6, %v15806_v3, 0.0 }
0x115e   :  { %3218 = vrot.lane.b32.xlu0 %v15710_v38, %s15012_s14 }
0x1179   :  { %3214 = vadd.xlane.f32.xlu1 %v3213_v62 }
0x117d   :  { %3381 = vadd.xlane.f32.xlu0 %v3380_v1  ;;  %3552 = vadd.xlane.f32.xlu1 %v3551_v2 }
0x1181   :  { %3723 = vadd.xlane.f32.xlu1 %v3722_v4 }
0x1192   :  { %3727 = vrot.lane.b32.xlu1 %v15710_v38, %s15022_s16 }
0x1193   :  { %3556 = vrot.lane.b32.xlu0 %v15710_v38, %s15020_s20 }
0x11c9   :  { %v2536_v26 = vpop.xlane.xlu1 %2535 }
0x11ca   :  { %14327 = vrcp.f32 %v2536_v26  ;;  %v2703_v7 = vpop.xlane.xlu0 %2702 }
0x11cb   :  { %14329 = vrcp.f32 %v2703_v7 }
0x11d1   :  { %v2874_v8 = vpop.xlane.xlu1 %2873 }
0x11d2   :  { %14331 = vrcp.f32 %v2874_v8 }
0x11d4   :  { %v14328_v19 = vpop.eup %14327 }
0x11d5   :  { %v3045_v20 = vpop.xlane.xlu0 %3044  ;;  %v2538_v24 = vmul.f32 %v14328_v19, %v14312_v40  ;;  %v14330_v9 = vpop.eup %14329 }
0x11d6   :  { %14333 = vrcp.f32 %v3045_v20  ;;  %v2705_v38 = vmul.f32 %v14330_v9, %v14314_v42  ;;  %v3386_v15 = vpop.permute.xlu1 %3385 }
0x11d7   :  { %13178 = vmatmul.mubr.msk.f32.vlgmr.msra.gmra.mrb[28].mxu0 %vm619_vm6, %v2538_v24 }
0x11d8   :  { %13186 = vmatpush3.msra.mxu0 %v15784_v22  ;;  %13187 = vmatprep.mubr.msk.f32.mxu0 %vm15011_vm5, %v15010_v21 }
0x11d9   :  { %13195 = vmatprep.subr.mxu0 %v15010_v21  ;;  %v3219_v14 = vpop.permute.xlu0 %3218 }
0x11db   :  { %13188 = vmatmul.mubr.msk.f32.vlgmr.msra.gmra.mrb[30].mxu0 %vm619_vm6, %v2705_v38 }
0x11dc   :  { %v14332_v10 = vpop.eup %14331  ;;  %13196 = vmatpush3.msra.mxu0 %v2878_v6  ;;  %13197 = vmatprep.mubr.msk.f32.mxu0 %vm15011_vm5, %v15010_v21 }
0x11dd   :  { %13205 = vmatprep.subr.mxu0 %v15010_v21  ;;  %v2876_v11 = vmul.f32 %v14332_v10, %v14316_v44 }
0x11df   :  { %13198 = vmatmul.mubr.msk.f32.vlgmr.msra.gmra.mrb[32].mxu0 %vm619_vm6, %v2876_v11 }
0x11e0   :  { %v14334_v12 = vpop.eup %14333  ;;  %13206 = vmatpush3.msra.mxu0 %v3049_v5  ;;  %13207 = vmatprep.mubr.msk.f32.mxu0 %vm15011_vm5, %v15010_v21  ;;  %v12356_v5 = vld [vmem:[#allocation11 + $0x1] ss:$0 sm:$0xff] }
0x11e1   :  { %13215 = vmatprep.subr.mxu0 %v15010_v21  ;;  %v3047_v13 = vmul.f32 %v14334_v12, %v15789_v46  ;;  %v12352_v46 = vld [vmem:[%s16965_s6 + $0x20] sm:$0xff]  ;;  %s16977_s6 = sld [smem:[#allocation55_spill]] }
0x11e2   :  { %v13938_v48 = vpack.c.bf16 %v12353_v47, %v12352_v46  ;;  %v12359_v47 = vld [vmem:[#allocation12 + $0x1] ss:$0 sm:$0xff] }
0x11e3   :  { %13208 = vmatmul.mubr.msk.f32.vlgmr.msra.gmra.mrb[34].mxu0 %vm619_vm6, %v3047_v13 }
0x11e4   :  { %13216 = vmatpush3.msra.mxu0 %v3219_v14  ;;  %13217 = vmatprep.mubr.msk.f32.mxu0 %vm15011_vm5, %v15010_v21 }
0x11e5   :  { %13225 = vmatprep.subr.mxu0 %v15010_v21  ;;  %13939 = vmatprep.subr.bf16.mxu1 %v13938_v48 }
0x11e6   :  { %13941 = vmatpush3.bf16.msra.mxu1 %v13938_v48 }
0x11e7   :  { %13943 = vmatprep.subr.bf16.mxu1 %v13942_v53 }
0x11ea   :  { %13945 = vmatpush3.bf16.msra.mxu1 %v13942_v53 }
0x1206   :  { %v3215_v16 = vpop.xlane.xlu1 %3214 }
0x1207   :  { %14335 = vrcp.f32 %v3215_v16 }
0x120a   :  { %v3382_v17 = vpop.xlane.xlu0 %3381  ;;  %v3553_v18 = vpop.xlane.xlu1 %3552 }
0x120b   :  { %14337 = vrcp.f32 %v3382_v17  ;;  %v12361_v17 = vld [vmem:[%s16966_s4 + $0x20] sm:$0xff] }
0x120c   :  { %14339 = vrcp.f32 %v3553_v18  ;;  %v12362_v18 = vld [vmem:[%s16966_s4 + $0x28] sm:$0xff] }
0x120e   :  { %v3724_v22 = vpop.xlane.xlu1 %3723  ;;  %v3557_v30 = vpop.permute.xlu0 %3556 }
0x120f   :  { %14341 = vrcp.f32 %v3724_v22  ;;  %v12363_v22 = vld [vmem:[%s16966_s4 + $0x30] sm:$0xff] }
0x1211   :  { %v14336_v23 = vpop.eup %14335 }
0x1212   :  { %v3217_v25 = vmul.f32 %v14336_v23, %v14320_v60  ;;  %v3728_v35 = vpop.permute.xlu1 %3727  ;;  %v13946_v23 = vpack.c.bf16 %v12362_v18, %v12361_v17  ;;  %v4196_v17 = vld [vmem:[%s16968_s23 + $0x10] sm:$0xff] }
0x1214   :  { %13218 = vmatmul.mubr.msk.f32.vlgmr.msra.gmra.mrb[36].mxu0 %vm619_vm6, %v3217_v25  ;;  %v12364_v25 = vld [vmem:[%s16966_s4 + $0x38] sm:$0xff]  ;;  %s16978_s4 = sld [smem:[#allocation56_spill]] }
0x1215   :  { %v14338_v27 = vpop.eup %14337  ;;  %13226 = vmatpush3.msra.mxu0 %v3386_v15  ;;  %13227 = vmatprep.mubr.msk.f32.mxu0 %vm15011_vm5, %v15010_v21 }
0x1216   :  { %13235 = vmatprep.subr.mxu0 %v15010_v21  ;;  %v3384_v28 = vmul.f32 %v14338_v27, %v15797_v61  ;;  %v14340_v29 = vpop.eup %14339  ;;  %v13950_v27 = vpack.c.bf16 %v12364_v25, %v12363_v22  ;;  %v4197_v22 = vld [vmem:[%s16968_s23 + $0x18] sm:$0xff] }
0x1217   :  { %v3555_v31 = vmul.f32 %v14340_v29, %v15800_v63  ;;  %v12369_v29 = vld [vmem:[%s16967_s13 + $0x48] sm:$0xff] }
0x1218   :  { %13228 = vmatmul.mubr.msk.f32.vlgmr.msra.gmra.mrb[38].mxu0 %vm619_vm6, %v3384_v28  ;;  %v12368_v28 = vld [vmem:[%s16967_s13 + $0x40] sm:$0xff] }
0x1219   :  { %13236 = vmatpush3.msra.mxu0 %v3557_v30  ;;  %13237 = vmatprep.mubr.msk.f32.mxu0 %vm15011_vm5, %v15010_v21  ;;  %v14342_v34 = vpop.eup %14341  ;;  %v12370_v30 = vld [vmem:[%s16967_s13 + $0x50] sm:$0xff] }
0x121a   :  { %13245 = vmatprep.subr.mxu0 %v15010_v21  ;;  %v3726_v36 = vmul.f32 %v14342_v34, %v15806_v3  ;;  %v12371_v34 = vld [vmem:[%s16967_s13 + $0x58] sm:$0xff] }
0x121c   :  { %13238 = vmatmul.mubr.msk.f32.vlgmr.msra.gmra.mrb[40].mxu0 %vm619_vm6, %v3555_v31  ;;  %v13954_v31 = vpack.c.bf16 %v12369_v29, %v12368_v28 }
0x121d   :  { %13246 = vmatpush3.msra.mxu0 %v3728_v35  ;;  %13247 = vmatprep.mubr.msk.f32.mxu0 %vm15011_vm5, %v15010_v21  ;;  %v13958_v35 = vpack.c.bf16 %v12371_v34, %v12370_v30 }
0x121e   :  { %13947 = vmatprep.subr.bf16.mxu0 %v13946_v23  ;;  %13955 = vmatprep.subr.bf16.mxu1 %v13954_v31 }
0x1220   :  { %13248 = vmatmul.mubr.msk.f32.vlgmr.msra.gmra.mrb[42].mxu0 %vm619_vm6, %v3726_v36  ;;  %v12372_v36 = vld [vmem:[%s16967_s13 + $0x60] sm:$0xff] }
0x1221   :  { %13949 = vmatpush3.bf16.msra.mxu0 %v13946_v23  ;;  %v13974_v23 = vpack.c.bf16 %v4197_v22, %v4196_v17 }
0x1222   :  { %13951 = vmatprep.subr.bf16.mxu0 %v13950_v27 }
0x1225   :  { %13953 = vmatpush3.bf16.msra.mxu0 %v13950_v27 }
0x12aa   :  { %v2611_v39 = vpop.f32.mrb[28].mxu0 }
0x12ab   :  { %2615 = vst.msk [vmem:[#allocation2] sm:$0xff] %vm619_vm6, %v2611_v39  ;;  %v13179_v40 = vpop.f32.mrb[29].mxu0  ;;  %v12373_v39 = vld [vmem:[%s16967_s13 + $0x68] sm:$0xff] }
0x12ac   :  { %v13962_v40 = vpack.c.bf16 %v12373_v39, %v12372_v36 }
0x12ae   :  { %v2778_v41 = vpop.f32.mrb[30].mxu0 }
0x12af   :  { %2783 = vrot.lane.b32.xlu0 %v2778_v41, %s15000_s29  ;;  %v13189_v42 = vpop.f32.mrb[31].mxu0 }
0x12b2   :  { %v2949_v37 = vpop.f32.mrb[32].mxu0 }
0x12b3   :  { %2954 = vrot.lane.b32.xlu1 %v2949_v37, %s14991_s18  ;;  %v13199_v43 = vpop.f32.mrb[33].mxu0 }
0x12b6   :  { %v3120_v44 = vpop.f32.mrb[34].mxu0 }
0x12b7   :  { %3125 = vrot.lane.b32.xlu1 %v3120_v44, %s15023_s22  ;;  %v13209_v45 = vpop.f32.mrb[35].mxu0 }
0x12e7   :  { %v3290_v49 = vpop.f32.mrb[36].mxu0 }
0x12e8   :  { %3294 = vst.msk [vmem:[#allocation2 + $0x8] sm:$0xff] %vm619_vm6, %v3290_v49  ;;  %v13219_v52 = vpop.f32.mrb[37].mxu0  ;;  %v12360_v49 = vld [vmem:[#allocation14 + $0x1] ss:$0 sm:$0xff] }
0x12eb   :  { %v3457_v54 = vpop.f32.mrb[38].mxu0 }
0x12ec   :  { %3462 = vrot.lane.b32.xlu0 %v3457_v54, %s15000_s29  ;;  %v13229_v55 = vpop.f32.mrb[39].mxu0 }
0x12ef   :  { %v3628_v56 = vpop.f32.mrb[40].mxu0 }
0x12f0   :  { %3633 = vrot.lane.b32.xlu0 %v3628_v56, %s14991_s18  ;;  %v13239_v57 = vpop.f32.mrb[41].mxu0  ;;  %v12374_v56 = vld [vmem:[%s16967_s13 + $0x70] sm:$0xff] }
0x12f1   :  { %v12375_v57 = vld [vmem:[%s16967_s13 + $0x78] sm:$0xff]  ;;  %s16979_s13 = sld [smem:[#allocation61_spill]] }
0x12f3   :  { %v3799_v58 = vpop.f32.mrb[42].mxu0 }
0x12f4   :  { %3804 = vrot.lane.b32.xlu1 %v3799_v58, %s15023_s22  ;;  %v13249_v59 = vpop.f32.mrb[43].mxu0  ;;  %v13966_v58 = vpack.c.bf16 %v12375_v57, %v12374_v56  ;;  %v4474_v57 = vld [vmem:[%s16970_s26] sm:$0xff] }
0x12f5   :  { %v12365_v59 = vld [vmem:[#allocation15 + $0x1] ss:$0 sm:$0xff] }
0x1321   :  { %v2784_v60 = vpop.permute.xlu0 %2783 }
0x1322   :  { %2786 = vst.msk [vmem:[#allocation2] sm:$0xff] %vm953_vm7, %v2784_v60 }
0x1325   :  { %v2955_v61 = vpop.permute.xlu1 %2954 }
0x1326   :  { %2957 = vst.msk [vmem:[#allocation2] sm:$0xff] %vm1125_vm8, %v2955_v61 }
0x1329   :  { %v3126_v62 = vpop.permute.xlu1 %3125 }
0x132a   :  { %3128 = vst.msk [vmem:[#allocation2] sm:$0xff] %vm1297_vm9, %v3126_v62 }
0x1331   :  { %v3808_v63 = vld [vmem:[#allocation2] sm:$0xff] }
0x1332   :  { %13258 = vmatprep.mubr.msk.f32.mxu1 %vm534_vm4, %v3808_v63 }
0x135e   :  { %v3463_v1 = vpop.permute.xlu0 %3462 }
0x135f   :  { %3465 = vst.msk [vmem:[#allocation2 + $0x8] sm:$0xff] %vm953_vm7, %v3463_v1 }
0x1362   :  { %v3634_v2 = vpop.permute.xlu0 %3633 }
0x1363   :  { %3636 = vst.msk [vmem:[#allocation2 + $0x8] sm:$0xff] %vm1125_vm8, %v3634_v2 }
0x1366   :  { %v3805_v3 = vpop.permute.xlu1 %3804 }
0x1367   :  { %3807 = vst.msk [vmem:[#allocation2 + $0x8] sm:$0xff] %vm1297_vm9, %v3805_v3  ;;  %v12376_v3 = vld [vmem:[#allocation17 + $0x1] ss:$0 sm:$0xff] }
0x136e   :  { %v3809_v4 = vld [vmem:[#allocation2 + $0x8] sm:$0xff] }
0x136f   :  { %13259 = vmatmul.mubr.msk.f32.vlgmr.msra.gmra.mrb[32].mxu1 %vm534_vm4, %v3809_v4 }
0x1370   :  { %13957 = vmatpush3.bf16.msra.mxu1 %v13954_v31 }
0x1371   :  { %13959 = vmatprep.subr.bf16.mxu1 %v13958_v35 }
0x1374   :  { %13961 = vmatpush3.bf16.msra.mxu1 %v13958_v35  ;;  %v12379_v35 = vld [vmem:[#allocation18 + $0x1] ss:$0 sm:$0xff] }
0x1375   :  { %13963 = vmatprep.subr.bf16.mxu1 %v13962_v40 }
0x1378   :  { %13965 = vmatpush3.bf16.msra.mxu1 %v13962_v40 }
0x1379   :  { %13967 = vmatprep.subr.bf16.mxu1 %v13966_v58 }
0x137c   :  { %13969 = vmatpush3.bf16.msra.mxu1 %v13966_v58  ;;  %v4475_v58 = vld [vmem:[%s16970_s26 + $0x8] sm:$0xff] }
0x1442   :  { %v13260_v6 = vpop.f32.mrb[32].mxu1 }
0x1443   :  { %v3901_v26 = vadd.f32 %v13260_v6, %v12356_v5  ;;  %v3895_v7 = vpop.f32.mrb[33].mxu1 }
0x1444   :  { %v3896_v8 = vadd.f32 %v12356_v5, %v3895_v7 }
0x1445   :  { %v3905_v19 = vadd.f32 %v3901_v26, %v15688_v33 }
0x1446   :  { %v3904_v20 = vadd.f32 %v3896_v8, %v15686_v32 }
0x1447   :  { %v3913_v24 = vsel %vm534_vm4, %v3905_v19, 0.0 }
0x1448   :  { %3914 = vadd.xlane.f32.xlu1 %v3913_v24  ;;  %v3910_v9 = vsel %vm534_vm4, %v3904_v20, 0.0 }
0x1449   :  { %3911 = vadd.xlane.f32.xlu0 %v3910_v9 }
0x14d5   :  { %v3915_v38 = vpop.xlane.xlu1 %3914 }
0x14d6   :  { %v3917_v10 = vmul.f32 0.03125, %v3915_v38  ;;  %v3912_v11 = vpop.xlane.xlu0 %3911 }
0x14d7   :  { %v3916_v12 = vmul.f32 0.03125, %v3912_v11 }
0x14d8   :  { %v3919_v13 = vsub.f32 %v3905_v19, %v3917_v10 }
0x14d9   :  { %v3918_v14 = vsub.f32 %v3904_v20, %v3916_v12 }
0x14da   :  { %v3921_v33 = vmul.f32 %v3919_v13, %v3919_v13 }
0x14db   :  { %v3920_v15 = vmul.f32 %v3918_v14, %v3918_v14 }
0x14dc   :  { %v3925_v16 = vsel %vm534_vm4, %v3921_v33, 0.0  ;;  %v4194_v33 = vld [vmem:[%s16968_s23] sm:$0xff] }
0x14dd   :  { %v3922_v32 = vsel %vm534_vm4, %v3920_v15, 0.0 }
0x14de   :  { %3923 = vadd.xlane.f32.xlu0 %v3922_v32 }
0x14e2   :  { %3926 = vadd.xlane.f32.xlu0 %v3925_v16  ;;  %v4195_v16 = vld [vmem:[%s16968_s23 + $0x8] sm:$0xff]  ;;  %s16980_s23 = sld [smem:[#allocation62_spill]] }
0x14e3   :  { %v13970_v18 = vpack.c.bf16 %v4195_v16, %v4194_v33 }
0x14e5   :  { %13971 = vmatprep.subr.bf16.mxu0 %v13970_v18 }
0x156b   :  { %v3924_v41 = vpop.xlane.xlu0 %3923 }
0x156c   :  { %v3928_v42 = vmul.f32 0.03125, %v3924_v41  ;;  %v12380_v41 = vld [vmem:[#allocation20 + $0x1] ss:$0 sm:$0xff] }
0x156e   :  { %v3930_v37 = vadd.f32 1e-05, %v3928_v42 }
0x156f   :  { %v3927_v43 = vpop.xlane.xlu0 %3926 }
0x1570   :  { %14343 = vrsqrt.f32 %v3930_v37  ;;  %v3929_v44 = vmul.f32 0.03125, %v3927_v43 }
0x1572   :  { %v3931_v45 = vadd.f32 1e-05, %v3929_v44 }
0x1574   :  { %14345 = vrsqrt.f32 %v3931_v45  ;;  %v4290_v45 = vld [vmem:[%s16969_s25 + $0x8] sm:$0xff] }
0x157a   :  { %v14344_v46 = vpop.eup %14343 }
0x157b   :  { %v3934_v48 = vmul.f32 %v14344_v46, %v3918_v14  ;;  %v4291_v46 = vld [vmem:[%s16969_s25 + $0x10] sm:$0xff] }
0x157d   :  { %v3942_v50 = vmul.f32 %v12359_v47, %v3934_v48  ;;  %v4296_v48 = vrot.slane %v4290_v45, 4 }
0x157e   :  { %v14346_v51 = vpop.eup %14345 }
0x157f   :  { %v3935_v52 = vmul.f32 %v14346_v51, %v3919_v13  ;;  %v3950_v53 = vadd.f32 %v12360_v49, %v3942_v50 }
0x1581   :  { %v3943_v54 = vmul.f32 %v12359_v47, %v3935_v52  ;;  %13269 = vmatprep.mubr.msk.f32.mxu0 %vm534_vm4, %v3950_v53  ;;  %v4292_v47 = vld [vmem:[%s16969_s25 + $0x18] sm:$0x7] }
0x1582   :  { %v4299_v50 = vrot.slane %v4292_v47, 4 }
0x1583   :  { %v3951_v55 = vadd.f32 %v12360_v49, %v3943_v54  ;;  %v4297_v49 = vrot.slane %v4291_v46, 4  ;;  %v14516_v54 = vld [vmem:[%s16960_s1 + $0x8] sm:$0xff] }
0x1585   :  { %13270 = vmatmul.mubr.msk.f32.vlgmr.msra.gmra.mrb[44].mxu0 %vm534_vm4, %v3951_v55  ;;  %v4298_v51 = vsel %vm442_vm0, %v4296_v48, %v4297_v49  ;;  %v4300_v52 = vsel %vm442_vm0, %v4297_v49, %v4299_v50 }
0x1586   :  { %13973 = vmatpush3.bf16.msra.mxu0 %v13970_v18 }
0x1587   :  { %13975 = vmatprep.subr.bf16.mxu0 %v13974_v23 }
0x158a   :  { %13977 = vmatpush3.bf16.msra.mxu0 %v13974_v23 }
0x1658   :  { %v13271_v60 = vpop.f32.mrb[44].mxu0 }
0x1659   :  { %v4043_v61 = vadd.f32 %v13271_v60, %v12365_v59  ;;  %v4037_v62 = vpop.f32.mrb[45].mxu0  ;;  %v12381_v60 = vld [vmem:[#allocation8] ss:$0 sm:$0xff] }
0x165a   :  { %v4038_v63 = vadd.f32 %v12365_v59, %v4037_v62  ;;  %v13990_v59 = vpack.c.bf16 %v4475_v58, %v4474_v57 }
0x165b   :  { %v4047_v2 = vmax.f32 %v4043_v61, 0.0 }
0x165c   :  { %v4046_v1 = vmax.f32 %v4038_v63, 0.0  ;;  %13991 = vmatprep.subr.bf16.mxu1 %v13990_v59 }
0x165e   :  { %13288 = vmatprep.mubr.msk.f32.mxu1 %vm2228_vm10, %v4046_v1 }
0x165f   :  { %13289 = vmatmul.mubr.msk.f32.vlgmr.msra.gmra.mrb[34].mxu1 %vm2228_vm10, %v4047_v2  ;;  %v14511_v2 = vld [vmem:[%s16960_s1] sm:$0xff] }
0x1660   :  { %13993 = vmatpush3.bf16.msra.mxu1 %v13990_v59 }
0x1732   :  { %v13290_v4 = vpop.f32.mrb[34].mxu1 }
0x1733   :  { %v4143_v5 = vadd.f32 %v13290_v4, %v12376_v3  ;;  %v4137_v6 = vpop.f32.mrb[35].mxu1  ;;  %v4476_v4 = vld [vmem:[%s16970_s26 + $0x10] sm:$0xff] }
0x1734   :  { %v4138_v26 = vadd.f32 %v12376_v3, %v4137_v6  ;;  %v14512_v3 = vld [vmem:[%s16960_s1 + $0x8] sm:$0xff] }
0x1735   :  { %v4147_v7 = vadd.f32 %v4143_v5, %v3951_v55  ;;  %v4289_v55 = vld [vmem:[%s16969_s25] sm:$0xff]  ;;  %v4477_v5 = vld [vmem:[%s16970_s26 + $0x18] sm:$0xff]  ;;  %s16981_s25 = sld [smem:[#allocation51_spill]] }
0x1736   :  { %v4146_v8 = vadd.f32 %v4138_v26, %v3950_v53  ;;  %v13978_v53 = vpack.c.bf16 %v4300_v52, %v4298_v51  ;;  %v13984_v56 = vpack.c.bf16 %v4290_v45, %v4289_v55  ;;  %v13994_v6 = vpack.c.bf16 %v4477_v5, %v4476_v4  ;;  %v12390_v26 = vld [vmem:[#allocation21] ss:$0 sm:$0xff] }
0x1737   :  { %v4155_v19 = vsel %vm534_vm4, %v4147_v7, 0.0 }
0x1738   :  { %4156 = vadd.xlane.f32.xlu0 %v4155_v19  ;;  %v4152_v20 = vsel %vm534_vm4, %v4146_v8, 0.0  ;;  %13980 = vmatprep.subr.msk.bf16.mxu0 %vm15905_vm12, %v13978_v53 }
0x1739   :  { %4153 = vadd.xlane.f32.xlu1 %v4152_v20  ;;  %13995 = vmatprep.subr.bf16.mxu1 %v13994_v6 }
0x173a   :  { %13997 = vmatpush3.bf16.msra.mxu1 %v13994_v6 }
0x173b   :  { %13337 = vmatprep.subr.mxu1 %v15010_v21 }
0x17c5   :  { %v4157_v24 = vpop.xlane.xlu0 %4156 }
0x17c6   :  { %v4159_v9 = vmul.f32 0.03125, %v4157_v24  ;;  %v4154_v38 = vpop.xlane.xlu1 %4153  ;;  %v14513_v24 = vld [vmem:[%s16964_s2] sm:$0xff] }
0x17c7   :  { %v4158_v10 = vmul.f32 0.03125, %v4154_v38  ;;  %v14514_v38 = vld [vmem:[%s16964_s2 + $0x8] sm:$0xff] }
0x17c8   :  { %v4161_v11 = vsub.f32 %v4147_v7, %v4159_v9 }
0x17c9   :  { %v4160_v12 = vsub.f32 %v4146_v8, %v4158_v10 }
0x17ca   :  { %v4163_v13 = vmul.f32 %v4161_v11, %v4161_v11 }
0x17cb   :  { %v4162_v14 = vmul.f32 %v4160_v12, %v4160_v12 }
0x17cc   :  { %v4167_v15 = vsel %vm534_vm4, %v4163_v13, 0.0 }
0x17cd   :  { %4168 = vadd.xlane.f32.xlu0 %v4167_v15  ;;  %v4164_v32 = vsel %vm534_vm4, %v4162_v14, 0.0 }
0x17ce   :  { %4165 = vadd.xlane.f32.xlu1 %v4164_v32 }
0x185a   :  { %v4169_v25 = vpop.xlane.xlu0 %4168 }
0x185b   :  { %v4171_v27 = vmul.f32 0.03125, %v4169_v25  ;;  %v4166_v28 = vpop.xlane.xlu1 %4165 }
0x185c   :  { %v4170_v29 = vmul.f32 0.03125, %v4166_v28 }
0x185d   :  { %v4173_v30 = vadd.f32 1e-05, %v4171_v27 }
0x185e   :  { %v4172_v31 = vadd.f32 1e-05, %v4170_v29 }
0x185f   :  { %14347 = vrsqrt.f32 %v4173_v30 }
0x1860   :  { %14349 = vrsqrt.f32 %v4172_v31 }
0x1869   :  { %v14348_v34 = vpop.eup %14347 }
0x186a   :  { %v14350_v36 = vpop.eup %14349  ;;  %v4177_v39 = vmul.f32 %v14348_v34, %v4161_v11  ;;  %v12391_v11 = vld [vmem:[%s16973_s8] ss:$0 sm:$0xff] }
0x186b   :  { %v4176_v40 = vmul.f32 %v14350_v36, %v4160_v12 }
0x186c   :  { %v4185_v42 = vmul.f32 %v12379_v35, %v4177_v39 }
0x186d   :  { %v4184_v37 = vmul.f32 %v12379_v35, %v4176_v40 }
0x186e   :  { %v4193_v44 = vadd.f32 %v12380_v41, %v4185_v42 }
0x186f   :  { %v4192_v43 = vadd.f32 %v12380_v41, %v4184_v37 }
0x1871   :  { %13299 = vmatprep.mubr.msk.f32.mxu0 %vm534_vm4, %v4192_v43 }
0x1872   :  { %13300 = vmatmul.mubr.msk.f32.vlgmr.msra.gmra.mrb[46].mxu0 %vm534_vm4, %v4193_v44 }
0x1873   :  { %13983 = vmatpush3.bf16.msk.msra.mxu0 %vm15905_vm12, %v13978_v53 }
0x1874   :  { %13986 = vmatprep.subr.msk.bf16.mxu0 %vm15440_vm3, %v13984_v56 }
0x1945   :  { %v13301_v61 = vpop.f32.mrb[46].mxu0 }
0x1946   :  { %v15918_v62 = vadd.f32 %v13301_v61, %v12381_v60  ;;  %v4277_v63 = vpop.f32.mrb[47].mxu0 }
0x1947   :  { %v15920_v1 = vadd.f32 %v12381_v60, %v4277_v63 }
0x1948   :  { %4288 = vst.msk [vmem:[#allocation29 + $0x8] sm:$0xff] %vm4286_vm13, %v15918_v62 }
0x1949   :  { %13306 = vmatprep.mubr.msk.f32.mxu0 %vm4286_vm13, %v15920_v1  ;;  %4287 = vst.msk [vmem:[#allocation29] sm:$0xff] %vm4286_vm13, %v15920_v1 }
0x194a   :  { %13307 = vmatmul.mubr.msk.f32.vlgmr.msra.gmra.mrb[48].mxu0 %vm4286_vm13, %v15918_v62 }
0x194b   :  { %13989 = vmatpush3.bf16.msk.msra.mxu0 %vm15440_vm3, %v13984_v56  ;;  %13313 = vmatprep.mubr.msk.f32.mxu0 %vm435_vm1, %v14511_v2 }
0x194c   :  { %13327 = vmatprep.subr.mxu0 %v15010_v21 }
0x1952   :  { %13314 = vmatmul.mubr.msk.f32.vlgmr.msra.gmra.mrb[48].mxu0 %vm435_vm1, %v14512_v3 }
0x1953   :  { %13329 = vmatprep.mubr.msk.f32.mxu0 %vm15011_vm5, %v15010_v21 }
0x1a25   :  { %v13315_v7 = vpop.f32.mrb[48].mxu0 }
0x1a26   :  { %v4471_v8 = vadd.f32 %v13315_v7, %v12390_v26  ;;  %v4454_v19 = vpop.f32.mrb[49].mxu0 }
0x1a27   :  { %v4470_v20 = vadd.f32 %v12390_v26, %v4454_v19 }
0x1a28   :  { %v15946_v10 = vadd.f32 %v14514_v38, %v4471_v8 }
0x1a29   :  { %v15943_v9 = vadd.f32 %v14513_v24, %v4470_v20 }
0x1a2b   :  { %13324 = vmatprep.mubr.msk.f32.mxu1 %vm534_vm4, %v15943_v9 }
0x1a2c   :  { %13325 = vmatmul.mubr.msk.f32.vlgmr.msra.gmra.mrb[36].mxu1 %vm534_vm4, %v15946_v10 }
0x1a2d   :  { %13339 = vmatprep.mubr.msk.f32.mxu1 %vm15011_vm5, %v15010_v21 }
0x1aff   :  { %v13326_v12 = vpop.f32.mrb[36].mxu1 }
0x1b00   :  { %v4557_v13 = vpop.f32.mrb[37].mxu1  ;;  %v15969_v15 = vadd.f32 %v13326_v12, %v12391_v11 }
0x1b01   :  { %v15955_v14 = vadd.f32 %v12391_v11, %v4557_v13 }
0x1b03   :  { %4734 = vrot.lane.b32.xlu0 %v15955_v14, %s15014_s24  ;;  %4567 = vrot.lane.b32.xlu1 %v15955_v14, %s15013_s3 }
0x1b07   :  { %4903 = vrot.lane.b32.xlu0 %v15955_v14, %s15017_s0  ;;  %4732 = vrot.lane.b32.xlu1 %v15955_v14, %s15015_s12 }
0x1b0b   :  { %5074 = vrot.lane.b32.xlu0 %v15955_v14, %s15018_s10  ;;  %4905 = vrot.lane.b32.xlu1 %v15955_v14, %s15016_s7 }
0x1b0f   :  { %5413 = vrot.lane.b32.xlu0 %v15969_v15, %s15014_s24  ;;  %5076 = vrot.lane.b32.xlu1 %v15955_v14, %s15019_s11 }
0x1b13   :  { %5584 = vrot.lane.b32.xlu0 %v15969_v15, %s15016_s7  ;;  %5246 = vrot.lane.b32.xlu1 %v15969_v15, %s15013_s3 }
0x1b17   :  { %5755 = vrot.lane.b32.xlu0 %v15969_v15, %s15019_s11  ;;  %5411 = vrot.lane.b32.xlu1 %v15969_v15, %s15015_s12 }
0x1b1b   :  { %4655 = vrot.lane.b32.xlu0 %v15955_v14, %s15012_s14  ;;  %5582 = vrot.lane.b32.xlu1 %v15969_v15, %s15017_s0 }
0x1b1f   :  { %5753 = vrot.lane.b32.xlu1 %v15969_v15, %s15018_s10 }
0x1b23   :  { %4822 = vrot.lane.b32.xlu1 %v15955_v14, %s15021_s15 }
0x1b75   :  { %v4735_v32 = vpop.permute.xlu0 %4734  ;;  %v4568_v33 = vpop.permute.xlu1 %4567 }
0x1b76   :  { %13328 = vmatpush3.xpose.msk.msra.mxu0 %vm619_vm6, %v4568_v33  ;;  %13338 = vmatpush3.xpose.msk.msra.mxu1 %vm619_vm6, %v4735_v32 }
0x1b77   :  { %13347 = vmatprep.subr.mxu1 %v15010_v21  ;;  %13332 = vmatprep.subr.mxu0 %v15010_v21 }
0x1b79   :  { %v4904_v16 = vpop.permute.xlu0 %4903  ;;  %13330 = vmatmul.mubr.msk.f32.vlgmr.msra.gmra.mrb[50].mxu0 %vm619_vm6, %v15955_v14  ;;  %v4733_v17 = vpop.permute.xlu1 %4732 }
0x1b7a   :  { %13340 = vmatmul.mubr.msk.f32.vlgmr.msra.gmra.mrb[38].mxu1 %vm619_vm6, %v4733_v17  ;;  %13334 = vmatprep.mubr.msk.f32.mxu0 %vm15011_vm5, %v15010_v21 }
0x1b7b   :  { %13349 = vmatprep.mubr.msk.f32.mxu1 %vm15011_vm5, %v15010_v21 }
0x1b7d   :  { %v5075_v18 = vpop.permute.xlu0 %5074  ;;  %v4906_v22 = vpop.permute.xlu1 %4905 }
0x1b7e   :  { %13348 = vmatpush3.xpose.msk.msra.mxu1 %vm619_vm6, %v4906_v22 }
0x1b7f   :  { %13357 = vmatprep.subr.mxu1 %v15010_v21 }
0x1b81   :  { %v5414_v23 = vpop.permute.xlu0 %5413  ;;  %13350 = vmatmul.mubr.msk.f32.vlgmr.msra.gmra.mrb[40].mxu1 %vm619_vm6, %v4904_v16  ;;  %v5077_v25 = vpop.permute.xlu1 %5076 }
0x1b82   :  { %13358 = vmatpush3.xpose.msk.msra.mxu1 %vm619_vm6, %v5077_v25  ;;  %13359 = vmatprep.mubr.msk.f32.mxu1 %vm15011_vm5, %v15010_v21 }
0x1b83   :  { %13367 = vmatprep.subr.mxu1 %v15010_v21 }
0x1b85   :  { %v5585_v27 = vpop.permute.xlu0 %5584  ;;  %13360 = vmatmul.mubr.msk.f32.vlgmr.msra.gmra.mrb[42].mxu1 %vm619_vm6, %v5075_v18  ;;  %v5247_v28 = vpop.permute.xlu1 %5246 }
0x1b86   :  { %13368 = vmatpush3.xpose.msk.msra.mxu1 %vm619_vm6, %v5247_v28  ;;  %13369 = vmatprep.mubr.msk.f32.mxu1 %vm15011_vm5, %v15010_v21 }
0x1b87   :  { %13377 = vmatprep.subr.mxu1 %v15010_v21 }
0x1b89   :  { %v5756_v29 = vpop.permute.xlu0 %5755  ;;  %13370 = vmatmul.mubr.msk.f32.vlgmr.msra.gmra.mrb[44].mxu1 %vm619_vm6, %v15969_v15  ;;  %v5412_v30 = vpop.permute.xlu1 %5411 }
0x1b8a   :  { %13378 = vmatpush3.xpose.msk.msra.mxu1 %vm619_vm6, %v5414_v23  ;;  %13379 = vmatprep.mubr.msk.f32.mxu1 %vm15011_vm5, %v15010_v21 }
0x1b8b   :  { %13387 = vmatprep.subr.mxu1 %v15010_v21 }
0x1b8d   :  { %v4656_v31 = vpop.permute.xlu0 %4655  ;;  %13380 = vmatmul.mubr.msk.f32.vlgmr.msra.gmra.mrb[46].mxu1 %vm619_vm6, %v5412_v30  ;;  %v5583_v34 = vpop.permute.xlu1 %5582 }
0x1b8e   :  { %13333 = vmatpush3.msra.mxu0 %v4656_v31  ;;  %13388 = vmatpush3.xpose.msk.msra.mxu1 %vm619_vm6, %v5585_v27 }
0x1b8f   :  { %13389 = vmatprep.mubr.msk.f32.mxu1 %vm15011_vm5, %v15010_v21  ;;  %13397 = vmatprep.subr.mxu1 %v15010_v21 }
0x1b90   :  { %13342 = vmatprep.subr.mxu0 %v15010_v21 }
0x1b91   :  { %13390 = vmatmul.mubr.msk.f32.vlgmr.msra.gmra.mrb[48].mxu1 %vm619_vm6, %v5583_v34  ;;  %v5754_v35 = vpop.permute.xlu1 %5753 }
0x1b92   :  { %13398 = vmatpush3.xpose.msk.msra.mxu1 %vm619_vm6, %v5756_v29  ;;  %13399 = vmatprep.mubr.msk.f32.mxu1 %vm15011_vm5, %v15010_v21 }
0x1b95   :  { %13400 = vmatmul.mubr.msk.f32.vlgmr.msra.gmra.mrb[50].mxu1 %vm619_vm6, %v5754_v35  ;;  %v16043_v8 = vpop.permute.xlu1 %4822 }
0x1c4c   :  { %v4639_v36 = vpop.f32.mrb[50].mxu0 }
0x1c4d   :  { %v4643_v39 = vmul.f32 0.35355338, %v4639_v36  ;;  %v13331_v40 = vpop.f32.mrb[51].mxu0  ;;  %v4806_v41 = vpop.f32.mrb[38].mxu1 }
0x1c4e   :  { %v4810_v42 = vmul.f32 0.35355338, %v4806_v41  ;;  %v13341_v37 = vpop.f32.mrb[39].mxu1 }
0x1c4f   :  { %v4644_v43 = vsel %vm619_vm6, %v4643_v39, -inf }
0x1c50   :  { %4645 = vmax.xlane.f32.xlu0 %v4644_v43  ;;  %v4811_v44 = vsel %vm619_vm6, %v4810_v42, -inf }
0x1c51   :  { %4812 = vmax.xlane.f32.xlu1 %v4811_v44 }
0x1c54   :  { %v4977_v45 = vpop.f32.mrb[40].mxu1 }
0x1c55   :  { %v4981_v46 = vmul.f32 0.35355338, %v4977_v45  ;;  %v13351_v47 = vpop.f32.mrb[41].mxu1 }
0x1c57   :  { %v4982_v48 = vsel %vm619_vm6, %v4981_v46, -inf }
0x1c58   :  { %4983 = vmax.xlane.f32.xlu0 %v4982_v48  ;;  %v5148_v49 = vpop.f32.mrb[42].mxu1 }
0x1c59   :  { %v5152_v50 = vmul.f32 0.35355338, %v5148_v49  ;;  %v13361_v51 = vpop.f32.mrb[43].mxu1 }
0x1c5b   :  { %v5153_v52 = vsel %vm619_vm6, %v5152_v50, -inf }
0x1c5c   :  { %5154 = vmax.xlane.f32.xlu0 %v5153_v52  ;;  %v5318_v53 = vpop.f32.mrb[44].mxu1 }
0x1c5d   :  { %v5322_v55 = vmul.f32 0.35355338, %v5318_v53  ;;  %v13371_v56 = vpop.f32.mrb[45].mxu1 }
0x1c5f   :  { %v5323_v57 = vsel %vm619_vm6, %v5322_v55, -inf }
0x1c60   :  { %5324 = vmax.xlane.f32.xlu1 %v5323_v57  ;;  %v5485_v58 = vpop.f32.mrb[46].mxu1 }
0x1c61   :  { %v5489_v59 = vmul.f32 0.35355338, %v5485_v58  ;;  %v13381_v60 = vpop.f32.mrb[47].mxu1 }
0x1c63   :  { %v5490_v61 = vsel %vm619_vm6, %v5489_v59, -inf }
0x1c64   :  { %5491 = vmax.xlane.f32.xlu0 %v5490_v61  ;;  %v5656_v63 = vpop.f32.mrb[48].mxu1 }
0x1c65   :  { %v5660_v2 = vmul.f32 0.35355338, %v5656_v63  ;;  %v13391_v3 = vpop.f32.mrb[49].mxu1 }
0x1c67   :  { %v5661_v4 = vsel %vm619_vm6, %v5660_v2, -inf }
0x1c68   :  { %5662 = vmax.xlane.f32.xlu1 %v5661_v4  ;;  %v5827_v5 = vpop.f32.mrb[50].mxu1 }
0x1c69   :  { %v5831_v6 = vmul.f32 0.35355338, %v5827_v5  ;;  %v13401_v26 = vpop.f32.mrb[51].mxu1 }
0x1c6b   :  { %v5832_v7 = vsel %vm619_vm6, %v5831_v6, -inf }
0x1c6c   :  { %5833 = vmax.xlane.f32.xlu0 %v5832_v7 }
0x1c79   :  { %5164 = vrot.lane.b32.xlu1 %v15955_v14, %s15022_s16 }
0x1c82   :  { %4993 = vrot.lane.b32.xlu0 %v15955_v14, %s15020_s20 }
0x1cdd   :  { %v4646_v19 = vpop.xlane.xlu0 %4645 }
0x1cde   :  { %v4647_v20 = vsub.f32 %v4643_v39, %v4646_v19  ;;  %v4813_v24 = vpop.xlane.xlu1 %4812 }
0x1cdf   :  { %v4814_v38 = vsub.f32 %v4810_v42, %v4813_v24 }
0x1ce0   :  { %v4648_v11 = vmul.f32 1.442695, %v4647_v20 }
0x1ce1   :  { %v4815_v12 = vmul.f32 1.442695, %v4814_v38 }
0x1ce2   :  { %14351 = vpow2.f32 %v4648_v11 }
0x1ce3   :  { %14353 = vpow2.f32 %v4815_v12 }
0x1ce5   :  { %v4984_v13 = vpop.xlane.xlu0 %4983 }
0x1ce6   :  { %v4985_v32 = vsub.f32 %v4981_v46, %v4984_v13 }
0x1ce8   :  { %v4986_v33 = vmul.f32 1.442695, %v4985_v32 }
0x1ce9   :  { %v5155_v16 = vpop.xlane.xlu0 %5154 }
0x1cea   :  { %14355 = vpow2.f32 %v4986_v33  ;;  %v5156_v17 = vsub.f32 %v5152_v50, %v5155_v16 }
0x1cec   :  { %v14352_v18 = vpop.eup %14351  ;;  %v5157_v22 = vmul.f32 1.442695, %v5156_v17 }
0x1ced   :  { %v14354_v23 = vpop.eup %14353  ;;  %v4650_v14 = vsel %vm619_vm6, %v14352_v18, 0.0  ;;  %v5325_v31 = vpop.xlane.xlu1 %5324 }
0x1cee   :  { %14357 = vpow2.f32 %v5157_v22  ;;  %4651 = vadd.xlane.f32.xlu1 %v4650_v14  ;;  %v4817_v25 = vsel %vm619_vm6, %v14354_v23, 0.0  ;;  %v5326_v34 = vsub.f32 %v5322_v55, %v5325_v31 }
0x1cef   :  { %4818 = vadd.xlane.f32.xlu0 %v4817_v25 }
0x1cf0   :  { %v5327_v40 = vmul.f32 1.442695, %v5326_v34  ;;  %v5926_v34 = vld [vmem:[%s16974_s27] sm:$0xff] }
0x1cf1   :  { %v5492_v35 = vpop.xlane.xlu0 %5491 }
0x1cf2   :  { %v5493_v39 = vsub.f32 %v5489_v59, %v5492_v35  ;;  %14359 = vpow2.f32 %v5327_v40  ;;  %v5927_v35 = vld [vmem:[%s16974_s27 + $0x8] sm:$0xff]  ;;  %v5928_v40 = vld [vmem:[%s16974_s27 + $0x10] sm:$0xff] }
0x1cf4   :  { %v14356_v27 = vpop.eup %14355  ;;  %v5494_v37 = vmul.f32 1.442695, %v5493_v39 }
0x1cf5   :  { %v4988_v28 = vsel %vm619_vm6, %v14356_v27, 0.0  ;;  %v5663_v36 = vpop.xlane.xlu1 %5662 }
0x1cf6   :  { %4989 = vadd.xlane.f32.xlu1 %v4988_v28  ;;  %v5664_v41 = vsub.f32 %v5660_v2, %v5663_v36  ;;  %14361 = vpow2.f32 %v5494_v37  ;;  %v13998_v36 = vpack.c.bf16 %v5927_v35, %v5926_v34 }
0x1cf8   :  { %v16048_v29 = vpop.eup %14357  ;;  %v5665_v43 = vmul.f32 1.442695, %v5664_v41  ;;  %v5929_v41 = vld [vmem:[%s16974_s27 + $0x18] sm:$0xff]  ;;  %13999 = vmatprep.subr.bf16.mxu1 %v13998_v36 }
0x1cf9   :  { %v5159_v30 = vsel %vm619_vm6, %v16048_v29, 0.0  ;;  %v5834_v42 = vpop.xlane.xlu0 %5833  ;;  %v5165_v55 = vpop.permute.xlu1 %5164  ;;  %v14002_v37 = vpack.c.bf16 %v5929_v41, %v5928_v40  ;;  %14001 = vmatpush3.bf16.msra.mxu1 %v13998_v36  ;;  %v12421_v40 = vld [vmem:[%s16977_s6] ss:$0 sm:$0xff] }
0x1cfa   :  { %5160 = vadd.xlane.f32.xlu0 %v5159_v30  ;;  %v5835_v44 = vsub.f32 %v5831_v6, %v5834_v42  ;;  %14363 = vpow2.f32 %v5665_v43 }
0x1cfb   :  { %14003 = vmatprep.subr.bf16.mxu1 %v14002_v37 }
0x1cfc   :  { %v5836_v45 = vmul.f32 1.442695, %v5835_v44  ;;  %v14360_v46 = vpop.eup %14359 }
0x1cfd   :  { %v5329_v48 = vsel %vm619_vm6, %v14360_v46, 0.0  ;;  %v4994_v56 = vpop.permute.xlu0 %4993  ;;  %14005 = vmatpush3.bf16.msra.mxu1 %v14002_v37 }
0x1cfe   :  { %14365 = vpow2.f32 %v5836_v45 }
0x1d00   :  { %v16056_v47 = vpop.eup %14361 }
0x1d01   :  { %v5496_v50 = vsel %vm619_vm6, %v16056_v47, 0.0 }
0x1d04   :  { %v16059_v49 = vpop.eup %14363 }
0x1d05   :  { %v5667_v51 = vsel %vm619_vm6, %v16059_v49, 0.0 }
0x1d07   :  { %5501 = vrot.lane.b32.xlu1 %v15969_v15, %s15021_s15 }
0x1d08   :  { %v16065_v52 = vpop.eup %14365 }
0x1d09   :  { %v5838_v53 = vsel %vm619_vm6, %v16065_v52, 0.0 }
0x1d10   :  { %5334 = vrot.lane.b32.xlu0 %v15969_v15, %s15012_s14 }
0x1d2b   :  { %5330 = vadd.xlane.f32.xlu1 %v5329_v48 }
0x1d2f   :  { %5497 = vadd.xlane.f32.xlu0 %v5496_v50  ;;  %5668 = vadd.xlane.f32.xlu1 %v5667_v51 }
0x1d33   :  { %5839 = vadd.xlane.f32.xlu1 %v5838_v53 }
0x1d44   :  { %5843 = vrot.lane.b32.xlu1 %v15969_v15, %s15022_s16 }
0x1d45   :  { %5672 = vrot.lane.b32.xlu0 %v15969_v15, %s15020_s20 }
0x1d7b   :  { %v4652_v57 = vpop.xlane.xlu1 %4651 }
0x1d7c   :  { %14367 = vrcp.f32 %v4652_v57  ;;  %v4819_v58 = vpop.xlane.xlu0 %4818 }
0x1d7d   :  { %14369 = vrcp.f32 %v4819_v58  ;;  %v12418_v58 = vld [vmem:[#allocation24] ss:$0 sm:$0xff] }
0x1d83   :  { %v4990_v59 = vpop.xlane.xlu1 %4989 }
0x1d84   :  { %14371 = vrcp.f32 %v4990_v59 }
0x1d86   :  { %v14368_v60 = vpop.eup %14367 }
0x1d87   :  { %v5161_v61 = vpop.xlane.xlu0 %5160  ;;  %v4654_v63 = vmul.f32 %v14368_v60, %v14352_v18  ;;  %v14370_v2 = vpop.eup %14369 }
0x1d88   :  { %14373 = vrcp.f32 %v5161_v61  ;;  %v4821_v15 = vmul.f32 %v14370_v2, %v14354_v23  ;;  %v5502_v7 = vpop.permute.xlu1 %5501 }
0x1d89   :  { %13335 = vmatmul.mubr.msk.f32.vlgmr.msra.gmra.mrb[52].mxu0 %vm619_vm6, %v4654_v63 }
0x1d8a   :  { %13343 = vmatpush3.msra.mxu0 %v16043_v8  ;;  %13344 = vmatprep.mubr.msk.f32.mxu0 %vm15011_vm5, %v15010_v21 }
0x1d8b   :  { %13352 = vmatprep.subr.mxu0 %v15010_v21  ;;  %v5335_v26 = vpop.permute.xlu0 %5334 }
0x1d8d   :  { %13345 = vmatmul.mubr.msk.f32.vlgmr.msra.gmra.mrb[54].mxu0 %vm619_vm6, %v4821_v15 }
0x1d8e   :  { %v14372_v3 = vpop.eup %14371  ;;  %13353 = vmatpush3.msra.mxu0 %v4994_v56  ;;  %13354 = vmatprep.mubr.msk.f32.mxu0 %vm15011_vm5, %v15010_v21 }
0x1d8f   :  { %13362 = vmatprep.subr.mxu0 %v15010_v21  ;;  %v4992_v4 = vmul.f32 %v14372_v3, %v14356_v27 }
0x1d91   :  { %13355 = vmatmul.mubr.msk.f32.vlgmr.msra.gmra.mrb[56].mxu0 %vm619_vm6, %v4992_v4 }
0x1d92   :  { %v14374_v5 = vpop.eup %14373  ;;  %13363 = vmatpush3.msra.mxu0 %v5165_v55  ;;  %13364 = vmatprep.mubr.msk.f32.mxu0 %vm15011_vm5, %v15010_v21 }
0x1d93   :  { %13372 = vmatprep.subr.mxu0 %v15010_v21  ;;  %v5163_v6 = vmul.f32 %v14374_v5, %v16048_v29 }
0x1d95   :  { %13365 = vmatmul.mubr.msk.f32.vlgmr.msra.gmra.mrb[58].mxu0 %vm619_vm6, %v5163_v6 }
0x1d96   :  { %13373 = vmatpush3.msra.mxu0 %v5335_v26  ;;  %13374 = vmatprep.mubr.msk.f32.mxu0 %vm15011_vm5, %v15010_v21 }
0x1d97   :  { %13382 = vmatprep.subr.mxu0 %v15010_v21 }
0x1db8   :  { %v5331_v8 = vpop.xlane.xlu1 %5330 }
0x1db9   :  { %14375 = vrcp.f32 %v5331_v8 }
0x1dbc   :  { %v5498_v19 = vpop.xlane.xlu0 %5497  ;;  %v5669_v20 = vpop.xlane.xlu1 %5668 }
0x1dbd   :  { %14377 = vrcp.f32 %v5498_v19 }
0x1dbe   :  { %14379 = vrcp.f32 %v5669_v20 }
0x1dc0   :  { %v5840_v24 = vpop.xlane.xlu1 %5839  ;;  %v5673_v33 = vpop.permute.xlu0 %5672 }
0x1dc1   :  { %14381 = vrcp.f32 %v5840_v24 }
0x1dc3   :  { %v14376_v38 = vpop.eup %14375 }
0x1dc4   :  { %v5333_v11 = vmul.f32 %v14376_v38, %v14360_v46  ;;  %v5844_v18 = vpop.permute.xlu1 %5843  ;;  %v6064_v38 = vld [vmem:[%s16975_s28] sm:$0xff] }
0x1dc6   :  { %13375 = vmatmul.mubr.msk.f32.vlgmr.msra.gmra.mrb[60].mxu0 %vm619_vm6, %v5333_v11  ;;  %v6065_v11 = vld [vmem:[%s16975_s28 + $0x8] sm:$0xff] }
0x1dc7   :  { %v14378_v12 = vpop.eup %14377  ;;  %13383 = vmatpush3.msra.mxu0 %v5502_v7  ;;  %13384 = vmatprep.mubr.msk.f32.mxu0 %vm15011_vm5, %v15010_v21 }
0x1dc8   :  { %13392 = vmatprep.subr.mxu0 %v15010_v21  ;;  %v5500_v13 = vmul.f32 %v14378_v12, %v16056_v47  ;;  %v14380_v32 = vpop.eup %14379  ;;  %v6066_v12 = vld [vmem:[%s16975_s28 + $0x10] sm:$0xff] }
0x1dc9   :  { %v5671_v16 = vmul.f32 %v14380_v32, %v16059_v49  ;;  %v6067_v32 = vld [vmem:[%s16975_s28 + $0x18] sm:$0xff] }
0x1dca   :  { %13385 = vmatmul.mubr.msk.f32.vlgmr.msra.gmra.mrb[62].mxu0 %vm619_vm6, %v5500_v13  ;;  %v14006_v13 = vpack.c.bf16 %v6065_v11, %v6064_v38  ;;  %v12431_v11 = vld [vmem:[%s16970_s26 + $0x20] sm:$0xff] }
0x1dcb   :  { %13393 = vmatpush3.msra.mxu0 %v5673_v33  ;;  %13394 = vmatprep.mubr.msk.f32.mxu0 %vm15011_vm5, %v15010_v21  ;;  %v14382_v17 = vpop.eup %14381  ;;  %v14010_v33 = vpack.c.bf16 %v6067_v32, %v6066_v12  ;;  %v12432_v12 = vld [vmem:[%s16970_s26 + $0x28] sm:$0xff] }
0x1dcc   :  { %13402 = vmatprep.subr.mxu0 %v15010_v21  ;;  %v5842_v22 = vmul.f32 %v14382_v17, %v16065_v52  ;;  %v6159_v17 = vld [vmem:[%s16976_s17 + $0x8] sm:$0xff]  ;;  %v14030_v32 = vpack.c.bf16 %v12432_v12, %v12431_v11 }
0x1dce   :  { %13395 = vmatmul.mubr.msk.f32.vlgmr.msra.gmra.mrb[64].mxu0 %vm619_vm6, %v5671_v16  ;;  %v6158_v16 = vld [vmem:[%s16976_s17] sm:$0xff] }
0x1dcf   :  { %13403 = vmatpush3.msra.mxu0 %v5844_v18  ;;  %13404 = vmatprep.mubr.msk.f32.mxu0 %vm15011_vm5, %v15010_v21  ;;  %v6160_v18 = vld [vmem:[%s16976_s17 + $0x10] sm:$0xff] }
0x1dd0   :  { %14007 = vmatprep.subr.bf16.mxu0 %v14006_v13 }
0x1dd2   :  { %13405 = vmatmul.mubr.msk.f32.vlgmr.msra.gmra.mrb[66].mxu0 %vm619_vm6, %v5842_v22  ;;  %v14014_v22 = vpack.c.bf16 %v6159_v17, %v6158_v16 }
0x1dd3   :  { %14009 = vmatpush3.bf16.msra.mxu0 %v14006_v13  ;;  %v12433_v13 = vld [vmem:[%s16970_s26 + $0x30] sm:$0xff] }
0x1dd4   :  { %14011 = vmatprep.subr.bf16.mxu0 %v14010_v33  ;;  %14015 = vmatprep.subr.bf16.mxu1 %v14014_v22 }
0x1dd7   :  { %14013 = vmatpush3.bf16.msra.mxu0 %v14010_v33  ;;  %v12434_v33 = vld [vmem:[%s16970_s26 + $0x38] sm:$0xff]  ;;  %s16982_s26 = sld [smem:[#allocation63_spill]] }
0x1dd8   :  { %v14034_v16 = vpack.c.bf16 %v12434_v33, %v12433_v13  ;;  %14031 = vmatprep.subr.bf16.mxu0 %v14030_v32 }
0x1e5c   :  { %v4727_v23 = vpop.f32.mrb[52].mxu0 }
0x1e5d   :  { %4731 = vst.msk [vmem:[#allocation2] sm:$0xff] %vm619_vm6, %v4727_v23  ;;  %v13336_v14 = vpop.f32.mrb[53].mxu0  ;;  %v6161_v23 = vld [vmem:[%s16976_s17 + $0x18] sm:$0xff] }
0x1e5e   :  { %v14018_v14 = vpack.c.bf16 %v6161_v23, %v6160_v18 }
0x1e60   :  { %v4894_v25 = vpop.f32.mrb[54].mxu0 }
0x1e61   :  { %4899 = vrot.lane.b32.xlu0 %v4894_v25, %s15000_s29  ;;  %v13346_v27 = vpop.f32.mrb[55].mxu0  ;;  %v6162_v25 = vld [vmem:[%s16976_s17 + $0x20] sm:$0xff] }
0x1e62   :  { %v6163_v27 = vld [vmem:[%s16976_s17 + $0x28] sm:$0xff] }
0x1e64   :  { %v5065_v28 = vpop.f32.mrb[56].mxu0 }
0x1e65   :  { %5070 = vrot.lane.b32.xlu1 %v5065_v28, %s14991_s18  ;;  %v13356_v29 = vpop.f32.mrb[57].mxu0  ;;  %v14022_v28 = vpack.c.bf16 %v6163_v27, %v6162_v25 }
0x1e68   :  { %v5236_v30 = vpop.f32.mrb[58].mxu0 }
0x1e69   :  { %5241 = vrot.lane.b32.xlu1 %v5236_v30, %s15023_s22  ;;  %v13366_v31 = vpop.f32.mrb[59].mxu0 }
0x1e99   :  { %v5406_v39 = vpop.f32.mrb[60].mxu0 }
0x1e9a   :  { %5410 = vst.msk [vmem:[#allocation2 + $0x8] sm:$0xff] %vm619_vm6, %v5406_v39  ;;  %v13376_v42 = vpop.f32.mrb[61].mxu0 }
0x1e9b   :  { %v12422_v42 = vld [vmem:[%s16978_s4] ss:$0 sm:$0xff] }
0x1e9d   :  { %v5573_v43 = vpop.f32.mrb[62].mxu0 }
0x1e9e   :  { %5578 = vrot.lane.b32.xlu0 %v5573_v43, %s15000_s29  ;;  %v13386_v44 = vpop.f32.mrb[63].mxu0 }
0x1ea1   :  { %v5744_v45 = vpop.f32.mrb[64].mxu0 }
0x1ea2   :  { %5749 = vrot.lane.b32.xlu0 %v5744_v45, %s14991_s18  ;;  %v13396_v46 = vpop.f32.mrb[65].mxu0 }
0x1ea5   :  { %v5915_v47 = vpop.f32.mrb[66].mxu0 }
0x1ea6   :  { %5920 = vrot.lane.b32.xlu1 %v5915_v47, %s15023_s22  ;;  %v13406_v48 = vpop.f32.mrb[67].mxu0 }
0x1ea7   :  { %v6164_v48 = vld [vmem:[%s16976_s17 + $0x30] sm:$0xff] }
0x1ed3   :  { %v4900_v49 = vpop.permute.xlu0 %4899 }
0x1ed4   :  { %4902 = vst.msk [vmem:[#allocation2] sm:$0xff] %vm953_vm7, %v4900_v49  ;;  %v6165_v49 = vld [vmem:[%s16976_s17 + $0x38] sm:$0xff] }
0x1ed7   :  { %v5071_v50 = vpop.permute.xlu1 %5070 }
0x1ed8   :  { %5073 = vst.msk [vmem:[#allocation2] sm:$0xff] %vm1125_vm8, %v5071_v50  ;;  %v14026_v50 = vpack.c.bf16 %v6165_v49, %v6164_v48 }
0x1edb   :  { %v5242_v51 = vpop.permute.xlu1 %5241 }
0x1edc   :  { %5244 = vst.msk [vmem:[#allocation2] sm:$0xff] %vm1297_vm9, %v5242_v51  ;;  %v12423_v51 = vld [vmem:[#allocation26] ss:$0 sm:$0xff] }
0x1ee3   :  { %v5924_v52 = vld [vmem:[#allocation2] sm:$0xff] }
0x1ee4   :  { %13415 = vmatprep.mubr.msk.f32.mxu1 %vm534_vm4, %v5924_v52 }
0x1f10   :  { %v5579_v53 = vpop.permute.xlu0 %5578 }
0x1f11   :  { %5581 = vst.msk [vmem:[#allocation2 + $0x8] sm:$0xff] %vm953_vm7, %v5579_v53 }
0x1f14   :  { %v5750_v55 = vpop.permute.xlu0 %5749 }
0x1f15   :  { %5752 = vst.msk [vmem:[#allocation2 + $0x8] sm:$0xff] %vm1125_vm8, %v5750_v55 }
0x1f18   :  { %v5921_v56 = vpop.permute.xlu1 %5920 }
0x1f19   :  { %5923 = vst.msk [vmem:[#allocation2 + $0x8] sm:$0xff] %vm1297_vm9, %v5921_v56 }
0x1f20   :  { %v5925_v57 = vld [vmem:[#allocation2 + $0x8] sm:$0xff] }
0x1f21   :  { %13416 = vmatmul.mubr.msk.f32.vlgmr.msra.gmra.mrb[52].mxu1 %vm534_vm4, %v5925_v57 }
0x1f22   :  { %14017 = vmatpush3.bf16.msra.mxu1 %v14014_v22 }
0x1f23   :  { %14019 = vmatprep.subr.bf16.mxu1 %v14018_v14 }
0x1f26   :  { %14021 = vmatpush3.bf16.msra.mxu1 %v14018_v14 }
0x1f27   :  { %14023 = vmatprep.subr.bf16.mxu1 %v14022_v28 }
0x1f2a   :  { %14025 = vmatpush3.bf16.msra.mxu1 %v14022_v28  ;;  %v12429_v28 = vld [vmem:[%s16979_s13] ss:$0 sm:$0xff] }
0x1f2b   :  { %14027 = vmatprep.subr.bf16.mxu1 %v14026_v50 }
0x1f2e   :  { %14029 = vmatpush3.bf16.msra.mxu1 %v14026_v50 }
0x1f2f   :  { %13469 = vmatprep.subr.mxu1 %v15010_v21 }
0x1ff4   :  { %v13417_v59 = vpop.f32.mrb[52].mxu1 }
0x1ff5   :  { %v6015_v60 = vadd.f32 %v13417_v59, %v12418_v58  ;;  %v6009_v61 = vpop.f32.mrb[53].mxu1  ;;  %v12426_v59 = vld [vmem:[#allocation27] ss:$0 sm:$0xff] }
0x1ff6   :  { %v6010_v63 = vadd.f32 %v12418_v58, %v6009_v61 }
0x1ff7   :  { %v6019_v2 = vadd.f32 %v6015_v60, %v15946_v10 }
0x1ff8   :  { %v6018_v15 = vadd.f32 %v6010_v63, %v15943_v9 }
0x1ff9   :  { %v6025_v3 = vsel %vm534_vm4, %v6019_v2, 0.0 }
0x1ffa   :  { %6026 = vadd.xlane.f32.xlu1 %v6025_v3  ;;  %v6022_v4 = vsel %vm534_vm4, %v6018_v15, 0.0 }
0x1ffb   :  { %6023 = vadd.xlane.f32.xlu0 %v6022_v4 }
0x2087   :  { %v6027_v5 = vpop.xlane.xlu1 %6026 }
0x2088   :  { %v6029_v6 = vmul.f32 0.03125, %v6027_v5  ;;  %v6024_v26 = vpop.xlane.xlu0 %6023 }
0x2089   :  { %v6028_v7 = vmul.f32 0.03125, %v6024_v26 }
0x208a   :  { %v6031_v8 = vsub.f32 %v6019_v2, %v6029_v6 }
0x208b   :  { %v6030_v19 = vsub.f32 %v6018_v15, %v6028_v7 }
0x208c   :  { %v6033_v10 = vmul.f32 %v6031_v8, %v6031_v8 }
0x208d   :  { %v6032_v20 = vmul.f32 %v6030_v19, %v6030_v19 }
0x208e   :  { %v6037_v24 = vsel %vm534_vm4, %v6033_v10, 0.0 }
0x208f   :  { %v6034_v9 = vsel %vm534_vm4, %v6032_v20, 0.0 }
0x2090   :  { %6035 = vadd.xlane.f32.xlu0 %v6034_v9 }
0x2094   :  { %6038 = vadd.xlane.f32.xlu0 %v6037_v24 }
0x211d   :  { %v6036_v29 = vpop.xlane.xlu0 %6035 }
0x211e   :  { %v6040_v30 = vmul.f32 0.03125, %v6036_v29 }
0x2120   :  { %v6042_v31 = vadd.f32 1e-05, %v6040_v30 }
0x2121   :  { %v6039_v34 = vpop.xlane.xlu0 %6038 }
0x2122   :  { %14383 = vrsqrt.f32 %v6042_v31  ;;  %v6041_v35 = vmul.f32 0.03125, %v6039_v34  ;;  %v12430_v34 = vld [vmem:[%s16980_s23] ss:$0 sm:$0xff] }
0x2124   :  { %v6043_v36 = vadd.f32 1e-05, %v6041_v35 }
0x2126   :  { %14385 = vrsqrt.f32 %v6043_v36 }
0x212c   :  { %v14384_v39 = vpop.eup %14383 }
0x212d   :  { %v6046_v41 = vmul.f32 %v14384_v39, %v6030_v19 }
0x212f   :  { %v6054_v37 = vmul.f32 %v12421_v40, %v6046_v41  ;;  %v12436_v41 = vld [vmem:[%s16973_s8 + $0x1] ss:$0 sm:$0xff]  ;;  %s16983_s8 = sld [smem:[#allocation67_spill]] }
0x2130   :  { %v14386_v43 = vpop.eup %14385 }
0x2131   :  { %v6047_v44 = vmul.f32 %v14386_v43, %v6031_v8  ;;  %v6062_v45 = vadd.f32 %v12422_v42, %v6054_v37 }
0x2133   :  { %v6055_v46 = vmul.f32 %v12421_v40, %v6047_v44  ;;  %13426 = vmatprep.mubr.msk.f32.mxu0 %vm534_vm4, %v6062_v45 }
0x2135   :  { %v6063_v47 = vadd.f32 %v12422_v42, %v6055_v46  ;;  %v8414_v0 = vld [vmem:[%s16983_s8 + $0x18] sm:$0xff] }
0x2137   :  { %13427 = vmatmul.mubr.msk.f32.vlgmr.msra.gmra.mrb[68].mxu0 %vm534_vm4, %v6063_v47 }
0x2138   :  { %14033 = vmatpush3.bf16.msra.mxu0 %v14030_v32 }
0x2139   :  { %14035 = vmatprep.subr.bf16.mxu0 %v14034_v16 }
0x213c   :  { %14037 = vmatpush3.bf16.msra.mxu0 %v14034_v16 }
0x213d   :  { %13459 = vmatprep.subr.mxu0 %v15010_v21 }
0x220a   :  { %v13428_v52 = vpop.f32.mrb[68].mxu0 }
0x220b   :  { %v6153_v53 = vadd.f32 %v13428_v52, %v12423_v51  ;;  %v6147_v55 = vpop.f32.mrb[69].mxu0 }
0x220c   :  { %v6148_v56 = vadd.f32 %v12423_v51, %v6147_v55 }
0x220d   :  { %v6157_v58 = vmax.f32 %v6153_v53, 0.0 }
0x220e   :  { %v6156_v57 = vmax.f32 %v6148_v56, 0.0 }
0x2210   :  { %13445 = vmatprep.mubr.msk.f32.mxu1 %vm2228_vm10, %v6156_v57 }
0x2211   :  { %13446 = vmatmul.mubr.msk.f32.vlgmr.msra.gmra.mrb[54].mxu1 %vm2228_vm10, %v6157_v58 }
0x2212   :  { %13471 = vmatprep.mubr.msk.f32.mxu1 %vm15011_vm5, %v15010_v21 }
0x22e4   :  { %v13447_v60 = vpop.f32.mrb[54].mxu1 }
0x22e5   :  { %v6251_v61 = vadd.f32 %v13447_v60, %v12426_v59  ;;  %v6245_v63 = vpop.f32.mrb[55].mxu1 }
0x22e6   :  { %v6246_v2 = vadd.f32 %v12426_v59, %v6245_v63 }
0x22e7   :  { %v6255_v15 = vadd.f32 %v6251_v61, %v6063_v47 }
0x22e8   :  { %v6254_v3 = vadd.f32 %v6246_v2, %v6062_v45 }
0x22e9   :  { %v6261_v4 = vsel %vm534_vm4, %v6255_v15, 0.0 }
0x22ea   :  { %6262 = vadd.xlane.f32.xlu0 %v6261_v4  ;;  %v6258_v5 = vsel %vm534_vm4, %v6254_v3, 0.0 }
0x22eb   :  { %6259 = vadd.xlane.f32.xlu1 %v6258_v5 }
0x2377   :  { %v6263_v6 = vpop.xlane.xlu0 %6262 }
0x2378   :  { %v6265_v26 = vmul.f32 0.03125, %v6263_v6  ;;  %v6260_v7 = vpop.xlane.xlu1 %6259 }
0x2379   :  { %v6264_v8 = vmul.f32 0.03125, %v6260_v7 }
0x237a   :  { %v6267_v19 = vsub.f32 %v6255_v15, %v6265_v26 }
0x237b   :  { %v6266_v20 = vsub.f32 %v6254_v3, %v6264_v8 }
0x237c   :  { %v6269_v9 = vmul.f32 %v6267_v19, %v6267_v19 }
0x237d   :  { %v6268_v10 = vmul.f32 %v6266_v20, %v6266_v20 }
0x237e   :  { %v6273_v24 = vsel %vm534_vm4, %v6269_v9, 0.0 }
0x237f   :  { %6274 = vadd.xlane.f32.xlu0 %v6273_v24  ;;  %v6270_v38 = vsel %vm534_vm4, %v6268_v10, 0.0 }
0x2380   :  { %6271 = vadd.xlane.f32.xlu1 %v6270_v38 }
0x240c   :  { %v6275_v17 = vpop.xlane.xlu0 %6274 }
0x240d   :  { %v6277_v18 = vmul.f32 0.03125, %v6275_v17  ;;  %v6272_v22 = vpop.xlane.xlu1 %6271 }
0x240e   :  { %v6276_v23 = vmul.f32 0.03125, %v6272_v22 }
0x240f   :  { %v6279_v14 = vadd.f32 1e-05, %v6277_v18 }
0x2410   :  { %v6278_v25 = vadd.f32 1e-05, %v6276_v23 }
0x2411   :  { %14387 = vrsqrt.f32 %v6279_v14 }
0x2412   :  { %14389 = vrsqrt.f32 %v6278_v25 }
0x241b   :  { %v14388_v27 = vpop.eup %14387 }
0x241c   :  { %v14390_v29 = vpop.eup %14389  ;;  %v6283_v30 = vmul.f32 %v14388_v27, %v6267_v19 }
0x241d   :  { %v6282_v31 = vmul.f32 %v14390_v29, %v6266_v20 }
0x241e   :  { %v6291_v35 = vmul.f32 %v12429_v28, %v6283_v30 }
0x241f   :  { %v6290_v36 = vmul.f32 %v12429_v28, %v6282_v31 }
0x2420   :  { %v16166_v40 = vadd.f32 %v12430_v34, %v6291_v35 }
0x2421   :  { %v16164_v39 = vadd.f32 %v12430_v34, %v6290_v36 }
0x2423   :  { %13456 = vmatprep.mubr.msk.f32.mxu0 %vm534_vm4, %v16164_v39 }
0x2424   :  { %13457 = vmatmul.mubr.msk.f32.vlgmr.msra.gmra.mrb[70].mxu0 %vm534_vm4, %v16166_v40 }
0x2425   :  { %13461 = vmatprep.mubr.msk.f32.mxu0 %vm15011_vm5, %v15010_v21 }
0x24f7   :  { %v13458_v42 = vpop.f32.mrb[70].mxu0 }
0x24f8   :  { %v6385_v37 = vpop.f32.mrb[71].mxu0  ;;  %v16189_v44 = vadd.f32 %v13458_v42, %v12436_v41 }
0x24f9   :  { %v16175_v43 = vadd.f32 %v12436_v41, %v6385_v37 }
0x24fb   :  { %6562 = vrot.lane.b32.xlu0 %v16175_v43, %s15014_s24  ;;  %6395 = vrot.lane.b32.xlu1 %v16175_v43, %s15013_s3 }
0x24ff   :  { %6731 = vrot.lane.b32.xlu0 %v16175_v43, %s15017_s0  ;;  %6560 = vrot.lane.b32.xlu1 %v16175_v43, %s15015_s12 }
0x2503   :  { %6902 = vrot.lane.b32.xlu0 %v16175_v43, %s15018_s10  ;;  %6733 = vrot.lane.b32.xlu1 %v16175_v43, %s15016_s7 }
0x2507   :  { %7241 = vrot.lane.b32.xlu0 %v16189_v44, %s15014_s24  ;;  %6904 = vrot.lane.b32.xlu1 %v16175_v43, %s15019_s11 }
0x250b   :  { %7412 = vrot.lane.b32.xlu0 %v16189_v44, %s15016_s7  ;;  %7074 = vrot.lane.b32.xlu1 %v16189_v44, %s15013_s3 }
0x250f   :  { %7583 = vrot.lane.b32.xlu0 %v16189_v44, %s15019_s11  ;;  %7239 = vrot.lane.b32.xlu1 %v16189_v44, %s15015_s12 }
0x2513   :  { %6483 = vrot.lane.b32.xlu0 %v16175_v43, %s15012_s14  ;;  %7410 = vrot.lane.b32.xlu1 %v16189_v44, %s15017_s0 }
0x2517   :  { %7581 = vrot.lane.b32.xlu1 %v16189_v44, %s15018_s10 }
0x251b   :  { %6650 = vrot.lane.b32.xlu1 %v16175_v43, %s15021_s15 }
0x256d   :  { %v6563_v45 = vpop.permute.xlu0 %6562  ;;  %v6396_v46 = vpop.permute.xlu1 %6395 }
0x256e   :  { %13460 = vmatpush3.xpose.msk.msra.mxu0 %vm619_vm6, %v6396_v46  ;;  %13470 = vmatpush3.xpose.msk.msra.mxu1 %vm619_vm6, %v6563_v45 }
0x256f   :  { %13479 = vmatprep.subr.mxu1 %v15010_v21  ;;  %13464 = vmatprep.subr.mxu0 %v15010_v21 }
0x2571   :  { %v6732_v47 = vpop.permute.xlu0 %6731  ;;  %13462 = vmatmul.mubr.msk.f32.vlgmr.msra.gmra.mrb[72].mxu0 %vm619_vm6, %v16175_v43  ;;  %v6561_v48 = vpop.permute.xlu1 %6560 }
0x2572   :  { %13472 = vmatmul.mubr.msk.f32.vlgmr.msra.gmra.mrb[56].mxu1 %vm619_vm6, %v6561_v48  ;;  %13466 = vmatprep.mubr.msk.f32.mxu0 %vm15011_vm5, %v15010_v21 }
0x2573   :  { %13481 = vmatprep.mubr.msk.f32.mxu1 %vm15011_vm5, %v15010_v21 }
0x2575   :  { %v6903_v49 = vpop.permute.xlu0 %6902  ;;  %v6734_v50 = vpop.permute.xlu1 %6733 }
0x2576   :  { %13480 = vmatpush3.xpose.msk.msra.mxu1 %vm619_vm6, %v6734_v50 }
0x2577   :  { %13489 = vmatprep.subr.mxu1 %v15010_v21 }
0x2579   :  { %v7242_v51 = vpop.permute.xlu0 %7241  ;;  %13482 = vmatmul.mubr.msk.f32.vlgmr.msra.gmra.mrb[58].mxu1 %vm619_vm6, %v6732_v47  ;;  %v6905_v52 = vpop.permute.xlu1 %6904 }
0x257a   :  { %13490 = vmatpush3.xpose.msk.msra.mxu1 %vm619_vm6, %v6905_v52  ;;  %13491 = vmatprep.mubr.msk.f32.mxu1 %vm15011_vm5, %v15010_v21 }
0x257b   :  { %13499 = vmatprep.subr.mxu1 %v15010_v21 }
0x257d   :  { %v7413_v53 = vpop.permute.xlu0 %7412  ;;  %13492 = vmatmul.mubr.msk.f32.vlgmr.msra.gmra.mrb[60].mxu1 %vm619_vm6, %v6903_v49  ;;  %v7075_v55 = vpop.permute.xlu1 %7074 }
0x257e   :  { %13500 = vmatpush3.xpose.msk.msra.mxu1 %vm619_vm6, %v7075_v55  ;;  %13501 = vmatprep.mubr.msk.f32.mxu1 %vm15011_vm5, %v15010_v21 }
0x257f   :  { %13509 = vmatprep.subr.mxu1 %v15010_v21 }
0x2581   :  { %v7584_v56 = vpop.permute.xlu0 %7583  ;;  %13502 = vmatmul.mubr.msk.f32.vlgmr.msra.gmra.mrb[62].mxu1 %vm619_vm6, %v16189_v44  ;;  %v7240_v57 = vpop.permute.xlu1 %7239 }
0x2582   :  { %13510 = vmatpush3.xpose.msk.msra.mxu1 %vm619_vm6, %v7242_v51  ;;  %13511 = vmatprep.mubr.msk.f32.mxu1 %vm15011_vm5, %v15010_v21 }
0x2583   :  { %13519 = vmatprep.subr.mxu1 %v15010_v21 }
0x2585   :  { %v6484_v58 = vpop.permute.xlu0 %6483  ;;  %13512 = vmatmul.mubr.msk.f32.vlgmr.msra.gmra.mrb[64].mxu1 %vm619_vm6, %v7240_v57  ;;  %v7411_v59 = vpop.permute.xlu1 %7410 }
0x2586   :  { %13465 = vmatpush3.msra.mxu0 %v6484_v58  ;;  %13520 = vmatpush3.xpose.msk.msra.mxu1 %vm619_vm6, %v7413_v53 }
0x2587   :  { %13521 = vmatprep.mubr.msk.f32.mxu1 %vm15011_vm5, %v15010_v21  ;;  %13529 = vmatprep.subr.mxu1 %v15010_v21 }
0x2588   :  { %13474 = vmatprep.subr.mxu0 %v15010_v21 }
0x2589   :  { %13522 = vmatmul.mubr.msk.f32.vlgmr.msra.gmra.mrb[66].mxu1 %vm619_vm6, %v7411_v59  ;;  %v7582_v60 = vpop.permute.xlu1 %7581 }
0x258a   :  { %13530 = vmatpush3.xpose.msk.msra.mxu1 %vm619_vm6, %v7584_v56  ;;  %13531 = vmatprep.mubr.msk.f32.mxu1 %vm15011_vm5, %v15010_v21 }
0x258d   :  { %13532 = vmatmul.mubr.msk.f32.vlgmr.msra.gmra.mrb[68].mxu1 %vm619_vm6, %v7582_v60  ;;  %v16263_v30 = vpop.permute.xlu1 %6650 }
0x2644   :  { %v6467_v61 = vpop.f32.mrb[72].mxu0 }
0x2645   :  { %v6471_v63 = vmul.f32 0.35355338, %v6467_v61  ;;  %v13463_v2 = vpop.f32.mrb[73].mxu0  ;;  %v6634_v15 = vpop.f32.mrb[56].mxu1 }
0x2646   :  { %v6638_v3 = vmul.f32 0.35355338, %v6634_v15  ;;  %v13473_v4 = vpop.f32.mrb[57].mxu1 }
0x2647   :  { %v6472_v5 = vsel %vm619_vm6, %v6471_v63, -inf }
0x2648   :  { %6473 = vmax.xlane.f32.xlu0 %v6472_v5  ;;  %v6639_v6 = vsel %vm619_vm6, %v6638_v3, -inf }
0x2649   :  { %6640 = vmax.xlane.f32.xlu1 %v6639_v6 }
0x264c   :  { %v6805_v26 = vpop.f32.mrb[58].mxu1 }
0x264d   :  { %v6809_v7 = vmul.f32 0.35355338, %v6805_v26  ;;  %v13483_v8 = vpop.f32.mrb[59].mxu1 }
0x264f   :  { %v6810_v19 = vsel %vm619_vm6, %v6809_v7, -inf }
0x2650   :  { %6811 = vmax.xlane.f32.xlu0 %v6810_v19  ;;  %v6976_v20 = vpop.f32.mrb[60].mxu1 }
0x2651   :  { %v6980_v9 = vmul.f32 0.35355338, %v6976_v20  ;;  %v13493_v10 = vpop.f32.mrb[61].mxu1 }
0x2653   :  { %v6981_v24 = vsel %vm619_vm6, %v6980_v9, -inf }
0x2654   :  { %6982 = vmax.xlane.f32.xlu0 %v6981_v24  ;;  %v7146_v38 = vpop.f32.mrb[62].mxu1 }
0x2655   :  { %v7150_v11 = vmul.f32 0.35355338, %v7146_v38  ;;  %v13503_v12 = vpop.f32.mrb[63].mxu1 }
0x2657   :  { %v7151_v13 = vsel %vm619_vm6, %v7150_v11, -inf }
0x2658   :  { %7152 = vmax.xlane.f32.xlu1 %v7151_v13  ;;  %v7313_v32 = vpop.f32.mrb[64].mxu1 }
0x2659   :  { %v7317_v33 = vmul.f32 0.35355338, %v7313_v32  ;;  %v13513_v16 = vpop.f32.mrb[65].mxu1 }
0x265b   :  { %v7318_v17 = vsel %vm619_vm6, %v7317_v33, -inf }
0x265c   :  { %7319 = vmax.xlane.f32.xlu0 %v7318_v17  ;;  %v7484_v18 = vpop.f32.mrb[66].mxu1 }
0x265d   :  { %v7488_v22 = vmul.f32 0.35355338, %v7484_v18  ;;  %v13523_v23 = vpop.f32.mrb[67].mxu1 }
0x265f   :  { %v7489_v14 = vsel %vm619_vm6, %v7488_v22, -inf }
0x2660   :  { %7490 = vmax.xlane.f32.xlu1 %v7489_v14  ;;  %v7655_v25 = vpop.f32.mrb[68].mxu1 }
0x2661   :  { %v7659_v27 = vmul.f32 0.35355338, %v7655_v25  ;;  %v13533_v28 = vpop.f32.mrb[69].mxu1 }
0x2663   :  { %v7660_v29 = vsel %vm619_vm6, %v7659_v27, -inf }
0x2664   :  { %7661 = vmax.xlane.f32.xlu0 %v7660_v29 }
0x2671   :  { %6992 = vrot.lane.b32.xlu1 %v16175_v43, %s15022_s16 }
0x267a   :  { %6821 = vrot.lane.b32.xlu0 %v16175_v43, %s15020_s20 }
0x26d5   :  { %v6474_v31 = vpop.xlane.xlu0 %6473 }
0x26d6   :  { %v6475_v34 = vsub.f32 %v6471_v63, %v6474_v31  ;;  %v6641_v35 = vpop.xlane.xlu1 %6640 }
0x26d7   :  { %v6642_v36 = vsub.f32 %v6638_v3, %v6641_v35 }
0x26d8   :  { %v6476_v41 = vmul.f32 1.442695, %v6475_v34 }
0x26d9   :  { %v6643_v42 = vmul.f32 1.442695, %v6642_v36 }
0x26da   :  { %14391 = vpow2.f32 %v6476_v41 }
0x26db   :  { %14393 = vpow2.f32 %v6643_v42 }
0x26dd   :  { %v6812_v37 = vpop.xlane.xlu0 %6811 }
0x26de   :  { %v6813_v45 = vsub.f32 %v6809_v7, %v6812_v37 }
0x26e0   :  { %v6814_v46 = vmul.f32 1.442695, %v6813_v45 }
0x26e1   :  { %v6983_v47 = vpop.xlane.xlu0 %6982 }
0x26e2   :  { %14395 = vpow2.f32 %v6814_v46  ;;  %v6984_v48 = vsub.f32 %v6980_v9, %v6983_v47 }
0x26e4   :  { %v14392_v49 = vpop.eup %14391  ;;  %v6985_v50 = vmul.f32 1.442695, %v6984_v48 }
0x26e5   :  { %v14394_v51 = vpop.eup %14393  ;;  %v6478_v43 = vsel %vm619_vm6, %v14392_v49, 0.0  ;;  %v7153_v58 = vpop.xlane.xlu1 %7152 }
0x26e6   :  { %14397 = vpow2.f32 %v6985_v50  ;;  %6479 = vadd.xlane.f32.xlu1 %v6478_v43  ;;  %v6645_v52 = vsel %vm619_vm6, %v14394_v51, 0.0  ;;  %v7154_v59 = vsub.f32 %v7150_v11, %v7153_v58 }
0x26e7   :  { %6646 = vadd.xlane.f32.xlu0 %v6645_v52 }
0x26e8   :  { %v7155_v2 = vmul.f32 1.442695, %v7154_v59  ;;  %v12463_v59 = vld [vmem:[%s16974_s27 + $0x20] sm:$0xff] }
0x26e9   :  { %v7320_v60 = vpop.xlane.xlu0 %7319 }
0x26ea   :  { %v7321_v63 = vsub.f32 %v7317_v33, %v7320_v60  ;;  %14399 = vpow2.f32 %v7155_v2  ;;  %v12464_v60 = vld [vmem:[%s16974_s27 + $0x28] sm:$0xff]  ;;  %v12465_v2 = vld [vmem:[%s16974_s27 + $0x30] sm:$0xff] }
0x26ec   :  { %v14396_v53 = vpop.eup %14395  ;;  %v7322_v4 = vmul.f32 1.442695, %v7321_v63 }
0x26ed   :  { %v6816_v55 = vsel %vm619_vm6, %v14396_v53, 0.0  ;;  %v7491_v61 = vpop.xlane.xlu1 %7490 }
0x26ee   :  { %6817 = vadd.xlane.f32.xlu1 %v6816_v55  ;;  %v7492_v15 = vsub.f32 %v7488_v22, %v7491_v61  ;;  %14401 = vpow2.f32 %v7322_v4  ;;  %v14038_v61 = vpack.c.bf16 %v12464_v60, %v12463_v59 }
0x26f0   :  { %v16268_v56 = vpop.eup %14397  ;;  %v7493_v5 = vmul.f32 1.442695, %v7492_v15  ;;  %v12466_v15 = vld [vmem:[%s16974_s27 + $0x38] sm:$0xff]  ;;  %14039 = vmatprep.subr.bf16.mxu1 %v14038_v61  ;;  %s16984_s27 = sld [smem:[#allocation64_spill]] }
0x26f1   :  { %v6987_v57 = vsel %vm619_vm6, %v16268_v56, 0.0  ;;  %v7662_v3 = vpop.xlane.xlu0 %7661  ;;  %v6993_v11 = vpop.permute.xlu1 %6992  ;;  %v14042_v4 = vpack.c.bf16 %v12466_v15, %v12465_v2  ;;  %14041 = vmatpush3.bf16.msra.mxu1 %v14038_v61  ;;  %v12472_v2 = vld [vmem:[%s16977_s6 + $0x1] ss:$0 sm:$0xff]  ;;  %s16989_s6 = sld [smem:[#allocation75_spill]] }
0x26f2   :  { %6988 = vadd.xlane.f32.xlu0 %v6987_v57  ;;  %v7663_v6 = vsub.f32 %v7659_v27, %v7662_v3  ;;  %14403 = vpow2.f32 %v7493_v5 }
0x26f3   :  { %14043 = vmatprep.subr.bf16.mxu1 %v14042_v4 }
0x26f4   :  { %v7664_v26 = vmul.f32 1.442695, %v7663_v6  ;;  %v14400_v7 = vpop.eup %14399 }
0x26f5   :  { %v7157_v19 = vsel %vm619_vm6, %v14400_v7, 0.0  ;;  %v6822_v12 = vpop.permute.xlu0 %6821  ;;  %14045 = vmatpush3.bf16.msra.mxu1 %v14042_v4 }
0x26f6   :  { %14405 = vpow2.f32 %v7664_v26 }
0x26f8   :  { %v16276_v8 = vpop.eup %14401 }
0x26f9   :  { %v7324_v9 = vsel %vm619_vm6, %v16276_v8, 0.0 }
0x26fc   :  { %v16279_v20 = vpop.eup %14403 }
0x26fd   :  { %v7495_v10 = vsel %vm619_vm6, %v16279_v20, 0.0 }
0x26ff   :  { %7329 = vrot.lane.b32.xlu1 %v16189_v44, %s15021_s15 }
0x2700   :  { %v16285_v24 = vpop.eup %14405 }
0x2701   :  { %v7666_v38 = vsel %vm619_vm6, %v16285_v24, 0.0 }
0x2708   :  { %7162 = vrot.lane.b32.xlu0 %v16189_v44, %s15012_s14 }
0x2723   :  { %7158 = vadd.xlane.f32.xlu1 %v7157_v19 }
0x2727   :  { %7325 = vadd.xlane.f32.xlu0 %v7324_v9  ;;  %7496 = vadd.xlane.f32.xlu1 %v7495_v10 }
0x272b   :  { %7667 = vadd.xlane.f32.xlu1 %v7666_v38 }
0x273c   :  { %7671 = vrot.lane.b32.xlu1 %v16189_v44, %s15022_s16 }
0x273d   :  { %7500 = vrot.lane.b32.xlu0 %v16189_v44, %s15020_s20 }
0x2773   :  { %v6480_v13 = vpop.xlane.xlu1 %6479 }
0x2774   :  { %14407 = vrcp.f32 %v6480_v13  ;;  %v6647_v32 = vpop.xlane.xlu0 %6646 }
0x2775   :  { %14409 = vrcp.f32 %v6647_v32  ;;  %v12467_v32 = vld [vmem:[#allocation24 + $0x1] ss:$0 sm:$0xff] }
0x277b   :  { %v6818_v33 = vpop.xlane.xlu1 %6817 }
0x277c   :  { %14411 = vrcp.f32 %v6818_v33 }
0x277e   :  { %v14408_v16 = vpop.eup %14407 }
0x277f   :  { %v6989_v17 = vpop.xlane.xlu0 %6988  ;;  %v6482_v18 = vmul.f32 %v14408_v16, %v14392_v49  ;;  %v14410_v22 = vpop.eup %14409 }
0x2780   :  { %14413 = vrcp.f32 %v6989_v17  ;;  %v6649_v44 = vmul.f32 %v14410_v22, %v14394_v51  ;;  %v7330_v29 = vpop.permute.xlu1 %7329 }
0x2781   :  { %13467 = vmatmul.mubr.msk.f32.vlgmr.msra.gmra.mrb[74].mxu0 %vm619_vm6, %v6482_v18 }
0x2782   :  { %13475 = vmatpush3.msra.mxu0 %v16263_v30  ;;  %13476 = vmatprep.mubr.msk.f32.mxu0 %vm15011_vm5, %v15010_v21 }
0x2783   :  { %13484 = vmatprep.subr.mxu0 %v15010_v21  ;;  %v7163_v28 = vpop.permute.xlu0 %7162 }
0x2785   :  { %13477 = vmatmul.mubr.msk.f32.vlgmr.msra.gmra.mrb[76].mxu0 %vm619_vm6, %v6649_v44 }
0x2786   :  { %v14412_v23 = vpop.eup %14411  ;;  %13485 = vmatpush3.msra.mxu0 %v6822_v12  ;;  %13486 = vmatprep.mubr.msk.f32.mxu0 %vm15011_vm5, %v15010_v21 }
0x2787   :  { %13494 = vmatprep.subr.mxu0 %v15010_v21  ;;  %v6820_v14 = vmul.f32 %v14412_v23, %v14396_v53 }
0x2789   :  { %13487 = vmatmul.mubr.msk.f32.vlgmr.msra.gmra.mrb[78].mxu0 %vm619_vm6, %v6820_v14 }
0x278a   :  { %v14414_v25 = vpop.eup %14413  ;;  %13495 = vmatpush3.msra.mxu0 %v6993_v11  ;;  %13496 = vmatprep.mubr.msk.f32.mxu0 %vm15011_vm5, %v15010_v21 }
0x278b   :  { %13504 = vmatprep.subr.mxu0 %v15010_v21  ;;  %v6991_v27 = vmul.f32 %v14414_v25, %v16268_v56 }
0x278d   :  { %13497 = vmatmul.mubr.msk.f32.vlgmr.msra.gmra.mrb[80].mxu0 %vm619_vm6, %v6991_v27 }
0x278e   :  { %13505 = vmatpush3.msra.mxu0 %v7163_v28  ;;  %13506 = vmatprep.mubr.msk.f32.mxu0 %vm15011_vm5, %v15010_v21 }
0x278f   :  { %13514 = vmatprep.subr.mxu0 %v15010_v21 }
0x27b0   :  { %v7159_v30 = vpop.xlane.xlu1 %7158 }
0x27b1   :  { %14415 = vrcp.f32 %v7159_v30 }
0x27b4   :  { %v7326_v31 = vpop.xlane.xlu0 %7325  ;;  %v7497_v34 = vpop.xlane.xlu1 %7496 }
0x27b5   :  { %14417 = vrcp.f32 %v7326_v31 }
0x27b6   :  { %14419 = vrcp.f32 %v7497_v34 }
0x27b8   :  { %v7668_v35 = vpop.xlane.xlu1 %7667  ;;  %v7501_v46 = vpop.permute.xlu0 %7500 }
0x27b9   :  { %14421 = vrcp.f32 %v7668_v35 }
0x27bb   :  { %v14416_v36 = vpop.eup %14415 }
0x27bc   :  { %v7161_v41 = vmul.f32 %v14416_v36, %v14400_v7  ;;  %v7672_v49 = vpop.permute.xlu1 %7671  ;;  %v12474_v36 = vld [vmem:[%s16975_s28 + $0x20] sm:$0xff] }
0x27be   :  { %13507 = vmatmul.mubr.msk.f32.vlgmr.msra.gmra.mrb[82].mxu0 %vm619_vm6, %v7161_v41  ;;  %v12475_v41 = vld [vmem:[%s16975_s28 + $0x28] sm:$0xff] }
0x27bf   :  { %v14418_v42 = vpop.eup %14417  ;;  %13515 = vmatpush3.msra.mxu0 %v7330_v29  ;;  %13516 = vmatprep.mubr.msk.f32.mxu0 %vm15011_vm5, %v15010_v21 }
0x27c0   :  { %13524 = vmatprep.subr.mxu0 %v15010_v21  ;;  %v7328_v37 = vmul.f32 %v14418_v42, %v16276_v8  ;;  %v14420_v45 = vpop.eup %14419  ;;  %v12476_v42 = vld [vmem:[%s16975_s28 + $0x30] sm:$0xff] }
0x27c1   :  { %v7499_v47 = vmul.f32 %v14420_v45, %v16279_v20  ;;  %v12477_v45 = vld [vmem:[%s16975_s28 + $0x38] sm:$0xff]  ;;  %s16987_s28 = sld [smem:[#allocation70_spill]] }
0x27c2   :  { %13517 = vmatmul.mubr.msk.f32.vlgmr.msra.gmra.mrb[84].mxu0 %vm619_vm6, %v7328_v37  ;;  %v14046_v37 = vpack.c.bf16 %v12475_v41, %v12474_v36  ;;  %v8138_v41 = vld [vmem:[%s16981_s25] sm:$0xff] }
0x27c3   :  { %13525 = vmatpush3.msra.mxu0 %v7501_v46  ;;  %13526 = vmatprep.mubr.msk.f32.mxu0 %vm15011_vm5, %v15010_v21  ;;  %v14422_v48 = vpop.eup %14421  ;;  %v14050_v46 = vpack.c.bf16 %v12477_v45, %v12476_v42  ;;  %v8139_v42 = vld [vmem:[%s16981_s25 + $0x8] sm:$0xff] }
0x27c4   :  { %13534 = vmatprep.subr.mxu0 %v15010_v21  ;;  %v7670_v50 = vmul.f32 %v14422_v48, %v16285_v24  ;;  %v12482_v48 = vld [vmem:[%s16976_s17 + $0x48] sm:$0xff]  ;;  %v14070_v45 = vpack.c.bf16 %v8139_v42, %v8138_v41 }
0x27c6   :  { %13527 = vmatmul.mubr.msk.f32.vlgmr.msra.gmra.mrb[86].mxu0 %vm619_vm6, %v7499_v47  ;;  %v12481_v47 = vld [vmem:[%s16976_s17 + $0x40] sm:$0xff] }
0x27c7   :  { %13535 = vmatpush3.msra.mxu0 %v7672_v49  ;;  %13536 = vmatprep.mubr.msk.f32.mxu0 %vm15011_vm5, %v15010_v21  ;;  %v12483_v49 = vld [vmem:[%s16976_s17 + $0x50] sm:$0xff] }
0x27c8   :  { %14047 = vmatprep.subr.bf16.mxu0 %v14046_v37 }
0x27ca   :  { %13537 = vmatmul.mubr.msk.f32.vlgmr.msra.gmra.mrb[88].mxu0 %vm619_vm6, %v7670_v50  ;;  %v14054_v50 = vpack.c.bf16 %v12482_v48, %v12481_v47  ;;  %v8234_v48 = vld [vmem:[%s16982_s26 + $0x8] sm:$0xff] }
0x27cb   :  { %14049 = vmatpush3.bf16.msra.mxu0 %v14046_v37  ;;  %v8140_v37 = vld [vmem:[%s16981_s25 + $0x10] sm:$0xff] }
0x27cc   :  { %14051 = vmatprep.subr.bf16.mxu0 %v14050_v46  ;;  %14055 = vmatprep.subr.bf16.mxu1 %v14054_v50 }
0x27cf   :  { %14053 = vmatpush3.bf16.msra.mxu0 %v14050_v46  ;;  %v8141_v46 = vld [vmem:[%s16981_s25 + $0x18] sm:$0xff]  ;;  %s16993_s25 = sld [smem:[#allocation76_spill]] }
0x27d0   :  { %v14074_v47 = vpack.c.bf16 %v8141_v46, %v8140_v37  ;;  %14071 = vmatprep.subr.bf16.mxu0 %v14070_v45 }
0x2854   :  { %v6555_v51 = vpop.f32.mrb[74].mxu0 }
0x2855   :  { %6559 = vst.msk [vmem:[#allocation2] sm:$0xff] %vm619_vm6, %v6555_v51  ;;  %v13468_v43 = vpop.f32.mrb[75].mxu0  ;;  %v12484_v51 = vld [vmem:[%s16976_s17 + $0x58] sm:$0xff] }
0x2856   :  { %v14058_v43 = vpack.c.bf16 %v12484_v51, %v12483_v49  ;;  %v8235_v49 = vld [vmem:[%s16982_s26 + $0x10] sm:$0xff]  ;;  %v8240_v51 = vrot.slane %v8234_v48, 4 }
0x2858   :  { %v6722_v52 = vpop.f32.mrb[76].mxu0 }
0x2859   :  { %6727 = vrot.lane.b32.xlu0 %v6722_v52, %s15000_s29  ;;  %v13478_v53 = vpop.f32.mrb[77].mxu0  ;;  %v12485_v52 = vld [vmem:[%s16976_s17 + $0x60] sm:$0xff] }
0x285a   :  { %v12486_v53 = vld [vmem:[%s16976_s17 + $0x68] sm:$0xff] }
0x285c   :  { %v6893_v55 = vpop.f32.mrb[78].mxu0 }
0x285d   :  { %6898 = vrot.lane.b32.xlu1 %v6893_v55, %s14991_s18  ;;  %v13488_v56 = vpop.f32.mrb[79].mxu0  ;;  %v14062_v55 = vpack.c.bf16 %v12486_v53, %v12485_v52 }
0x2860   :  { %v7064_v57 = vpop.f32.mrb[80].mxu0 }
0x2861   :  { %7069 = vrot.lane.b32.xlu1 %v7064_v57, %s15023_s22  ;;  %v13498_v58 = vpop.f32.mrb[81].mxu0 }
0x2891   :  { %v7234_v63 = vpop.f32.mrb[82].mxu0 }
0x2892   :  { %7238 = vst.msk [vmem:[#allocation2 + $0x8] sm:$0xff] %vm619_vm6, %v7234_v63  ;;  %v13508_v3 = vpop.f32.mrb[83].mxu0 }
0x2893   :  { %v12473_v3 = vld [vmem:[%s16978_s4 + $0x1] ss:$0 sm:$0xff]  ;;  %s16990_s4 = sld [smem:[#allocation71_spill]] }
0x2895   :  { %v7401_v5 = vpop.f32.mrb[84].mxu0 }
0x2896   :  { %7406 = vrot.lane.b32.xlu0 %v7401_v5, %s15000_s29  ;;  %v13518_v6 = vpop.f32.mrb[85].mxu0 }
0x2899   :  { %v7572_v26 = vpop.f32.mrb[86].mxu0 }
0x289a   :  { %7577 = vrot.lane.b32.xlu0 %v7572_v26, %s14991_s18  ;;  %v13528_v7 = vpop.f32.mrb[87].mxu0 }
0x289d   :  { %v7743_v8 = vpop.f32.mrb[88].mxu0 }
0x289e   :  { %7748 = vrot.lane.b32.xlu1 %v7743_v8, %s15023_s22  ;;  %v13538_v19 = vpop.f32.mrb[89].mxu0 }
0x289f   :  { %v12487_v19 = vld [vmem:[%s16976_s17 + $0x70] sm:$0xff] }
0x28cb   :  { %v6728_v20 = vpop.permute.xlu0 %6727 }
0x28cc   :  { %6730 = vst.msk [vmem:[#allocation2] sm:$0xff] %vm953_vm7, %v6728_v20  ;;  %v12488_v20 = vld [vmem:[%s16976_s17 + $0x78] sm:$0xff]  ;;  %s16988_s17 = sld [smem:[#allocation73_spill]] }
0x28cf   :  { %v6899_v9 = vpop.permute.xlu1 %6898 }
0x28d0   :  { %6901 = vst.msk [vmem:[#allocation2] sm:$0xff] %vm1125_vm8, %v6899_v9  ;;  %v14066_v9 = vpack.c.bf16 %v12488_v20, %v12487_v19 }
0x28d3   :  { %v7070_v10 = vpop.permute.xlu1 %7069 }
0x28d4   :  { %7072 = vst.msk [vmem:[#allocation2] sm:$0xff] %vm1297_vm9, %v7070_v10  ;;  %v12478_v10 = vld [vmem:[#allocation26 + $0x1] ss:$0 sm:$0xff] }
0x28db   :  { %v7752_v24 = vld [vmem:[#allocation2] sm:$0xff] }
0x28dc   :  { %13547 = vmatprep.mubr.msk.f32.mxu1 %vm534_vm4, %v7752_v24 }
0x2908   :  { %v7407_v38 = vpop.permute.xlu0 %7406 }
0x2909   :  { %7409 = vst.msk [vmem:[#allocation2 + $0x8] sm:$0xff] %vm953_vm7, %v7407_v38 }
0x290c   :  { %v7578_v11 = vpop.permute.xlu0 %7577 }
0x290d   :  { %7580 = vst.msk [vmem:[#allocation2 + $0x8] sm:$0xff] %vm1125_vm8, %v7578_v11 }
0x2910   :  { %v7749_v12 = vpop.permute.xlu1 %7748 }
0x2911   :  { %7751 = vst.msk [vmem:[#allocation2 + $0x8] sm:$0xff] %vm1297_vm9, %v7749_v12 }
0x2918   :  { %v7753_v13 = vld [vmem:[#allocation2 + $0x8] sm:$0xff] }
0x2919   :  { %13548 = vmatmul.mubr.msk.f32.vlgmr.msra.gmra.mrb[70].mxu1 %vm534_vm4, %v7753_v13 }
0x291a   :  { %14057 = vmatpush3.bf16.msra.mxu1 %v14054_v50  ;;  %v8236_v50 = vld [vmem:[%s16982_s26 + $0x18] sm:$0x7] }
0x291b   :  { %14059 = vmatprep.subr.bf16.mxu1 %v14058_v43  ;;  %v8243_v52 = vrot.slane %v8236_v50, 4 }
0x291e   :  { %14061 = vmatpush3.bf16.msra.mxu1 %v14058_v43  ;;  %v8241_v43 = vrot.slane %v8235_v49, 4 }
0x291f   :  { %14063 = vmatprep.subr.bf16.mxu1 %v14062_v55 }
0x2920   :  { %v8242_v53 = vsel %vm442_vm0, %v8240_v51, %v8241_v43 }
0x2922   :  { %14065 = vmatpush3.bf16.msra.mxu1 %v14062_v55  ;;  %v8244_v55 = vsel %vm442_vm0, %v8241_v43, %v8243_v52  ;;  %vm10111_vm0 = vcmask 531456  }
0x2923   :  { %14067 = vmatprep.subr.bf16.mxu1 %v14066_v9 }
0x2926   :  { %14069 = vmatpush3.bf16.msra.mxu1 %v14066_v9 }
0x29ec   :  { %v13549_v33 = vpop.f32.mrb[70].mxu1 }
0x29ed   :  { %v7845_v16 = vadd.f32 %v13549_v33, %v12467_v32  ;;  %v7839_v17 = vpop.f32.mrb[71].mxu1  ;;  %v12489_v33 = vld [vmem:[#allocation27 + $0x1] ss:$0 sm:$0xff] }
0x29ee   :  { %v7840_v18 = vadd.f32 %v12467_v32, %v7839_v17 }
0x29ef   :  { %v7849_v22 = vadd.f32 %v7845_v16, %v16166_v40 }
0x29f0   :  { %v7848_v44 = vadd.f32 %v7840_v18, %v16164_v39 }
0x29f1   :  { %v7857_v23 = vsel %vm534_vm4, %v7849_v22, 0.0 }
0x29f2   :  { %7858 = vadd.xlane.f32.xlu1 %v7857_v23  ;;  %v7854_v14 = vsel %vm534_vm4, %v7848_v44, 0.0 }
0x29f3   :  { %7855 = vadd.xlane.f32.xlu0 %v7854_v14 }
0x2a7f   :  { %v7859_v25 = vpop.xlane.xlu1 %7858 }
0x2a80   :  { %v7861_v27 = vmul.f32 0.03125, %v7859_v25  ;;  %v7856_v28 = vpop.xlane.xlu0 %7855 }
0x2a81   :  { %v7860_v29 = vmul.f32 0.03125, %v7856_v28 }
0x2a82   :  { %v7863_v30 = vsub.f32 %v7849_v22, %v7861_v27 }
0x2a83   :  { %v7862_v31 = vsub.f32 %v7848_v44, %v7860_v29 }
0x2a84   :  { %v7865_v40 = vmul.f32 %v7863_v30, %v7863_v30 }
0x2a85   :  { %v7864_v34 = vmul.f32 %v7862_v31, %v7862_v31 }
0x2a86   :  { %v7869_v35 = vsel %vm534_vm4, %v7865_v40, 0.0 }
0x2a87   :  { %v7866_v39 = vsel %vm534_vm4, %v7864_v34, 0.0 }
0x2a88   :  { %7867 = vadd.xlane.f32.xlu0 %v7866_v39 }
0x2a8c   :  { %7870 = vadd.xlane.f32.xlu0 %v7869_v35 }
0x2b15   :  { %v7868_v56 = vpop.xlane.xlu0 %7867 }
0x2b16   :  { %v7872_v57 = vmul.f32 0.03125, %v7868_v56  ;;  %v14078_v56 = vpack.c.bf16 %v8244_v55, %v8242_v53 }
0x2b18   :  { %v7874_v58 = vadd.f32 1e-05, %v7872_v57 }
0x2b19   :  { %v7871_v59 = vpop.xlane.xlu0 %7870 }
0x2b1a   :  { %14423 = vrsqrt.f32 %v7874_v58  ;;  %v7873_v60 = vmul.f32 0.03125, %v7871_v59 }
0x2b1c   :  { %v7875_v61 = vadd.f32 1e-05, %v7873_v60 }
0x2b1e   :  { %14425 = vrsqrt.f32 %v7875_v61 }
0x2b24   :  { %v14424_v63 = vpop.eup %14423 }
0x2b25   :  { %v7878_v15 = vmul.f32 %v14424_v63, %v7862_v31 }
0x2b27   :  { %v7886_v4 = vmul.f32 %v12472_v2, %v7878_v15  ;;  %v12494_v15 = vld [vmem:[%s16979_s13 + $0x1] ss:$0 sm:$0xff]  ;;  %s16991_s13 = sld [smem:[#allocation72_spill]] }
0x2b28   :  { %v14426_v5 = vpop.eup %14425 }
0x2b29   :  { %v7879_v6 = vmul.f32 %v14426_v5, %v7863_v30  ;;  %v7894_v26 = vadd.f32 %v12473_v3, %v7886_v4 }
0x2b2b   :  { %v7887_v7 = vmul.f32 %v12472_v2, %v7879_v6  ;;  %13558 = vmatprep.mubr.msk.f32.mxu0 %vm534_vm4, %v7894_v26  ;;  %v12495_v6 = vld [vmem:[%s16980_s23 + $0x1] ss:$0 sm:$0xff]  ;;  %s16992_s23 = sld [smem:[#allocation74_spill]] }
0x2b2d   :  { %v7895_v8 = vadd.f32 %v12473_v3, %v7887_v7 }
0x2b2f   :  { %13559 = vmatmul.mubr.msk.f32.vlgmr.msra.gmra.mrb[90].mxu0 %vm534_vm4, %v7895_v8 }
0x2b30   :  { %14073 = vmatpush3.bf16.msra.mxu0 %v14070_v45 }
0x2b31   :  { %14075 = vmatprep.subr.bf16.mxu0 %v14074_v47 }
0x2b34   :  { %14077 = vmatpush3.bf16.msra.mxu0 %v14074_v47 }
0x2b35   :  { %14080 = vmatprep.subr.msk.bf16.mxu0 %vm15905_vm12, %v14078_v56 }
0x2c02   :  { %v13560_v24 = vpop.f32.mrb[90].mxu0 }
0x2c03   :  { %v7987_v38 = vadd.f32 %v13560_v24, %v12478_v10  ;;  %v7981_v11 = vpop.f32.mrb[91].mxu0  ;;  %v8412_v24 = vld [vmem:[%s16983_s8 + $0x8] sm:$0xff] }
0x2c04   :  { %v7982_v12 = vadd.f32 %v12478_v10, %v7981_v11  ;;  %v14515_v10 = vld [vmem:[%s16960_s1] sm:$0xff]  ;;  %s16985_s1 = sld [smem:[#allocation68_spill]] }
0x2c05   :  { %v7991_v32 = vmax.f32 %v7987_v38, 0.0 }
0x2c06   :  { %v7990_v13 = vmax.f32 %v7982_v12, 0.0  ;;  %v12496_v12 = vld [vmem:[#allocation23] ss:$0 sm:$0xff] }
0x2c08   :  { %13577 = vmatprep.mubr.msk.f32.mxu1 %vm2228_vm10, %v7990_v13 }
0x2c09   :  { %13578 = vmatmul.mubr.msk.f32.vlgmr.msra.gmra.mrb[72].mxu1 %vm2228_vm10, %v7991_v32 }
0x2cdc   :  { %v13579_v16 = vpop.f32.mrb[72].mxu1 }
0x2cdd   :  { %v8087_v17 = vadd.f32 %v13579_v16, %v12489_v33  ;;  %v8081_v18 = vpop.f32.mrb[73].mxu1 }
0x2cde   :  { %v8082_v22 = vadd.f32 %v12489_v33, %v8081_v18 }
0x2cdf   :  { %v8091_v44 = vadd.f32 %v8087_v17, %v7895_v8  ;;  %v8233_v8 = vld [vmem:[%s16982_s26] sm:$0xff]  ;;  %s16994_s26 = sld [smem:[#allocation77_spill]] }
0x2ce0   :  { %v8090_v23 = vadd.f32 %v8082_v22, %v7894_v26  ;;  %v14084_v9 = vpack.c.bf16 %v8234_v48, %v8233_v8  ;;  %v12505_v17 = vld [vmem:[%s16984_s27] ss:$0 sm:$0xff] }
0x2ce1   :  { %v8099_v14 = vsel %vm534_vm4, %v8091_v44, 0.0 }
0x2ce2   :  { %8100 = vadd.xlane.f32.xlu0 %v8099_v14  ;;  %v8096_v25 = vsel %vm534_vm4, %v8090_v23, 0.0  ;;  %v14517_v14 = vld [vmem:[%s16964_s2] sm:$0xff] }
0x2ce3   :  { %8097 = vadd.xlane.f32.xlu1 %v8096_v25 }
0x2d6f   :  { %v8101_v27 = vpop.xlane.xlu0 %8100 }
0x2d70   :  { %v8103_v28 = vmul.f32 0.03125, %v8101_v27  ;;  %v8098_v29 = vpop.xlane.xlu1 %8097  ;;  %v14518_v27 = vld [vmem:[%s16964_s2 + $0x8] sm:$0xff]  ;;  %s16986_s2 = sld [smem:[#allocation69_spill]] }
0x2d71   :  { %v8102_v30 = vmul.f32 0.03125, %v8098_v29  ;;  %v12506_v29 = vld [vmem:[%s16985_s1] ss:$0 sm:$0xff] }
0x2d72   :  { %v8105_v31 = vsub.f32 %v8091_v44, %v8103_v28 }
0x2d73   :  { %v8104_v34 = vsub.f32 %v8090_v23, %v8102_v30 }
0x2d74   :  { %v8107_v39 = vmul.f32 %v8105_v31, %v8105_v31 }
0x2d75   :  { %v8106_v40 = vmul.f32 %v8104_v34, %v8104_v34 }
0x2d76   :  { %v8111_v35 = vsel %vm534_vm4, %v8107_v39, 0.0 }
0x2d77   :  { %8112 = vadd.xlane.f32.xlu0 %v8111_v35  ;;  %v8108_v36 = vsel %vm534_vm4, %v8106_v40, 0.0 }
0x2d78   :  { %8109 = vadd.xlane.f32.xlu1 %v8108_v36 }
0x2e04   :  { %v8113_v57 = vpop.xlane.xlu0 %8112 }
0x2e05   :  { %v8115_v58 = vmul.f32 0.03125, %v8113_v57  ;;  %v8110_v59 = vpop.xlane.xlu1 %8109 }
0x2e06   :  { %v8114_v60 = vmul.f32 0.03125, %v8110_v59 }
0x2e07   :  { %v8117_v61 = vadd.f32 1e-05, %v8115_v58 }
0x2e08   :  { %v8116_v63 = vadd.f32 1e-05, %v8114_v60 }
0x2e09   :  { %14427 = vrsqrt.f32 %v8117_v61 }
0x2e0a   :  { %14429 = vrsqrt.f32 %v8116_v63 }
0x2e13   :  { %v14428_v2 = vpop.eup %14427 }
0x2e14   :  { %v14430_v3 = vpop.eup %14429  ;;  %v8121_v4 = vmul.f32 %v14428_v2, %v8105_v31 }
0x2e15   :  { %v8120_v5 = vmul.f32 %v14430_v3, %v8104_v34 }
0x2e16   :  { %v8129_v26 = vmul.f32 %v12494_v15, %v8121_v4 }
0x2e17   :  { %v8128_v7 = vmul.f32 %v12494_v15, %v8120_v5 }
0x2e18   :  { %v8137_v20 = vadd.f32 %v12495_v6, %v8129_v26 }
0x2e19   :  { %v8136_v19 = vadd.f32 %v12495_v6, %v8128_v7 }
0x2e1b   :  { %13588 = vmatprep.mubr.msk.f32.mxu0 %vm534_vm4, %v8136_v19 }
0x2e1c   :  { %13589 = vmatmul.mubr.msk.f32.vlgmr.msra.gmra.mrb[92].mxu0 %vm534_vm4, %v8137_v20 }
0x2e1d   :  { %14083 = vmatpush3.bf16.msk.msra.mxu0 %vm15905_vm12, %v14078_v56  ;;  %13595 = vmatprep.mubr.msk.f32.mxu0 %vm4286_vm13, %v15920_v1  ;;  %v8411_v1 = vld [vmem:[%s16983_s8] sm:$0xff] }
0x2e1e   :  { %14086 = vmatprep.subr.msk.bf16.mxu0 %vm15440_vm3, %v14084_v9  ;;  %v14090_v38 = vpack.c.bf16 %v8412_v24, %v8411_v1 }
0x2e20   :  { %13596 = vmatmul.mubr.msk.f32.vlgmr.msra.gmra.mrb[94].mxu0 %vm4286_vm13, %v15918_v62  ;;  %14091 = vmatprep.subr.bf16.mxu1 %v14090_v38  ;;  %v8413_v62 = vld [vmem:[%s16983_s8 + $0x10] sm:$0xff] }
0x2e21   :  { %14089 = vmatpush3.bf16.msk.msra.mxu0 %vm15440_vm3, %v14084_v9  ;;  %13602 = vmatprep.mubr.msk.f32.mxu0 %vm435_vm1, %v14515_v10  ;;  %v14094_v11 = vpack.c.bf16 %v8414_v0, %v8413_v62 }
0x2e22   :  { %13616 = vmatprep.subr.mxu0 %v15010_v21  ;;  %14093 = vmatpush3.bf16.msra.mxu1 %v14090_v38 }
0x2e23   :  { %14095 = vmatprep.subr.bf16.mxu1 %v14094_v11 }
0x2e26   :  { %14097 = vmatpush3.bf16.msra.mxu1 %v14094_v11 }
0x2e27   :  { %13626 = vmatprep.subr.mxu1 %v15010_v21 }
0x2e28   :  { %13603 = vmatmul.mubr.msk.f32.vlgmr.msra.gmra.mrb[94].mxu0 %vm435_vm1, %v14516_v54 }
0x2e29   :  { %13618 = vmatprep.mubr.msk.f32.mxu0 %vm15011_vm5, %v15010_v21 }
0x2eef   :  { %v13590_v13 = vpop.f32.mrb[92].mxu0 }
0x2ef0   :  { %v8227_v32 = vadd.f32 %v13590_v13, %v12496_v12  ;;  %v8221_v33 = vpop.f32.mrb[93].mxu0 }
0x2ef1   :  { %v8222_v16 = vadd.f32 %v12496_v12, %v8221_v33 }
0x2ef2   :  { %8232 = vst.msk [vmem:[#allocation30 + $0x8] sm:$0xff] %vm8230_vm14, %v8227_v32 }
0x2ef3   :  { %8231 = vst.msk [vmem:[#allocation30] sm:$0xff] %vm8230_vm14, %v8222_v16 }
0x2efb   :  { %v13604_v18 = vpop.f32.mrb[94].mxu0 }
0x2efc   :  { %v8408_v22 = vadd.f32 %v13604_v18, %v12505_v17  ;;  %v8391_v44 = vpop.f32.mrb[95].mxu0 }
0x2efd   :  { %v8407_v23 = vadd.f32 %v12505_v17, %v8391_v44 }
0x2efe   :  { %v16417_v28 = vadd.f32 %v14518_v27, %v8408_v22 }
0x2eff   :  { %v16414_v25 = vadd.f32 %v14517_v14, %v8407_v23 }
0x2f01   :  { %13613 = vmatprep.mubr.msk.f32.mxu1 %vm534_vm4, %v16414_v25 }
0x2f02   :  { %13614 = vmatmul.mubr.msk.f32.vlgmr.msra.gmra.mrb[74].mxu1 %vm534_vm4, %v16417_v28 }
0x2f03   :  { %13628 = vmatprep.mubr.msk.f32.mxu1 %vm15011_vm5, %v15010_v21 }
0x2fd5   :  { %v13615_v30 = vpop.f32.mrb[74].mxu1 }
0x2fd6   :  { %v8494_v31 = vpop.f32.mrb[75].mxu1  ;;  %v16440_v39 = vadd.f32 %v13615_v30, %v12506_v29 }
0x2fd7   :  { %v16426_v34 = vadd.f32 %v12506_v29, %v8494_v31 }
0x2fd9   :  { %8671 = vrot.lane.b32.xlu0 %v16426_v34, %s15014_s24  ;;  %8504 = vrot.lane.b32.xlu1 %v16426_v34, %s15013_s3 }
0x2fdd   :  { %8840 = vrot.lane.b32.xlu0 %v16426_v34, %s15017_s0  ;;  %8669 = vrot.lane.b32.xlu1 %v16426_v34, %s15015_s12 }
0x2fe1   :  { %9011 = vrot.lane.b32.xlu0 %v16426_v34, %s15018_s10  ;;  %8842 = vrot.lane.b32.xlu1 %v16426_v34, %s15016_s7 }
0x2fe5   :  { %9350 = vrot.lane.b32.xlu0 %v16440_v39, %s15014_s24  ;;  %9013 = vrot.lane.b32.xlu1 %v16426_v34, %s15019_s11 }
0x2fe9   :  { %9521 = vrot.lane.b32.xlu0 %v16440_v39, %s15016_s7  ;;  %9183 = vrot.lane.b32.xlu1 %v16440_v39, %s15013_s3 }
0x2fed   :  { %9692 = vrot.lane.b32.xlu0 %v16440_v39, %s15019_s11  ;;  %9348 = vrot.lane.b32.xlu1 %v16440_v39, %s15015_s12 }
0x2ff1   :  { %8592 = vrot.lane.b32.xlu0 %v16426_v34, %s15012_s14  ;;  %9519 = vrot.lane.b32.xlu1 %v16440_v39, %s15017_s0 }
0x2ff5   :  { %9690 = vrot.lane.b32.xlu1 %v16440_v39, %s15018_s10 }
0x2ff9   :  { %8759 = vrot.lane.b32.xlu1 %v16426_v34, %s15021_s15 }
0x304b   :  { %v8672_v40 = vpop.permute.xlu0 %8671  ;;  %v8505_v35 = vpop.permute.xlu1 %8504 }
0x304c   :  { %13617 = vmatpush3.xpose.msk.msra.mxu0 %vm619_vm6, %v8505_v35  ;;  %13627 = vmatpush3.xpose.msk.msra.mxu1 %vm619_vm6, %v8672_v40 }
0x304d   :  { %13636 = vmatprep.subr.mxu1 %v15010_v21  ;;  %13621 = vmatprep.subr.mxu0 %v15010_v21 }
0x304f   :  { %v8841_v36 = vpop.permute.xlu0 %8840  ;;  %13619 = vmatmul.mubr.msk.f32.vlgmr.msra.gmra.mrb[96].mxu0 %vm619_vm6, %v16426_v34  ;;  %v8670_v41 = vpop.permute.xlu1 %8669 }
0x3050   :  { %13629 = vmatmul.mubr.msk.f32.vlgmr.msra.gmra.mrb[76].mxu1 %vm619_vm6, %v8670_v41  ;;  %13623 = vmatprep.mubr.msk.f32.mxu0 %vm15011_vm5, %v15010_v21 }
0x3051   :  { %13638 = vmatprep.mubr.msk.f32.mxu1 %vm15011_vm5, %v15010_v21 }
0x3053   :  { %v9012_v42 = vpop.permute.xlu0 %9011  ;;  %v8843_v37 = vpop.permute.xlu1 %8842 }
0x3054   :  { %13637 = vmatpush3.xpose.msk.msra.mxu1 %vm619_vm6, %v8843_v37 }
0x3055   :  { %13646 = vmatprep.subr.mxu1 %v15010_v21 }
0x3057   :  { %v9351_v45 = vpop.permute.xlu0 %9350  ;;  %13639 = vmatmul.mubr.msk.f32.vlgmr.msra.gmra.mrb[78].mxu1 %vm619_vm6, %v8841_v36  ;;  %v9014_v46 = vpop.permute.xlu1 %9013 }
0x3058   :  { %13647 = vmatpush3.xpose.msk.msra.mxu1 %vm619_vm6, %v9014_v46  ;;  %13648 = vmatprep.mubr.msk.f32.mxu1 %vm15011_vm5, %v15010_v21 }
0x3059   :  { %13656 = vmatprep.subr.mxu1 %v15010_v21 }
0x305b   :  { %v9522_v47 = vpop.permute.xlu0 %9521  ;;  %13649 = vmatmul.mubr.msk.f32.vlgmr.msra.gmra.mrb[80].mxu1 %vm619_vm6, %v9012_v42  ;;  %v9184_v48 = vpop.permute.xlu1 %9183 }
0x305c   :  { %13657 = vmatpush3.xpose.msk.msra.mxu1 %vm619_vm6, %v9184_v48  ;;  %13658 = vmatprep.mubr.msk.f32.mxu1 %vm15011_vm5, %v15010_v21 }
0x305d   :  { %13666 = vmatprep.subr.mxu1 %v15010_v21 }
0x305f   :  { %v9693_v49 = vpop.permute.xlu0 %9692  ;;  %13659 = vmatmul.mubr.msk.f32.vlgmr.msra.gmra.mrb[82].mxu1 %vm619_vm6, %v16440_v39  ;;  %v9349_v50 = vpop.permute.xlu1 %9348 }
0x3060   :  { %13667 = vmatpush3.xpose.msk.msra.mxu1 %vm619_vm6, %v9351_v45  ;;  %13668 = vmatprep.mubr.msk.f32.mxu1 %vm15011_vm5, %v15010_v21 }
0x3061   :  { %13676 = vmatprep.subr.mxu1 %v15010_v21 }
0x3063   :  { %v8593_v51 = vpop.permute.xlu0 %8592  ;;  %13669 = vmatmul.mubr.msk.f32.vlgmr.msra.gmra.mrb[84].mxu1 %vm619_vm6, %v9349_v50  ;;  %v9520_v43 = vpop.permute.xlu1 %9519 }
0x3064   :  { %13622 = vmatpush3.msra.mxu0 %v8593_v51  ;;  %13677 = vmatpush3.xpose.msk.msra.mxu1 %vm619_vm6, %v9522_v47 }
0x3065   :  { %13678 = vmatprep.mubr.msk.f32.mxu1 %vm15011_vm5, %v15010_v21  ;;  %13686 = vmatprep.subr.mxu1 %v15010_v21 }
0x3066   :  { %13631 = vmatprep.subr.mxu0 %v15010_v21 }
0x3067   :  { %13679 = vmatmul.mubr.msk.f32.vlgmr.msra.gmra.mrb[86].mxu1 %vm619_vm6, %v9520_v43  ;;  %v9691_v52 = vpop.permute.xlu1 %9690 }
0x3068   :  { %13687 = vmatpush3.xpose.msk.msra.mxu1 %vm619_vm6, %v9693_v49  ;;  %13688 = vmatprep.mubr.msk.f32.mxu1 %vm15011_vm5, %v15010_v21 }
0x306b   :  { %13689 = vmatmul.mubr.msk.f32.vlgmr.msra.gmra.mrb[88].mxu1 %vm619_vm6, %v9691_v52  ;;  %v16514_v33 = vpop.permute.xlu1 %8759 }
0x3122   :  { %v8576_v53 = vpop.f32.mrb[96].mxu0 }
0x3123   :  { %v8580_v55 = vmul.f32 0.35355338, %v8576_v53  ;;  %v13620_v56 = vpop.f32.mrb[97].mxu0  ;;  %v8743_v57 = vpop.f32.mrb[76].mxu1 }
0x3124   :  { %v8747_v58 = vmul.f32 0.35355338, %v8743_v57  ;;  %v13630_v59 = vpop.f32.mrb[77].mxu1 }
0x3125   :  { %v8581_v60 = vsel %vm619_vm6, %v8580_v55, -inf }
0x3126   :  { %8582 = vmax.xlane.f32.xlu0 %v8581_v60  ;;  %v8748_v61 = vsel %vm619_vm6, %v8747_v58, -inf }
0x3127   :  { %8749 = vmax.xlane.f32.xlu1 %v8748_v61 }
0x312a   :  { %v8914_v63 = vpop.f32.mrb[78].mxu1 }
0x312b   :  { %v8918_v2 = vmul.f32 0.35355338, %v8914_v63  ;;  %v13640_v15 = vpop.f32.mrb[79].mxu1 }
0x312d   :  { %v8919_v3 = vsel %vm619_vm6, %v8918_v2, -inf }
0x312e   :  { %8920 = vmax.xlane.f32.xlu0 %v8919_v3  ;;  %v9085_v4 = vpop.f32.mrb[80].mxu1 }
0x312f   :  { %v9089_v5 = vmul.f32 0.35355338, %v9085_v4  ;;  %v13650_v6 = vpop.f32.mrb[81].mxu1 }
0x3131   :  { %v9090_v26 = vsel %vm619_vm6, %v9089_v5, -inf }
0x3132   :  { %9091 = vmax.xlane.f32.xlu0 %v9090_v26  ;;  %v9255_v7 = vpop.f32.mrb[82].mxu1 }
0x3133   :  { %v9259_v8 = vmul.f32 0.35355338, %v9255_v7  ;;  %v13660_v19 = vpop.f32.mrb[83].mxu1 }
0x3135   :  { %v9260_v20 = vsel %vm619_vm6, %v9259_v8, -inf }
0x3136   :  { %9261 = vmax.xlane.f32.xlu1 %v9260_v20  ;;  %v9422_v9 = vpop.f32.mrb[84].mxu1 }
0x3137   :  { %v9426_v10 = vmul.f32 0.35355338, %v9422_v9  ;;  %v13670_v54 = vpop.f32.mrb[85].mxu1 }
0x3139   :  { %v9427_v1 = vsel %vm619_vm6, %v9426_v10, -inf }
0x313a   :  { %9428 = vmax.xlane.f32.xlu0 %v9427_v1  ;;  %v9593_v24 = vpop.f32.mrb[86].mxu1 }
0x313b   :  { %v9597_v38 = vmul.f32 0.35355338, %v9593_v24  ;;  %v13680_v62 = vpop.f32.mrb[87].mxu1 }
0x313d   :  { %v9598_v0 = vsel %vm619_vm6, %v9597_v38, -inf }
0x313e   :  { %9599 = vmax.xlane.f32.xlu1 %v9598_v0  ;;  %v9764_v11 = vpop.f32.mrb[88].mxu1 }
0x313f   :  { %v9768_v12 = vmul.f32 0.35355338, %v9764_v11  ;;  %v13690_v13 = vpop.f32.mrb[89].mxu1 }
0x3141   :  { %v9769_v32 = vsel %vm619_vm6, %v9768_v12, -inf }
0x3142   :  { %9770 = vmax.xlane.f32.xlu0 %v9769_v32 }
0x314f   :  { %9101 = vrot.lane.b32.xlu1 %v16426_v34, %s15022_s16 }
0x3158   :  { %8930 = vrot.lane.b32.xlu0 %v16426_v34, %s15020_s20 }
0x31b3   :  { %v8583_v16 = vpop.xlane.xlu0 %8582 }
0x31b4   :  { %v8584_v17 = vsub.f32 %v8580_v55, %v8583_v16  ;;  %v8750_v18 = vpop.xlane.xlu1 %8749 }
0x31b5   :  { %v8751_v22 = vsub.f32 %v8747_v58, %v8750_v18 }
0x31b6   :  { %v8585_v44 = vmul.f32 1.442695, %v8584_v17 }
0x31b7   :  { %v8752_v23 = vmul.f32 1.442695, %v8751_v22 }
0x31b8   :  { %14431 = vpow2.f32 %v8585_v44 }
0x31b9   :  { %14433 = vpow2.f32 %v8752_v23 }
0x31bb   :  { %v8921_v14 = vpop.xlane.xlu0 %8920 }
0x31bc   :  { %v8922_v27 = vsub.f32 %v8918_v2, %v8921_v14 }
0x31be   :  { %v8923_v29 = vmul.f32 1.442695, %v8922_v27 }
0x31bf   :  { %v9092_v30 = vpop.xlane.xlu0 %9091 }
0x31c0   :  { %14435 = vpow2.f32 %v8923_v29  ;;  %v9093_v31 = vsub.f32 %v9089_v5, %v9092_v30 }
0x31c2   :  { %v14432_v40 = vpop.eup %14431  ;;  %v9094_v35 = vmul.f32 1.442695, %v9093_v31 }
0x31c3   :  { %v14434_v36 = vpop.eup %14433  ;;  %v8587_v34 = vsel %vm619_vm6, %v14432_v40, 0.0  ;;  %v9262_v47 = vpop.xlane.xlu1 %9261 }
0x31c4   :  { %14437 = vpow2.f32 %v9094_v35  ;;  %8588 = vadd.xlane.f32.xlu1 %v8587_v34  ;;  %v8754_v41 = vsel %vm619_vm6, %v14434_v36, 0.0  ;;  %v9263_v48 = vsub.f32 %v9259_v8, %v9262_v47 }
0x31c5   :  { %8755 = vadd.xlane.f32.xlu0 %v8754_v41 }
0x31c6   :  { %v9264_v43 = vmul.f32 1.442695, %v9263_v48  ;;  %v9865_v48 = vld [vmem:[%s16986_s2 + $0x10] sm:$0xff] }
0x31c7   :  { %v9429_v49 = vpop.xlane.xlu0 %9428 }
0x31c8   :  { %v9430_v51 = vsub.f32 %v9426_v10, %v9429_v49  ;;  %14439 = vpow2.f32 %v9264_v43  ;;  %v9866_v49 = vld [vmem:[%s16986_s2 + $0x18] sm:$0xff] }
0x31ca   :  { %v14436_v42 = vpop.eup %14435  ;;  %v9431_v55 = vmul.f32 1.442695, %v9430_v51  ;;  %v14102_v51 = vpack.c.bf16 %v9866_v49, %v9865_v48 }
0x31cb   :  { %v8925_v37 = vsel %vm619_vm6, %v14436_v42, 0.0  ;;  %v9600_v50 = vpop.xlane.xlu1 %9599 }
0x31cc   :  { %8926 = vadd.xlane.f32.xlu1 %v8925_v37  ;;  %v9601_v52 = vsub.f32 %v9597_v38, %v9600_v50  ;;  %14441 = vpow2.f32 %v9431_v55  ;;  %v9863_v37 = vld [vmem:[%s16986_s2] sm:$0xff] }
0x31ce   :  { %v16519_v45 = vpop.eup %14437  ;;  %v9602_v56 = vmul.f32 1.442695, %v9601_v52 }
0x31cf   :  { %v9096_v46 = vsel %vm619_vm6, %v16519_v45, 0.0  ;;  %v9771_v53 = vpop.xlane.xlu0 %9770  ;;  %v9102_v5 = vpop.permute.xlu1 %9101 }
0x31d0   :  { %9097 = vadd.xlane.f32.xlu0 %v9096_v46  ;;  %v9772_v57 = vsub.f32 %v9768_v12, %v9771_v53  ;;  %14443 = vpow2.f32 %v9602_v56 }
0x31d2   :  { %v9773_v58 = vmul.f32 1.442695, %v9772_v57  ;;  %v14440_v59 = vpop.eup %14439 }
0x31d3   :  { %v9266_v61 = vsel %vm619_vm6, %v14440_v59, 0.0  ;;  %v8931_v6 = vpop.permute.xlu0 %8930 }
0x31d4   :  { %14445 = vpow2.f32 %v9773_v58 }
0x31d6   :  { %v16527_v60 = vpop.eup %14441 }
0x31d7   :  { %v9433_v2 = vsel %vm619_vm6, %v16527_v60, 0.0 }
0x31da   :  { %v16530_v63 = vpop.eup %14443 }
0x31db   :  { %v9604_v15 = vsel %vm619_vm6, %v16530_v63, 0.0 }
0x31dd   :  { %9438 = vrot.lane.b32.xlu1 %v16440_v39, %s15021_s15 }
0x31de   :  { %v16536_v3 = vpop.eup %14445 }
0x31df   :  { %v9775_v4 = vsel %vm619_vm6, %v16536_v3, 0.0 }
0x31e6   :  { %9271 = vrot.lane.b32.xlu0 %v16440_v39, %s15012_s14 }
0x3201   :  { %9267 = vadd.xlane.f32.xlu1 %v9266_v61 }
0x3205   :  { %9434 = vadd.xlane.f32.xlu0 %v9433_v2  ;;  %9605 = vadd.xlane.f32.xlu1 %v9604_v15 }
0x3209   :  { %9776 = vadd.xlane.f32.xlu1 %v9775_v4  ;;  %v12533_v4 = vld [vmem:[%s16987_s28] ss:$0 sm:$0xff] }
0x321a   :  { %9780 = vrot.lane.b32.xlu1 %v16440_v39, %s15022_s16 }
0x321b   :  { %9609 = vrot.lane.b32.xlu0 %v16440_v39, %s15020_s20 }
0x3251   :  { %v8589_v26 = vpop.xlane.xlu1 %8588 }
0x3252   :  { %14447 = vrcp.f32 %v8589_v26  ;;  %v8756_v7 = vpop.xlane.xlu0 %8755 }
0x3253   :  { %14449 = vrcp.f32 %v8756_v7 }
0x3259   :  { %v8927_v8 = vpop.xlane.xlu1 %8926 }
0x325a   :  { %14451 = vrcp.f32 %v8927_v8 }
0x325c   :  { %v14448_v19 = vpop.eup %14447 }
0x325d   :  { %v8591_v20 = vmul.f32 %v14448_v19, %v14432_v40  ;;  %v9098_v9 = vpop.xlane.xlu0 %9097  ;;  %v14450_v10 = vpop.eup %14449 }
0x325e   :  { %14453 = vrcp.f32 %v9098_v9  ;;  %v8758_v39 = vmul.f32 %v14450_v10, %v14434_v36  ;;  %v9439_v0 = vpop.permute.xlu1 %9438 }
0x325f   :  { %13624 = vmatmul.mubr.msk.f32.vlgmr.msra.gmra.mrb[98].mxu0 %vm619_vm6, %v8591_v20 }
0x3260   :  { %13632 = vmatpush3.msra.mxu0 %v16514_v33  ;;  %13633 = vmatprep.mubr.msk.f32.mxu0 %vm15011_vm5, %v15010_v21 }
0x3261   :  { %13641 = vmatprep.subr.mxu0 %v15010_v21  ;;  %v9272_v62 = vpop.permute.xlu0 %9271 }
0x3263   :  { %13634 = vmatmul.mubr.msk.f32.vlgmr.msra.gmra.mrb[100].mxu0 %vm619_vm6, %v8758_v39 }
0x3264   :  { %v14452_v54 = vpop.eup %14451  ;;  %13642 = vmatpush3.msra.mxu0 %v8931_v6  ;;  %13643 = vmatprep.mubr.msk.f32.mxu0 %vm15011_vm5, %v15010_v21 }
0x3265   :  { %v8929_v1 = vmul.f32 %v14452_v54, %v14436_v42  ;;  %13651 = vmatprep.subr.mxu0 %v15010_v21 }
0x3267   :  { %13644 = vmatmul.mubr.msk.f32.vlgmr.msra.gmra.mrb[102].mxu0 %vm619_vm6, %v8929_v1 }
0x3268   :  { %v14454_v24 = vpop.eup %14453  ;;  %13652 = vmatpush3.msra.mxu0 %v9102_v5  ;;  %13653 = vmatprep.mubr.msk.f32.mxu0 %vm15011_vm5, %v15010_v21 }
0x3269   :  { %v9100_v38 = vmul.f32 %v14454_v24, %v16519_v45  ;;  %13661 = vmatprep.subr.mxu0 %v15010_v21  ;;  %v9864_v45 = vld [vmem:[%s16986_s2 + $0x8] sm:$0xff] }
0x326a   :  { %v14098_v46 = vpack.c.bf16 %v9864_v45, %v9863_v37  ;;  %v12536_v37 = vld [vmem:[%s16990_s4] ss:$0 sm:$0xff] }
0x326b   :  { %13654 = vmatmul.mubr.msk.f32.vlgmr.msra.gmra.mrb[104].mxu0 %vm619_vm6, %v9100_v38 }
0x326c   :  { %13662 = vmatpush3.msra.mxu0 %v9272_v62  ;;  %13663 = vmatprep.mubr.msk.f32.mxu0 %vm15011_vm5, %v15010_v21 }
0x326d   :  { %13671 = vmatprep.subr.mxu0 %v15010_v21  ;;  %14099 = vmatprep.subr.bf16.mxu1 %v14098_v46 }
0x326e   :  { %14101 = vmatpush3.bf16.msra.mxu1 %v14098_v46  ;;  %v12537_v46 = vld [vmem:[%s16991_s13] ss:$0 sm:$0xff] }
0x326f   :  { %14103 = vmatprep.subr.bf16.mxu1 %v14102_v51 }
0x3272   :  { %14105 = vmatpush3.bf16.msra.mxu1 %v14102_v51 }
0x328e   :  { %v9268_v11 = vpop.xlane.xlu1 %9267 }
0x328f   :  { %14455 = vrcp.f32 %v9268_v11  ;;  %v10001_v11 = vld [vmem:[%s16988_s17] sm:$0xff] }
0x3292   :  { %v9435_v12 = vpop.xlane.xlu0 %9434  ;;  %v9606_v13 = vpop.xlane.xlu1 %9605 }
0x3293   :  { %14457 = vrcp.f32 %v9435_v12  ;;  %v10002_v12 = vld [vmem:[%s16988_s17 + $0x8] sm:$0xff] }
0x3294   :  { %14459 = vrcp.f32 %v9606_v13  ;;  %v14106_v13 = vpack.c.bf16 %v10002_v12, %v10001_v11  ;;  %v12549_v12 = vld [vmem:[%s16983_s8 + $0x30] sm:$0xff] }
0x3296   :  { %v9777_v32 = vpop.xlane.xlu1 %9776  ;;  %v9610_v44 = vpop.permute.xlu0 %9609 }
0x3297   :  { %14461 = vrcp.f32 %v9777_v32  ;;  %v10003_v32 = vld [vmem:[%s16988_s17 + $0x10] sm:$0xff] }
0x3299   :  { %v14456_v33 = vpop.eup %14455 }
0x329a   :  { %v9270_v16 = vmul.f32 %v14456_v33, %v14440_v59  ;;  %v9781_v27 = vpop.permute.xlu1 %9780  ;;  %v10004_v33 = vld [vmem:[%s16988_s17 + $0x18] sm:$0xff] }
0x329c   :  { %13664 = vmatmul.mubr.msk.f32.vlgmr.msra.gmra.mrb[106].mxu0 %vm619_vm6, %v9270_v16  ;;  %v14110_v16 = vpack.c.bf16 %v10004_v33, %v10003_v32 }
0x329d   :  { %v14458_v17 = vpop.eup %14457  ;;  %13672 = vmatpush3.msra.mxu0 %v9439_v0  ;;  %13673 = vmatprep.mubr.msk.f32.mxu0 %vm15011_vm5, %v15010_v21 }
0x329e   :  { %v9437_v18 = vmul.f32 %v14458_v17, %v16527_v60  ;;  %13681 = vmatprep.subr.mxu0 %v15010_v21  ;;  %v14460_v22 = vpop.eup %14459  ;;  %v10095_v17 = vld [vmem:[%s16989_s6] sm:$0xff] }
0x329f   :  { %v9608_v23 = vmul.f32 %v14460_v22, %v16530_v63  ;;  %v10097_v22 = vld [vmem:[%s16989_s6 + $0x10] sm:$0xff] }
0x32a0   :  { %13674 = vmatmul.mubr.msk.f32.vlgmr.msra.gmra.mrb[108].mxu0 %vm619_vm6, %v9437_v18  ;;  %v10096_v18 = vld [vmem:[%s16989_s6 + $0x8] sm:$0xff] }
0x32a1   :  { %13682 = vmatpush3.msra.mxu0 %v9610_v44  ;;  %13683 = vmatprep.mubr.msk.f32.mxu0 %vm15011_vm5, %v15010_v21  ;;  %v14462_v14 = vpop.eup %14461  ;;  %v14114_v44 = vpack.c.bf16 %v10096_v18, %v10095_v17 }
0x32a2   :  { %13691 = vmatprep.subr.mxu0 %v15010_v21  ;;  %v9779_v29 = vmul.f32 %v14462_v14, %v16536_v3 }
0x32a3   :  { %14115 = vmatprep.subr.bf16.mxu1 %v14114_v44 }
0x32a4   :  { %13684 = vmatmul.mubr.msk.f32.vlgmr.msra.gmra.mrb[110].mxu0 %vm619_vm6, %v9608_v23  ;;  %v10098_v23 = vld [vmem:[%s16989_s6 + $0x18] sm:$0xff] }
0x32a5   :  { %13692 = vmatpush3.msra.mxu0 %v9781_v27  ;;  %13693 = vmatprep.mubr.msk.f32.mxu0 %vm15011_vm5, %v15010_v21  ;;  %v14118_v14 = vpack.c.bf16 %v10098_v23, %v10097_v22  ;;  %v10099_v27 = vld [vmem:[%s16989_s6 + $0x20] sm:$0xff] }
0x32a6   :  { %14107 = vmatprep.subr.bf16.mxu0 %v14106_v13 }
0x32a8   :  { %13694 = vmatmul.mubr.msk.f32.vlgmr.msra.gmra.mrb[112].mxu0 %vm619_vm6, %v9779_v29  ;;  %v10100_v29 = vld [vmem:[%s16989_s6 + $0x28] sm:$0xff] }
0x32a9   :  { %14109 = vmatpush3.bf16.msra.mxu0 %v14106_v13  ;;  %v12550_v13 = vld [vmem:[%s16983_s8 + $0x38] sm:$0xff] }
0x32aa   :  { %14111 = vmatprep.subr.bf16.mxu0 %v14110_v16  ;;  %v14134_v32 = vpack.c.bf16 %v12550_v13, %v12549_v12 }
0x32ad   :  { %14113 = vmatpush3.bf16.msra.mxu0 %v14110_v16 }
0x3332   :  { %v8664_v30 = vpop.f32.mrb[98].mxu0 }
0x3333   :  { %8668 = vst.msk [vmem:[#allocation2] sm:$0xff] %vm619_vm6, %v8664_v30  ;;  %v13625_v31 = vpop.f32.mrb[99].mxu0  ;;  %v14122_v30 = vpack.c.bf16 %v10100_v29, %v10099_v27 }
0x3336   :  { %v8831_v40 = vpop.f32.mrb[100].mxu0 }
0x3337   :  { %8836 = vrot.lane.b32.xlu0 %v8831_v40, %s15000_s29  ;;  %v13635_v35 = vpop.f32.mrb[101].mxu0 }
0x333a   :  { %v9002_v36 = vpop.f32.mrb[102].mxu0 }
0x333b   :  { %9007 = vrot.lane.b32.xlu1 %v9002_v36, %s14991_s18  ;;  %v13645_v34 = vpop.f32.mrb[103].mxu0 }
0x333e   :  { %v9173_v41 = vpop.f32.mrb[104].mxu0 }
0x333f   :  { %9178 = vrot.lane.b32.xlu1 %v9173_v41, %s15023_s22  ;;  %v13655_v42 = vpop.f32.mrb[105].mxu0 }
0x336f   :  { %v9343_v47 = vpop.f32.mrb[106].mxu0 }
0x3370   :  { %9347 = vst.msk [vmem:[#allocation2 + $0x8] sm:$0xff] %vm619_vm6, %v9343_v47  ;;  %v13665_v50 = vpop.f32.mrb[107].mxu0 }
0x3373   :  { %v9510_v43 = vpop.f32.mrb[108].mxu0 }
0x3374   :  { %9515 = vrot.lane.b32.xlu0 %v9510_v43, %s15000_s29  ;;  %v13675_v52 = vpop.f32.mrb[109].mxu0 }
0x3375   :  { %v10101_v52 = vld [vmem:[%s16989_s6 + $0x30] sm:$0xff] }
0x3377   :  { %v9681_v53 = vpop.f32.mrb[110].mxu0 }
0x3378   :  { %9686 = vrot.lane.b32.xlu0 %v9681_v53, %s14991_s18  ;;  %v13685_v55 = vpop.f32.mrb[111].mxu0  ;;  %v10102_v53 = vld [vmem:[%s16989_s6 + $0x38] sm:$0xff] }
0x3379   :  { %v14126_v55 = vpack.c.bf16 %v10102_v53, %v10101_v52 }
0x337b   :  { %v9852_v56 = vpop.f32.mrb[112].mxu0 }
0x337c   :  { %9857 = vrot.lane.b32.xlu1 %v9852_v56, %s15023_s22  ;;  %v13695_v57 = vpop.f32.mrb[113].mxu0  ;;  %v10103_v56 = vld [vmem:[%s16989_s6 + $0x40] sm:$0x1] }
0x337d   :  { %v12538_v57 = vld [vmem:[%s16992_s23] ss:$0 sm:$0xff] }
0x33a9   :  { %v8837_v58 = vpop.permute.xlu0 %8836 }
0x33aa   :  { %8839 = vst.msk [vmem:[#allocation2] sm:$0xff] %vm953_vm7, %v8837_v58 }
0x33ad   :  { %v9008_v59 = vpop.permute.xlu1 %9007 }
0x33ae   :  { %9010 = vst.msk [vmem:[#allocation2] sm:$0xff] %vm1125_vm8, %v9008_v59 }
0x33b1   :  { %v9179_v60 = vpop.permute.xlu1 %9178 }
0x33b2   :  { %9181 = vst.msk [vmem:[#allocation2] sm:$0xff] %vm1297_vm9, %v9179_v60 }
0x33b9   :  { %v9861_v61 = vld [vmem:[#allocation2] sm:$0xff] }
0x33ba   :  { %13704 = vmatprep.mubr.msk.f32.mxu1 %vm534_vm4, %v9861_v61 }
0x33e6   :  { %v9516_v63 = vpop.permute.xlu0 %9515 }
0x33e7   :  { %9518 = vst.msk [vmem:[#allocation2 + $0x8] sm:$0xff] %vm953_vm7, %v9516_v63 }
0x33ea   :  { %v9687_v2 = vpop.permute.xlu0 %9686 }
0x33eb   :  { %9689 = vst.msk [vmem:[#allocation2 + $0x8] sm:$0xff] %vm1125_vm8, %v9687_v2 }
0x33ee   :  { %v9858_v15 = vpop.permute.xlu1 %9857 }
0x33ef   :  { %9860 = vst.msk [vmem:[#allocation2 + $0x8] sm:$0xff] %vm1297_vm9, %v9858_v15  ;;  %v12541_v15 = vld [vmem:[%s16993_s25] ss:$0 sm:$0xff] }
0x33f6   :  { %v9862_v3 = vld [vmem:[#allocation2 + $0x8] sm:$0xff] }
0x33f7   :  { %13705 = vmatmul.mubr.msk.f32.vlgmr.msra.gmra.mrb[90].mxu1 %vm534_vm4, %v9862_v3 }
0x33f8   :  { %14117 = vmatpush3.bf16.msra.mxu1 %v14114_v44 }
0x33f9   :  { %14119 = vmatprep.subr.bf16.mxu1 %v14118_v14 }
0x33fc   :  { %14121 = vmatpush3.bf16.msra.mxu1 %v14118_v14  ;;  %v12545_v14 = vld [vmem:[%s16994_s26] ss:$0 sm:$0xff] }
0x33fd   :  { %14123 = vmatprep.subr.bf16.mxu1 %v14122_v30 }
0x3400   :  { %14125 = vmatpush3.bf16.msra.mxu1 %v14122_v30 }
0x3401   :  { %14127 = vmatprep.subr.bf16.mxu1 %v14126_v55 }
0x3404   :  { %14129 = vmatpush3.bf16.msra.mxu1 %v14126_v55 }
0x3405   :  { %13734 = vmatprep.subr.msk.mxu1 %vm10118_vm15, %v10103_v56 }
0x3408   :  { %13735 = vmatpush3.msk.msra.mxu1 %vm10118_vm15, %v10103_v56 }
0x3409   :  { %13760 = vmatprep.subr.mxu1 %v15010_v21 }
0x34ca   :  { %v13706_v5 = vpop.f32.mrb[90].mxu1 }
0x34cb   :  { %v9952_v6 = vadd.f32 %v13706_v5, %v12533_v4  ;;  %v9946_v26 = vpop.f32.mrb[91].mxu1 }
0x34cc   :  { %v9947_v7 = vadd.f32 %v12533_v4, %v9946_v26 }
0x34cd   :  { %v9956_v8 = vadd.f32 %v9952_v6, %v16417_v28 }
0x34ce   :  { %v9955_v19 = vadd.f32 %v9947_v7, %v16414_v25 }
0x34cf   :  { %v9962_v20 = vsel %vm534_vm4, %v9956_v8, 0.0 }
0x34d0   :  { %9963 = vadd.xlane.f32.xlu1 %v9962_v20  ;;  %v9959_v9 = vsel %vm534_vm4, %v9955_v19, 0.0 }
0x34d1   :  { %9960 = vadd.xlane.f32.xlu0 %v9959_v9 }
0x355d   :  { %v9964_v10 = vpop.xlane.xlu1 %9963 }
0x355e   :  { %v9966_v39 = vmul.f32 0.03125, %v9964_v10  ;;  %v9961_v54 = vpop.xlane.xlu0 %9960 }
0x355f   :  { %v9965_v1 = vmul.f32 0.03125, %v9961_v54 }
0x3560   :  { %v9968_v24 = vsub.f32 %v9956_v8, %v9966_v39 }
0x3561   :  { %v9967_v38 = vsub.f32 %v9955_v19, %v9965_v1 }
0x3562   :  { %v9970_v28 = vmul.f32 %v9968_v24, %v9968_v24 }
0x3563   :  { %v9969_v62 = vmul.f32 %v9967_v38, %v9967_v38 }
0x3564   :  { %v9974_v0 = vsel %vm534_vm4, %v9970_v28, 0.0  ;;  %v12547_v28 = vld [vmem:[%s16983_s8 + $0x20] sm:$0xff] }
0x3565   :  { %v9971_v25 = vsel %vm534_vm4, %v9969_v62, 0.0 }
0x3566   :  { %9972 = vadd.xlane.f32.xlu0 %v9971_v25 }
0x356a   :  { %9975 = vadd.xlane.f32.xlu0 %v9974_v0  ;;  %v12548_v0 = vld [vmem:[%s16983_s8 + $0x28] sm:$0xff] }
0x356b   :  { %v14130_v11 = vpack.c.bf16 %v12548_v0, %v12547_v28 }
0x356d   :  { %14131 = vmatprep.subr.bf16.mxu0 %v14130_v11 }
0x35f3   :  { %v9973_v31 = vpop.xlane.xlu0 %9972 }
0x35f4   :  { %v9977_v40 = vmul.f32 0.03125, %v9973_v31  ;;  %v12546_v31 = vld [vmem:[%s15279_s5] ss:$0 sm:$0xff] }
0x35f6   :  { %v9979_v35 = vadd.f32 1e-05, %v9977_v40 }
0x35f7   :  { %v9976_v36 = vpop.xlane.xlu0 %9975 }
0x35f8   :  { %14463 = vrsqrt.f32 %v9979_v35  ;;  %v9978_v34 = vmul.f32 0.03125, %v9976_v36 }
0x35fa   :  { %v9980_v41 = vadd.f32 1e-05, %v9978_v34 }
0x35fc   :  { %14465 = vrsqrt.f32 %v9980_v41  ;;  %v12552_v41 = vld [vmem:[%s16985_s1 + $0x1] ss:$0 sm:$0xff] }
0x3602   :  { %v14464_v42 = vpop.eup %14463 }
0x3603   :  { %v9983_v45 = vmul.f32 %v14464_v42, %v9967_v38 }
0x3605   :  { %v9991_v47 = vmul.f32 %v12536_v37, %v9983_v45 }
0x3606   :  { %v14466_v48 = vpop.eup %14465 }
0x3607   :  { %v9984_v49 = vmul.f32 %v14466_v48, %v9968_v24  ;;  %v9999_v50 = vadd.f32 %v12537_v46, %v9991_v47 }
0x3609   :  { %v9992_v51 = vmul.f32 %v12536_v37, %v9984_v49  ;;  %13715 = vmatprep.mubr.msk.f32.mxu0 %vm534_vm4, %v9999_v50 }
0x360b   :  { %v10000_v43 = vadd.f32 %v12537_v46, %v9992_v51 }
0x360d   :  { %13716 = vmatmul.mubr.msk.f32.vlgmr.msra.gmra.mrb[114].mxu0 %vm534_vm4, %v10000_v43 }
0x360e   :  { %14133 = vmatpush3.bf16.msra.mxu0 %v14130_v11 }
0x360f   :  { %14135 = vmatprep.subr.bf16.mxu0 %v14134_v32 }
0x3612   :  { %14137 = vmatpush3.bf16.msra.mxu0 %v14134_v32 }
0x3613   :  { %13750 = vmatprep.subr.mxu0 %v15010_v21 }
0x36e0   :  { %v13717_v58 = vpop.f32.mrb[114].mxu0 }
0x36e1   :  { %v10090_v59 = vadd.f32 %v13717_v58, %v12538_v57  ;;  %v10084_v60 = vpop.f32.mrb[115].mxu0 }
0x36e2   :  { %v10085_v61 = vadd.f32 %v12538_v57, %v10084_v60 }
0x36e3   :  { %v10094_v2 = vmax.f32 %v10090_v59, 0.0 }
0x36e4   :  { %v10093_v63 = vmax.f32 %v10085_v61, 0.0 }
0x36e6   :  { %13736 = vmatprep.mubr.msk.f32.mxu1 %vm10111_vm0, %v10093_v63 }
0x36e7   :  { %13737 = vmatmul.mubr.msk.f32.vlgmr.msra.gmra.mrb[92].mxu1 %vm10111_vm0, %v10094_v2 }
0x36e8   :  { %13762 = vmatprep.mubr.msk.f32.mxu1 %vm15011_vm5, %v15010_v21 }
0x37ba   :  { %v13738_v3 = vpop.f32.mrb[92].mxu1 }
0x37bb   :  { %v10194_v4 = vadd.f32 %v13738_v3, %v12541_v15  ;;  %v10188_v5 = vpop.f32.mrb[93].mxu1 }
0x37bc   :  { %v10189_v6 = vadd.f32 %v12541_v15, %v10188_v5 }
0x37bd   :  { %v10198_v26 = vadd.f32 %v10194_v4, %v10000_v43 }
0x37be   :  { %v10197_v7 = vadd.f32 %v10189_v6, %v9999_v50 }
0x37bf   :  { %v10204_v8 = vsel %vm534_vm4, %v10198_v26, 0.0 }
0x37c0   :  { %10205 = vadd.xlane.f32.xlu0 %v10204_v8  ;;  %v10201_v19 = vsel %vm534_vm4, %v10197_v7, 0.0 }
0x37c1   :  { %10202 = vadd.xlane.f32.xlu1 %v10201_v19 }
0x384d   :  { %v10206_v20 = vpop.xlane.xlu0 %10205 }
0x384e   :  { %v10208_v9 = vmul.f32 0.03125, %v10206_v20  ;;  %v10203_v10 = vpop.xlane.xlu1 %10202 }
0x384f   :  { %v10207_v39 = vmul.f32 0.03125, %v10203_v10 }
0x3850   :  { %v10210_v54 = vsub.f32 %v10198_v26, %v10208_v9 }
0x3851   :  { %v10209_v1 = vsub.f32 %v10197_v7, %v10207_v39 }
0x3852   :  { %v10212_v24 = vmul.f32 %v10210_v54, %v10210_v54 }
0x3853   :  { %v10211_v38 = vmul.f32 %v10209_v1, %v10209_v1 }
0x3854   :  { %v10216_v62 = vsel %vm534_vm4, %v10212_v24, 0.0 }
0x3855   :  { %10217 = vadd.xlane.f32.xlu0 %v10216_v62  ;;  %v10213_v25 = vsel %vm534_vm4, %v10211_v38, 0.0 }
0x3856   :  { %10214 = vadd.xlane.f32.xlu1 %v10213_v25 }
0x38e2   :  { %v10218_v33 = vpop.xlane.xlu0 %10217 }
0x38e3   :  { %v10220_v16 = vmul.f32 0.03125, %v10218_v33  ;;  %v10215_v17 = vpop.xlane.xlu1 %10214 }
0x38e4   :  { %v10219_v18 = vmul.f32 0.03125, %v10215_v17 }
0x38e5   :  { %v10222_v22 = vadd.f32 1e-05, %v10220_v16 }
0x38e6   :  { %v10221_v44 = vadd.f32 1e-05, %v10219_v18 }
0x38e7   :  { %14467 = vrsqrt.f32 %v10222_v22 }
0x38e8   :  { %14469 = vrsqrt.f32 %v10221_v44 }
0x38f1   :  { %v14468_v23 = vpop.eup %14467 }
0x38f2   :  { %v14470_v27 = vpop.eup %14469  ;;  %v10226_v29 = vmul.f32 %v14468_v23, %v10210_v54 }
0x38f3   :  { %v10225_v30 = vmul.f32 %v14470_v27, %v10209_v1 }
0x38f4   :  { %v10234_v40 = vmul.f32 %v12545_v14, %v10226_v29 }
0x38f5   :  { %v10233_v35 = vmul.f32 %v12545_v14, %v10225_v30 }
0x38f6   :  { %v16643_v34 = vadd.f32 %v12546_v31, %v10234_v40 }
0x38f7   :  { %v16641_v36 = vadd.f32 %v12546_v31, %v10233_v35 }
0x38f9   :  { %13747 = vmatprep.mubr.msk.f32.mxu0 %vm534_vm4, %v16641_v36 }
0x38fa   :  { %13748 = vmatmul.mubr.msk.f32.vlgmr.msra.gmra.mrb[116].mxu0 %vm534_vm4, %v16643_v34 }
0x38fb   :  { %13752 = vmatprep.mubr.msk.f32.mxu0 %vm15011_vm5, %v15010_v21 }
0x39cd   :  { %v13749_v42 = vpop.f32.mrb[116].mxu0 }
0x39ce   :  { %v10328_v37 = vpop.f32.mrb[117].mxu0  ;;  %v16666_v46 = vadd.f32 %v13749_v42, %v12552_v41 }
0x39cf   :  { %v16652_v45 = vadd.f32 %v12552_v41, %v10328_v37 }
0x39d1   :  { %10505 = vrot.lane.b32.xlu0 %v16652_v45, %s15014_s24  ;;  %10338 = vrot.lane.b32.xlu1 %v16652_v45, %s15013_s3 }
0x39d5   :  { %10674 = vrot.lane.b32.xlu0 %v16652_v45, %s15017_s0  ;;  %10503 = vrot.lane.b32.xlu1 %v16652_v45, %s15015_s12 }
0x39d9   :  { %10845 = vrot.lane.b32.xlu0 %v16652_v45, %s15018_s10  ;;  %10676 = vrot.lane.b32.xlu1 %v16652_v45, %s15016_s7 }
0x39dd   :  { %11184 = vrot.lane.b32.xlu0 %v16666_v46, %s15014_s24  ;;  %10847 = vrot.lane.b32.xlu1 %v16652_v45, %s15019_s11  ;;  %s15025_s24 = smov [#allocation30]  }
0x39e1   :  { %11355 = vrot.lane.b32.xlu0 %v16666_v46, %s15016_s7  ;;  %11017 = vrot.lane.b32.xlu1 %v16666_v46, %s15013_s3 }
0x39e5   :  { %11526 = vrot.lane.b32.xlu0 %v16666_v46, %s15019_s11  ;;  %11182 = vrot.lane.b32.xlu1 %v16666_v46, %s15015_s12  ;;  %s12197_s12 = sshll.u32 %s15025_s24, 4  ;;  %s16865_s12 = int_to_ptr.vmem [resolvable:$true] %s12197_s12 }
0x39e9   :  { %10426 = vrot.lane.b32.xlu0 %v16652_v45, %s15012_s14  ;;  %11353 = vrot.lane.b32.xlu1 %v16666_v46, %s15017_s0 }
0x39ed   :  { %11524 = vrot.lane.b32.xlu1 %v16666_v46, %s15018_s10 }
0x39f1   :  { %10593 = vrot.lane.b32.xlu1 %v16652_v45, %s15021_s15 }
0x3a43   :  { %v10506_v47 = vpop.permute.xlu0 %10505  ;;  %v10339_v48 = vpop.permute.xlu1 %10338 }
0x3a44   :  { %13751 = vmatpush3.xpose.msk.msra.mxu0 %vm619_vm6, %v10339_v48  ;;  %13761 = vmatpush3.xpose.msk.msra.mxu1 %vm619_vm6, %v10506_v47 }
0x3a45   :  { %13770 = vmatprep.subr.mxu1 %v15010_v21  ;;  %13755 = vmatprep.subr.mxu0 %v15010_v21 }
0x3a47   :  { %v10675_v49 = vpop.permute.xlu0 %10674  ;;  %13753 = vmatmul.mubr.msk.f32.vlgmr.msra.gmra.mrb[118].mxu0 %vm619_vm6, %v16652_v45  ;;  %v10504_v50 = vpop.permute.xlu1 %10503 }
0x3a48   :  { %13763 = vmatmul.mubr.msk.f32.vlgmr.msra.gmra.mrb[94].mxu1 %vm619_vm6, %v10504_v50  ;;  %13757 = vmatprep.mubr.msk.f32.mxu0 %vm15011_vm5, %v15010_v21 }
0x3a49   :  { %13772 = vmatprep.mubr.msk.f32.mxu1 %vm15011_vm5, %v15010_v21 }
0x3a4b   :  { %v10846_v51 = vpop.permute.xlu0 %10845  ;;  %v10677_v43 = vpop.permute.xlu1 %10676 }
0x3a4c   :  { %13771 = vmatpush3.xpose.msk.msra.mxu1 %vm619_vm6, %v10677_v43 }
0x3a4d   :  { %13780 = vmatprep.subr.mxu1 %v15010_v21 }
0x3a4f   :  { %v11185_v52 = vpop.permute.xlu0 %11184  ;;  %13773 = vmatmul.mubr.msk.f32.vlgmr.msra.gmra.mrb[96].mxu1 %vm619_vm6, %v10675_v49  ;;  %v10848_v53 = vpop.permute.xlu1 %10847 }
0x3a50   :  { %13781 = vmatpush3.xpose.msk.msra.mxu1 %vm619_vm6, %v10848_v53  ;;  %13782 = vmatprep.mubr.msk.f32.mxu1 %vm15011_vm5, %v15010_v21 }
0x3a51   :  { %13790 = vmatprep.subr.mxu1 %v15010_v21 }
0x3a53   :  { %v11356_v55 = vpop.permute.xlu0 %11355  ;;  %13783 = vmatmul.mubr.msk.f32.vlgmr.msra.gmra.mrb[98].mxu1 %vm619_vm6, %v10846_v51  ;;  %v11018_v56 = vpop.permute.xlu1 %11017 }
0x3a54   :  { %13791 = vmatpush3.xpose.msk.msra.mxu1 %vm619_vm6, %v11018_v56  ;;  %13792 = vmatprep.mubr.msk.f32.mxu1 %vm15011_vm5, %v15010_v21 }
0x3a55   :  { %13800 = vmatprep.subr.mxu1 %v15010_v21 }
0x3a57   :  { %v11527_v57 = vpop.permute.xlu0 %11526  ;;  %13793 = vmatmul.mubr.msk.f32.vlgmr.msra.gmra.mrb[100].mxu1 %vm619_vm6, %v16666_v46  ;;  %v11183_v58 = vpop.permute.xlu1 %11182 }
0x3a58   :  { %13801 = vmatpush3.xpose.msk.msra.mxu1 %vm619_vm6, %v11185_v52  ;;  %13802 = vmatprep.mubr.msk.f32.mxu1 %vm15011_vm5, %v15010_v21 }
0x3a59   :  { %13810 = vmatprep.subr.mxu1 %v15010_v21 }
0x3a5b   :  { %v10427_v59 = vpop.permute.xlu0 %10426  ;;  %13803 = vmatmul.mubr.msk.f32.vlgmr.msra.gmra.mrb[102].mxu1 %vm619_vm6, %v11183_v58  ;;  %v11354_v60 = vpop.permute.xlu1 %11353 }
0x3a5c   :  { %13756 = vmatpush3.msra.mxu0 %v10427_v59  ;;  %13811 = vmatpush3.xpose.msk.msra.mxu1 %vm619_vm6, %v11356_v55 }
0x3a5d   :  { %13812 = vmatprep.mubr.msk.f32.mxu1 %vm15011_vm5, %v15010_v21  ;;  %13820 = vmatprep.subr.mxu1 %v15010_v21 }
0x3a5e   :  { %13765 = vmatprep.subr.mxu0 %v15010_v21 }
0x3a5f   :  { %13813 = vmatmul.mubr.msk.f32.vlgmr.msra.gmra.mrb[104].mxu1 %vm619_vm6, %v11354_v60  ;;  %v11525_v61 = vpop.permute.xlu1 %11524 }
0x3a60   :  { %13821 = vmatpush3.xpose.msk.msra.mxu1 %vm619_vm6, %v11527_v57  ;;  %13822 = vmatprep.mubr.msk.f32.mxu1 %vm15011_vm5, %v15010_v21 }
0x3a63   :  { %13823 = vmatmul.mubr.msk.f32.vlgmr.msra.gmra.mrb[106].mxu1 %vm619_vm6, %v11525_v61  ;;  %v16740_v44 = vpop.permute.xlu1 %10593 }
0x3b1a   :  { %v10410_v63 = vpop.f32.mrb[118].mxu0 }
0x3b1b   :  { %v10414_v2 = vmul.f32 0.35355338, %v10410_v63  ;;  %v13754_v15 = vpop.f32.mrb[119].mxu0  ;;  %v10577_v3 = vpop.f32.mrb[94].mxu1 }
0x3b1c   :  { %v10581_v4 = vmul.f32 0.35355338, %v10577_v3  ;;  %v13764_v5 = vpop.f32.mrb[95].mxu1 }
0x3b1d   :  { %v10415_v6 = vsel %vm619_vm6, %v10414_v2, -inf }
0x3b1e   :  { %10416 = vmax.xlane.f32.xlu0 %v10415_v6  ;;  %v10582_v26 = vsel %vm619_vm6, %v10581_v4, -inf }
0x3b1f   :  { %10583 = vmax.xlane.f32.xlu1 %v10582_v26 }
0x3b22   :  { %v10748_v7 = vpop.f32.mrb[96].mxu1 }
0x3b23   :  { %v10752_v8 = vmul.f32 0.35355338, %v10748_v7  ;;  %v13774_v19 = vpop.f32.mrb[97].mxu1 }
0x3b25   :  { %v10753_v20 = vsel %vm619_vm6, %v10752_v8, -inf }
0x3b26   :  { %10754 = vmax.xlane.f32.xlu0 %v10753_v20  ;;  %v10919_v9 = vpop.f32.mrb[98].mxu1 }
0x3b27   :  { %v10923_v10 = vmul.f32 0.35355338, %v10919_v9  ;;  %v13784_v39 = vpop.f32.mrb[99].mxu1 }
0x3b29   :  { %v10924_v54 = vsel %vm619_vm6, %v10923_v10, -inf }
0x3b2a   :  { %10925 = vmax.xlane.f32.xlu0 %v10924_v54  ;;  %v11089_v1 = vpop.f32.mrb[100].mxu1 }
0x3b2b   :  { %v11093_v24 = vmul.f32 0.35355338, %v11089_v1  ;;  %v13794_v38 = vpop.f32.mrb[101].mxu1 }
0x3b2d   :  { %v11094_v62 = vsel %vm619_vm6, %v11093_v24, -inf }
0x3b2e   :  { %11095 = vmax.xlane.f32.xlu1 %v11094_v62  ;;  %v11256_v25 = vpop.f32.mrb[102].mxu1 }
0x3b2f   :  { %v11260_v28 = vmul.f32 0.35355338, %v11256_v25  ;;  %v13804_v0 = vpop.f32.mrb[103].mxu1 }
0x3b31   :  { %v11261_v11 = vsel %vm619_vm6, %v11260_v28, -inf }
0x3b32   :  { %11262 = vmax.xlane.f32.xlu0 %v11261_v11  ;;  %v11427_v12 = vpop.f32.mrb[104].mxu1 }
0x3b33   :  { %v11431_v13 = vmul.f32 0.35355338, %v11427_v12  ;;  %v13814_v32 = vpop.f32.mrb[105].mxu1 }
0x3b35   :  { %v11432_v33 = vsel %vm619_vm6, %v11431_v13, -inf }
0x3b36   :  { %11433 = vmax.xlane.f32.xlu1 %v11432_v33  ;;  %v11598_v16 = vpop.f32.mrb[106].mxu1 }
0x3b37   :  { %v11602_v17 = vmul.f32 0.35355338, %v11598_v16  ;;  %v13824_v18 = vpop.f32.mrb[107].mxu1 }
0x3b39   :  { %v11603_v22 = vsel %vm619_vm6, %v11602_v17, -inf }
0x3b3a   :  { %11604 = vmax.xlane.f32.xlu0 %v11603_v22 }
0x3b47   :  { %10935 = vrot.lane.b32.xlu1 %v16652_v45, %s15022_s16 }
0x3b50   :  { %10764 = vrot.lane.b32.xlu0 %v16652_v45, %s15020_s20 }
0x3bab   :  { %v10417_v23 = vpop.xlane.xlu0 %10416 }
0x3bac   :  { %v10418_v14 = vsub.f32 %v10414_v2, %v10417_v23  ;;  %v10584_v27 = vpop.xlane.xlu1 %10583 }
0x3bad   :  { %v10585_v29 = vsub.f32 %v10581_v4, %v10584_v27 }
0x3bae   :  { %v10419_v30 = vmul.f32 1.442695, %v10418_v14 }
0x3baf   :  { %v10586_v31 = vmul.f32 1.442695, %v10585_v29 }
0x3bb0   :  { %14471 = vpow2.f32 %v10419_v30 }
0x3bb1   :  { %14473 = vpow2.f32 %v10586_v31 }
0x3bb3   :  { %v10755_v40 = vpop.xlane.xlu0 %10754 }
0x3bb4   :  { %v10756_v35 = vsub.f32 %v10752_v8, %v10755_v40 }
0x3bb6   :  { %v10757_v41 = vmul.f32 1.442695, %v10756_v35 }
0x3bb7   :  { %v10926_v42 = vpop.xlane.xlu0 %10925 }
0x3bb8   :  { %14475 = vpow2.f32 %v10757_v41  ;;  %v10927_v37 = vsub.f32 %v10923_v10, %v10926_v42 }
0x3bba   :  { %v14472_v47 = vpop.eup %14471  ;;  %v10928_v48 = vmul.f32 1.442695, %v10927_v37 }
0x3bbb   :  { %v14474_v49 = vpop.eup %14473  ;;  %v10421_v45 = vsel %vm619_vm6, %v14472_v47, 0.0  ;;  %v11096_v55 = vpop.xlane.xlu1 %11095 }
0x3bbc   :  { %14477 = vpow2.f32 %v10928_v48  ;;  %10422 = vadd.xlane.f32.xlu1 %v10421_v45  ;;  %v10588_v50 = vsel %vm619_vm6, %v14474_v49, 0.0  ;;  %v11097_v56 = vsub.f32 %v11093_v24, %v11096_v55  ;;  %v12581_v55 = vld [vmem:[%s16986_s2 + $0x30] sm:$0xff] }
0x3bbd   :  { %10589 = vadd.xlane.f32.xlu0 %v10588_v50 }
0x3bbe   :  { %v11098_v60 = vmul.f32 1.442695, %v11097_v56  ;;  %v12582_v56 = vld [vmem:[%s16986_s2 + $0x38] sm:$0xff] }
0x3bbf   :  { %v11263_v57 = vpop.xlane.xlu0 %11262 }
0x3bc0   :  { %v11264_v59 = vsub.f32 %v11260_v28, %v11263_v57  ;;  %14479 = vpow2.f32 %v11098_v60 }
0x3bc2   :  { %v14476_v51 = vpop.eup %14475  ;;  %v11265_v2 = vmul.f32 1.442695, %v11264_v59 }
0x3bc3   :  { %v10759_v43 = vsel %vm619_vm6, %v14476_v51, 0.0  ;;  %v11434_v58 = vpop.xlane.xlu1 %11433 }
0x3bc4   :  { %10760 = vadd.xlane.f32.xlu1 %v10759_v43  ;;  %v11435_v61 = vsub.f32 %v11431_v13, %v11434_v58  ;;  %14481 = vpow2.f32 %v11265_v2  ;;  %v12580_v43 = vld [vmem:[%s16986_s2 + $0x28] sm:$0xff]  ;;  %v14142_v58 = vpack.c.bf16 %v12582_v56, %v12581_v55 }
0x3bc6   :  { %v16745_v52 = vpop.eup %14477  ;;  %v11436_v15 = vmul.f32 1.442695, %v11435_v61 }
0x3bc7   :  { %v10930_v53 = vsel %vm619_vm6, %v16745_v52, 0.0  ;;  %v11605_v63 = vpop.xlane.xlu0 %11604  ;;  %v10936_v10 = vpop.permute.xlu1 %10935 }
0x3bc8   :  { %10931 = vadd.xlane.f32.xlu0 %v10930_v53  ;;  %v11606_v3 = vsub.f32 %v11602_v17, %v11605_v63  ;;  %14483 = vpow2.f32 %v11436_v15 }
0x3bca   :  { %v11607_v4 = vmul.f32 1.442695, %v11606_v3  ;;  %v14480_v5 = vpop.eup %14479 }
0x3bcb   :  { %v11100_v26 = vsel %vm619_vm6, %v14480_v5, 0.0  ;;  %v10765_v39 = vpop.permute.xlu0 %10764 }
0x3bcc   :  { %14485 = vpow2.f32 %v11607_v4 }
0x3bce   :  { %v16753_v6 = vpop.eup %14481 }
0x3bcf   :  { %v11267_v8 = vsel %vm619_vm6, %v16753_v6, 0.0 }
0x3bd2   :  { %v16756_v7 = vpop.eup %14483 }
0x3bd3   :  { %v11438_v19 = vsel %vm619_vm6, %v16756_v7, 0.0 }
0x3bd5   :  { %11272 = vrot.lane.b32.xlu1 %v16666_v46, %s15021_s15 }
0x3bd6   :  { %v16762_v20 = vpop.eup %14485 }
0x3bd7   :  { %v11609_v9 = vsel %vm619_vm6, %v16762_v20, 0.0 }
0x3bde   :  { %11105 = vrot.lane.b32.xlu0 %v16666_v46, %s15012_s14  ;;  %s15024_s14 = smov [#allocation29]  }
0x3bdf   :  { %s12185_s3 = sshll.u32 %s15024_s14, 4  ;;  %s12186_s3 = int_to_ptr.vmem [resolvable:$true] %s12185_s3 }
0x3be0   :  { %s14871_s7 = scalar_lea.vmem %s12186_s3, 256  ;;  %p14876_p3 = scmp.lt.s32.totalorder %s12186_s3, %s12186_s3 }
0x3be1   :  { %p14872_p2 = scmp.ne.s32.totalorder %s12186_s3, %s14871_s7  ;;  %p14877_p4 = scmp.lt.s32.totalorder %s14871_s7, %s14871_s7 }
0x3be3   :  { %p14878_p5 = por %p14877_p4, %p14876_p3 }
0x3be5   :  { %p14879_p6 = pnand %p14878_p5, %p14872_p2 }
0x3bf9   :  { %11101 = vadd.xlane.f32.xlu1 %v11100_v26 }
0x3bfd   :  { %11268 = vadd.xlane.f32.xlu0 %v11267_v8  ;;  %11439 = vadd.xlane.f32.xlu1 %v11438_v19 }
0x3c01   :  { %11610 = vadd.xlane.f32.xlu1 %v11609_v9 }
0x3c12   :  { %11614 = vrot.lane.b32.xlu1 %v16666_v46, %s15022_s16 }
0x3c13   :  { %11443 = vrot.lane.b32.xlu0 %v16666_v46, %s15020_s20 }
0x3c49   :  { %v10423_v54 = vpop.xlane.xlu1 %10422 }
0x3c4a   :  { %14487 = vrcp.f32 %v10423_v54  ;;  %v10590_v1 = vpop.xlane.xlu0 %10589 }
0x3c4b   :  { %14489 = vrcp.f32 %v10590_v1 }
0x3c51   :  { %v10761_v24 = vpop.xlane.xlu1 %10760 }
0x3c52   :  { %14491 = vrcp.f32 %v10761_v24 }
0x3c54   :  { %v14488_v38 = vpop.eup %14487 }
0x3c55   :  { %v10425_v62 = vmul.f32 %v14488_v38, %v14472_v47  ;;  %v10932_v25 = vpop.xlane.xlu0 %10931  ;;  %v14490_v28 = vpop.eup %14489 }
0x3c56   :  { %14493 = vrcp.f32 %v10932_v25  ;;  %v10592_v46 = vmul.f32 %v14490_v28, %v14474_v49  ;;  %v11273_v33 = vpop.permute.xlu1 %11272 }
0x3c57   :  { %13758 = vmatmul.mubr.msk.f32.vlgmr.msra.gmra.mrb[120].mxu0 %vm619_vm6, %v10425_v62 }
0x3c58   :  { %13766 = vmatpush3.msra.mxu0 %v16740_v44  ;;  %13767 = vmatprep.mubr.msk.f32.mxu0 %vm15011_vm5, %v15010_v21 }
0x3c59   :  { %13775 = vmatprep.subr.mxu0 %v15010_v21  ;;  %v11106_v32 = vpop.permute.xlu0 %11105 }
0x3c5b   :  { %13768 = vmatmul.mubr.msk.f32.vlgmr.msra.gmra.mrb[122].mxu0 %vm619_vm6, %v10592_v46 }
0x3c5c   :  { %v14492_v0 = vpop.eup %14491  ;;  %13776 = vmatpush3.msra.mxu0 %v10765_v39  ;;  %13777 = vmatprep.mubr.msk.f32.mxu0 %vm15011_vm5, %v15010_v21 }
0x3c5d   :  { %v10763_v11 = vmul.f32 %v14492_v0, %v14476_v51  ;;  %13785 = vmatprep.subr.mxu0 %v15010_v21  ;;  %v12579_v51 = vld [vmem:[%s16986_s2 + $0x20] sm:$0xff] }
0x3c5f   :  { %13778 = vmatmul.mubr.msk.f32.vlgmr.msra.gmra.mrb[124].mxu0 %vm619_vm6, %v10763_v11 }
0x3c60   :  { %v14494_v12 = vpop.eup %14493  ;;  %13786 = vmatpush3.msra.mxu0 %v10936_v10  ;;  %13787 = vmatprep.mubr.msk.f32.mxu0 %vm15011_vm5, %v15010_v21 }
0x3c61   :  { %v10934_v13 = vmul.f32 %v14494_v12, %v16745_v52  ;;  %13795 = vmatprep.subr.mxu0 %v15010_v21  ;;  %v14138_v52 = vpack.c.bf16 %v12580_v43, %v12579_v51  ;;  %v12590_v43 = vld [vmem:[%s16991_s13 + $0x1] ss:$0 sm:$0xff] }
0x3c63   :  { %13788 = vmatmul.mubr.msk.f32.vlgmr.msra.gmra.mrb[126].mxu0 %vm619_vm6, %v10934_v13  ;;  %14139 = vmatprep.subr.bf16.mxu1 %v14138_v52 }
0x3c64   :  { %13796 = vmatpush3.msra.mxu0 %v11106_v32  ;;  %13797 = vmatprep.mubr.msk.f32.mxu0 %vm15011_vm5, %v15010_v21 }
0x3c65   :  { %13805 = vmatprep.subr.mxu0 %v15010_v21  ;;  %14141 = vmatpush3.bf16.msra.mxu1 %v14138_v52 }
0x3c66   :  { %14143 = vmatprep.subr.bf16.mxu1 %v14142_v58 }
0x3c69   :  { %14145 = vmatpush3.bf16.msra.mxu1 %v14142_v58 }
0x3c86   :  { %v11102_v16 = vpop.xlane.xlu1 %11101 }
0x3c87   :  { %14495 = vrcp.f32 %v11102_v16  ;;  %v12592_v16 = vld [vmem:[%s16988_s17 + $0x28] sm:$0xff] }
0x3c8a   :  { %v11269_v17 = vpop.xlane.xlu0 %11268  ;;  %v11440_v18 = vpop.xlane.xlu1 %11439 }
0x3c8b   :  { %14497 = vrcp.f32 %v11269_v17 }
0x3c8c   :  { %14499 = vrcp.f32 %v11440_v18  ;;  %v12593_v18 = vld [vmem:[%s16988_s17 + $0x30] sm:$0xff] }
0x3c8e   :  { %v11611_v22 = vpop.xlane.xlu1 %11610  ;;  %v11444_v30 = vpop.permute.xlu0 %11443 }
0x3c8f   :  { %14501 = vrcp.f32 %v11611_v22  ;;  %v12594_v22 = vld [vmem:[%s16988_s17 + $0x38] sm:$0xff] }
0x3c91   :  { %v14496_v44 = vpop.eup %14495 }
0x3c92   :  { %v11104_v23 = vmul.f32 %v14496_v44, %v14480_v5  ;;  %v11615_v35 = vpop.permute.xlu1 %11614  ;;  %v14150_v44 = vpack.c.bf16 %v12594_v22, %v12593_v18 }
0x3c94   :  { %13798 = vmatmul.mubr.msk.f32.vlgmr.msra.gmra.mrb[128].mxu0 %vm619_vm6, %v11104_v23  ;;  %v12599_v23 = vld [vmem:[%s16989_s6 + $0x48] sm:$0xff] }
0x3c95   :  { %v14498_v14 = vpop.eup %14497  ;;  %13806 = vmatpush3.msra.mxu0 %v11273_v33  ;;  %13807 = vmatprep.mubr.msk.f32.mxu0 %vm15011_vm5, %v15010_v21  ;;  %v12591_v33 = vld [vmem:[%s16988_s17 + $0x20] sm:$0xff] }
0x3c96   :  { %v11271_v27 = vmul.f32 %v14498_v14, %v16753_v6  ;;  %13815 = vmatprep.subr.mxu0 %v15010_v21  ;;  %v14500_v29 = vpop.eup %14499  ;;  %v14146_v17 = vpack.c.bf16 %v12592_v16, %v12591_v33  ;;  %v12600_v14 = vld [vmem:[%s16989_s6 + $0x50] sm:$0xff] }
0x3c97   :  { %v11442_v31 = vmul.f32 %v14500_v29, %v16756_v7  ;;  %v14154_v29 = vpack.c.bf16 %v12600_v14, %v12599_v23 }
0x3c98   :  { %13808 = vmatmul.mubr.msk.f32.vlgmr.msra.gmra.mrb[130].mxu0 %vm619_vm6, %v11271_v27  ;;  %v12601_v27 = vld [vmem:[%s16989_s6 + $0x58] sm:$0xff] }
0x3c99   :  { %13816 = vmatpush3.msra.mxu0 %v11444_v30  ;;  %13817 = vmatprep.mubr.msk.f32.mxu0 %vm15011_vm5, %v15010_v21  ;;  %v14502_v40 = vpop.eup %14501  ;;  %v12602_v30 = vld [vmem:[%s16989_s6 + $0x60] sm:$0xff] }
0x3c9a   :  { %13825 = vmatprep.subr.mxu0 %v15010_v21  ;;  %v11613_v41 = vmul.f32 %v14502_v40, %v16762_v20  ;;  %v12584_v20 = vld [vmem:[%s16987_s28 + $0x1] ss:$0 sm:$0xff]  ;;  %v12603_v40 = vld [vmem:[%s16989_s6 + $0x68] sm:$0xff]  ;;  %14155 = vmatprep.subr.bf16.mxu1 %v14154_v29 }
0x3c9c   :  { %13818 = vmatmul.mubr.msk.f32.vlgmr.msra.gmra.mrb[132].mxu0 %vm619_vm6, %v11442_v31  ;;  %v14158_v31 = vpack.c.bf16 %v12602_v30, %v12601_v27  ;;  %v12615_v30 = vld [vmem:[%s16994_s26 + $0x1] ss:$0 sm:$0xff] }
0x3c9d   :  { %13826 = vmatpush3.msra.mxu0 %v11615_v35  ;;  %13827 = vmatprep.mubr.msk.f32.mxu0 %vm15011_vm5, %v15010_v21  ;;  %v12604_v35 = vld [vmem:[%s16989_s6 + $0x70] sm:$0xff] }
0x3c9e   :  { %14147 = vmatprep.subr.bf16.mxu0 %v14146_v17 }
0x3ca0   :  { %13828 = vmatmul.mubr.msk.f32.vlgmr.msra.gmra.mrb[134].mxu0 %vm619_vm6, %v11613_v41  ;;  %v14162_v41 = vpack.c.bf16 %v12604_v35, %v12603_v40 }
0x3ca1   :  { %14149 = vmatpush3.bf16.msra.mxu0 %v14146_v17 }
0x3ca2   :  { %14151 = vmatprep.subr.bf16.mxu0 %v14150_v44 }
0x3ca5   :  { %14153 = vmatpush3.bf16.msra.mxu0 %v14150_v44 }
0x3d2a   :  { %v10498_v42 = vpop.f32.mrb[120].mxu0 }
0x3d2b   :  { %10502 = vst.msk [vmem:[#allocation2] sm:$0xff] %vm619_vm6, %v10498_v42  ;;  %v13759_v37 = vpop.f32.mrb[121].mxu0 }
0x3d2e   :  { %v10665_v47 = vpop.f32.mrb[122].mxu0 }
0x3d2f   :  { %10670 = vrot.lane.b32.xlu0 %v10665_v47, %s15000_s29  ;;  %v13769_v48 = vpop.f32.mrb[123].mxu0 }
0x3d32   :  { %v10836_v49 = vpop.f32.mrb[124].mxu0 }
0x3d33   :  { %10841 = vrot.lane.b32.xlu1 %v10836_v49, %s14991_s18  ;;  %v13779_v45 = vpop.f32.mrb[125].mxu0 }
0x3d36   :  { %v11007_v21 = vpop.f32.mrb[126].mxu0 }
0x3d37   :  { %11012 = vrot.lane.b32.xlu1 %v11007_v21, %s15023_s22  ;;  %v13789_v50 = vpop.f32.mrb[127].mxu0 }
0x3d38   :  { %v12589_v50 = vld [vmem:[%s16990_s4 + $0x1] ss:$0 sm:$0xff] }
0x3d67   :  { %v11177_v53 = vpop.f32.mrb[128].mxu0 }
0x3d68   :  { %11181 = vst.msk [vmem:[#allocation2 + $0x8] sm:$0xff] %vm619_vm6, %v11177_v53  ;;  %v13799_v57 = vpop.f32.mrb[129].mxu0 }
0x3d6b   :  { %v11344_v59 = vpop.f32.mrb[130].mxu0 }
0x3d6c   :  { %11349 = vrot.lane.b32.xlu0 %v11344_v59, %s15000_s29  ;;  %v13809_v60 = vpop.f32.mrb[131].mxu0  ;;  %v12605_v59 = vld [vmem:[%s16989_s6 + $0x78] sm:$0xff] }
0x3d6d   :  { %v12606_v60 = vld [vmem:[%s16989_s6 + $0x80] sm:$0xff] }
0x3d6f   :  { %v11515_v61 = vpop.f32.mrb[132].mxu0 }
0x3d70   :  { %11520 = vrot.lane.b32.xlu0 %v11515_v61, %s14991_s18  ;;  %v13819_v63 = vpop.f32.mrb[133].mxu0  ;;  %v14166_v61 = vpack.c.bf16 %v12606_v60, %v12605_v59  ;;  %s16995_s18 = sld [smem:[#allocation65_spill]] }
0x3d71   :  { %v12607_v63 = vld [vmem:[%s16989_s6 + $0x88] sm:$0x1] }
0x3d73   :  { %v11686_v2 = vpop.f32.mrb[134].mxu0 }
0x3d74   :  { %11691 = vrot.lane.b32.xlu1 %v11686_v2, %s15023_s22  ;;  %v13829_v15 = vpop.f32.mrb[135].mxu0  ;;  %v12596_v2 = vld [vmem:[%s16992_s23 + $0x1] ss:$0 sm:$0xff] }
0x3d76   :  { %v12087_v33 = vld [vmem:[%s16995_s18 + $0x10] sm:$0xff]  ;;  %v12088_v16 = vld [vmem:[%s16995_s18 + $0x18] sm:$0xff] }
0x3d77   :  { %v14174_v17 = vpack.c.bf16 %v12088_v16, %v12087_v33 }
0x3da1   :  { %v10671_v3 = vpop.permute.xlu0 %10670 }
0x3da2   :  { %10673 = vst.msk [vmem:[#allocation2] sm:$0xff] %vm953_vm7, %v10671_v3 }
0x3da5   :  { %v10842_v4 = vpop.permute.xlu1 %10841 }
0x3da6   :  { %10844 = vst.msk [vmem:[#allocation2] sm:$0xff] %vm1125_vm8, %v10842_v4 }
0x3da9   :  { %v11013_v5 = vpop.permute.xlu1 %11012 }
0x3daa   :  { %11015 = vst.msk [vmem:[#allocation2] sm:$0xff] %vm1297_vm9, %v11013_v5 }
0x3db1   :  { %v11695_v6 = vld [vmem:[#allocation2] sm:$0xff] }
0x3db2   :  { %13838 = vmatprep.mubr.msk.f32.mxu1 %vm534_vm4, %v11695_v6 }
0x3dde   :  { %v11350_v26 = vpop.permute.xlu0 %11349 }
0x3ddf   :  { %11352 = vst.msk [vmem:[#allocation2 + $0x8] sm:$0xff] %vm953_vm7, %v11350_v26 }
0x3de2   :  { %v11521_v7 = vpop.permute.xlu0 %11520 }
0x3de3   :  { %11523 = vst.msk [vmem:[#allocation2 + $0x8] sm:$0xff] %vm1125_vm8, %v11521_v7  ;;  %v12609_v7 = vld [vmem:[%s16993_s25 + $0x1] ss:$0 sm:$0xff] }
0x3de6   :  { %v11692_v8 = vpop.permute.xlu1 %11691 }
0x3de7   :  { %11694 = vst.msk [vmem:[#allocation2 + $0x8] sm:$0xff] %vm1297_vm9, %v11692_v8 }
0x3dee   :  { %v11696_v19 = vld [vmem:[#allocation2 + $0x8] sm:$0xff] }
0x3def   :  { %13839 = vmatmul.mubr.msk.f32.vlgmr.msra.gmra.mrb[108].mxu1 %vm534_vm4, %v11696_v19 }
0x3df0   :  { %14157 = vmatpush3.bf16.msra.mxu1 %v14154_v29 }
0x3df1   :  { %14159 = vmatprep.subr.bf16.mxu1 %v14158_v31 }
0x3df4   :  { %14161 = vmatpush3.bf16.msra.mxu1 %v14158_v31 }
0x3df5   :  { %14163 = vmatprep.subr.bf16.mxu1 %v14162_v41 }
0x3df8   :  { %14165 = vmatpush3.bf16.msra.mxu1 %v14162_v41  ;;  %v12616_v41 = vld [vmem:[%s15279_s5 + $0x1] ss:$0 sm:$0xff] }
0x3df9   :  { %14167 = vmatprep.subr.bf16.mxu1 %v14166_v61 }
0x3dfc   :  { %14169 = vmatpush3.bf16.msra.mxu1 %v14166_v61 }
0x3dfd   :  { %13868 = vmatprep.subr.msk.mxu1 %vm10118_vm15, %v12607_v63 }
0x3e00   :  { %13869 = vmatpush3.msk.msra.mxu1 %vm10118_vm15, %v12607_v63 }
0x3ec2   :  { %v13840_v9 = vpop.f32.mrb[108].mxu1 }
0x3ec3   :  { %v11788_v10 = vadd.f32 %v13840_v9, %v12584_v20  ;;  %v11782_v39 = vpop.f32.mrb[109].mxu1 }
0x3ec4   :  { %v11783_v54 = vadd.f32 %v12584_v20, %v11782_v39 }
0x3ec5   :  { %v11792_v1 = vadd.f32 %v11788_v10, %v16643_v34 }
0x3ec6   :  { %v11791_v24 = vadd.f32 %v11783_v54, %v16641_v36 }
0x3ec7   :  { %v11800_v38 = vsel %vm534_vm4, %v11792_v1, 0.0 }
0x3ec8   :  { %11801 = vadd.xlane.f32.xlu1 %v11800_v38  ;;  %v11797_v62 = vsel %vm534_vm4, %v11791_v24, 0.0 }
0x3ec9   :  { %11798 = vadd.xlane.f32.xlu0 %v11797_v62 }
0x3f55   :  { %v11802_v25 = vpop.xlane.xlu1 %11801 }
0x3f56   :  { %v11804_v28 = vmul.f32 0.03125, %v11802_v25  ;;  %v11799_v46 = vpop.xlane.xlu0 %11798 }
0x3f57   :  { %v11803_v0 = vmul.f32 0.03125, %v11799_v46 }
0x3f58   :  { %v11806_v11 = vsub.f32 %v11792_v1, %v11804_v28 }
0x3f59   :  { %v11805_v12 = vsub.f32 %v11791_v24, %v11803_v0 }
0x3f5a   :  { %v11808_v34 = vmul.f32 %v11806_v11, %v11806_v11 }
0x3f5b   :  { %v11807_v13 = vmul.f32 %v11805_v12, %v11805_v12 }
0x3f5c   :  { %v11812_v32 = vsel %vm534_vm4, %v11808_v34, 0.0  ;;  %v12086_v34 = vld [vmem:[%s16995_s18 + $0x8] sm:$0xff] }
0x3f5d   :  { %v11809_v36 = vsel %vm534_vm4, %v11807_v13, 0.0 }
0x3f5e   :  { %11810 = vadd.xlane.f32.xlu0 %v11809_v36  ;;  %v12085_v36 = vld [vmem:[%s16995_s18] sm:$0xff] }
0x3f62   :  { %11813 = vadd.xlane.f32.xlu0 %v11812_v32  ;;  %v14170_v32 = vpack.c.bf16 %v12086_v34, %v12085_v36 }
0x3f64   :  { %14171 = vmatprep.subr.bf16.mxu0 %v14170_v32 }
0x3feb   :  { %v11811_v42 = vpop.xlane.xlu0 %11810 }
0x3fec   :  { %v11815_v37 = vmul.f32 0.03125, %v11811_v42 }
0x3fee   :  { %v11817_v47 = vadd.f32 1e-05, %v11815_v37 }
0x3fef   :  { %v11814_v48 = vpop.xlane.xlu0 %11813 }
0x3ff0   :  { %14503 = vrsqrt.f32 %v11817_v47  ;;  %v11816_v49 = vmul.f32 0.03125, %v11814_v48 }
0x3ff2   :  { %v11818_v45 = vadd.f32 1e-05, %v11816_v49 }
0x3ff4   :  { %14505 = vrsqrt.f32 %v11818_v45 }
0x3ffa   :  { %v14504_v21 = vpop.eup %14503 }
0x3ffb   :  { %v11821_v51 = vmul.f32 %v14504_v21, %v11805_v12 }
0x3ffd   :  { %v11829_v52 = vmul.f32 %v12589_v50, %v11821_v51 }
0x3ffe   :  { %v14506_v53 = vpop.eup %14505 }
0x3fff   :  { %v11822_v55 = vmul.f32 %v14506_v53, %v11806_v11  ;;  %v11837_v56 = vadd.f32 %v12590_v43, %v11829_v52 }
0x4001   :  { %v11830_v57 = vmul.f32 %v12589_v50, %v11822_v55  ;;  %13849 = vmatprep.mubr.msk.f32.mxu0 %vm534_vm4, %v11837_v56 }
0x4003   :  { %v11838_v58 = vadd.f32 %v12590_v43, %v11830_v57 }
0x4005   :  { %13850 = vmatmul.mubr.msk.f32.vlgmr.msra.gmra.mrb[136].mxu0 %vm534_vm4, %v11838_v58 }
0x4006   :  { %14173 = vmatpush3.bf16.msra.mxu0 %v14170_v32 }
0x4007   :  { %14175 = vmatprep.subr.bf16.mxu0 %v14174_v17 }
0x400a   :  { %14177 = vmatpush3.bf16.msra.mxu0 %v14174_v17 }
0x40d8   :  { %v13851_v15 = vpop.f32.mrb[136].mxu0 }
0x40d9   :  { %v11930_v3 = vadd.f32 %v13851_v15, %v12596_v2  ;;  %v11924_v4 = vpop.f32.mrb[137].mxu0 }
0x40da   :  { %v11925_v5 = vadd.f32 %v12596_v2, %v11924_v4 }
0x40db   :  { %v11934_v26 = vmax.f32 %v11930_v3, 0.0 }
0x40dc   :  { %v11933_v6 = vmax.f32 %v11925_v5, 0.0 }
0x40de   :  { %13870 = vmatprep.mubr.msk.f32.mxu1 %vm10111_vm0, %v11933_v6 }
0x40df   :  { %13871 = vmatmul.mubr.msk.f32.vlgmr.msra.gmra.mrb[110].mxu1 %vm10111_vm0, %v11934_v26 }
0x41b2   :  { %v13872_v8 = vpop.f32.mrb[110].mxu1 }
0x41b3   :  { %v12034_v19 = vadd.f32 %v13872_v8, %v12609_v7  ;;  %v12028_v20 = vpop.f32.mrb[111].mxu1 }
0x41b4   :  { %v12029_v9 = vadd.f32 %v12609_v7, %v12028_v20 }
0x41b5   :  { %v12038_v10 = vadd.f32 %v12034_v19, %v11838_v58 }
0x41b6   :  { %v12037_v39 = vadd.f32 %v12029_v9, %v11837_v56 }
0x41b7   :  { %v12046_v54 = vsel %vm534_vm4, %v12038_v10, 0.0 }
0x41b8   :  { %12047 = vadd.xlane.f32.xlu0 %v12046_v54  ;;  %v12043_v1 = vsel %vm534_vm4, %v12037_v39, 0.0 }
0x41b9   :  { %12044 = vadd.xlane.f32.xlu1 %v12043_v1 }
0x4245   :  { %v12048_v24 = vpop.xlane.xlu0 %12047 }
0x4246   :  { %v12050_v38 = vmul.f32 0.03125, %v12048_v24  ;;  %v12045_v62 = vpop.xlane.xlu1 %12044 }
0x4247   :  { %v12049_v25 = vmul.f32 0.03125, %v12045_v62 }
0x4248   :  { %v12052_v28 = vsub.f32 %v12038_v10, %v12050_v38 }
0x4249   :  { %v12051_v46 = vsub.f32 %v12037_v39, %v12049_v25 }
0x424a   :  { %v12054_v0 = vmul.f32 %v12052_v28, %v12052_v28 }
0x424b   :  { %v12053_v11 = vmul.f32 %v12051_v46, %v12051_v46 }
0x424c   :  { %v12058_v12 = vsel %vm534_vm4, %v12054_v0, 0.0 }
0x424d   :  { %12059 = vadd.xlane.f32.xlu0 %v12058_v12  ;;  %v12055_v13 = vsel %vm534_vm4, %v12053_v11, 0.0 }
0x424e   :  { %12056 = vadd.xlane.f32.xlu1 %v12055_v13 }
0x42da   :  { %v12060_v18 = vpop.xlane.xlu0 %12059 }
0x42db   :  { %v12062_v22 = vmul.f32 0.03125, %v12060_v18  ;;  %v12057_v44 = vpop.xlane.xlu1 %12056 }
0x42dc   :  { %v12061_v23 = vmul.f32 0.03125, %v12057_v44 }
0x42dd   :  { %v12064_v14 = vadd.f32 1e-05, %v12062_v22 }
0x42de   :  { %v12063_v27 = vadd.f32 1e-05, %v12061_v23 }
0x42df   :  { %14507 = vrsqrt.f32 %v12064_v14 }
0x42e0   :  { %14509 = vrsqrt.f32 %v12063_v27 }
0x42e9   :  { %v14508_v29 = vpop.eup %14507 }
0x42ea   :  { %v14510_v31 = vpop.eup %14509  ;;  %v12068_v40 = vmul.f32 %v14508_v29, %v12052_v28 }
0x42eb   :  { %v12067_v35 = vmul.f32 %v14510_v31, %v12051_v46 }
0x42ec   :  { %v12076_v42 = vmul.f32 %v12615_v30, %v12068_v40 }
0x42ed   :  { %v12075_v37 = vmul.f32 %v12615_v30, %v12067_v35 }
0x42ee   :  { %v12084_v48 = vadd.f32 %v12616_v41, %v12076_v42 }
0x42ef   :  { %v12083_v47 = vadd.f32 %v12616_v41, %v12075_v37 }
0x42f1   :  { %13881 = vmatprep.mubr.msk.f32.mxu0 %vm534_vm4, %v12083_v47 }
0x42f2   :  { %13882 = vmatmul.mubr.msk.f32.vlgmr.msra.gmra.mrb[138].mxu0 %vm534_vm4, %v12084_v48 }
0x42f3   :  { %14882 = shalt.err (!%p14879_p6)
}
0x42f4   :  { %s14883_s5 = scalar_lea.hbm %s15284_s21, 256 }
0x42f5   :  { %p14884_p7 = scmp.ne.s32.totalorder %s15284_s21, %s14883_s5  ;;  %p14887_p8 = scmp.lt.u32.totalorder %s14883_s5, %s15284_s21 }
0x42f7   :  { %p14889_p9 = pnand %p14887_p8, %p14884_p7 }
0x42f9   :  { %14892 = shalt.err (!%p14889_p9)
}
0x42fa   :  { %12191 = dma.vmem_to_hbm [thread:$0]  %s12186_s3, 256, %s15284_s21, [#allocation5], %s14999_s19, %s14999_s19, %s15000_s29  }
0x42fb   :  { %s14893_s0 = scalar_lea.vmem %s16865_s12, 256  ;;  %p14898_p11 = scmp.lt.s32.totalorder %s16865_s12, %s16865_s12 }
0x42fc   :  { %p14894_p10 = scmp.ne.s32.totalorder %s16865_s12, %s14893_s0  ;;  %p14899_p12 = scmp.lt.s32.totalorder %s14893_s0, %s14893_s0 }
0x42fe   :  { %p14900_p13 = por %p14899_p12, %p14898_p11 }
0x4300   :  { %p14901_p0 = pnand %p14900_p13, %p14894_p10 }
0x4302   :  { %14904 = shalt.err (!%p14901_p0)
}
0x4303   :  { %s14905_s10 = scalar_lea.hbm %s15289_s9, 256 }
0x4304   :  { %p14906_p1 = scmp.ne.s32.totalorder %s15289_s9, %s14905_s10  ;;  %p14909_p2 = scmp.lt.u32.totalorder %s14905_s10, %s15289_s9 }
0x4306   :  { %p14911_p3 = pnand %p14909_p2, %p14906_p1 }
0x4308   :  { %14914 = shalt.err (!%p14911_p3)
}
0x4309   :  { %s16996_s21 = sld [smem:[#allocation66_spill]]  ;;  %vm12177_vm1 = vcmask 23552  }
0x430a   :  { %12203 = dma.vmem_to_hbm [thread:$0]  %s16865_s12, 256, %s15289_s9, [#allocation31], %s14999_s19, %s14999_s19, %s15000_s29  }
0x430f   :  { %v12617_v49 = vld [vmem:[%s16996_s21] ss:$0 sm:$0xff] }
0x43c5   :  { %v13883_v45 = vpop.f32.mrb[138].mxu0 }
0x43c6   :  { %v12174_v21 = vadd.f32 %v13883_v45, %v12617_v49  ;;  %v12168_v50 = vpop.f32.mrb[139].mxu0 }
0x43c7   :  { %v12169_v51 = vadd.f32 %v12617_v49, %v12168_v50 }
0x43c8   :  { %12179 = vst.msk [vmem:[%s15294_s30 + $0x8] sm:$0xff] %vm12177_vm1, %v12174_v21 }
0x43c9   :  { %12178 = vst.msk [vmem:[%s15294_s30] sm:$0xff] %vm12177_vm1, %v12169_v51 }
0x43ca   :  { %14933 = dma.done.wait [#allocation5], 256  }
0x43cb   :  { %14934 = vsyncadd [#allocation5], 4294967040 }
0x43cc   :  { %14935 = dma.done.wait [#allocation31], 256  }
0x43cd   :  { %14936 = vsyncadd [#allocation31], 4294967040 }
0x43ce   :  { %12214 = vsyncpa [#allocation4], 1 }
0x43cf   :  { %12215 = vsyncpa [#allocation7], 1 }
0x43d0   :  { %12216 = vsyncpa [#allocation10], 1 }
0x43d1   :  { %12217 = vsyncpa [#allocation13], 1 }
0x43d2   :  { %12218 = vsyncpa [#allocation16], 1 }
0x43d3   :  { %12219 = vsyncpa [#allocation19], 1 }
0x43d4   :  { %12220 = vsyncpa [#allocation22], 1 }
0x43d5   :  { %12221 = vsyncpa [#allocation25], 1 }
0x43d6   :  { %12222 = vsyncpa [#allocation28], 1 }
0x43d7   :  { %12223 = vsyncpa [#allocation5], 1 }
0x43d8   :  { %12224 = vsyncpa [#allocation31], 1 }

</bundles_post_ra>
